<compile_context>
chip_gen: v5e
topology: v5e:2x2
jax: 0.10.0
libtpu: 0.0.40
codegen_flags: <defaults>
</compile_context>

<pallas_src>
import jax
import jax.numpy as jnp
from jax.experimental import pallas as pl
from jax.experimental.pallas import tpu as pltpu


# ---------------------------------------------------------------------------
# fc1: K-tiled, N-parallel (x @ W1 + b1) with fused ReLU.
# ---------------------------------------------------------------------------
def _fc1_kernel(x_ref, w_ref, b_ref, o_ref, acc_ref):
    k = pl.program_id(1)

    @pl.when(k == 0)
    def _():
        acc_ref[...] = jnp.zeros_like(acc_ref)

    acc_ref[...] += jnp.dot(
        x_ref[...], w_ref[...], preferred_element_type=jnp.float32
    )

    @pl.when(k == pl.num_programs(1) - 1)
    def _():
        o_ref[...] = jnp.maximum(
            acc_ref[...] + b_ref[...].astype(jnp.float32), 0.0
        ).astype(o_ref.dtype)


def _pick_fc1_tiling(K):
    """Pick (tk, vmem_limit_bytes) per TPU generation.

    Default is safe on v7x (64 MiB VMEM per TensorCore: 7 MiB weight tiles,
    double-buffered, under a 48 MiB scoped limit).  On chips with 128 MiB
    VMEM (v5e/v6e) use larger tiles for fewer DMA steps.
    """
    tk, vmem_limit = 7168, 48 << 20           # 7 MiB / weight buffer
    try:
        info = pltpu.get_tpu_info()
        vmem_bytes = getattr(info, "vmem_capacity_bytes", 0) or 0
        if vmem_bytes >= (96 << 20):
            tk, vmem_limit = 21504, 96 << 20  # 21 MiB / weight buffer
    except Exception:
        pass
    if K % tk != 0:                           # safe fallback for odd K
        tk = 1024 if K % 1024 == 0 else K
    return tk, vmem_limit


def pallas_fc1(x, w, b, *, tn=256):
    """x: [B, K] f32, w: [K, N] f32, b: [N] f32 -> relu(x @ w + b), [B, N]."""
    B, K = x.shape
    Kw, N = w.shape
    assert K == Kw and N % tn == 0, (K, Kw, N, tn)
    tk, vmem_limit = _pick_fc1_tiling(K)
    b2 = b.reshape(1, N)

    cost = pl.CostEstimate(
        flops=2 * B * K * N,
        transcendentals=0,
        bytes_accessed=K * N * 4 + B * K * 4 + B * N * 4,
    )

    return pl.pallas_call(
        _fc1_kernel,
        out_shape=jax.ShapeDtypeStruct((B, N), x.dtype),
        grid_spec=pltpu.PrefetchScalarGridSpec(
            num_scalar_prefetch=0,
            grid=(N // tn, K // tk),          # (parallel over N, reduce over K)
            in_specs=[
                pl.BlockSpec((B, tk), lambda n, k: (0, k)),
                pl.BlockSpec((tk, tn), lambda n, k: (k, n)),
                pl.BlockSpec((1, tn), lambda n, k: (0, n)),
            ],
            out_specs=pl.BlockSpec((B, tn), lambda n, k: (0, n)),
            scratch_shapes=[pltpu.VMEM((B, tn), jnp.float32)],
        ),
        compiler_params=pltpu.CompilerParams(
            dimension_semantics=("parallel", "arbitrary"),
            vmem_limit_bytes=vmem_limit,
        ),
        cost_estimate=cost,
    )(x, w, b2)


# ---------------------------------------------------------------------------
# fc2 + fc3 fused head: relu(h @ W2 + b2) @ W3 + b3, everything VMEM-resident.
# ---------------------------------------------------------------------------
def _head_kernel(x_ref, w2_ref, b2_ref, w3_ref, b3_ref, o_ref):
    h = jnp.maximum(
        jnp.dot(x_ref[...], w2_ref[...], preferred_element_type=jnp.float32)
        + b2_ref[...].astype(jnp.float32),
        0.0,
    )
    o_ref[...] = (
        jnp.dot(h.astype(w3_ref.dtype), w3_ref[...],
                preferred_element_type=jnp.float32)
        + b3_ref[...].astype(jnp.float32)
    ).astype(o_ref.dtype)


def pallas_head(x, w2, b2, w3, b3):
    """relu(x @ w2 + b2) @ w3 + b3 in one launch (all operands fit in VMEM)."""
    B, K2 = x.shape
    K2w, N2 = w2.shape
    N2w, C = w3.shape
    assert K2 == K2w and N2 == N2w, (K2, K2w, N2, N2w)
    vmem = pl.BlockSpec(memory_space=pltpu.MemorySpace.VMEM)
    return pl.pallas_call(
        _head_kernel,
        out_shape=jax.ShapeDtypeStruct((B, C), x.dtype),
        in_specs=[vmem, vmem, vmem, vmem, vmem],
        out_specs=vmem,
    )(x, w2, b2.reshape(1, N2), w3, b3.reshape(1, C))


# ---------------------------------------------------------------------------
# Parameters & forward.
# ---------------------------------------------------------------------------
def init_ann_params(key, num_classes):
    """Deterministic parameter init matching the module's shapes.

    Weights are stored already transposed to (in_features, out_features).
    """
    dims = [(3 * 224 * 224, 512), (512, 256), (256, num_classes)]
    params = []
    for i, (fan_in, fan_out) in enumerate(dims):
        kw, kb, key = jax.random.split(jax.random.fold_in(key, i), 3)
        bound = 1.0 / jnp.sqrt(jnp.float32(fan_in))
        w = jax.random.uniform(
            kw, (fan_in, fan_out), jnp.float32, minval=-bound, maxval=bound
        )
        b = jax.random.uniform(
            kb, (fan_out,), jnp.float32, minval=-bound, maxval=bound
        )
        params.append((w, b))
    return params


def ann_forward(params, x_nchw):
    """x_nchw: [B, 3, 224, 224] float32 -> logits [B, num_classes]."""
    B = x_nchw.shape[0]
    x = x_nchw.reshape(B, -1)                 # nn.Flatten (C,H,W row-major)
    (w1, b1), (w2, b2), (w3, b3) = params
    x = pallas_fc1(x, w1, b1)                 # fc1 + ReLU (HBM-BW bound)
    # dropout: identity in eval mode
    x = pallas_head(x, w2, b2, w3, b3)        # fc2 + ReLU + fc3 fused
    # dropout: identity in eval mode (applied between fc2 and fc3 in train)
    return x


if __name__ == "__main__":
    num_classes = 10
    dropout_rate = 0.5  # unused in eval-mode forward

    key = jax.random.PRNGKey(0)
    kx, kp = jax.random.split(key)

    # Input shape is dictated by fc1's in_features = 3*224*224.
    x = jax.random.normal(kx, (2, 3, 224, 224), dtype=jnp.float32)
    params = init_ann_params(kp, num_classes)

    out = jax.jit(ann_forward)(params, x)
    out = jax.block_until_ready(out)
    assert out.shape == (2, num_classes), out.shape

    # Reference check in plain JAX (same math, no Pallas).
    xf = x.reshape(2, -1)
    (w1, b1), (w2, b2), (w3, b3) = params
    ref = jnp.maximum(xf @ w1 + b1, 0.0)
    ref = jnp.maximum(ref @ w2 + b2, 0.0)
    ref = ref @ w3 + b3
    assert jnp.allclose(out, ref, atol=2e-3, rtol=2e-3), float(
        jnp.max(jnp.abs(out - ref))
    )

    print("KERNEL_OK")
</pallas_src>

<mosaic_0001>
module attributes {stable_mosaic.version = 11 : i64} {
  func.func @_head_kernel(%arg0: memref<2x512xf32, #tpu.memory_space<vmem>>, %arg1: memref<512x256xf32, #tpu.memory_space<vmem>>, %arg2: memref<1x256xf32, #tpu.memory_space<vmem>>, %arg3: memref<256x10xf32, #tpu.memory_space<vmem>>, %arg4: memref<1x10xf32, #tpu.memory_space<vmem>>, %arg5: memref<2x10xf32, #tpu.memory_space<vmem>>) attributes {dimension_semantics = [], scalar_prefetch = 0 : i64, scratch_operands = 0 : i64, tpu.core_type = #tpu.core_type<tc>} {
    %c0 = arith.constant 0 : index
    %c0_0 = arith.constant 0 : index
    %0 = vector.load %arg0[%c0, %c0_0] : memref<2x512xf32, #tpu.memory_space<vmem>>, vector<2x512xf32>
    %c0_1 = arith.constant 0 : index
    %c0_2 = arith.constant 0 : index
    %1 = vector.load %arg1[%c0_1, %c0_2] : memref<512x256xf32, #tpu.memory_space<vmem>>, vector<512x256xf32>
    %cst = arith.constant dense<0.000000e+00> : vector<2x256xf32>
    %2 = tpu.matmul %0, %1, %cst {dimension_numbers = #tpu.dot_dimension_numbers<[1], [0], [0], [1], [0, 0, 1, 1], [], []>} : vector<2x512xf32>, vector<512x256xf32>, vector<2x256xf32> -> vector<2x256xf32>
    %c0_3 = arith.constant 0 : index
    %c0_4 = arith.constant 0 : index
    %3 = vector.load %arg2[%c0_3, %c0_4] : memref<1x256xf32, #tpu.memory_space<vmem>>, vector<1x256xf32>
    %4 = vector.broadcast %3 : vector<1x256xf32> to vector<2x256xf32>
    %5 = arith.addf %2, %4 : vector<2x256xf32>
    %cst_5 = arith.constant 0.000000e+00 : f32
    %6 = vector.broadcast %cst_5 : f32 to vector<2x256xf32>
    %7 = arith.maximumf %5, %6 : vector<2x256xf32>
    %c0_6 = arith.constant 0 : index
    %c0_7 = arith.constant 0 : index
    %8 = vector.load %arg3[%c0_6, %c0_7] : memref<256x10xf32, #tpu.memory_space<vmem>>, vector<256x10xf32>
    %cst_8 = arith.constant dense<0.000000e+00> : vector<2x10xf32>
    %9 = tpu.matmul %7, %8, %cst_8 {dimension_numbers = #tpu.dot_dimension_numbers<[1], [0], [0], [1], [0, 0, 1, 1], [], []>} : vector<2x256xf32>, vector<256x10xf32>, vector<2x10xf32> -> vector<2x10xf32>
    %c0_9 = arith.constant 0 : index
    %c0_10 = arith.constant 0 : index
    %10 = vector.load %arg4[%c0_9, %c0_10] : memref<1x10xf32, #tpu.memory_space<vmem>>, vector<1x10xf32>
    %11 = vector.broadcast %10 : vector<1x10xf32> to vector<2x10xf32>
    %12 = arith.addf %9, %11 : vector<2x10xf32>
    %c0_11 = arith.constant 0 : index
    %c0_12 = arith.constant 0 : index
    %13 = vector.load %arg5[%c0_11, %c0_12] : memref<2x10xf32, #tpu.memory_space<vmem>>, vector<2x10xf32>
    tpu.vector_store %arg5[%c0_11, %c0_12], %12 {strides = array<i32>} : memref<2x10xf32, #tpu.memory_space<vmem>>, vector<2x10xf32>,
    return
  }
}

module attributes {stable_mosaic.version = 11 : i64} {
  func.func @_fc1_kernel(%arg0: i32, %arg1: i32, %arg2: memref<2x7168xf32, #tpu.memory_space<vmem>>, %arg3: memref<7168x256xf32, #tpu.memory_space<vmem>>, %arg4: memref<1x256xf32, #tpu.memory_space<vmem>>, %arg5: memref<2x256xf32, #tpu.memory_space<vmem>>, %arg6: memref<2x256xf32, #tpu.memory_space<vmem>>) attributes {dimension_semantics = [#tpu.dimension_semantics<parallel>, #tpu.dimension_semantics<arbitrary>], iteration_bounds = array<i64: 2, 21>, scalar_prefetch = 0 : i64, scratch_operands = 1 : i64, tpu.core_type = #tpu.core_type<tc>, window_params = [{transform_indices = @transform_0, window_bounds = array<i64: 2, 7168>}, {transform_indices = @transform_1, window_bounds = array<i64: 7168, 256>}, {transform_indices = @transform_2, window_bounds = array<i64: 1, 256>}, {transform_indices = @transform_3, window_bounds = array<i64: 2, 256>}]} {
    %c0_i32 = arith.constant 0 : i32
    %0 = arith.cmpi eq, %arg1, %c0_i32 : i32
    %1 = arith.extui %0 : i1 to i32
    %c0_i32_0 = arith.constant 0 : i32
    %2 = arith.cmpi ne, %1, %c0_i32_0 : i32
    scf.if %2 {
      %cst_9 = arith.constant 0.000000e+00 : f32
      %12 = vector.broadcast %cst_9 : f32 to vector<2x256xf32>
      %c0_10 = arith.constant 0 : index
      %c0_11 = arith.constant 0 : index
      %13 = vector.load %arg6[%c0_10, %c0_11] : memref<2x256xf32, #tpu.memory_space<vmem>>, vector<2x256xf32>
      tpu.vector_store %arg6[%c0_10, %c0_11], %12 {strides = array<i32>} : memref<2x256xf32, #tpu.memory_space<vmem>>, vector<2x256xf32>,
    } else {
    }
    %c0 = arith.constant 0 : index
    %c0_1 = arith.constant 0 : index
    %3 = vector.load %arg6[%c0, %c0_1] : memref<2x256xf32, #tpu.memory_space<vmem>>, vector<2x256xf32>
    %c0_2 = arith.constant 0 : index
    %c0_3 = arith.constant 0 : index
    %4 = vector.load %arg2[%c0_2, %c0_3] : memref<2x7168xf32, #tpu.memory_space<vmem>>, vector<2x7168xf32>
    %c0_4 = arith.constant 0 : index
    %c0_5 = arith.constant 0 : index
    %5 = vector.load %arg3[%c0_4, %c0_5] : memref<7168x256xf32, #tpu.memory_space<vmem>>, vector<7168x256xf32>
    %cst = arith.constant dense<0.000000e+00> : vector<2x256xf32>
    %6 = tpu.matmul %4, %5, %cst {dimension_numbers = #tpu.dot_dimension_numbers<[1], [0], [0], [1], [0, 0, 1, 1], [], []>} : vector<2x7168xf32>, vector<7168x256xf32>, vector<2x256xf32> -> vector<2x256xf32>
    %7 = arith.addf %3, %6 : vector<2x256xf32>
    %c0_6 = arith.constant 0 : index
    %c0_7 = arith.constant 0 : index
    %8 = vector.load %arg6[%c0_6, %c0_7] : memref<2x256xf32, #tpu.memory_space<vmem>>, vector<2x256xf32>
    tpu.vector_store %arg6[%c0_6, %c0_7], %7 {strides = array<i32>} : memref<2x256xf32, #tpu.memory_space<vmem>>, vector<2x256xf32>,
    %c20_i32 = arith.constant 20 : i32
    %9 = arith.cmpi eq, %arg1, %c20_i32 : i32
    %10 = arith.extui %9 : i1 to i32
    %c0_i32_8 = arith.constant 0 : i32
    %11 = arith.cmpi ne, %10, %c0_i32_8 : i32
    scf.if %11 {
      %c0_9 = arith.constant 0 : index
      %c0_10 = arith.constant 0 : index
      %12 = vector.load %arg6[%c0_9, %c0_10] : memref<2x256xf32, #tpu.memory_space<vmem>>, vector<2x256xf32>
      %c0_11 = arith.constant 0 : index
      %c0_12 = arith.constant 0 : index
      %13 = vector.load %arg4[%c0_11, %c0_12] : memref<1x256xf32, #tpu.memory_space<vmem>>, vector<1x256xf32>
      %14 = vector.broadcast %13 : vector<1x256xf32> to vector<2x256xf32>
      %15 = arith.addf %12, %14 : vector<2x256xf32>
      %cst_13 = arith.constant 0.000000e+00 : f32
      %16 = vector.broadcast %cst_13 : f32 to vector<2x256xf32>
      %17 = arith.maximumf %15, %16 : vector<2x256xf32>
      %c0_14 = arith.constant 0 : index
      %c0_15 = arith.constant 0 : index
      %18 = vector.load %arg5[%c0_14, %c0_15] : memref<2x256xf32, #tpu.memory_space<vmem>>, vector<2x256xf32>
      tpu.vector_store %arg5[%c0_14, %c0_15], %17 {strides = array<i32>} : memref<2x256xf32, #tpu.memory_space<vmem>>, vector<2x256xf32>,
    } else {
    }
    return
  }
  func.func @transform_0(%arg0: i32, %arg1: i32) -> (i32, i32) {
    %c0_i32 = arith.constant 0 : i32
    %c0_i32_0 = arith.constant 0 : i32
    return %c0_i32, %arg1 : i32, i32
  }
  func.func @transform_1(%arg0: i32, %arg1: i32) -> (i32, i32) {
    %c0_i32 = arith.constant 0 : i32
    return %arg1, %arg0 : i32, i32
  }
  func.func @transform_2(%arg0: i32, %arg1: i32) -> (i32, i32) {
    %c0_i32 = arith.constant 0 : i32
    %c0_i32_0 = arith.constant 0 : i32
    return %c0_i32, %arg0 : i32, i32
  }
  func.func @transform_3(%arg0: i32, %arg1: i32) -> (i32, i32) {
    %c0_i32 = arith.constant 0 : i32
    %c0_i32_0 = arith.constant 0 : i32
    return %c0_i32, %arg0 : i32, i32
  }
}

</mosaic_0001>

<bundles_post_ra>
// kernel: ann_forward.3
= control target key start
LH: loop header
LB: loop body
LE: loop exit
PB: predicated region body
PF: predicated region fallthrough
CT: control target
= control target key end

     0   :  { %s973_s0 = inlined_call_operand.vmem [shape: f32[2,512], index: 0, kind: input, shape index: {}]   ;;  %s974_s1 = inlined_call_operand.vmem [shape: f32[512,256], index: 1, kind: input, shape index: {}]   ;;  %s975_s2 = inlined_call_operand.vmem [shape: f32[1,256], index: 2, kind: input, shape index: {}]   ;;  %s976_s3 = inlined_call_operand.vmem [shape: f32[256,10], index: 3, kind: input, shape index: {}]   ;;  %s977_s4 = inlined_call_operand.vmem [shape: f32[1,10], index: 4, kind: input, shape index: {}]   ;;  %s978_s5 = inlined_call_operand.hbm [shape: f32[2,10], index: 5, kind: output, shape index: {}]  }
   0x1   :  { %v116_v0 = vld [vmem:[%s974_s1 + $0x2f0] sm:$0xff]  ;;  %v114_v2 = vld [vmem:[%s974_s1 + $0x2e0] sm:$0xff]  ;;  %v117_v62 = vld [vmem:[%s974_s1 + $0x2f8] sm:$0xff] }
   0x2   :  { %v52_v1 = vld [vmem:[%s974_s1 + $0xf0] sm:$0xff]  ;;  %206 = vmatpush.msra.mxu2 %v116_v0  ;;  %v50_v4 = vld [vmem:[%s974_s1 + $0xe0] sm:$0xff]  ;;  %v53_v0 = vld [vmem:[%s974_s1 + $0xf8] sm:$0xff] }
   0x3   :  { %166 = vmatpush.msra.mxu0 %v52_v1  ;;  %v148_v3 = vld [vmem:[%s974_s1 + $0x3f0] sm:$0xff]  ;;  %v146_v7 = vld [vmem:[%s974_s1 + $0x3e0] sm:$0xff]  ;;  %v149_v1 = vld [vmem:[%s974_s1 + $0x3f8] sm:$0xff] }
   0x4   :  { %v84_v5 = vld [vmem:[%s974_s1 + $0x1f0] sm:$0xff]  ;;  %226 = vmatpush.msra.mxu3 %v148_v3  ;;  %207 = vmatpush.msra.mxu2 %v114_v2  ;;  %v82_v9 = vld [vmem:[%s974_s1 + $0x1e0] sm:$0xff]  ;;  %v115_v2 = vld [vmem:[%s974_s1 + $0x2e8] sm:$0xff] }
   0x5   :  { %186 = vmatpush.msra.mxu1 %v84_v5  ;;  %v112_v6 = vld [vmem:[%s974_s1 + $0x2d0] sm:$0xff]  ;;  %167 = vmatpush.msra.mxu0 %v50_v4  ;;  %v110_v11 = vld [vmem:[%s974_s1 + $0x2c0] sm:$0xff]  ;;  %v51_v4 = vld [vmem:[%s974_s1 + $0xe8] sm:$0xff] }
   0x6   :  { %v48_v8 = vld [vmem:[%s974_s1 + $0xd0] sm:$0xff]  ;;  %227 = vmatpush.msra.mxu3 %v146_v7  ;;  %v46_v12 = vld [vmem:[%s974_s1 + $0xc0] sm:$0xff]  ;;  %208 = vmatpush.msra.mxu2 %v112_v6  ;;  %v85_v5 = vld [vmem:[%s974_s1 + $0x1f8] sm:$0xff] }
   0x7   :  { %v144_v10 = vld [vmem:[%s974_s1 + $0x3d0] sm:$0xff]  ;;  %187 = vmatpush.msra.mxu1 %v82_v9  ;;  %168 = vmatpush.msra.mxu0 %v48_v8  ;;  %v142_v14 = vld [vmem:[%s974_s1 + $0x3c0] sm:$0xff]  ;;  %v113_v6 = vld [vmem:[%s974_s1 + $0x2d8] sm:$0xff] }
   0x8   :  { %v80_v13 = vld [vmem:[%s974_s1 + $0x1d0] sm:$0xff]  ;;  %v78_v15 = vld [vmem:[%s974_s1 + $0x1c0] sm:$0xff]  ;;  %228 = vmatpush.msra.mxu3 %v144_v10  ;;  %209 = vmatpush.msra.mxu2 %v110_v11  ;;  %v147_v7 = vld [vmem:[%s974_s1 + $0x3e8] sm:$0xff] }
   0x9   :  { %188 = vmatpush.msra.mxu1 %v80_v13  ;;  %v108_v16 = vld [vmem:[%s974_s1 + $0x2b0] sm:$0xff]  ;;  %169 = vmatpush.msra.mxu0 %v46_v12  ;;  %v106_v20 = vld [vmem:[%s974_s1 + $0x2a0] sm:$0xff]  ;;  %v49_v8 = vld [vmem:[%s974_s1 + $0xd8] sm:$0xff] }
   0xa   :  { %v44_v17 = vld [vmem:[%s974_s1 + $0xb0] sm:$0xff]  ;;  %229 = vmatpush.msra.mxu3 %v142_v14  ;;  %v42_v21 = vld [vmem:[%s974_s1 + $0xa0] sm:$0xff]  ;;  %210 = vmatpush.msra.mxu2 %v108_v16  ;;  %v83_v9 = vld [vmem:[%s974_s1 + $0x1e8] sm:$0xff] }
   0xb   :  { %v140_v18 = vld [vmem:[%s974_s1 + $0x3b0] sm:$0xff]  ;;  %189 = vmatpush.msra.mxu1 %v78_v15  ;;  %170 = vmatpush.msra.mxu0 %v44_v17  ;;  %v138_v22 = vld [vmem:[%s974_s1 + $0x3a0] sm:$0xff]  ;;  %v111_v10 = vld [vmem:[%s974_s1 + $0x2c8] sm:$0xff] }
   0xc   :  { %v76_v19 = vld [vmem:[%s974_s1 + $0x1b0] sm:$0xff]  ;;  %v74_v23 = vld [vmem:[%s974_s1 + $0x1a0] sm:$0xff]  ;;  %230 = vmatpush.msra.mxu3 %v140_v18  ;;  %211 = vmatpush.msra.mxu2 %v106_v20  ;;  %v145_v11 = vld [vmem:[%s974_s1 + $0x3d8] sm:$0xff] }
   0xd   :  { %190 = vmatpush.msra.mxu1 %v76_v19  ;;  %v104_v24 = vld [vmem:[%s974_s1 + $0x290] sm:$0xff]  ;;  %171 = vmatpush.msra.mxu0 %v42_v21  ;;  %v102_v28 = vld [vmem:[%s974_s1 + $0x280] sm:$0xff]  ;;  %v47_v12 = vld [vmem:[%s974_s1 + $0xc8] sm:$0xff] }
   0xe   :  { %v40_v25 = vld [vmem:[%s974_s1 + $0x90] sm:$0xff]  ;;  %231 = vmatpush.msra.mxu3 %v138_v22  ;;  %v38_v29 = vld [vmem:[%s974_s1 + $0x80] sm:$0xff]  ;;  %212 = vmatpush.msra.mxu2 %v104_v24  ;;  %v81_v13 = vld [vmem:[%s974_s1 + $0x1d8] sm:$0xff] }
   0xf   :  { %v136_v26 = vld [vmem:[%s974_s1 + $0x390] sm:$0xff]  ;;  %191 = vmatpush.msra.mxu1 %v74_v23  ;;  %172 = vmatpush.msra.mxu0 %v40_v25  ;;  %v134_v30 = vld [vmem:[%s974_s1 + $0x380] sm:$0xff]  ;;  %v109_v15 = vld [vmem:[%s974_s1 + $0x2b8] sm:$0xff] }
  0x10   :  { %v72_v27 = vld [vmem:[%s974_s1 + $0x190] sm:$0xff]  ;;  %v70_v31 = vld [vmem:[%s974_s1 + $0x180] sm:$0xff]  ;;  %232 = vmatpush.msra.mxu3 %v136_v26  ;;  %213 = vmatpush.msra.mxu2 %v102_v28  ;;  %v143_v16 = vld [vmem:[%s974_s1 + $0x3c8] sm:$0xff] }
  0x11   :  { %192 = vmatpush.msra.mxu1 %v72_v27  ;;  %v100_v32 = vld [vmem:[%s974_s1 + $0x270] sm:$0xff]  ;;  %173 = vmatpush.msra.mxu0 %v38_v29  ;;  %v98_v36 = vld [vmem:[%s974_s1 + $0x260] sm:$0xff]  ;;  %v45_v17 = vld [vmem:[%s974_s1 + $0xb8] sm:$0xff] }
  0x12   :  { %v36_v33 = vld [vmem:[%s974_s1 + $0x70] sm:$0xff]  ;;  %233 = vmatpush.msra.mxu3 %v134_v30  ;;  %v34_v37 = vld [vmem:[%s974_s1 + $0x60] sm:$0xff]  ;;  %214 = vmatpush.msra.mxu2 %v100_v32  ;;  %v79_v18 = vld [vmem:[%s974_s1 + $0x1c8] sm:$0xff] }
  0x13   :  { %v132_v34 = vld [vmem:[%s974_s1 + $0x370] sm:$0xff]  ;;  %193 = vmatpush.msra.mxu1 %v70_v31  ;;  %174 = vmatpush.msra.mxu0 %v36_v33  ;;  %v130_v38 = vld [vmem:[%s974_s1 + $0x360] sm:$0xff]  ;;  %v107_v19 = vld [vmem:[%s974_s1 + $0x2a8] sm:$0xff] }
  0x14   :  { %v68_v35 = vld [vmem:[%s974_s1 + $0x170] sm:$0xff]  ;;  %v66_v39 = vld [vmem:[%s974_s1 + $0x160] sm:$0xff]  ;;  %234 = vmatpush.msra.mxu3 %v132_v34  ;;  %215 = vmatpush.msra.mxu2 %v98_v36  ;;  %v141_v20 = vld [vmem:[%s974_s1 + $0x3b8] sm:$0xff] }
  0x15   :  { %194 = vmatpush.msra.mxu1 %v68_v35  ;;  %v96_v40 = vld [vmem:[%s974_s1 + $0x250] sm:$0xff]  ;;  %175 = vmatpush.msra.mxu0 %v34_v37  ;;  %v94_v44 = vld [vmem:[%s974_s1 + $0x240] sm:$0xff]  ;;  %v43_v21 = vld [vmem:[%s974_s1 + $0xa8] sm:$0xff] }
  0x16   :  { %v32_v41 = vld [vmem:[%s974_s1 + $0x50] sm:$0xff]  ;;  %235 = vmatpush.msra.mxu3 %v130_v38  ;;  %v30_v45 = vld [vmem:[%s974_s1 + $0x40] sm:$0xff]  ;;  %216 = vmatpush.msra.mxu2 %v96_v40  ;;  %v77_v22 = vld [vmem:[%s974_s1 + $0x1b8] sm:$0xff] }
  0x17   :  { %v128_v42 = vld [vmem:[%s974_s1 + $0x350] sm:$0xff]  ;;  %195 = vmatpush.msra.mxu1 %v66_v39  ;;  %176 = vmatpush.msra.mxu0 %v32_v41  ;;  %v126_v46 = vld [vmem:[%s974_s1 + $0x340] sm:$0xff]  ;;  %v105_v23 = vld [vmem:[%s974_s1 + $0x298] sm:$0xff] }
  0x18   :  { %v64_v43 = vld [vmem:[%s974_s1 + $0x150] sm:$0xff]  ;;  %v62_v47 = vld [vmem:[%s974_s1 + $0x140] sm:$0xff]  ;;  %236 = vmatpush.msra.mxu3 %v128_v42  ;;  %217 = vmatpush.msra.mxu2 %v94_v44  ;;  %v139_v24 = vld [vmem:[%s974_s1 + $0x3a8] sm:$0xff] }
  0x19   :  { %196 = vmatpush.msra.mxu1 %v64_v43  ;;  %v92_v48 = vld [vmem:[%s974_s1 + $0x230] sm:$0xff]  ;;  %177 = vmatpush.msra.mxu0 %v30_v45  ;;  %v90_v52 = vld [vmem:[%s974_s1 + $0x220] sm:$0xff]  ;;  %v41_v25 = vld [vmem:[%s974_s1 + $0x98] sm:$0xff] }
  0x1a   :  { %v28_v49 = vld [vmem:[%s974_s1 + $0x30] sm:$0xff]  ;;  %237 = vmatpush.msra.mxu3 %v126_v46  ;;  %v26_v53 = vld [vmem:[%s974_s1 + $0x20] sm:$0xff]  ;;  %218 = vmatpush.msra.mxu2 %v92_v48  ;;  %v75_v26 = vld [vmem:[%s974_s1 + $0x1a8] sm:$0xff] }
  0x1b   :  { %v124_v50 = vld [vmem:[%s974_s1 + $0x330] sm:$0xff]  ;;  %197 = vmatpush.msra.mxu1 %v62_v47  ;;  %178 = vmatpush.msra.mxu0 %v28_v49  ;;  %v122_v54 = vld [vmem:[%s974_s1 + $0x320] sm:$0xff]  ;;  %v103_v27 = vld [vmem:[%s974_s1 + $0x288] sm:$0xff] }
  0x1c   :  { %v60_v51 = vld [vmem:[%s974_s1 + $0x130] sm:$0xff]  ;;  %v58_v55 = vld [vmem:[%s974_s1 + $0x120] sm:$0xff]  ;;  %238 = vmatpush.msra.mxu3 %v124_v50  ;;  %219 = vmatpush.msra.mxu2 %v90_v52  ;;  %v137_v28 = vld [vmem:[%s974_s1 + $0x398] sm:$0xff] }
  0x1d   :  { %198 = vmatpush.msra.mxu1 %v60_v51  ;;  %v88_v56 = vld [vmem:[%s974_s1 + $0x210] sm:$0xff]  ;;  %179 = vmatpush.msra.mxu0 %v26_v53  ;;  %v86_v60 = vld [vmem:[%s974_s1 + $0x200] sm:$0xff]  ;;  %v39_v29 = vld [vmem:[%s974_s1 + $0x88] sm:$0xff] }
  0x1e   :  { %v24_v57 = vld [vmem:[%s974_s1 + $0x10] sm:$0xff]  ;;  %239 = vmatpush.msra.mxu3 %v122_v54  ;;  %v22_v61 = vld [vmem:[%s974_s1] sm:$0xff]  ;;  %220 = vmatpush.msra.mxu2 %v88_v56  ;;  %v73_v30 = vld [vmem:[%s974_s1 + $0x198] sm:$0xff] }
  0x1f   :  { %v120_v58 = vld [vmem:[%s974_s1 + $0x310] sm:$0xff]  ;;  %199 = vmatpush.msra.mxu1 %v58_v55  ;;  %180 = vmatpush.msra.mxu0 %v24_v57  ;;  %v118_v63 = vld [vmem:[%s974_s1 + $0x300] sm:$0xff]  ;;  %v101_v31 = vld [vmem:[%s974_s1 + $0x278] sm:$0xff] }
  0x20   :  { %v56_v59 = vld [vmem:[%s974_s1 + $0x110] sm:$0xff]  ;;  %240 = vmatpush.msra.mxu3 %v120_v58  ;;  %221 = vmatpush.msra.mxu2 %v86_v60  ;;  %v54_v3 = vld [vmem:[%s974_s1 + $0x100] sm:$0xff]  ;;  %v135_v32 = vld [vmem:[%s974_s1 + $0x388] sm:$0xff] }
  0x21   :  { %200 = vmatpush.msra.mxu1 %v56_v59  ;;  %181 = vmatpush.msra.mxu0 %v22_v61  ;;  %v21_v14 = vld [vmem:[%s973_s0] sm:$0xff]  ;;  %v37_v33 = vld [vmem:[%s974_s1 + $0x78] sm:$0xff]  ;;  %v71_v34 = vld [vmem:[%s974_s1 + $0x188] sm:$0xff] }
  0x22   :  { %286 = vmatpush.msrb.mxu2 %v117_v62  ;;  %241 = vmatpush.msra.mxu3 %v118_v63  ;;  %157 = vst [vmem:[#allocation1] ss:$4 sm:$0xff] %v21_v14  ;;  %v99_v35 = vld [vmem:[%s974_s1 + $0x268] sm:$0xff]  ;;  %v133_v36 = vld [vmem:[%s974_s1 + $0x378] sm:$0xff] }
  0x23   :  { %246 = vmatpush.msrb.mxu0 %v53_v0  ;;  %201 = vmatpush.msra.mxu1 %v54_v3  ;;  %v35_v37 = vld [vmem:[%s974_s1 + $0x68] sm:$0xff]  ;;  %v69_v38 = vld [vmem:[%s974_s1 + $0x178] sm:$0xff] }
  0x24   :  { %306 = vmatpush.msrb.mxu3 %v149_v1  ;;  %287 = vmatpush.msrb.mxu2 %v115_v2  ;;  %v97_v39 = vld [vmem:[%s974_s1 + $0x258] sm:$0xff]  ;;  %v131_v40 = vld [vmem:[%s974_s1 + $0x368] sm:$0xff] }
  0x25   :  { %247 = vmatpush.msrb.mxu0 %v51_v4  ;;  %266 = vmatpush.msrb.mxu1 %v85_v5 }
  0x26   :  { %288 = vmatpush.msrb.mxu2 %v113_v6  ;;  %307 = vmatpush.msrb.mxu3 %v147_v7 }
  0x27   :  { %248 = vmatpush.msrb.mxu0 %v49_v8  ;;  %267 = vmatpush.msrb.mxu1 %v83_v9 }
  0x28   :  { %289 = vmatpush.msrb.mxu2 %v111_v10  ;;  %308 = vmatpush.msrb.mxu3 %v145_v11 }
  0x29   :  { %249 = vmatpush.msrb.mxu0 %v47_v12  ;;  %268 = vmatpush.msrb.mxu1 %v81_v13 }
  0x2a   :  { %290 = vmatpush.msrb.mxu2 %v109_v15  ;;  %309 = vmatpush.msrb.mxu3 %v143_v16 }
  0x2b   :  { %250 = vmatpush.msrb.mxu0 %v45_v17  ;;  %269 = vmatpush.msrb.mxu1 %v79_v18 }
  0x2c   :  { %291 = vmatpush.msrb.mxu2 %v107_v19  ;;  %310 = vmatpush.msrb.mxu3 %v141_v20 }
  0x2d   :  { %251 = vmatpush.msrb.mxu0 %v43_v21  ;;  %270 = vmatpush.msrb.mxu1 %v77_v22 }
  0x2e   :  { %292 = vmatpush.msrb.mxu2 %v105_v23  ;;  %311 = vmatpush.msrb.mxu3 %v139_v24 }
  0x2f   :  { %252 = vmatpush.msrb.mxu0 %v41_v25  ;;  %271 = vmatpush.msrb.mxu1 %v75_v26 }
  0x30   :  { %293 = vmatpush.msrb.mxu2 %v103_v27  ;;  %312 = vmatpush.msrb.mxu3 %v137_v28 }
  0x31   :  { %253 = vmatpush.msrb.mxu0 %v39_v29  ;;  %272 = vmatpush.msrb.mxu1 %v73_v30 }
  0x32   :  { %294 = vmatpush.msrb.mxu2 %v101_v31  ;;  %313 = vmatpush.msrb.mxu3 %v135_v32 }
  0x33   :  { %254 = vmatpush.msrb.mxu0 %v37_v33  ;;  %273 = vmatpush.msrb.mxu1 %v71_v34 }
  0x34   :  { %10 = vsyncpa [#allocation3], 0  ;;  %295 = vmatpush.msrb.mxu2 %v99_v35  ;;  %314 = vmatpush.msrb.mxu3 %v133_v36  ;;  %v33_v41 = vld [vmem:[%s974_s1 + $0x58] sm:$0xff]  ;;  %v67_v42 = vld [vmem:[%s974_s1 + $0x168] sm:$0xff]  ;;  %s450_s8 = smov [#allocation2]   ;;  %s413_s11 = sshll.u32 %s978_s5, 4  ;;  %s414_s11 = int_to_ptr.hbm [resolvable:$true] %s413_s11 }
  0x35   :  { %255 = vmatpush.msrb.mxu0 %v35_v37  ;;  %274 = vmatpush.msrb.mxu1 %v69_v38  ;;  %v95_v43 = vld [vmem:[%s974_s1 + $0x248] sm:$0xff]  ;;  %v129_v44 = vld [vmem:[%s974_s1 + $0x358] sm:$0xff]  ;;  %v160_v45 = vld.sshfl [vmem:[#allocation1 + $0x10] sm:$0xff pattern:$0x73625140]  ;;  %s411_s0 = sshll.u32 %s450_s8, 4  ;;  %s412_s0 = int_to_ptr.vmem [resolvable:$true] %s411_s0 }
  0x36   :  { %296 = vmatpush.msrb.mxu2 %v97_v39  ;;  %315 = vmatpush.msrb.mxu3 %v131_v40  ;;  %v31_v46 = vld [vmem:[%s974_s1 + $0x48] sm:$0xff]  ;;  %v65_v47 = vld [vmem:[%s974_s1 + $0x158] sm:$0xff]  ;;  %v158_v50 = vld.sshfl [vmem:[#allocation1] sm:$0xff pattern:$0x73625140]  ;;  %vm404_vm0 = vcmask 74752  }
  0x37   :  { %256 = vmatpush.msrb.mxu0 %v33_v41  ;;  %275 = vmatpush.msrb.mxu1 %v67_v42  ;;  %v93_v48 = vld [vmem:[%s974_s1 + $0x238] sm:$0xff]  ;;  %v127_v49 = vld [vmem:[%s974_s1 + $0x348] sm:$0xff]  ;;  %v342_v6 = vld [vmem:[%s976_s3 + $0x70] sm:$0xff] }
  0x38   :  { %297 = vmatpush.msrb.mxu2 %v95_v43  ;;  %316 = vmatpush.msrb.mxu3 %v129_v44  ;;  %v161_v51 = vld.sshfl [vmem:[#allocation1 + $0x18] sm:$0xff pattern:$0x73625140]  ;;  %v63_v53 = vld [vmem:[%s974_s1 + $0x148] sm:$0xff]  ;;  %v358_v9 = vld [vmem:[%s976_s3 + $0xf0] sm:$0xff] }
  0x39   :  { %222 = vmatmul.f32.vlgmr.msra.gmra.mxu2 %v160_v45  ;;  %257 = vmatpush.msrb.mxu0 %v31_v46  ;;  %v29_v52 = vld [vmem:[%s974_s1 + $0x38] sm:$0xff]  ;;  %v91_v54 = vld [vmem:[%s974_s1 + $0x228] sm:$0xff]  ;;  %v340_v10 = vld [vmem:[%s976_s3 + $0x60] sm:$0xff] }
  0x3a   :  { %276 = vmatpush.msrb.mxu1 %v65_v47  ;;  %298 = vmatpush.msrb.mxu2 %v93_v48  ;;  %v125_v55 = vld [vmem:[%s974_s1 + $0x338] sm:$0xff]  ;;  %v159_v56 = vld.sshfl [vmem:[#allocation1 + $0x8] sm:$0xff pattern:$0x73625140]  ;;  %v356_v13 = vld [vmem:[%s976_s3 + $0xe0] sm:$0xff] }
  0x3b   :  { %317 = vmatpush.msrb.mxu3 %v127_v49  ;;  %182 = vmatmul.f32.vlgmr.msra.gmra.mxu0 %v158_v50  ;;  %v27_v57 = vld [vmem:[%s974_s1 + $0x28] sm:$0xff]  ;;  %v61_v58 = vld [vmem:[%s974_s1 + $0x138] sm:$0xff]  ;;  %v338_v14 = vld [vmem:[%s976_s3 + $0x50] sm:$0xff] }
  0x3c   :  { %242 = vmatmul.f32.vlgmr.msra.gmra.mxu3 %v161_v51  ;;  %258 = vmatpush.msrb.mxu0 %v29_v52  ;;  %v89_v59 = vld [vmem:[%s974_s1 + $0x218] sm:$0xff]  ;;  %v123_v60 = vld [vmem:[%s974_s1 + $0x328] sm:$0xff]  ;;  %v354_v17 = vld [vmem:[%s976_s3 + $0xd0] sm:$0xff] }
  0x3d   :  { %277 = vmatpush.msrb.mxu1 %v63_v53  ;;  %299 = vmatpush.msrb.mxu2 %v91_v54  ;;  %v25_v61 = vld [vmem:[%s974_s1 + $0x18] sm:$0xff]  ;;  %v59_v62 = vld [vmem:[%s974_s1 + $0x128] sm:$0xff]  ;;  %v336_v18 = vld [vmem:[%s976_s3 + $0x40] sm:$0xff] }
  0x3e   :  { %318 = vmatpush.msrb.mxu3 %v125_v55  ;;  %202 = vmatmul.f32.vlgmr.msra.gmra.mxu1 %v159_v56  ;;  %v87_v63 = vld [vmem:[%s974_s1 + $0x208] sm:$0xff]  ;;  %v121_v0 = vld [vmem:[%s974_s1 + $0x318] sm:$0xff]  ;;  %v334_v20 = vld [vmem:[%s976_s3 + $0x30] sm:$0xff] }
  0x3f   :  { %259 = vmatpush.msrb.mxu0 %v27_v57  ;;  %278 = vmatpush.msrb.mxu1 %v61_v58  ;;  %v23_v1 = vld [vmem:[%s974_s1 + $0x8] sm:$0xff]  ;;  %v57_v2 = vld [vmem:[%s974_s1 + $0x118] sm:$0xff]  ;;  %v332_v23 = vld [vmem:[%s976_s3 + $0x20] sm:$0xff] }
  0x40   :  { %300 = vmatpush.msrb.mxu2 %v89_v59  ;;  %319 = vmatpush.msrb.mxu3 %v123_v60  ;;  %v119_v3 = vld [vmem:[%s974_s1 + $0x308] sm:$0xff]  ;;  %v343_v5 = vld [vmem:[%s976_s3 + $0x78] sm:$0xff]  ;;  %v352_v24 = vld [vmem:[%s976_s3 + $0xc0] sm:$0xff] }
  0x41   :  { %260 = vmatpush.msrb.mxu0 %v25_v61  ;;  %279 = vmatpush.msrb.mxu1 %v59_v62  ;;  %v55_v4 = vld [vmem:[%s974_s1 + $0x108] sm:$0xff]  ;;  %v359_v7 = vld [vmem:[%s976_s3 + $0xf8] sm:$0xff]  ;;  %v330_v27 = vld [vmem:[%s976_s3 + $0x10] sm:$0xff] }
  0x42   :  { %301 = vmatpush.msrb.mxu2 %v87_v63  ;;  %320 = vmatpush.msrb.mxu3 %v121_v0  ;;  %v341_v8 = vld [vmem:[%s976_s3 + $0x68] sm:$0xff]  ;;  %v339_v12 = vld [vmem:[%s976_s3 + $0x58] sm:$0xff]  ;;  %v350_v28 = vld [vmem:[%s976_s3 + $0xb0] sm:$0xff] }
  0x43   :  { %302 = vmatmul.f32.vlgmr.msrb.gmra.mxu2 %v160_v45  ;;  %261 = vmatpush.msrb.mxu0 %v23_v1  ;;  %v357_v11 = vld [vmem:[%s976_s3 + $0xe8] sm:$0xff]  ;;  %v355_v15 = vld [vmem:[%s976_s3 + $0xd8] sm:$0xff]  ;;  %v328_v31 = vld [vmem:[%s976_s3] sm:$0xff] }
  0x44   :  { %280 = vmatpush.msrb.mxu1 %v57_v2  ;;  %321 = vmatpush.msrb.mxu3 %v119_v3  ;;  %v337_v16 = vld [vmem:[%s976_s3 + $0x48] sm:$0xff]  ;;  %v335_v19 = vld [vmem:[%s976_s3 + $0x38] sm:$0xff]  ;;  %v348_v32 = vld [vmem:[%s976_s3 + $0xa0] sm:$0xff] }
  0x45   :  { %262 = vmatmul.f32.vlgmr.msrb.gmra.mxu0 %v158_v50  ;;  %322 = vmatmul.f32.vlgmr.msrb.gmra.mxu3 %v161_v51  ;;  %v333_v21 = vld [vmem:[%s976_s3 + $0x28] sm:$0xff]  ;;  %v331_v25 = vld [vmem:[%s976_s3 + $0x18] sm:$0xff]  ;;  %v346_v34 = vld [vmem:[%s976_s3 + $0x90] sm:$0xff] }
  0x46   :  { %281 = vmatpush.msrb.mxu1 %v55_v4  ;;  %364 = vmatpush.msra.mxu0 %v343_v5  ;;  %v353_v22 = vld [vmem:[%s976_s3 + $0xc8] sm:$0xff]  ;;  %v351_v26 = vld [vmem:[%s976_s3 + $0xb8] sm:$0xff]  ;;  %v344_v36 = vld [vmem:[%s976_s3 + $0x80] sm:$0xff] }
  0x47   :  { %282 = vmatmul.f32.vlgmr.msrb.gmra.mxu1 %v159_v56  ;;  %v329_v29 = vld [vmem:[%s976_s3 + $0x8] sm:$0xff]  ;;  %v347_v33 = vld [vmem:[%s976_s3 + $0x98] sm:$0xff]  ;;  %v150_v37 = vld [vmem:[%s975_s2] sm:$0x3] }
  0x48   :  { %365 = vmatpush.msra.mxu0 %v342_v6  ;;  %384 = vmatpush.msra.mxu1 %v359_v7  ;;  %v349_v30 = vld [vmem:[%s976_s3 + $0xa8] sm:$0xff]  ;;  %v152_v38 = vperm.slane %v150_v37, 0  ;;  %v153_v46 = vperm.slane %v150_v37, 1  ;;  %v423_v58 = vld [vmem:[%s977_s4] ss:$0 sm:$0xff] }
  0x49   :  { %v345_v35 = vld [vmem:[%s976_s3 + $0x88] sm:$0xff] }
  0x4a   :  { %366 = vmatpush.msra.mxu0 %v341_v8  ;;  %385 = vmatpush.msra.mxu1 %v358_v9 }
  0x4c   :  { %367 = vmatpush.msra.mxu0 %v340_v10  ;;  %386 = vmatpush.msra.mxu1 %v357_v11 }
  0x4e   :  { %368 = vmatpush.msra.mxu0 %v339_v12  ;;  %387 = vmatpush.msra.mxu1 %v356_v13 }
  0x50   :  { %369 = vmatpush.msra.mxu0 %v338_v14  ;;  %388 = vmatpush.msra.mxu1 %v355_v15 }
  0x52   :  { %370 = vmatpush.msra.mxu0 %v337_v16  ;;  %389 = vmatpush.msra.mxu1 %v354_v17 }
  0x54   :  { %371 = vmatpush.msra.mxu0 %v336_v18  ;;  %390 = vmatpush.msra.mxu1 %v353_v22 }
  0x56   :  { %372 = vmatpush.msra.mxu0 %v335_v19  ;;  %391 = vmatpush.msra.mxu1 %v352_v24 }
  0x58   :  { %373 = vmatpush.msra.mxu0 %v334_v20  ;;  %392 = vmatpush.msra.mxu1 %v351_v26 }
  0x5a   :  { %374 = vmatpush.msra.mxu0 %v333_v21  ;;  %393 = vmatpush.msra.mxu1 %v350_v28 }
  0x5c   :  { %375 = vmatpush.msra.mxu0 %v332_v23  ;;  %394 = vmatpush.msra.mxu1 %v349_v30 }
  0x5e   :  { %376 = vmatpush.msra.mxu0 %v331_v25  ;;  %395 = vmatpush.msra.mxu1 %v348_v32 }
  0x60   :  { %377 = vmatpush.msra.mxu0 %v330_v27  ;;  %396 = vmatpush.msra.mxu1 %v347_v33 }
  0x62   :  { %378 = vmatpush.msra.mxu0 %v329_v29  ;;  %397 = vmatpush.msra.mxu1 %v346_v34 }
  0x64   :  { %379 = vmatpush.msra.mxu0 %v328_v31  ;;  %398 = vmatpush.msra.mxu1 %v345_v35 }
  0x66   :  { %399 = vmatpush.msra.mxu1 %v344_v36 }
  0xb8   :  { %v183_v39 = vpop.f32.mrf.mxu0 }
  0xb9   :  { %v184_v40 = vadd.f32 %v183_v39, %v152_v38 }
  0xbb   :  { %v203_v41 = vpop.f32.mrf.mxu1 }
  0xbc   :  { %v204_v42 = vadd.f32 %v203_v41, %v184_v40  ;;  %v223_v43 = vpop.f32.mrf.mxu2 }
  0xbe   :  { %v224_v44 = vadd.f32 %v223_v43, %v204_v42 }
  0xbf   :  { %v243_v45 = vpop.f32.mrf.mxu3 }
  0xc0   :  { %v244_v47 = vadd.f32 %v243_v45, %v224_v44 }
  0xc2   :  { %v326_v48 = vmax.f32 %v244_v47, 0.0  ;;  %v263_v49 = vpop.f32.mrf.mxu0 }
  0xc3   :  { %v264_v50 = vadd.f32 %v263_v49, %v153_v46 }
  0xc4   :  { %v283_v51 = vpop.f32.mrf.mxu1  ;;  %380 = vmatmul.f32.vlgmr.msra.gmra.mxu0 %v326_v48 }
  0xc5   :  { %v284_v52 = vadd.f32 %v283_v51, %v264_v50 }
  0xc6   :  { %v303_v53 = vpop.f32.mrf.mxu2 }
  0xc7   :  { %v304_v54 = vadd.f32 %v303_v53, %v284_v52 }
  0xc8   :  { %v323_v55 = vpop.f32.mrf.mxu3 }
  0xc9   :  { %v324_v56 = vadd.f32 %v323_v55, %v304_v54 }
  0xcb   :  { %v327_v57 = vmax.f32 %v324_v56, 0.0 }
  0xcd   :  { %400 = vmatmul.f32.vlgmr.msra.gmra.mxu1 %v327_v57 }
 0x141   :  { %v381_v59 = vpop.f32.mrf.mxu0 }
 0x142   :  { %v382_v60 = vadd.f32 %v423_v58, %v381_v59 }
 0x14a   :  { %v401_v61 = vpop.f32.mrf.mxu1 }
 0x14b   :  { %v402_v62 = vadd.f32 %v401_v61, %v382_v60 }
 0x14d   :  { %405 = vst.msk [vmem:[#allocation2] sm:$0x3] %vm404_vm0, %v402_v62 }
 0x14e   :  { %416 = dma.vmem_to_hbm [thread:$0]  %s412_s0, 32, %s414_s11, [#allocation3]  }
 0x14f   :  { %448 = dma.done.wait [#allocation3], 32  }
 0x150   :  { %449 = vsyncadd [#allocation3], 4294967264 }
 0x151   :  { %421 = vsyncpa [#allocation3], 1 }

// kernel: ann_forward.2
= control target key start
LH: loop header
LB: loop body
LE: loop exit
PB: predicated region body
PF: predicated region fallthrough
CT: control target
= control target key end

     0   :  { %8 = vsyncpa [#allocation4], 0  ;;  %s6960_s0 = inlined_call_operand.vmem [shape: f32[2,150528], index: 0, kind: input, shape index: {}]   ;;  %s6961_s1 = inlined_call_operand.hbm [shape: f32[150528,512], index: 1, kind: input, shape index: {}]   ;;  %s6962_s2 = inlined_call_operand.vmem [shape: f32[1,512], index: 2, kind: input, shape index: {}]   ;;  %s6963_s3 = inlined_call_operand.vmem [shape: f32[2,512], index: 3, kind: output, shape index: {}]  }
   0x1   :  { %10 = vsyncpa [#allocation4 + $0x1], 0  ;;  %s4797_s12 = smov 0   ;;  %s4799_s13 = smov 0  }
   0x2   :  { %s4801_s14 = smov 0   ;;  %s4803_s15 = smov 0  }
   0x3   :  { %s4805_s16 = smov 0   ;;  %s4807_s17 = smov 0  }
   0x4   :  { %s4809_s18 = smov 0   ;;  %s4811_s19 = smov 0  }
   0x5 LB: > { %s4573_s20 = sadd.s32 4294967295, %s4771_s19   ;;  %s25_s21 = sadd.s32 1, %s4763_s17  ;;  %s4771_s19 = sphi %s4811_s19, %s16_s19   ;;  %s4767_s18 = sphi %s4809_s18, %s6978_s18   ;;  %s4763_s17 = sphi %s4807_s17, %s6977_s17   ;;  %s4759_s16 = sphi %s4805_s16, %s6976_s16   ;;  %s4755_s15 = sphi %s4803_s15, %s6975_s15   ;;  %s4751_s14 = sphi %s4801_s14, %s6974_s14   ;;  %s4747_s13 = sphi %s4799_s13, %s6973_s13   ;;  %s4743_s12 = sphi %s4797_s12, %s6972_s12  }
   0x6   : > { %p26_p0 = scmp.ge.s32.totalorder %s25_s21, 21  ;;  %s28_s22 = sadd.s32 1, %s4767_s18 }
   0x7   : > { %s63_s23 = sadd.s32 1, %s4751_s14  ;;  %p70_p1 = scmp.ne.s32.totalorder %s4751_s14, %s4747_s13 }
   0x8   : > { %s6980_s21 = smov (%p26_p0, %s25_s21), 0  ;;  %s6982_s22 = smov (!%p26_p0, %s28_s22), %s4767_s18 }
   0x9   : > { %s58_s24 = ssub.s32 %s4763_s17, %s6980_s21  ;;  %p71_p2 = scmp.eq.s32.totalorder %s4771_s19, 0 }
   0xa   : > { %p30_p3 = scmp.ge.s32.totalorder %s6982_s22, 2  ;;  %p76_p4 = scmp.ne.s32.totalorder %s4747_s13, %s4743_s12 }
   0xb   : > { %p4848_p5 = por %p71_p2, %p70_p1  ;;  %p77_p6 = scmp.eq.s32.totalorder %s4573_s20, 0 }
   0xc   : > { %s6984_s22 = smov (%p30_p3, %s6982_s22), 0  ;;  %p4598_p8 = scmp.lt.s32.totalorder %s4771_s19, 42 }
   0xd   : > { %6967 = sst [smem:[#allocation6_spill]] %s6984_s22  ;;  %p4854_p7 = por %p77_p6, %p76_p4 }
   0xe   : > { %s59_s27 = ssub.s32 %s4767_s18, %s6984_s22  ;;  %s161_s29 = sand.u32 1, %s4751_s14  }
   0xf   : > { %s60_s28 = sor.u32 %s59_s27, %s58_s24  ;;  %s4590_s30 = smul.u32 14336, %s161_s29 }
  0x10   : > { %p61_p9 = scmp.eq.s32.totalorder %s60_s28, 0  ;;  %s4577_s4 = sshll.u32 %s4767_s18, 1 }
  0x11   : > { %s4589_s6 = smul.u32 3584, %s4763_s17  ;;  %s165_s7 = scalar_lea.vmem [#allocation3], %s4590_s30 }
  0x12   : > { %s4864_s5 = scalar_select %p61_p9, %s4751_s14, %s63_s23  }
  0x13   : > { %s176_s8 = sshll.u32 %s165_s7, 4  ;;  %p4595_p10 = pnand %p4598_p8, %p4848_p5  ;;  %s177_s8 = int_to_ptr.vmem [resolvable:$true] %s176_s8 }
  0x14   : > { %s171_s9 = sadd.s32 %s4589_s6, %s4577_s4  ;;  %s162_s27 = scalar_lea.sflag [#allocation4], %s161_s29 }
  0x15   : > { %s4579_s10 = sshll.u32 %s171_s9, 3  ;;  %s4773_s28 = smov 512  }
  0x16   : > { %s173_s20 = scalar_lea.hbm %s6961_s1, %s4579_s10  ;;  %s4774_s23 = smov 256  }
  0x17   : > { %s174_s24 = sshll.u32 %s173_s20, 4  ;;  %s4775_s22 = smov 16   ;;  %s175_s24 = int_to_ptr.hbm [resolvable:$true] %s174_s24 }
  0x18   : > { %4597 = dma.hbm_to_vmem [thread:$0]  (!%p4595_p10), %s175_s24, 229376, %s177_s8, %s162_s27, %s4773_s28, %s4774_s23, %s4775_s22  }
  0x19   : > { %p4580_p11 = scmp.ge.s32.totalorder %s4771_s19, 1  ;;  %p192_p12 = scmp.lt.s32.totalorder %s4771_s19, 43 }
  0x1b   : > { %p193_p13 = pnand %p4580_p11, %p192_p12 }
  0x1d   : > { %196 = sbr.rel (%p193_p13) target bundleno = 1157 (0x485), region = 32 }
  0x22   : > { %s198_s25 = sand.u32 1, %s4747_s13  }
  0x23   : > { %s4591_s30 = smul.u32 14336, %s198_s25  ;;  %s199_s4 = scalar_lea.sflag [#allocation4], %s198_s25 }
  0x25   : > { %s4875_s6 = scalar_lea.vmem [#allocation3], %s4591_s30 }
  0x26   : > { %4738 = dma.done.wait (%p4854_p7), %s199_s4, 229376  }
  0x27   : > { %4740 = vsyncadd (%p4854_p7), %s199_s4, 4294737920  ;;  %s235_s29 = smul.u32 56, %s4755_s15  ;;  %s4582_s22 = sshll.u32 %s4759_s16, 1 }
  0x28   : > { %p244_p0 = scmp.lt.s32.totalorder %s4582_s22, 3  ;;  %p4585_p2 = scmp.ne.s32.totalorder %s4755_s15, 0 }
  0x29   : > { %p236_p1 = scmp.lt.s32.totalorder %s235_s29, 1175 }
  0x2a   : > { %s6986_s22 = smov (!%p244_p0, %s4582_s22), 3  ;;  %257 = sbr.rel (%p4585_p2) target bundleno = 49 (0x31), region = 40 }
  0x2b   : > { %s6988_s29 = smov (!%p236_p1, %s235_s29), 1175  ;;  %s246_s9 = scalar_lea.vmem %s6962_s2, %s6986_s22 }
  0x2c   : > { %s4584_s10 = sshll.u32 %s6986_s22, 1  ;;  %s4581_s11 = sshll.u32 %s6988_s29, 1 }
  0x2d   : > { %s4893_s20 = scalar_lea.vmem %s6963_s3, %s4584_s10  ;;  %s4898_s27 = scalar_lea.vmem %s6960_s0, %s4581_s11 }
  0x2f   : > { %v4776_v0 = vmov 0.0  }
  0x30   : > { %258 = vst [vmem:[#allocation2] sm:$0xf] %v4776_v0 }
  0x31 PF: > { %v304_v1 = vld [vmem:[%s4875_s6 + $0xf0] sm:$0xff]  ;;  %v302_v3 = vld [vmem:[%s4875_s6 + $0xe0] sm:$0xff]  ;;  %vm4450_vm0 = vcmask 1041408   ;;  %p4586_p3 = scmp.ne.s32.totalorder %s4755_s15, 20 }
  0x32   : > { %v368_v2 = vld [vmem:[%s4875_s6 + $0x2f0] sm:$0xff]  ;;  %2207 = vmatpush.msra.mxu0 %v304_v1  ;;  %v366_v5 = vld [vmem:[%s4875_s6 + $0x2e0] sm:$0xff] }
  0x33   : > { %2247 = vmatpush.msra.mxu2 %v368_v2  ;;  %v336_v4 = vld [vmem:[%s4875_s6 + $0x1f0] sm:$0xff]  ;;  %v334_v8 = vld [vmem:[%s4875_s6 + $0x1e0] sm:$0xff] }
  0x34   : > { %v400_v6 = vld [vmem:[%s4875_s6 + $0x3f0] sm:$0xff]  ;;  %2227 = vmatpush.msra.mxu1 %v336_v4  ;;  %2208 = vmatpush.msra.mxu0 %v302_v3  ;;  %v398_v10 = vld [vmem:[%s4875_s6 + $0x3e0] sm:$0xff] }
  0x35   : > { %2267 = vmatpush.msra.mxu3 %v400_v6  ;;  %v300_v7 = vld [vmem:[%s4875_s6 + $0xd0] sm:$0xff]  ;;  %2248 = vmatpush.msra.mxu2 %v366_v5  ;;  %v298_v12 = vld [vmem:[%s4875_s6 + $0xc0] sm:$0xff] }
  0x36   : > { %v364_v9 = vld [vmem:[%s4875_s6 + $0x2d0] sm:$0xff]  ;;  %2228 = vmatpush.msra.mxu1 %v334_v8  ;;  %v362_v13 = vld [vmem:[%s4875_s6 + $0x2c0] sm:$0xff]  ;;  %2209 = vmatpush.msra.mxu0 %v300_v7 }
  0x37   : > { %v332_v11 = vld [vmem:[%s4875_s6 + $0x1d0] sm:$0xff]  ;;  %2268 = vmatpush.msra.mxu3 %v398_v10  ;;  %2249 = vmatpush.msra.mxu2 %v364_v9  ;;  %v330_v15 = vld [vmem:[%s4875_s6 + $0x1c0] sm:$0xff] }
  0x38   : > { %v396_v14 = vld [vmem:[%s4875_s6 + $0x3d0] sm:$0xff]  ;;  %v394_v16 = vld [vmem:[%s4875_s6 + $0x3c0] sm:$0xff]  ;;  %2229 = vmatpush.msra.mxu1 %v332_v11  ;;  %2210 = vmatpush.msra.mxu0 %v298_v12 }
  0x39   : > { %2269 = vmatpush.msra.mxu3 %v396_v14  ;;  %v296_v17 = vld [vmem:[%s4875_s6 + $0xb0] sm:$0xff]  ;;  %2250 = vmatpush.msra.mxu2 %v362_v13  ;;  %v294_v21 = vld [vmem:[%s4875_s6 + $0xa0] sm:$0xff] }
  0x3a   : > { %v360_v18 = vld [vmem:[%s4875_s6 + $0x2b0] sm:$0xff]  ;;  %2230 = vmatpush.msra.mxu1 %v330_v15  ;;  %v358_v22 = vld [vmem:[%s4875_s6 + $0x2a0] sm:$0xff]  ;;  %2211 = vmatpush.msra.mxu0 %v296_v17 }
  0x3b   : > { %v328_v19 = vld [vmem:[%s4875_s6 + $0x1b0] sm:$0xff]  ;;  %2270 = vmatpush.msra.mxu3 %v394_v16  ;;  %2251 = vmatpush.msra.mxu2 %v360_v18  ;;  %v326_v23 = vld [vmem:[%s4875_s6 + $0x1a0] sm:$0xff] }
  0x3c   : > { %v392_v20 = vld [vmem:[%s4875_s6 + $0x3b0] sm:$0xff]  ;;  %v390_v24 = vld [vmem:[%s4875_s6 + $0x3a0] sm:$0xff]  ;;  %2231 = vmatpush.msra.mxu1 %v328_v19  ;;  %2212 = vmatpush.msra.mxu0 %v294_v21 }
  0x3d   : > { %2271 = vmatpush.msra.mxu3 %v392_v20  ;;  %v292_v25 = vld [vmem:[%s4875_s6 + $0x90] sm:$0xff]  ;;  %2252 = vmatpush.msra.mxu2 %v358_v22  ;;  %v290_v29 = vld [vmem:[%s4875_s6 + $0x80] sm:$0xff] }
  0x3e   : > { %v356_v26 = vld [vmem:[%s4875_s6 + $0x290] sm:$0xff]  ;;  %2232 = vmatpush.msra.mxu1 %v326_v23  ;;  %v354_v30 = vld [vmem:[%s4875_s6 + $0x280] sm:$0xff]  ;;  %2213 = vmatpush.msra.mxu0 %v292_v25 }
  0x3f   : > { %v324_v27 = vld [vmem:[%s4875_s6 + $0x190] sm:$0xff]  ;;  %2272 = vmatpush.msra.mxu3 %v390_v24  ;;  %2253 = vmatpush.msra.mxu2 %v356_v26  ;;  %v322_v31 = vld [vmem:[%s4875_s6 + $0x180] sm:$0xff] }
  0x40   : > { %v388_v28 = vld [vmem:[%s4875_s6 + $0x390] sm:$0xff]  ;;  %v386_v32 = vld [vmem:[%s4875_s6 + $0x380] sm:$0xff]  ;;  %2233 = vmatpush.msra.mxu1 %v324_v27  ;;  %2214 = vmatpush.msra.mxu0 %v290_v29 }
  0x41   : > { %2273 = vmatpush.msra.mxu3 %v388_v28  ;;  %v288_v33 = vld [vmem:[%s4875_s6 + $0x70] sm:$0xff]  ;;  %2254 = vmatpush.msra.mxu2 %v354_v30  ;;  %v286_v37 = vld [vmem:[%s4875_s6 + $0x60] sm:$0xff] }
  0x42   : > { %v352_v34 = vld [vmem:[%s4875_s6 + $0x270] sm:$0xff]  ;;  %2234 = vmatpush.msra.mxu1 %v322_v31  ;;  %v350_v38 = vld [vmem:[%s4875_s6 + $0x260] sm:$0xff]  ;;  %2215 = vmatpush.msra.mxu0 %v288_v33 }
  0x43   : > { %v320_v35 = vld [vmem:[%s4875_s6 + $0x170] sm:$0xff]  ;;  %2274 = vmatpush.msra.mxu3 %v386_v32  ;;  %2255 = vmatpush.msra.mxu2 %v352_v34  ;;  %v318_v39 = vld [vmem:[%s4875_s6 + $0x160] sm:$0xff] }
  0x44   : > { %v384_v36 = vld [vmem:[%s4875_s6 + $0x370] sm:$0xff]  ;;  %v382_v40 = vld [vmem:[%s4875_s6 + $0x360] sm:$0xff]  ;;  %2235 = vmatpush.msra.mxu1 %v320_v35  ;;  %2216 = vmatpush.msra.mxu0 %v286_v37 }
  0x45   : > { %2275 = vmatpush.msra.mxu3 %v384_v36  ;;  %v284_v41 = vld [vmem:[%s4875_s6 + $0x50] sm:$0xff]  ;;  %2256 = vmatpush.msra.mxu2 %v350_v38  ;;  %v282_v45 = vld [vmem:[%s4875_s6 + $0x40] sm:$0xff] }
  0x46   : > { %v348_v42 = vld [vmem:[%s4875_s6 + $0x250] sm:$0xff]  ;;  %2236 = vmatpush.msra.mxu1 %v318_v39  ;;  %v346_v46 = vld [vmem:[%s4875_s6 + $0x240] sm:$0xff]  ;;  %2217 = vmatpush.msra.mxu0 %v284_v41 }
  0x47   : > { %v316_v43 = vld [vmem:[%s4875_s6 + $0x150] sm:$0xff]  ;;  %2276 = vmatpush.msra.mxu3 %v382_v40  ;;  %2257 = vmatpush.msra.mxu2 %v348_v42  ;;  %v314_v47 = vld [vmem:[%s4875_s6 + $0x140] sm:$0xff] }
  0x48   : > { %v380_v44 = vld [vmem:[%s4875_s6 + $0x350] sm:$0xff]  ;;  %v378_v48 = vld [vmem:[%s4875_s6 + $0x340] sm:$0xff]  ;;  %2237 = vmatpush.msra.mxu1 %v316_v43  ;;  %2218 = vmatpush.msra.mxu0 %v282_v45 }
  0x49   : > { %2277 = vmatpush.msra.mxu3 %v380_v44  ;;  %v280_v49 = vld [vmem:[%s4875_s6 + $0x30] sm:$0xff]  ;;  %2258 = vmatpush.msra.mxu2 %v346_v46  ;;  %v278_v53 = vld [vmem:[%s4875_s6 + $0x20] sm:$0xff] }
  0x4a   : > { %v344_v50 = vld [vmem:[%s4875_s6 + $0x230] sm:$0xff]  ;;  %2238 = vmatpush.msra.mxu1 %v314_v47  ;;  %v342_v54 = vld [vmem:[%s4875_s6 + $0x220] sm:$0xff]  ;;  %2219 = vmatpush.msra.mxu0 %v280_v49 }
  0x4b   : > { %v312_v51 = vld [vmem:[%s4875_s6 + $0x130] sm:$0xff]  ;;  %2278 = vmatpush.msra.mxu3 %v378_v48  ;;  %2259 = vmatpush.msra.mxu2 %v344_v50  ;;  %v310_v55 = vld [vmem:[%s4875_s6 + $0x120] sm:$0xff] }
  0x4c   : > { %v376_v52 = vld [vmem:[%s4875_s6 + $0x330] sm:$0xff]  ;;  %v374_v56 = vld [vmem:[%s4875_s6 + $0x320] sm:$0xff]  ;;  %2239 = vmatpush.msra.mxu1 %v312_v51  ;;  %2220 = vmatpush.msra.mxu0 %v278_v53 }
  0x4d   : > { %2279 = vmatpush.msra.mxu3 %v376_v52  ;;  %v276_v57 = vld [vmem:[%s4875_s6 + $0x10] sm:$0xff]  ;;  %2260 = vmatpush.msra.mxu2 %v342_v54  ;;  %v274_v61 = vld [vmem:[%s4875_s6] sm:$0xff] }
  0x4e   : > { %v340_v58 = vld [vmem:[%s4875_s6 + $0x210] sm:$0xff]  ;;  %2240 = vmatpush.msra.mxu1 %v310_v55  ;;  %v338_v62 = vld [vmem:[%s4875_s6 + $0x200] sm:$0xff]  ;;  %2221 = vmatpush.msra.mxu0 %v276_v57 }
  0x4f   : > { %v308_v59 = vld [vmem:[%s4875_s6 + $0x110] sm:$0xff]  ;;  %2280 = vmatpush.msra.mxu3 %v374_v56  ;;  %2261 = vmatpush.msra.mxu2 %v340_v58  ;;  %v306_v1 = vld [vmem:[%s4875_s6 + $0x100] sm:$0xff] }
  0x50   : > { %v372_v60 = vld [vmem:[%s4875_s6 + $0x310] sm:$0xff]  ;;  %2241 = vmatpush.msra.mxu1 %v308_v59  ;;  %v370_v2 = vld [vmem:[%s4875_s6 + $0x300] sm:$0xff]  ;;  %2222 = vmatpush.msra.mxu0 %v274_v61 }
  0x51   : > { %v432_v63 = vld [vmem:[%s4875_s6 + $0x4f0] sm:$0xff]  ;;  %2281 = vmatpush.msra.mxu3 %v372_v60  ;;  %2262 = vmatpush.msra.mxu2 %v338_v62  ;;  %v430_v3 = vld [vmem:[%s4875_s6 + $0x4e0] sm:$0xff] }
  0x52   : > { %v496_v0 = vld [vmem:[%s4875_s6 + $0x6f0] sm:$0xff]  ;;  %2287 = vmatpush.msrb.mxu0 %v432_v63  ;;  %v494_v5 = vld [vmem:[%s4875_s6 + $0x6e0] sm:$0xff]  ;;  %2242 = vmatpush.msra.mxu1 %v306_v1 }
  0x53   : > { %v464_v4 = vld [vmem:[%s4875_s6 + $0x5f0] sm:$0xff]  ;;  %2327 = vmatpush.msrb.mxu2 %v496_v0  ;;  %2282 = vmatpush.msra.mxu3 %v370_v2  ;;  %v462_v8 = vld [vmem:[%s4875_s6 + $0x5e0] sm:$0xff] }
  0x54   : > { %v528_v6 = vld [vmem:[%s4875_s6 + $0x7f0] sm:$0xff]  ;;  %2288 = vmatpush.msrb.mxu0 %v430_v3  ;;  %2307 = vmatpush.msrb.mxu1 %v464_v4  ;;  %v526_v10 = vld [vmem:[%s4875_s6 + $0x7e0] sm:$0xff] }
  0x55   : > { %v428_v7 = vld [vmem:[%s4875_s6 + $0x4d0] sm:$0xff]  ;;  %2328 = vmatpush.msrb.mxu2 %v494_v5  ;;  %2347 = vmatpush.msrb.mxu3 %v528_v6  ;;  %v426_v11 = vld [vmem:[%s4875_s6 + $0x4c0] sm:$0xff] }
  0x56   : > { %v492_v9 = vld [vmem:[%s4875_s6 + $0x6d0] sm:$0xff]  ;;  %2289 = vmatpush.msrb.mxu0 %v428_v7  ;;  %2308 = vmatpush.msrb.mxu1 %v462_v8  ;;  %v490_v13 = vld [vmem:[%s4875_s6 + $0x6c0] sm:$0xff] }
  0x57   : > { %v460_v12 = vld [vmem:[%s4875_s6 + $0x5d0] sm:$0xff]  ;;  %2329 = vmatpush.msrb.mxu2 %v492_v9  ;;  %2348 = vmatpush.msrb.mxu3 %v526_v10  ;;  %v458_v16 = vld [vmem:[%s4875_s6 + $0x5c0] sm:$0xff] }
  0x58   : > { %v524_v14 = vld [vmem:[%s4875_s6 + $0x7d0] sm:$0xff]  ;;  %2290 = vmatpush.msrb.mxu0 %v426_v11  ;;  %2309 = vmatpush.msrb.mxu1 %v460_v12  ;;  %v522_v18 = vld [vmem:[%s4875_s6 + $0x7c0] sm:$0xff] }
  0x59   : > { %v424_v15 = vld [vmem:[%s4875_s6 + $0x4b0] sm:$0xff]  ;;  %2330 = vmatpush.msrb.mxu2 %v490_v13  ;;  %2349 = vmatpush.msrb.mxu3 %v524_v14  ;;  %v422_v19 = vld [vmem:[%s4875_s6 + $0x4a0] sm:$0xff] }
  0x5a   : > { %v488_v17 = vld [vmem:[%s4875_s6 + $0x6b0] sm:$0xff]  ;;  %2291 = vmatpush.msrb.mxu0 %v424_v15  ;;  %2310 = vmatpush.msrb.mxu1 %v458_v16  ;;  %v486_v21 = vld [vmem:[%s4875_s6 + $0x6a0] sm:$0xff] }
  0x5b   : > { %v456_v20 = vld [vmem:[%s4875_s6 + $0x5b0] sm:$0xff]  ;;  %2331 = vmatpush.msrb.mxu2 %v488_v17  ;;  %2350 = vmatpush.msrb.mxu3 %v522_v18  ;;  %v454_v25 = vld [vmem:[%s4875_s6 + $0x5a0] sm:$0xff] }
  0x5c   : > { %v520_v22 = vld [vmem:[%s4875_s6 + $0x7b0] sm:$0xff]  ;;  %2292 = vmatpush.msrb.mxu0 %v422_v19  ;;  %2311 = vmatpush.msrb.mxu1 %v456_v20  ;;  %v518_v27 = vld [vmem:[%s4875_s6 + $0x7a0] sm:$0xff] }
  0x5d   : > { %v260_v23 = vld [vmem:[%s4898_s27] sm:$0xff]  ;;  %v418_v28 = vld [vmem:[%s4875_s6 + $0x480] sm:$0xff]  ;;  %2332 = vmatpush.msrb.mxu2 %v486_v21  ;;  %2351 = vmatpush.msrb.mxu3 %v520_v22  ;;  %v263_v60 = vld [vmem:[%s4898_s27 + $0x18] sm:$0xff] }
  0x5e   : > { %v420_v24 = vld [vmem:[%s4875_s6 + $0x490] sm:$0xff]  ;;  %2080 = vst [vmem:[#allocation1] ss:$4 sm:$0xff] %v260_v23  ;;  %v482_v30 = vld [vmem:[%s4875_s6 + $0x680] sm:$0xff]  ;;  %2312 = vmatpush.msrb.mxu1 %v454_v25 }
  0x5f   : > { %v484_v26 = vld [vmem:[%s4875_s6 + $0x690] sm:$0xff]  ;;  %2293 = vmatpush.msrb.mxu0 %v420_v24  ;;  %v450_v33 = vld [vmem:[%s4875_s6 + $0x580] sm:$0xff]  ;;  %2352 = vmatpush.msrb.mxu3 %v518_v27 }
  0x60   : > { %v452_v29 = vld [vmem:[%s4875_s6 + $0x590] sm:$0xff]  ;;  %2333 = vmatpush.msrb.mxu2 %v484_v26  ;;  %v514_v35 = vld [vmem:[%s4875_s6 + $0x780] sm:$0xff] }
  0x61   : > { %v516_v31 = vld [vmem:[%s4875_s6 + $0x790] sm:$0xff]  ;;  %v414_v36 = vld [vmem:[%s4875_s6 + $0x460] sm:$0xff]  ;;  %2294 = vmatpush.msrb.mxu0 %v418_v28  ;;  %2313 = vmatpush.msrb.mxu1 %v452_v29 }
  0x62   : > { %v416_v32 = vld [vmem:[%s4875_s6 + $0x470] sm:$0xff]  ;;  %v478_v38 = vld [vmem:[%s4875_s6 + $0x660] sm:$0xff]  ;;  %2334 = vmatpush.msrb.mxu2 %v482_v30  ;;  %2353 = vmatpush.msrb.mxu3 %v516_v31 }
  0x63   : > { %v480_v34 = vld [vmem:[%s4875_s6 + $0x670] sm:$0xff]  ;;  %v261_v40 = vld [vmem:[%s4898_s27 + $0x8] sm:$0xff]  ;;  %v262_v43 = vld [vmem:[%s4898_s27 + $0x10] sm:$0xff]  ;;  %2295 = vmatpush.msrb.mxu0 %v416_v32  ;;  %2314 = vmatpush.msrb.mxu1 %v450_v33 }
  0x64   : > { %v448_v37 = vld [vmem:[%s4875_s6 + $0x570] sm:$0xff]  ;;  %v446_v42 = vld [vmem:[%s4875_s6 + $0x560] sm:$0xff]  ;;  %2082 = vst [vmem:[#allocation1 + $0x20] ss:$4 sm:$0xff] %v261_v40  ;;  %2335 = vmatpush.msrb.mxu2 %v480_v34  ;;  %2354 = vmatpush.msrb.mxu3 %v514_v35 }
  0x65   : > { %v512_v39 = vld [vmem:[%s4875_s6 + $0x770] sm:$0xff]  ;;  %v5009_v45 = vld.sshfl [vmem:[#allocation1 + $0x10] sm:$0xff pattern:$0x73625140]  ;;  %2296 = vmatpush.msrb.mxu0 %v414_v36  ;;  %2315 = vmatpush.msrb.mxu1 %v448_v37 }
  0x66   : > { %v412_v41 = vld [vmem:[%s4875_s6 + $0x450] sm:$0xff]  ;;  %v5015_v48 = vld.sshfl [vmem:[#allocation1 + $0x8] sm:$0xff pattern:$0x73625140]  ;;  %2336 = vmatpush.msrb.mxu2 %v478_v38  ;;  %2355 = vmatpush.msrb.mxu3 %v512_v39 }
  0x67   : > { %v476_v44 = vld [vmem:[%s4875_s6 + $0x650] sm:$0xff]  ;;  %v510_v49 = vld [vmem:[%s4875_s6 + $0x760] sm:$0xff]  ;;  %2297 = vmatpush.msrb.mxu0 %v412_v41  ;;  %2316 = vmatpush.msrb.mxu1 %v446_v42 }
  0x68   : > { %v5011_v46 = vld.sshfl [vmem:[#allocation1] sm:$0xff pattern:$0x73625140]  ;;  %v5013_v47 = vld.sshfl [vmem:[#allocation1 + $0x18] sm:$0xff pattern:$0x73625140]  ;;  %2337 = vmatpush.msrb.mxu2 %v476_v44  ;;  %2356 = vmatpush.msrb.mxu3 %v510_v49 }
  0x69   : > { %v410_v50 = vld [vmem:[%s4875_s6 + $0x440] sm:$0xff]  ;;  %v444_v51 = vld [vmem:[%s4875_s6 + $0x550] sm:$0xff]  ;;  %2091 = vst [vmem:[#allocation1] ss:$4 sm:$0xff] %v262_v43  ;;  %2263 = vmatmul.f32.vlgmr.msra.gmra.mxu2 %v5009_v45  ;;  %2223 = vmatmul.f32.vlgmr.msra.gmra.mxu0 %v5011_v46 }
  0x6a   : > { %v474_v52 = vld [vmem:[%s4875_s6 + $0x640] sm:$0xff]  ;;  %v508_v53 = vld [vmem:[%s4875_s6 + $0x750] sm:$0xff]  ;;  %2298 = vmatpush.msrb.mxu0 %v410_v50  ;;  %2317 = vmatpush.msrb.mxu1 %v444_v51 }
  0x6b   : > { %v408_v54 = vld [vmem:[%s4875_s6 + $0x430] sm:$0xff]  ;;  %v442_v55 = vld [vmem:[%s4875_s6 + $0x540] sm:$0xff]  ;;  %2338 = vmatpush.msrb.mxu2 %v474_v52  ;;  %2357 = vmatpush.msrb.mxu3 %v508_v53 }
  0x6c   : > { %v472_v56 = vld [vmem:[%s4875_s6 + $0x630] sm:$0xff]  ;;  %v506_v57 = vld [vmem:[%s4875_s6 + $0x740] sm:$0xff]  ;;  %2299 = vmatpush.msrb.mxu0 %v408_v54  ;;  %2318 = vmatpush.msrb.mxu1 %v442_v55 }
  0x6d   : > { %v406_v58 = vld [vmem:[%s4875_s6 + $0x420] sm:$0xff]  ;;  %v440_v59 = vld [vmem:[%s4875_s6 + $0x530] sm:$0xff]  ;;  %2339 = vmatpush.msrb.mxu2 %v472_v56  ;;  %2358 = vmatpush.msrb.mxu3 %v506_v57 }
  0x6e   : > { %v5029_v61 = vld.sshfl [vmem:[#allocation1 + $0x30] sm:$0xff pattern:$0x73625140]  ;;  %v5031_v62 = vld.sshfl [vmem:[#allocation1 + $0x20] sm:$0xff pattern:$0x73625140]  ;;  %2300 = vmatpush.msrb.mxu0 %v406_v58  ;;  %2319 = vmatpush.msrb.mxu1 %v440_v59 }
  0x6f   : > { %v5033_v63 = vld.sshfl [vmem:[#allocation1 + $0x38] sm:$0xff pattern:$0x73625140]  ;;  %v5035_v0 = vld.sshfl [vmem:[#allocation1 + $0x28] sm:$0xff pattern:$0x73625140]  ;;  %2283 = vmatmul.f32.vlgmr.msra.gmra.mxu3 %v5013_v47  ;;  %2243 = vmatmul.f32.vlgmr.msra.gmra.mxu1 %v5015_v48 }
  0x70   : > { %v470_v1 = vld [vmem:[%s4875_s6 + $0x620] sm:$0xff]  ;;  %v504_v2 = vld [vmem:[%s4875_s6 + $0x730] sm:$0xff]  ;;  %2092 = vst [vmem:[#allocation1 + $0x20] ss:$4 sm:$0xff] %v263_v60 }
  0x71   : > { %v404_v3 = vld [vmem:[%s4875_s6 + $0x410] sm:$0xff]  ;;  %v438_v4 = vld [vmem:[%s4875_s6 + $0x520] sm:$0xff]  ;;  %2340 = vmatpush.msrb.mxu2 %v470_v1  ;;  %2359 = vmatpush.msrb.mxu3 %v504_v2 }
  0x72   : > { %v468_v5 = vld [vmem:[%s4875_s6 + $0x610] sm:$0xff]  ;;  %v502_v6 = vld [vmem:[%s4875_s6 + $0x720] sm:$0xff]  ;;  %2301 = vmatpush.msrb.mxu0 %v404_v3  ;;  %2320 = vmatpush.msrb.mxu1 %v438_v4 }
  0x73   : > { %v402_v7 = vld [vmem:[%s4875_s6 + $0x400] sm:$0xff]  ;;  %v436_v8 = vld [vmem:[%s4875_s6 + $0x510] sm:$0xff]  ;;  %2341 = vmatpush.msrb.mxu2 %v468_v5  ;;  %2360 = vmatpush.msrb.mxu3 %v502_v6 }
  0x74   : > { %v466_v9 = vld [vmem:[%s4875_s6 + $0x600] sm:$0xff]  ;;  %v500_v10 = vld [vmem:[%s4875_s6 + $0x710] sm:$0xff]  ;;  %2302 = vmatpush.msrb.mxu0 %v402_v7  ;;  %2321 = vmatpush.msrb.mxu1 %v436_v8 }
  0x75   : > { %v560_v11 = vld [vmem:[%s4875_s6 + $0x8f0] sm:$0xff]  ;;  %2342 = vmatpush.msrb.mxu2 %v466_v9  ;;  %v434_v13 = vld [vmem:[%s4875_s6 + $0x500] sm:$0xff]  ;;  %2361 = vmatpush.msrb.mxu3 %v500_v10 }
  0x76   : > { %v624_v12 = vld [vmem:[%s4875_s6 + $0xaf0] sm:$0xff]  ;;  %v498_v14 = vld [vmem:[%s4875_s6 + $0x700] sm:$0xff]  ;;  %2367 = vmatpush.msra.mxu0 %v560_v11  ;;  %2322 = vmatpush.msrb.mxu1 %v434_v13 }
  0x77   : > { %v558_v15 = vld [vmem:[%s4875_s6 + $0x8e0] sm:$0xff]  ;;  %v592_v16 = vld [vmem:[%s4875_s6 + $0x9f0] sm:$0xff]  ;;  %2407 = vmatpush.msra.mxu2 %v624_v12  ;;  %2362 = vmatpush.msrb.mxu3 %v498_v14 }
  0x78   : > { %v622_v17 = vld [vmem:[%s4875_s6 + $0xae0] sm:$0xff]  ;;  %v656_v18 = vld [vmem:[%s4875_s6 + $0xbf0] sm:$0xff]  ;;  %2368 = vmatpush.msra.mxu0 %v558_v15  ;;  %2387 = vmatpush.msra.mxu1 %v592_v16 }
  0x79   : > { %v556_v19 = vld [vmem:[%s4875_s6 + $0x8d0] sm:$0xff]  ;;  %v590_v20 = vld [vmem:[%s4875_s6 + $0x9e0] sm:$0xff]  ;;  %2408 = vmatpush.msra.mxu2 %v622_v17  ;;  %2427 = vmatpush.msra.mxu3 %v656_v18 }
  0x7a   : > { %v620_v21 = vld [vmem:[%s4875_s6 + $0xad0] sm:$0xff]  ;;  %v654_v22 = vld [vmem:[%s4875_s6 + $0xbe0] sm:$0xff]  ;;  %2369 = vmatpush.msra.mxu0 %v556_v19  ;;  %2388 = vmatpush.msra.mxu1 %v590_v20 }
  0x7b   : > { %v554_v23 = vld [vmem:[%s4875_s6 + $0x8c0] sm:$0xff]  ;;  %v588_v24 = vld [vmem:[%s4875_s6 + $0x9d0] sm:$0xff]  ;;  %2409 = vmatpush.msra.mxu2 %v620_v21  ;;  %2428 = vmatpush.msra.mxu3 %v654_v22 }
  0x7c   : > { %v618_v25 = vld [vmem:[%s4875_s6 + $0xac0] sm:$0xff]  ;;  %v5066_v26 = vld.sshfl [vmem:[#allocation1] sm:$0xff pattern:$0x73625140]  ;;  %2343 = vmatmul.f32.vlgmr.msrb.gmra.mxu2 %v5029_v61  ;;  %2370 = vmatpush.msra.mxu0 %v554_v23 }
  0x7d   : > { %v5068_v27 = vld.sshfl [vmem:[#allocation1 + $0x10] sm:$0xff pattern:$0x73625140]  ;;  %v5070_v28 = vld.sshfl [vmem:[#allocation1 + $0x8] sm:$0xff pattern:$0x73625140]  ;;  %2389 = vmatpush.msra.mxu1 %v588_v24  ;;  %2410 = vmatpush.msra.mxu2 %v618_v25 }
  0x7e   : > { %v652_v29 = vld [vmem:[%s4875_s6 + $0xbd0] sm:$0xff]  ;;  %v586_v33 = vld [vmem:[%s4875_s6 + $0x9c0] sm:$0xff]  ;;  %2303 = vmatmul.f32.vlgmr.msrb.gmra.mxu0 %v5031_v62  ;;  %2363 = vmatmul.f32.vlgmr.msrb.gmra.mxu3 %v5033_v63 }
  0x7f   : > { %v264_v30 = vld [vmem:[%s4898_s27 + $0x20] sm:$0xff]  ;;  %v5074_v31 = vld.sshfl [vmem:[#allocation1 + $0x18] sm:$0xff pattern:$0x73625140]  ;;  %2429 = vmatpush.msra.mxu3 %v652_v29  ;;  %v650_v35 = vld [vmem:[%s4875_s6 + $0xbc0] sm:$0xff]  ;;  %2390 = vmatpush.msra.mxu1 %v586_v33 }
  0x80   : > { %v552_v32 = vld [vmem:[%s4875_s6 + $0x8b0] sm:$0xff]  ;;  %2101 = vst [vmem:[#allocation1] ss:$4 sm:$0xff] %v264_v30  ;;  %v550_v36 = vld [vmem:[%s4875_s6 + $0x8a0] sm:$0xff]  ;;  %2323 = vmatmul.f32.vlgmr.msrb.gmra.mxu1 %v5035_v0 }
  0x81   : > { %v616_v34 = vld [vmem:[%s4875_s6 + $0xab0] sm:$0xff]  ;;  %2371 = vmatpush.msra.mxu0 %v552_v32  ;;  %v614_v38 = vld [vmem:[%s4875_s6 + $0xaa0] sm:$0xff]  ;;  %2430 = vmatpush.msra.mxu3 %v650_v35 }
  0x82   : > { %v584_v37 = vld [vmem:[%s4875_s6 + $0x9b0] sm:$0xff]  ;;  %2411 = vmatpush.msra.mxu2 %v616_v34  ;;  %v582_v41 = vld [vmem:[%s4875_s6 + $0x9a0] sm:$0xff] }
  0x83   : > { %v648_v39 = vld [vmem:[%s4875_s6 + $0xbb0] sm:$0xff]  ;;  %2372 = vmatpush.msra.mxu0 %v550_v36  ;;  %2391 = vmatpush.msra.mxu1 %v584_v37  ;;  %v646_v43 = vld [vmem:[%s4875_s6 + $0xba0] sm:$0xff] }
  0x84   : > { %v548_v40 = vld [vmem:[%s4875_s6 + $0x890] sm:$0xff]  ;;  %2412 = vmatpush.msra.mxu2 %v614_v38  ;;  %2431 = vmatpush.msra.mxu3 %v648_v39  ;;  %v546_v44 = vld [vmem:[%s4875_s6 + $0x880] sm:$0xff] }
  0x85   : > { %v612_v42 = vld [vmem:[%s4875_s6 + $0xa90] sm:$0xff]  ;;  %2373 = vmatpush.msra.mxu0 %v548_v40  ;;  %2392 = vmatpush.msra.mxu1 %v582_v41  ;;  %v610_v50 = vld [vmem:[%s4875_s6 + $0xa80] sm:$0xff] }
  0x86   : > { %v580_v49 = vld [vmem:[%s4875_s6 + $0x990] sm:$0xff]  ;;  %2413 = vmatpush.msra.mxu2 %v612_v42  ;;  %2432 = vmatpush.msra.mxu3 %v646_v43  ;;  %v578_v53 = vld [vmem:[%s4875_s6 + $0x980] sm:$0xff] }
  0x87   : > { %v644_v51 = vld [vmem:[%s4875_s6 + $0xb90] sm:$0xff]  ;;  %2374 = vmatpush.msra.mxu0 %v546_v44  ;;  %2393 = vmatpush.msra.mxu1 %v580_v49  ;;  %v642_v55 = vld [vmem:[%s4875_s6 + $0xb80] sm:$0xff] }
  0x88   : > { %v544_v52 = vld [vmem:[%s4875_s6 + $0x870] sm:$0xff]  ;;  %2414 = vmatpush.msra.mxu2 %v610_v50  ;;  %2433 = vmatpush.msra.mxu3 %v644_v51  ;;  %v542_v56 = vld [vmem:[%s4875_s6 + $0x860] sm:$0xff] }
  0x89   : > { %v608_v54 = vld [vmem:[%s4875_s6 + $0xa70] sm:$0xff]  ;;  %2375 = vmatpush.msra.mxu0 %v544_v52  ;;  %2394 = vmatpush.msra.mxu1 %v578_v53  ;;  %v606_v58 = vld [vmem:[%s4875_s6 + $0xa60] sm:$0xff] }
  0x8a   : > { %v576_v57 = vld [vmem:[%s4875_s6 + $0x970] sm:$0xff]  ;;  %2415 = vmatpush.msra.mxu2 %v608_v54  ;;  %2434 = vmatpush.msra.mxu3 %v642_v55  ;;  %v574_v1 = vld [vmem:[%s4875_s6 + $0x960] sm:$0xff] }
  0x8b   : > { %v640_v59 = vld [vmem:[%s4875_s6 + $0xb70] sm:$0xff]  ;;  %2376 = vmatpush.msra.mxu0 %v542_v56  ;;  %2395 = vmatpush.msra.mxu1 %v576_v57  ;;  %v638_v3 = vld [vmem:[%s4875_s6 + $0xb60] sm:$0xff] }
  0x8c   : > { %v540_v60 = vld [vmem:[%s4875_s6 + $0x850] sm:$0xff]  ;;  %2416 = vmatpush.msra.mxu2 %v606_v58  ;;  %2435 = vmatpush.msra.mxu3 %v640_v59  ;;  %v538_v4 = vld [vmem:[%s4875_s6 + $0x840] sm:$0xff] }
  0x8d   : > { %v604_v2 = vld [vmem:[%s4875_s6 + $0xa50] sm:$0xff]  ;;  %2377 = vmatpush.msra.mxu0 %v540_v60  ;;  %2396 = vmatpush.msra.mxu1 %v574_v1  ;;  %v602_v6 = vld [vmem:[%s4875_s6 + $0xa40] sm:$0xff] }
  0x8e   : > { %v572_v5 = vld [vmem:[%s4875_s6 + $0x950] sm:$0xff]  ;;  %2417 = vmatpush.msra.mxu2 %v604_v2  ;;  %2436 = vmatpush.msra.mxu3 %v638_v3  ;;  %v570_v9 = vld [vmem:[%s4875_s6 + $0x940] sm:$0xff] }
  0x8f   : > { %v636_v7 = vld [vmem:[%s4875_s6 + $0xb50] sm:$0xff]  ;;  %2378 = vmatpush.msra.mxu0 %v538_v4  ;;  %2397 = vmatpush.msra.mxu1 %v572_v5  ;;  %v634_v11 = vld [vmem:[%s4875_s6 + $0xb40] sm:$0xff] }
  0x90   : > { %v536_v8 = vld [vmem:[%s4875_s6 + $0x830] sm:$0xff]  ;;  %2418 = vmatpush.msra.mxu2 %v602_v6  ;;  %2437 = vmatpush.msra.mxu3 %v636_v7  ;;  %v534_v12 = vld [vmem:[%s4875_s6 + $0x820] sm:$0xff] }
  0x91   : > { %v600_v10 = vld [vmem:[%s4875_s6 + $0xa30] sm:$0xff]  ;;  %2379 = vmatpush.msra.mxu0 %v536_v8  ;;  %2398 = vmatpush.msra.mxu1 %v570_v9  ;;  %v598_v14 = vld [vmem:[%s4875_s6 + $0xa20] sm:$0xff] }
  0x92   : > { %v568_v13 = vld [vmem:[%s4875_s6 + $0x930] sm:$0xff]  ;;  %2419 = vmatpush.msra.mxu2 %v600_v10  ;;  %2438 = vmatpush.msra.mxu3 %v634_v11  ;;  %v566_v17 = vld [vmem:[%s4875_s6 + $0x920] sm:$0xff] }
  0x93   : > { %v632_v15 = vld [vmem:[%s4875_s6 + $0xb30] sm:$0xff]  ;;  %2380 = vmatpush.msra.mxu0 %v534_v12  ;;  %2399 = vmatpush.msra.mxu1 %v568_v13  ;;  %v630_v19 = vld [vmem:[%s4875_s6 + $0xb20] sm:$0xff] }
  0x94   : > { %v532_v16 = vld [vmem:[%s4875_s6 + $0x810] sm:$0xff]  ;;  %2420 = vmatpush.msra.mxu2 %v598_v14  ;;  %2439 = vmatpush.msra.mxu3 %v632_v15  ;;  %v530_v20 = vld [vmem:[%s4875_s6 + $0x800] sm:$0xff] }
  0x95   : > { %v596_v18 = vld [vmem:[%s4875_s6 + $0xa10] sm:$0xff]  ;;  %2381 = vmatpush.msra.mxu0 %v532_v16  ;;  %2400 = vmatpush.msra.mxu1 %v566_v17  ;;  %v594_v22 = vld [vmem:[%s4875_s6 + $0xa00] sm:$0xff] }
  0x96   : > { %v564_v21 = vld [vmem:[%s4875_s6 + $0x910] sm:$0xff]  ;;  %2421 = vmatpush.msra.mxu2 %v596_v18  ;;  %2440 = vmatpush.msra.mxu3 %v630_v19  ;;  %v562_v29 = vld [vmem:[%s4875_s6 + $0x900] sm:$0xff] }
  0x97   : > { %v628_v23 = vld [vmem:[%s4875_s6 + $0xb10] sm:$0xff]  ;;  %2382 = vmatpush.msra.mxu0 %v530_v20  ;;  %2401 = vmatpush.msra.mxu1 %v564_v21  ;;  %v626_v30 = vld [vmem:[%s4875_s6 + $0xb00] sm:$0xff] }
  0x98   : > { %v688_v24 = vld [vmem:[%s4875_s6 + $0xcf0] sm:$0xff]  ;;  %2422 = vmatpush.msra.mxu2 %v594_v22  ;;  %2441 = vmatpush.msra.mxu3 %v628_v23  ;;  %v686_v32 = vld [vmem:[%s4875_s6 + $0xce0] sm:$0xff] }
  0x99   : > { %v752_v25 = vld [vmem:[%s4875_s6 + $0xef0] sm:$0xff]  ;;  %2383 = vmatmul.f32.vlgmr.msra.gmra.mxu0 %v5066_v26  ;;  %2423 = vmatmul.f32.vlgmr.msra.gmra.mxu2 %v5068_v27  ;;  %v750_v34 = vld [vmem:[%s4875_s6 + $0xee0] sm:$0xff] }
  0x9a   : > { %2447 = vmatpush.msrb.mxu0 %v688_v24  ;;  %2487 = vmatpush.msrb.mxu2 %v752_v25  ;;  %v720_v33 = vld [vmem:[%s4875_s6 + $0xdf0] sm:$0xff]  ;;  %v718_v37 = vld [vmem:[%s4875_s6 + $0xde0] sm:$0xff] }
  0x9b   : > { %v784_v35 = vld [vmem:[%s4875_s6 + $0xff0] sm:$0xff]  ;;  %2402 = vmatpush.msra.mxu1 %v562_v29  ;;  %2442 = vmatpush.msra.mxu3 %v626_v30  ;;  %v782_v39 = vld [vmem:[%s4875_s6 + $0xfe0] sm:$0xff] }
  0x9c   : > { %v684_v36 = vld [vmem:[%s4875_s6 + $0xcd0] sm:$0xff]  ;;  %2403 = vmatmul.f32.vlgmr.msra.gmra.mxu1 %v5070_v28  ;;  %2443 = vmatmul.f32.vlgmr.msra.gmra.mxu3 %v5074_v31  ;;  %v682_v40 = vld [vmem:[%s4875_s6 + $0xcc0] sm:$0xff] }
  0x9d   : > { %v748_v38 = vld [vmem:[%s4875_s6 + $0xed0] sm:$0xff]  ;;  %2448 = vmatpush.msrb.mxu0 %v686_v32  ;;  %2467 = vmatpush.msrb.mxu1 %v720_v33  ;;  %v5147_v42 = vld.sshfl [vmem:[#allocation1 + $0x30] sm:$0xff pattern:$0x73625140]  ;;  %v265_v49 = vld [vmem:[%s4898_s27 + $0x28] sm:$0xff] }
  0x9e   : > { %v5145_v41 = vld.sshfl [vmem:[#allocation1 + $0x20] sm:$0xff pattern:$0x73625140]  ;;  %v5149_v43 = vld.sshfl [vmem:[#allocation1 + $0x28] sm:$0xff pattern:$0x73625140]  ;;  %2488 = vmatpush.msrb.mxu2 %v750_v34  ;;  %2507 = vmatpush.msrb.mxu3 %v784_v35 }
  0x9f   : > { %v716_v44 = vld [vmem:[%s4875_s6 + $0xdd0] sm:$0xff]  ;;  %2449 = vmatpush.msrb.mxu0 %v684_v36  ;;  %2468 = vmatpush.msrb.mxu1 %v718_v37  ;;  %v746_v51 = vld [vmem:[%s4875_s6 + $0xec0] sm:$0xff] }
  0xa0   : > { %v5153_v50 = vld.sshfl [vmem:[#allocation1 + $0x38] sm:$0xff pattern:$0x73625140]  ;;  %2489 = vmatpush.msrb.mxu2 %v748_v38  ;;  %2508 = vmatpush.msrb.mxu3 %v782_v39  ;;  %v714_v54 = vld [vmem:[%s4875_s6 + $0xdc0] sm:$0xff] }
  0xa1   : > { %v780_v52 = vld [vmem:[%s4875_s6 + $0xfd0] sm:$0xff]  ;;  %2102 = vst [vmem:[#allocation1 + $0x20] ss:$4 sm:$0xff] %v265_v49  ;;  %2450 = vmatpush.msrb.mxu0 %v682_v40  ;;  %2469 = vmatpush.msrb.mxu1 %v716_v44  ;;  %v778_v56 = vld [vmem:[%s4875_s6 + $0xfc0] sm:$0xff] }
  0xa2   : > { %v680_v53 = vld [vmem:[%s4875_s6 + $0xcb0] sm:$0xff]  ;;  %2490 = vmatpush.msrb.mxu2 %v746_v51  ;;  %2509 = vmatpush.msrb.mxu3 %v780_v52  ;;  %v678_v57 = vld [vmem:[%s4875_s6 + $0xca0] sm:$0xff] }
  0xa3   : > { %v744_v55 = vld [vmem:[%s4875_s6 + $0xeb0] sm:$0xff]  ;;  %2451 = vmatpush.msrb.mxu0 %v680_v53  ;;  %2470 = vmatpush.msrb.mxu1 %v714_v54  ;;  %v742_v59 = vld [vmem:[%s4875_s6 + $0xea0] sm:$0xff] }
  0xa4   : > { %v712_v58 = vld [vmem:[%s4875_s6 + $0xdb0] sm:$0xff]  ;;  %2491 = vmatpush.msrb.mxu2 %v744_v55  ;;  %2510 = vmatpush.msrb.mxu3 %v778_v56  ;;  %v710_v2 = vld [vmem:[%s4875_s6 + $0xda0] sm:$0xff] }
  0xa5   : > { %v776_v60 = vld [vmem:[%s4875_s6 + $0xfb0] sm:$0xff]  ;;  %2452 = vmatpush.msrb.mxu0 %v678_v57  ;;  %2471 = vmatpush.msrb.mxu1 %v712_v58  ;;  %v774_v4 = vld [vmem:[%s4875_s6 + $0xfa0] sm:$0xff] }
  0xa6   : > { %v676_v1 = vld [vmem:[%s4875_s6 + $0xc90] sm:$0xff]  ;;  %2492 = vmatpush.msrb.mxu2 %v742_v59  ;;  %2511 = vmatpush.msrb.mxu3 %v776_v60  ;;  %v674_v5 = vld [vmem:[%s4875_s6 + $0xc80] sm:$0xff] }
  0xa7   : > { %v740_v3 = vld [vmem:[%s4875_s6 + $0xe90] sm:$0xff]  ;;  %2453 = vmatpush.msrb.mxu0 %v676_v1  ;;  %2472 = vmatpush.msrb.mxu1 %v710_v2  ;;  %v738_v7 = vld [vmem:[%s4875_s6 + $0xe80] sm:$0xff] }
  0xa8   : > { %v708_v6 = vld [vmem:[%s4875_s6 + $0xd90] sm:$0xff]  ;;  %2493 = vmatpush.msrb.mxu2 %v740_v3  ;;  %2512 = vmatpush.msrb.mxu3 %v774_v4  ;;  %v706_v10 = vld [vmem:[%s4875_s6 + $0xd80] sm:$0xff] }
  0xa9   : > { %v772_v8 = vld [vmem:[%s4875_s6 + $0xf90] sm:$0xff]  ;;  %2454 = vmatpush.msrb.mxu0 %v674_v5  ;;  %2473 = vmatpush.msrb.mxu1 %v708_v6  ;;  %v770_v12 = vld [vmem:[%s4875_s6 + $0xf80] sm:$0xff] }
  0xaa   : > { %v672_v9 = vld [vmem:[%s4875_s6 + $0xc70] sm:$0xff]  ;;  %2494 = vmatpush.msrb.mxu2 %v738_v7  ;;  %2513 = vmatpush.msrb.mxu3 %v772_v8  ;;  %v670_v13 = vld [vmem:[%s4875_s6 + $0xc60] sm:$0xff] }
  0xab   : > { %v736_v11 = vld [vmem:[%s4875_s6 + $0xe70] sm:$0xff]  ;;  %2455 = vmatpush.msrb.mxu0 %v672_v9  ;;  %2474 = vmatpush.msrb.mxu1 %v706_v10  ;;  %v734_v15 = vld [vmem:[%s4875_s6 + $0xe60] sm:$0xff] }
  0xac   : > { %v704_v14 = vld [vmem:[%s4875_s6 + $0xd70] sm:$0xff]  ;;  %2495 = vmatpush.msrb.mxu2 %v736_v11  ;;  %2514 = vmatpush.msrb.mxu3 %v770_v12  ;;  %v702_v18 = vld [vmem:[%s4875_s6 + $0xd60] sm:$0xff] }
  0xad   : > { %v768_v16 = vld [vmem:[%s4875_s6 + $0xf70] sm:$0xff]  ;;  %2456 = vmatpush.msrb.mxu0 %v670_v13  ;;  %2475 = vmatpush.msrb.mxu1 %v704_v14  ;;  %v766_v20 = vld [vmem:[%s4875_s6 + $0xf60] sm:$0xff] }
  0xae   : > { %v668_v17 = vld [vmem:[%s4875_s6 + $0xc50] sm:$0xff]  ;;  %2496 = vmatpush.msrb.mxu2 %v734_v15  ;;  %2515 = vmatpush.msrb.mxu3 %v768_v16  ;;  %v666_v21 = vld [vmem:[%s4875_s6 + $0xc40] sm:$0xff] }
  0xaf   : > { %v732_v19 = vld [vmem:[%s4875_s6 + $0xe50] sm:$0xff]  ;;  %2457 = vmatpush.msrb.mxu0 %v668_v17  ;;  %2476 = vmatpush.msrb.mxu1 %v702_v18  ;;  %v730_v23 = vld [vmem:[%s4875_s6 + $0xe40] sm:$0xff] }
  0xb0   : > { %v700_v22 = vld [vmem:[%s4875_s6 + $0xd50] sm:$0xff]  ;;  %2497 = vmatpush.msrb.mxu2 %v732_v19  ;;  %2516 = vmatpush.msrb.mxu3 %v766_v20  ;;  %v698_v29 = vld [vmem:[%s4875_s6 + $0xd40] sm:$0xff] }
  0xb1   : > { %v764_v24 = vld [vmem:[%s4875_s6 + $0xf50] sm:$0xff]  ;;  %2458 = vmatpush.msrb.mxu0 %v666_v21  ;;  %2477 = vmatpush.msrb.mxu1 %v700_v22  ;;  %v762_v32 = vld [vmem:[%s4875_s6 + $0xf40] sm:$0xff] }
  0xb2   : > { %v664_v25 = vld [vmem:[%s4875_s6 + $0xc30] sm:$0xff]  ;;  %2498 = vmatpush.msrb.mxu2 %v730_v23  ;;  %2517 = vmatpush.msrb.mxu3 %v764_v24  ;;  %v662_v33 = vld [vmem:[%s4875_s6 + $0xc20] sm:$0xff] }
  0xb3   : > { %v728_v30 = vld [vmem:[%s4875_s6 + $0xe30] sm:$0xff]  ;;  %2459 = vmatpush.msrb.mxu0 %v664_v25  ;;  %2478 = vmatpush.msrb.mxu1 %v698_v29  ;;  %v726_v35 = vld [vmem:[%s4875_s6 + $0xe20] sm:$0xff] }
  0xb4   : > { %v696_v34 = vld [vmem:[%s4875_s6 + $0xd30] sm:$0xff]  ;;  %2499 = vmatpush.msrb.mxu2 %v728_v30  ;;  %2518 = vmatpush.msrb.mxu3 %v762_v32  ;;  %v694_v38 = vld [vmem:[%s4875_s6 + $0xd20] sm:$0xff] }
  0xb5   : > { %v760_v36 = vld [vmem:[%s4875_s6 + $0xf30] sm:$0xff]  ;;  %2460 = vmatpush.msrb.mxu0 %v662_v33  ;;  %2479 = vmatpush.msrb.mxu1 %v696_v34  ;;  %v758_v40 = vld [vmem:[%s4875_s6 + $0xf20] sm:$0xff] }
  0xb6   : > { %v660_v37 = vld [vmem:[%s4875_s6 + $0xc10] sm:$0xff]  ;;  %2500 = vmatpush.msrb.mxu2 %v726_v35  ;;  %2519 = vmatpush.msrb.mxu3 %v760_v36  ;;  %v658_v44 = vld [vmem:[%s4875_s6 + $0xc00] sm:$0xff] }
  0xb7   : > { %v724_v39 = vld [vmem:[%s4875_s6 + $0xe10] sm:$0xff]  ;;  %2461 = vmatpush.msrb.mxu0 %v660_v37  ;;  %2480 = vmatpush.msrb.mxu1 %v694_v38  ;;  %v722_v51 = vld [vmem:[%s4875_s6 + $0xe00] sm:$0xff] }
  0xb8   : > { %v692_v49 = vld [vmem:[%s4875_s6 + $0xd10] sm:$0xff]  ;;  %2501 = vmatpush.msrb.mxu2 %v724_v39  ;;  %2520 = vmatpush.msrb.mxu3 %v758_v40  ;;  %v690_v55 = vld [vmem:[%s4875_s6 + $0xd00] sm:$0xff] }
  0xb9   : > { %v756_v52 = vld [vmem:[%s4875_s6 + $0xf10] sm:$0xff]  ;;  %2462 = vmatpush.msrb.mxu0 %v658_v44  ;;  %2481 = vmatpush.msrb.mxu1 %v692_v49  ;;  %v754_v56 = vld [vmem:[%s4875_s6 + $0xf00] sm:$0xff] }
  0xba   : > { %v816_v53 = vld [vmem:[%s4875_s6 + $0x10f0] sm:$0xff]  ;;  %2502 = vmatpush.msrb.mxu2 %v722_v51  ;;  %2521 = vmatpush.msrb.mxu3 %v756_v52  ;;  %v814_v57 = vld [vmem:[%s4875_s6 + $0x10e0] sm:$0xff] }
  0xbb   : > { %v880_v54 = vld [vmem:[%s4875_s6 + $0x12f0] sm:$0xff]  ;;  %2463 = vmatmul.f32.vlgmr.msrb.gmra.mxu0 %v5145_v41  ;;  %2503 = vmatmul.f32.vlgmr.msrb.gmra.mxu2 %v5147_v42  ;;  %v878_v59 = vld [vmem:[%s4875_s6 + $0x12e0] sm:$0xff] }
  0xbc   : > { %2527 = vmatpush.msra.mxu0 %v816_v53  ;;  %2567 = vmatpush.msra.mxu2 %v880_v54  ;;  %v848_v58 = vld [vmem:[%s4875_s6 + $0x11f0] sm:$0xff]  ;;  %v846_v2 = vld [vmem:[%s4875_s6 + $0x11e0] sm:$0xff] }
  0xbd   : > { %2482 = vmatpush.msrb.mxu1 %v690_v55  ;;  %2522 = vmatpush.msrb.mxu3 %v754_v56  ;;  %v912_v60 = vld [vmem:[%s4875_s6 + $0x13f0] sm:$0xff]  ;;  %v910_v4 = vld [vmem:[%s4875_s6 + $0x13e0] sm:$0xff] }
  0xbe   : > { %2483 = vmatmul.f32.vlgmr.msrb.gmra.mxu1 %v5149_v43  ;;  %2523 = vmatmul.f32.vlgmr.msrb.gmra.mxu3 %v5153_v50  ;;  %v812_v1 = vld [vmem:[%s4875_s6 + $0x10d0] sm:$0xff]  ;;  %v810_v5 = vld [vmem:[%s4875_s6 + $0x10c0] sm:$0xff] }
  0xbf   : > { %2528 = vmatpush.msra.mxu0 %v814_v57  ;;  %2547 = vmatpush.msra.mxu1 %v848_v58  ;;  %v876_v3 = vld [vmem:[%s4875_s6 + $0x12d0] sm:$0xff]  ;;  %v874_v7 = vld [vmem:[%s4875_s6 + $0x12c0] sm:$0xff] }
  0xc0   : > { %2568 = vmatpush.msra.mxu2 %v878_v59  ;;  %2587 = vmatpush.msra.mxu3 %v912_v60  ;;  %v844_v6 = vld [vmem:[%s4875_s6 + $0x11d0] sm:$0xff]  ;;  %v842_v10 = vld [vmem:[%s4875_s6 + $0x11c0] sm:$0xff] }
  0xc1   : > { %2529 = vmatpush.msra.mxu0 %v812_v1  ;;  %2548 = vmatpush.msra.mxu1 %v846_v2  ;;  %v908_v8 = vld [vmem:[%s4875_s6 + $0x13d0] sm:$0xff]  ;;  %v906_v12 = vld [vmem:[%s4875_s6 + $0x13c0] sm:$0xff] }
  0xc2   : > { %2569 = vmatpush.msra.mxu2 %v876_v3  ;;  %2588 = vmatpush.msra.mxu3 %v910_v4  ;;  %v808_v9 = vld [vmem:[%s4875_s6 + $0x10b0] sm:$0xff]  ;;  %v806_v13 = vld [vmem:[%s4875_s6 + $0x10a0] sm:$0xff] }
  0xc3   : > { %2530 = vmatpush.msra.mxu0 %v810_v5  ;;  %2549 = vmatpush.msra.mxu1 %v844_v6  ;;  %v872_v11 = vld [vmem:[%s4875_s6 + $0x12b0] sm:$0xff]  ;;  %v870_v15 = vld [vmem:[%s4875_s6 + $0x12a0] sm:$0xff] }
  0xc4   : > { %2570 = vmatpush.msra.mxu2 %v874_v7  ;;  %2589 = vmatpush.msra.mxu3 %v908_v8  ;;  %v840_v14 = vld [vmem:[%s4875_s6 + $0x11b0] sm:$0xff]  ;;  %v838_v18 = vld [vmem:[%s4875_s6 + $0x11a0] sm:$0xff] }
  0xc5   : > { %2531 = vmatpush.msra.mxu0 %v808_v9  ;;  %2550 = vmatpush.msra.mxu1 %v842_v10  ;;  %v904_v16 = vld [vmem:[%s4875_s6 + $0x13b0] sm:$0xff]  ;;  %v902_v20 = vld [vmem:[%s4875_s6 + $0x13a0] sm:$0xff] }
  0xc6   : > { %2571 = vmatpush.msra.mxu2 %v872_v11  ;;  %2590 = vmatpush.msra.mxu3 %v906_v12  ;;  %v804_v17 = vld [vmem:[%s4875_s6 + $0x1090] sm:$0xff]  ;;  %v802_v21 = vld [vmem:[%s4875_s6 + $0x1080] sm:$0xff] }
  0xc7   : > { %2532 = vmatpush.msra.mxu0 %v806_v13  ;;  %2551 = vmatpush.msra.mxu1 %v840_v14  ;;  %v868_v19 = vld [vmem:[%s4875_s6 + $0x1290] sm:$0xff]  ;;  %v866_v23 = vld [vmem:[%s4875_s6 + $0x1280] sm:$0xff] }
  0xc8   : > { %2572 = vmatpush.msra.mxu2 %v870_v15  ;;  %2591 = vmatpush.msra.mxu3 %v904_v16  ;;  %v836_v22 = vld [vmem:[%s4875_s6 + $0x1190] sm:$0xff]  ;;  %v834_v29 = vld [vmem:[%s4875_s6 + $0x1180] sm:$0xff] }
  0xc9   : > { %2533 = vmatpush.msra.mxu0 %v804_v17  ;;  %2552 = vmatpush.msra.mxu1 %v838_v18  ;;  %v900_v24 = vld [vmem:[%s4875_s6 + $0x1390] sm:$0xff]  ;;  %v898_v32 = vld [vmem:[%s4875_s6 + $0x1380] sm:$0xff] }
  0xca   : > { %2573 = vmatpush.msra.mxu2 %v868_v19  ;;  %2592 = vmatpush.msra.mxu3 %v902_v20  ;;  %v800_v25 = vld [vmem:[%s4875_s6 + $0x1070] sm:$0xff]  ;;  %v798_v33 = vld [vmem:[%s4875_s6 + $0x1060] sm:$0xff] }
  0xcb   : > { %2534 = vmatpush.msra.mxu0 %v802_v21  ;;  %2553 = vmatpush.msra.mxu1 %v836_v22  ;;  %v864_v30 = vld [vmem:[%s4875_s6 + $0x1270] sm:$0xff]  ;;  %v862_v35 = vld [vmem:[%s4875_s6 + $0x1260] sm:$0xff] }
  0xcc   : > { %2574 = vmatpush.msra.mxu2 %v866_v23  ;;  %2593 = vmatpush.msra.mxu3 %v900_v24  ;;  %v832_v34 = vld [vmem:[%s4875_s6 + $0x1170] sm:$0xff]  ;;  %v830_v38 = vld [vmem:[%s4875_s6 + $0x1160] sm:$0xff] }
  0xcd   : > { %2535 = vmatpush.msra.mxu0 %v800_v25  ;;  %2554 = vmatpush.msra.mxu1 %v834_v29  ;;  %v896_v36 = vld [vmem:[%s4875_s6 + $0x1370] sm:$0xff]  ;;  %v894_v40 = vld [vmem:[%s4875_s6 + $0x1360] sm:$0xff] }
  0xce   : > { %2575 = vmatpush.msra.mxu2 %v864_v30  ;;  %2594 = vmatpush.msra.mxu3 %v898_v32  ;;  %v796_v37 = vld [vmem:[%s4875_s6 + $0x1050] sm:$0xff]  ;;  %v794_v44 = vld [vmem:[%s4875_s6 + $0x1040] sm:$0xff] }
  0xcf   : > { %2536 = vmatpush.msra.mxu0 %v798_v33  ;;  %2555 = vmatpush.msra.mxu1 %v832_v34  ;;  %v860_v39 = vld [vmem:[%s4875_s6 + $0x1250] sm:$0xff]  ;;  %v858_v51 = vld [vmem:[%s4875_s6 + $0x1240] sm:$0xff] }
  0xd0   : > { %2576 = vmatpush.msra.mxu2 %v862_v35  ;;  %2595 = vmatpush.msra.mxu3 %v896_v36  ;;  %v828_v49 = vld [vmem:[%s4875_s6 + $0x1150] sm:$0xff]  ;;  %v826_v54 = vld [vmem:[%s4875_s6 + $0x1140] sm:$0xff] }
  0xd1   : > { %2537 = vmatpush.msra.mxu0 %v796_v37  ;;  %2556 = vmatpush.msra.mxu1 %v830_v38  ;;  %v892_v52 = vld [vmem:[%s4875_s6 + $0x1350] sm:$0xff]  ;;  %v890_v56 = vld [vmem:[%s4875_s6 + $0x1340] sm:$0xff] }
  0xd2   : > { %2577 = vmatpush.msra.mxu2 %v860_v39  ;;  %2596 = vmatpush.msra.mxu3 %v894_v40  ;;  %v792_v53 = vld [vmem:[%s4875_s6 + $0x1030] sm:$0xff]  ;;  %v790_v57 = vld [vmem:[%s4875_s6 + $0x1020] sm:$0xff] }
  0xd3   : > { %2538 = vmatpush.msra.mxu0 %v794_v44  ;;  %2557 = vmatpush.msra.mxu1 %v828_v49  ;;  %v856_v55 = vld [vmem:[%s4875_s6 + $0x1230] sm:$0xff]  ;;  %v854_v59 = vld [vmem:[%s4875_s6 + $0x1220] sm:$0xff] }
  0xd4   : > { %2578 = vmatpush.msra.mxu2 %v858_v51  ;;  %2597 = vmatpush.msra.mxu3 %v892_v52  ;;  %v824_v58 = vld [vmem:[%s4875_s6 + $0x1130] sm:$0xff]  ;;  %v822_v2 = vld [vmem:[%s4875_s6 + $0x1120] sm:$0xff] }
  0xd5   : > { %2539 = vmatpush.msra.mxu0 %v792_v53  ;;  %2558 = vmatpush.msra.mxu1 %v826_v54  ;;  %v888_v60 = vld [vmem:[%s4875_s6 + $0x1330] sm:$0xff]  ;;  %v886_v4 = vld [vmem:[%s4875_s6 + $0x1320] sm:$0xff] }
  0xd6   : > { %2579 = vmatpush.msra.mxu2 %v856_v55  ;;  %2598 = vmatpush.msra.mxu3 %v890_v56  ;;  %v788_v1 = vld [vmem:[%s4875_s6 + $0x1010] sm:$0xff]  ;;  %v786_v5 = vld [vmem:[%s4875_s6 + $0x1000] sm:$0xff] }
  0xd7   : > { %2540 = vmatpush.msra.mxu0 %v790_v57  ;;  %2559 = vmatpush.msra.mxu1 %v824_v58  ;;  %v852_v3 = vld [vmem:[%s4875_s6 + $0x1210] sm:$0xff]  ;;  %v850_v7 = vld [vmem:[%s4875_s6 + $0x1200] sm:$0xff] }
  0xd8   : > { %2580 = vmatpush.msra.mxu2 %v854_v59  ;;  %2599 = vmatpush.msra.mxu3 %v888_v60  ;;  %v820_v6 = vld [vmem:[%s4875_s6 + $0x1110] sm:$0xff]  ;;  %v5275_v10 = vld.sshfl [vmem:[#allocation1 + $0x10] sm:$0xff pattern:$0x73625140] }
  0xd9   : > { %2541 = vmatpush.msra.mxu0 %v788_v1  ;;  %2560 = vmatpush.msra.mxu1 %v822_v2  ;;  %v884_v8 = vld [vmem:[%s4875_s6 + $0x1310] sm:$0xff]  ;;  %v818_v13 = vld [vmem:[%s4875_s6 + $0x1100] sm:$0xff] }
  0xda   : > { %2581 = vmatpush.msra.mxu2 %v852_v3  ;;  %2600 = vmatpush.msra.mxu3 %v886_v4  ;;  %v5273_v9 = vld.sshfl [vmem:[#allocation1] sm:$0xff pattern:$0x73625140]  ;;  %v882_v14 = vld [vmem:[%s4875_s6 + $0x1300] sm:$0xff] }
  0xdb   : > { %2542 = vmatpush.msra.mxu0 %v786_v5  ;;  %2561 = vmatpush.msra.mxu1 %v820_v6  ;;  %v944_v11 = vld [vmem:[%s4875_s6 + $0x14f0] sm:$0xff]  ;;  %v5283_v15 = vld.sshfl [vmem:[#allocation1 + $0x8] sm:$0xff pattern:$0x73625140] }
  0xdc   : > { %v1008_v12 = vld [vmem:[%s4875_s6 + $0x16f0] sm:$0xff]  ;;  %2582 = vmatpush.msra.mxu2 %v850_v7  ;;  %2601 = vmatpush.msra.mxu3 %v884_v8  ;;  %v942_v17 = vld [vmem:[%s4875_s6 + $0x14e0] sm:$0xff] }
  0xdd   : > { %2543 = vmatmul.f32.vlgmr.msra.gmra.mxu0 %v5273_v9  ;;  %2583 = vmatmul.f32.vlgmr.msra.gmra.mxu2 %v5275_v10  ;;  %v5285_v16 = vld.sshfl [vmem:[#allocation1 + $0x18] sm:$0xff pattern:$0x73625140]  ;;  %v1006_v19 = vld [vmem:[%s4875_s6 + $0x16e0] sm:$0xff] }
  0xde   : > { %2607 = vmatpush.msrb.mxu0 %v944_v11  ;;  %2647 = vmatpush.msrb.mxu2 %v1008_v12  ;;  %v976_v18 = vld [vmem:[%s4875_s6 + $0x15f0] sm:$0xff]  ;;  %v974_v22 = vld [vmem:[%s4875_s6 + $0x15e0] sm:$0xff] }
  0xdf   : > { %2562 = vmatpush.msra.mxu1 %v818_v13  ;;  %2602 = vmatpush.msra.mxu3 %v882_v14  ;;  %v1040_v20 = vld [vmem:[%s4875_s6 + $0x17f0] sm:$0xff]  ;;  %v1038_v24 = vld [vmem:[%s4875_s6 + $0x17e0] sm:$0xff] }
  0xe0   : > { %2563 = vmatmul.f32.vlgmr.msra.gmra.mxu1 %v5283_v15  ;;  %2603 = vmatmul.f32.vlgmr.msra.gmra.mxu3 %v5285_v16  ;;  %v940_v21 = vld [vmem:[%s4875_s6 + $0x14d0] sm:$0xff]  ;;  %v938_v25 = vld [vmem:[%s4875_s6 + $0x14c0] sm:$0xff] }
  0xe1   : > { %2608 = vmatpush.msrb.mxu0 %v942_v17  ;;  %2627 = vmatpush.msrb.mxu1 %v976_v18  ;;  %v1004_v23 = vld [vmem:[%s4875_s6 + $0x16d0] sm:$0xff]  ;;  %v1002_v30 = vld [vmem:[%s4875_s6 + $0x16c0] sm:$0xff] }
  0xe2   : > { %2648 = vmatpush.msrb.mxu2 %v1006_v19  ;;  %2667 = vmatpush.msrb.mxu3 %v1040_v20  ;;  %v972_v29 = vld [vmem:[%s4875_s6 + $0x15d0] sm:$0xff]  ;;  %v970_v34 = vld [vmem:[%s4875_s6 + $0x15c0] sm:$0xff] }
  0xe3   : > { %2609 = vmatpush.msrb.mxu0 %v940_v21  ;;  %2628 = vmatpush.msrb.mxu1 %v974_v22  ;;  %v1036_v32 = vld [vmem:[%s4875_s6 + $0x17d0] sm:$0xff]  ;;  %v1034_v36 = vld [vmem:[%s4875_s6 + $0x17c0] sm:$0xff] }
  0xe4   : > { %2649 = vmatpush.msrb.mxu2 %v1004_v23  ;;  %2668 = vmatpush.msrb.mxu3 %v1038_v24  ;;  %v936_v33 = vld [vmem:[%s4875_s6 + $0x14b0] sm:$0xff]  ;;  %v934_v37 = vld [vmem:[%s4875_s6 + $0x14a0] sm:$0xff] }
  0xe5   : > { %2610 = vmatpush.msrb.mxu0 %v938_v25  ;;  %2629 = vmatpush.msrb.mxu1 %v972_v29  ;;  %v1000_v35 = vld [vmem:[%s4875_s6 + $0x16b0] sm:$0xff]  ;;  %v998_v39 = vld [vmem:[%s4875_s6 + $0x16a0] sm:$0xff] }
  0xe6   : > { %2650 = vmatpush.msrb.mxu2 %v1002_v30  ;;  %2669 = vmatpush.msrb.mxu3 %v1036_v32  ;;  %v968_v38 = vld [vmem:[%s4875_s6 + $0x15b0] sm:$0xff]  ;;  %v966_v49 = vld [vmem:[%s4875_s6 + $0x15a0] sm:$0xff] }
  0xe7   : > { %2611 = vmatpush.msrb.mxu0 %v936_v33  ;;  %2630 = vmatpush.msrb.mxu1 %v970_v34  ;;  %v1032_v40 = vld [vmem:[%s4875_s6 + $0x17b0] sm:$0xff]  ;;  %v1030_v52 = vld [vmem:[%s4875_s6 + $0x17a0] sm:$0xff] }
  0xe8   : > { %2651 = vmatpush.msrb.mxu2 %v1000_v35  ;;  %2670 = vmatpush.msrb.mxu3 %v1034_v36  ;;  %v932_v44 = vld [vmem:[%s4875_s6 + $0x1490] sm:$0xff]  ;;  %v930_v53 = vld [vmem:[%s4875_s6 + $0x1480] sm:$0xff] }
  0xe9   : > { %2612 = vmatpush.msrb.mxu0 %v934_v37  ;;  %2631 = vmatpush.msrb.mxu1 %v968_v38  ;;  %v996_v51 = vld [vmem:[%s4875_s6 + $0x1690] sm:$0xff]  ;;  %v994_v55 = vld [vmem:[%s4875_s6 + $0x1680] sm:$0xff] }
  0xea   : > { %2652 = vmatpush.msrb.mxu2 %v998_v39  ;;  %2671 = vmatpush.msrb.mxu3 %v1032_v40  ;;  %v964_v54 = vld [vmem:[%s4875_s6 + $0x1590] sm:$0xff]  ;;  %v962_v58 = vld [vmem:[%s4875_s6 + $0x1580] sm:$0xff] }
  0xeb   : > { %2613 = vmatpush.msrb.mxu0 %v932_v44  ;;  %2632 = vmatpush.msrb.mxu1 %v966_v49  ;;  %v1028_v56 = vld [vmem:[%s4875_s6 + $0x1790] sm:$0xff]  ;;  %v1026_v60 = vld [vmem:[%s4875_s6 + $0x1780] sm:$0xff] }
  0xec   : > { %2653 = vmatpush.msrb.mxu2 %v996_v51  ;;  %2672 = vmatpush.msrb.mxu3 %v1030_v52  ;;  %v928_v57 = vld [vmem:[%s4875_s6 + $0x1470] sm:$0xff]  ;;  %v926_v1 = vld [vmem:[%s4875_s6 + $0x1460] sm:$0xff] }
  0xed   : > { %2614 = vmatpush.msrb.mxu0 %v930_v53  ;;  %2633 = vmatpush.msrb.mxu1 %v964_v54  ;;  %v992_v59 = vld [vmem:[%s4875_s6 + $0x1670] sm:$0xff]  ;;  %v990_v3 = vld [vmem:[%s4875_s6 + $0x1660] sm:$0xff] }
  0xee   : > { %2654 = vmatpush.msrb.mxu2 %v994_v55  ;;  %2673 = vmatpush.msrb.mxu3 %v1028_v56  ;;  %v960_v2 = vld [vmem:[%s4875_s6 + $0x1570] sm:$0xff]  ;;  %v958_v6 = vld [vmem:[%s4875_s6 + $0x1560] sm:$0xff] }
  0xef   : > { %2615 = vmatpush.msrb.mxu0 %v928_v57  ;;  %2634 = vmatpush.msrb.mxu1 %v962_v58  ;;  %v1024_v4 = vld [vmem:[%s4875_s6 + $0x1770] sm:$0xff]  ;;  %v1022_v8 = vld [vmem:[%s4875_s6 + $0x1760] sm:$0xff] }
  0xf0   : > { %2655 = vmatpush.msrb.mxu2 %v992_v59  ;;  %2674 = vmatpush.msrb.mxu3 %v1026_v60  ;;  %v924_v5 = vld [vmem:[%s4875_s6 + $0x1450] sm:$0xff]  ;;  %v922_v11 = vld [vmem:[%s4875_s6 + $0x1440] sm:$0xff] }
  0xf1   : > { %2616 = vmatpush.msrb.mxu0 %v926_v1  ;;  %2635 = vmatpush.msrb.mxu1 %v960_v2  ;;  %v988_v7 = vld [vmem:[%s4875_s6 + $0x1650] sm:$0xff]  ;;  %v986_v13 = vld [vmem:[%s4875_s6 + $0x1640] sm:$0xff] }
  0xf2   : > { %2656 = vmatpush.msrb.mxu2 %v990_v3  ;;  %2675 = vmatpush.msrb.mxu3 %v1024_v4  ;;  %v956_v12 = vld [vmem:[%s4875_s6 + $0x1550] sm:$0xff]  ;;  %v954_v18 = vld [vmem:[%s4875_s6 + $0x1540] sm:$0xff] }
  0xf3   : > { %2617 = vmatpush.msrb.mxu0 %v924_v5  ;;  %2636 = vmatpush.msrb.mxu1 %v958_v6  ;;  %v1020_v14 = vld [vmem:[%s4875_s6 + $0x1750] sm:$0xff]  ;;  %v1018_v20 = vld [vmem:[%s4875_s6 + $0x1740] sm:$0xff] }
  0xf4   : > { %2657 = vmatpush.msrb.mxu2 %v988_v7  ;;  %2676 = vmatpush.msrb.mxu3 %v1022_v8  ;;  %v920_v17 = vld [vmem:[%s4875_s6 + $0x1430] sm:$0xff]  ;;  %v918_v21 = vld [vmem:[%s4875_s6 + $0x1420] sm:$0xff] }
  0xf5   : > { %2618 = vmatpush.msrb.mxu0 %v922_v11  ;;  %2637 = vmatpush.msrb.mxu1 %v956_v12  ;;  %v984_v19 = vld [vmem:[%s4875_s6 + $0x1630] sm:$0xff]  ;;  %v982_v23 = vld [vmem:[%s4875_s6 + $0x1620] sm:$0xff] }
  0xf6   : > { %2658 = vmatpush.msrb.mxu2 %v986_v13  ;;  %2677 = vmatpush.msrb.mxu3 %v1020_v14  ;;  %v952_v22 = vld [vmem:[%s4875_s6 + $0x1530] sm:$0xff]  ;;  %v950_v29 = vld [vmem:[%s4875_s6 + $0x1520] sm:$0xff] }
  0xf7   : > { %2619 = vmatpush.msrb.mxu0 %v920_v17  ;;  %2638 = vmatpush.msrb.mxu1 %v954_v18  ;;  %v1016_v24 = vld [vmem:[%s4875_s6 + $0x1730] sm:$0xff]  ;;  %v266_v30 = vld [vmem:[%s4898_s27 + $0x30] sm:$0xff]  ;;  %v5360_v52 = vld.sshfl [vmem:[#allocation1 + $0x28] sm:$0xff pattern:$0x73625140] }
  0xf8   : > { %2659 = vmatpush.msrb.mxu2 %v984_v19  ;;  %2678 = vmatpush.msrb.mxu3 %v1018_v20  ;;  %v916_v25 = vld [vmem:[%s4875_s6 + $0x1410] sm:$0xff]  ;;  %v1014_v33 = vld [vmem:[%s4875_s6 + $0x1720] sm:$0xff]  ;;  %2111 = vst [vmem:[#allocation1] ss:$4 sm:$0xff] %v266_v30 }
  0xf9   : > { %2620 = vmatpush.msrb.mxu0 %v918_v21  ;;  %2639 = vmatpush.msrb.mxu1 %v952_v22  ;;  %v980_v32 = vld [vmem:[%s4875_s6 + $0x1610] sm:$0xff]  ;;  %v914_v34 = vld [vmem:[%s4875_s6 + $0x1400] sm:$0xff] }
  0xfa   : > { %2660 = vmatpush.msrb.mxu2 %v982_v23  ;;  %2679 = vmatpush.msrb.mxu3 %v1016_v24  ;;  %v948_v35 = vld [vmem:[%s4875_s6 + $0x1510] sm:$0xff]  ;;  %v978_v36 = vld [vmem:[%s4875_s6 + $0x1600] sm:$0xff] }
  0xfb   : > { %2621 = vmatpush.msrb.mxu0 %v916_v25  ;;  %2640 = vmatpush.msrb.mxu1 %v950_v29  ;;  %v1012_v37 = vld [vmem:[%s4875_s6 + $0x1710] sm:$0xff]  ;;  %v5352_v39 = vld.sshfl [vmem:[#allocation1 + $0x30] sm:$0xff pattern:$0x73625140] }
  0xfc   : > { %2661 = vmatpush.msrb.mxu2 %v980_v32  ;;  %2680 = vmatpush.msrb.mxu3 %v1014_v33  ;;  %v5350_v38 = vld.sshfl [vmem:[#allocation1 + $0x20] sm:$0xff pattern:$0x73625140]  ;;  %v946_v49 = vld [vmem:[%s4875_s6 + $0x1500] sm:$0xff] }
  0xfd   : > { %2622 = vmatpush.msrb.mxu0 %v914_v34  ;;  %2641 = vmatpush.msrb.mxu1 %v948_v35  ;;  %v1072_v40 = vld [vmem:[%s4875_s6 + $0x18f0] sm:$0xff]  ;;  %v1010_v51 = vld [vmem:[%s4875_s6 + $0x1700] sm:$0xff] }
  0xfe   : > { %v1136_v44 = vld [vmem:[%s4875_s6 + $0x1af0] sm:$0xff]  ;;  %2662 = vmatpush.msrb.mxu2 %v978_v36  ;;  %2681 = vmatpush.msrb.mxu3 %v1012_v37  ;;  %v1070_v54 = vld [vmem:[%s4875_s6 + $0x18e0] sm:$0xff] }
  0xff   : > { %2623 = vmatmul.f32.vlgmr.msrb.gmra.mxu0 %v5350_v38  ;;  %2663 = vmatmul.f32.vlgmr.msrb.gmra.mxu2 %v5352_v39  ;;  %v5362_v53 = vld.sshfl [vmem:[#allocation1 + $0x38] sm:$0xff pattern:$0x73625140]  ;;  %v1134_v56 = vld [vmem:[%s4875_s6 + $0x1ae0] sm:$0xff] }
 0x100   : > { %2687 = vmatpush.msra.mxu0 %v1072_v40  ;;  %2727 = vmatpush.msra.mxu2 %v1136_v44  ;;  %v1104_v55 = vld [vmem:[%s4875_s6 + $0x19f0] sm:$0xff]  ;;  %v1102_v59 = vld [vmem:[%s4875_s6 + $0x19e0] sm:$0xff] }
 0x101   : > { %2642 = vmatpush.msrb.mxu1 %v946_v49  ;;  %2682 = vmatpush.msrb.mxu3 %v1010_v51  ;;  %v1168_v57 = vld [vmem:[%s4875_s6 + $0x1bf0] sm:$0xff]  ;;  %v1166_v1 = vld [vmem:[%s4875_s6 + $0x1be0] sm:$0xff] }
 0x102   : > { %2643 = vmatmul.f32.vlgmr.msrb.gmra.mxu1 %v5360_v52  ;;  %2683 = vmatmul.f32.vlgmr.msrb.gmra.mxu3 %v5362_v53  ;;  %v1068_v58 = vld [vmem:[%s4875_s6 + $0x18d0] sm:$0xff]  ;;  %v1066_v2 = vld [vmem:[%s4875_s6 + $0x18c0] sm:$0xff] }
 0x103   : > { %2688 = vmatpush.msra.mxu0 %v1070_v54  ;;  %2707 = vmatpush.msra.mxu1 %v1104_v55  ;;  %v1132_v60 = vld [vmem:[%s4875_s6 + $0x1ad0] sm:$0xff]  ;;  %v1130_v4 = vld [vmem:[%s4875_s6 + $0x1ac0] sm:$0xff] }
 0x104   : > { %2728 = vmatpush.msra.mxu2 %v1134_v56  ;;  %2747 = vmatpush.msra.mxu3 %v1168_v57  ;;  %v1100_v3 = vld [vmem:[%s4875_s6 + $0x19d0] sm:$0xff]  ;;  %v1098_v7 = vld [vmem:[%s4875_s6 + $0x19c0] sm:$0xff] }
 0x105   : > { %2689 = vmatpush.msra.mxu0 %v1068_v58  ;;  %2708 = vmatpush.msra.mxu1 %v1102_v59  ;;  %v1164_v5 = vld [vmem:[%s4875_s6 + $0x1bd0] sm:$0xff]  ;;  %v1162_v11 = vld [vmem:[%s4875_s6 + $0x1bc0] sm:$0xff] }
 0x106   : > { %2729 = vmatpush.msra.mxu2 %v1132_v60  ;;  %2748 = vmatpush.msra.mxu3 %v1166_v1  ;;  %v1064_v6 = vld [vmem:[%s4875_s6 + $0x18b0] sm:$0xff]  ;;  %v1062_v12 = vld [vmem:[%s4875_s6 + $0x18a0] sm:$0xff] }
 0x107   : > { %2690 = vmatpush.msra.mxu0 %v1066_v2  ;;  %2709 = vmatpush.msra.mxu1 %v1100_v3  ;;  %v1128_v8 = vld [vmem:[%s4875_s6 + $0x1ab0] sm:$0xff]  ;;  %v1126_v14 = vld [vmem:[%s4875_s6 + $0x1aa0] sm:$0xff] }
 0x108   : > { %2730 = vmatpush.msra.mxu2 %v1130_v4  ;;  %2749 = vmatpush.msra.mxu3 %v1164_v5  ;;  %v1096_v13 = vld [vmem:[%s4875_s6 + $0x19b0] sm:$0xff]  ;;  %v1094_v19 = vld [vmem:[%s4875_s6 + $0x19a0] sm:$0xff] }
 0x109   : > { %2691 = vmatpush.msra.mxu0 %v1064_v6  ;;  %2710 = vmatpush.msra.mxu1 %v1098_v7  ;;  %v1160_v17 = vld [vmem:[%s4875_s6 + $0x1bb0] sm:$0xff]  ;;  %v1158_v21 = vld [vmem:[%s4875_s6 + $0x1ba0] sm:$0xff] }
 0x10a   : > { %2731 = vmatpush.msra.mxu2 %v1128_v8  ;;  %2750 = vmatpush.msra.mxu3 %v1162_v11  ;;  %v1060_v18 = vld [vmem:[%s4875_s6 + $0x1890] sm:$0xff]  ;;  %v1058_v22 = vld [vmem:[%s4875_s6 + $0x1880] sm:$0xff] }
 0x10b   : > { %2692 = vmatpush.msra.mxu0 %v1062_v12  ;;  %2711 = vmatpush.msra.mxu1 %v1096_v13  ;;  %v1124_v20 = vld [vmem:[%s4875_s6 + $0x1a90] sm:$0xff]  ;;  %v1122_v24 = vld [vmem:[%s4875_s6 + $0x1a80] sm:$0xff] }
 0x10c   : > { %2732 = vmatpush.msra.mxu2 %v1126_v14  ;;  %2751 = vmatpush.msra.mxu3 %v1160_v17  ;;  %v1092_v23 = vld [vmem:[%s4875_s6 + $0x1990] sm:$0xff]  ;;  %v1090_v30 = vld [vmem:[%s4875_s6 + $0x1980] sm:$0xff] }
 0x10d   : > { %2693 = vmatpush.msra.mxu0 %v1060_v18  ;;  %2712 = vmatpush.msra.mxu1 %v1094_v19  ;;  %v1156_v25 = vld [vmem:[%s4875_s6 + $0x1b90] sm:$0xff]  ;;  %v1154_v33 = vld [vmem:[%s4875_s6 + $0x1b80] sm:$0xff] }
 0x10e   : > { %2733 = vmatpush.msra.mxu2 %v1124_v20  ;;  %2752 = vmatpush.msra.mxu3 %v1158_v21  ;;  %v1056_v29 = vld [vmem:[%s4875_s6 + $0x1870] sm:$0xff]  ;;  %v1054_v34 = vld [vmem:[%s4875_s6 + $0x1860] sm:$0xff] }
 0x10f   : > { %2694 = vmatpush.msra.mxu0 %v1058_v22  ;;  %2713 = vmatpush.msra.mxu1 %v1092_v23  ;;  %v1120_v32 = vld [vmem:[%s4875_s6 + $0x1a70] sm:$0xff]  ;;  %v1118_v36 = vld [vmem:[%s4875_s6 + $0x1a60] sm:$0xff] }
 0x110   : > { %2734 = vmatpush.msra.mxu2 %v1122_v24  ;;  %2753 = vmatpush.msra.mxu3 %v1156_v25  ;;  %v1088_v35 = vld [vmem:[%s4875_s6 + $0x1970] sm:$0xff]  ;;  %v1086_v44 = vld [vmem:[%s4875_s6 + $0x1960] sm:$0xff] }
 0x111   : > { %2695 = vmatpush.msra.mxu0 %v1056_v29  ;;  %2714 = vmatpush.msra.mxu1 %v1090_v30  ;;  %v1152_v37 = vld [vmem:[%s4875_s6 + $0x1b70] sm:$0xff]  ;;  %v1150_v51 = vld [vmem:[%s4875_s6 + $0x1b60] sm:$0xff] }
 0x112   : > { %2735 = vmatpush.msra.mxu2 %v1120_v32  ;;  %2754 = vmatpush.msra.mxu3 %v1154_v33  ;;  %v1052_v40 = vld [vmem:[%s4875_s6 + $0x1850] sm:$0xff]  ;;  %v1050_v54 = vld [vmem:[%s4875_s6 + $0x1840] sm:$0xff] }
 0x113   : > { %2696 = vmatpush.msra.mxu0 %v1054_v34  ;;  %2715 = vmatpush.msra.mxu1 %v1088_v35  ;;  %v1116_v49 = vld [vmem:[%s4875_s6 + $0x1a50] sm:$0xff]  ;;  %v1114_v56 = vld [vmem:[%s4875_s6 + $0x1a40] sm:$0xff] }
 0x114   : > { %2736 = vmatpush.msra.mxu2 %v1118_v36  ;;  %2755 = vmatpush.msra.mxu3 %v1152_v37  ;;  %v1084_v55 = vld [vmem:[%s4875_s6 + $0x1950] sm:$0xff]  ;;  %v1082_v59 = vld [vmem:[%s4875_s6 + $0x1940] sm:$0xff] }
 0x115   : > { %2697 = vmatpush.msra.mxu0 %v1052_v40  ;;  %2716 = vmatpush.msra.mxu1 %v1086_v44  ;;  %v1148_v57 = vld [vmem:[%s4875_s6 + $0x1b50] sm:$0xff]  ;;  %v1146_v1 = vld [vmem:[%s4875_s6 + $0x1b40] sm:$0xff]  ;;  %v2244_v44 = vpop.f32.mrf.mxu1 }
 0x116   : > { %2737 = vmatpush.msra.mxu2 %v1116_v49  ;;  %2756 = vmatpush.msra.mxu3 %v1150_v51  ;;  %v1048_v58 = vld [vmem:[%s4875_s6 + $0x1830] sm:$0xff]  ;;  %v1046_v2 = vld [vmem:[%s4875_s6 + $0x1820] sm:$0xff] }
 0x117   : > { %2698 = vmatpush.msra.mxu0 %v1050_v54  ;;  %2717 = vmatpush.msra.mxu1 %v1084_v55  ;;  %v1112_v60 = vld [vmem:[%s4875_s6 + $0x1a30] sm:$0xff]  ;;  %v1110_v4 = vld [vmem:[%s4875_s6 + $0x1a20] sm:$0xff] }
 0x118   : > { %2738 = vmatpush.msra.mxu2 %v1114_v56  ;;  %2757 = vmatpush.msra.mxu3 %v1148_v57  ;;  %v1080_v3 = vld [vmem:[%s4875_s6 + $0x1930] sm:$0xff]  ;;  %v1078_v7 = vld [vmem:[%s4875_s6 + $0x1920] sm:$0xff]  ;;  %v2224_v56 = vpop.f32.mrf.mxu0 }
 0x119   : > { %2699 = vmatpush.msra.mxu0 %v1048_v58  ;;  %2718 = vmatpush.msra.mxu1 %v1082_v59  ;;  %v1144_v5 = vld [vmem:[%s4875_s6 + $0x1b30] sm:$0xff]  ;;  %v1142_v12 = vld [vmem:[%s4875_s6 + $0x1b20] sm:$0xff]  ;;  %v2245_v59 = vadd.f32 %v2244_v44, %v2224_v56 }
 0x11a   : > { %2739 = vmatpush.msra.mxu2 %v1112_v60  ;;  %2758 = vmatpush.msra.mxu3 %v1146_v1  ;;  %v1044_v6 = vld [vmem:[%s4875_s6 + $0x1810] sm:$0xff]  ;;  %v1042_v13 = vld [vmem:[%s4875_s6 + $0x1800] sm:$0xff] }
 0x11b   : > { %v267_v8 = vld [vmem:[%s4898_s27 + $0x38] sm:$0xff]  ;;  %2700 = vmatpush.msra.mxu0 %v1046_v2  ;;  %2719 = vmatpush.msra.mxu1 %v1080_v3  ;;  %v1106_v17 = vld [vmem:[%s4875_s6 + $0x1a00] sm:$0xff]  ;;  %v5427_v19 = vld.sshfl [vmem:[#allocation1] sm:$0xff pattern:$0x73625140]  ;;  %v2264_v2 = vpop.f32.mrf.mxu2 }
 0x11c   : > { %v1108_v11 = vld [vmem:[%s4875_s6 + $0x1a10] sm:$0xff]  ;;  %2112 = vst [vmem:[#allocation1 + $0x20] ss:$4 sm:$0xff] %v267_v8  ;;  %2740 = vmatpush.msra.mxu2 %v1110_v4  ;;  %2759 = vmatpush.msra.mxu3 %v1144_v5  ;;  %v5429_v20 = vld.sshfl [vmem:[#allocation1 + $0x10] sm:$0xff pattern:$0x73625140] }
 0x11d   : > { %v1076_v14 = vld [vmem:[%s4875_s6 + $0x1910] sm:$0xff]  ;;  %2701 = vmatpush.msra.mxu0 %v1044_v6  ;;  %2720 = vmatpush.msra.mxu1 %v1078_v7  ;;  %v1074_v23 = vld [vmem:[%s4875_s6 + $0x1900] sm:$0xff]  ;;  %v2324_v56 = vpop.f32.mrf.mxu1 }
 0x11e   : > { %v1140_v18 = vld [vmem:[%s4875_s6 + $0x1b10] sm:$0xff]  ;;  %2741 = vmatpush.msra.mxu2 %v1108_v11  ;;  %2760 = vmatpush.msra.mxu3 %v1142_v12  ;;  %v1138_v24 = vld [vmem:[%s4875_s6 + $0x1b00] sm:$0xff]  ;;  %v2265_v11 = vadd.f32 %v2264_v2, %v2245_v59 }
 0x11f   : > { %2702 = vmatpush.msra.mxu0 %v1042_v13  ;;  %2721 = vmatpush.msra.mxu1 %v1076_v14  ;;  %v1200_v21 = vld [vmem:[%s4875_s6 + $0x1cf0] sm:$0xff]  ;;  %v5437_v25 = vld.sshfl [vmem:[#allocation1 + $0x8] sm:$0xff pattern:$0x73625140]  ;;  %v2284_v14 = vpop.f32.mrf.mxu3 }
 0x120   : > { %v1264_v22 = vld [vmem:[%s4875_s6 + $0x1ef0] sm:$0xff]  ;;  %2742 = vmatpush.msra.mxu2 %v1106_v17  ;;  %2761 = vmatpush.msra.mxu3 %v1140_v18  ;;  %v1198_v30 = vld [vmem:[%s4875_s6 + $0x1ce0] sm:$0xff] }
 0x121   : > { %2703 = vmatmul.f32.vlgmr.msra.gmra.mxu0 %v5427_v19  ;;  %2743 = vmatmul.f32.vlgmr.msra.gmra.mxu2 %v5429_v20  ;;  %v5439_v29 = vld.sshfl [vmem:[#allocation1 + $0x18] sm:$0xff pattern:$0x73625140]  ;;  %v1262_v33 = vld [vmem:[%s4875_s6 + $0x1ee0] sm:$0xff] }
 0x122   : > { %2767 = vmatpush.msrb.mxu0 %v1200_v21  ;;  %2807 = vmatpush.msrb.mxu2 %v1264_v22  ;;  %v1232_v32 = vld [vmem:[%s4875_s6 + $0x1df0] sm:$0xff]  ;;  %v1230_v36 = vld [vmem:[%s4875_s6 + $0x1de0] sm:$0xff] }
 0x123   : > { %2722 = vmatpush.msra.mxu1 %v1074_v23  ;;  %2762 = vmatpush.msra.mxu3 %v1138_v24  ;;  %v1296_v34 = vld [vmem:[%s4875_s6 + $0x1ff0] sm:$0xff]  ;;  %v1294_v40 = vld [vmem:[%s4875_s6 + $0x1fe0] sm:$0xff] }
 0x124   : > { %2723 = vmatmul.f32.vlgmr.msra.gmra.mxu1 %v5437_v25  ;;  %2763 = vmatmul.f32.vlgmr.msra.gmra.mxu3 %v5439_v29  ;;  %v1196_v35 = vld [vmem:[%s4875_s6 + $0x1cd0] sm:$0xff]  ;;  %v1194_v49 = vld [vmem:[%s4875_s6 + $0x1cc0] sm:$0xff] }
 0x125   : > { %2768 = vmatpush.msrb.mxu0 %v1198_v30  ;;  %2787 = vmatpush.msrb.mxu1 %v1232_v32  ;;  %v1260_v37 = vld [vmem:[%s4875_s6 + $0x1ed0] sm:$0xff]  ;;  %v1258_v54 = vld [vmem:[%s4875_s6 + $0x1ec0] sm:$0xff]  ;;  %v2285_v30 = vadd.f32 %v2284_v14, %v2265_v11 }
 0x126   : > { %2808 = vmatpush.msrb.mxu2 %v1262_v33  ;;  %2827 = vmatpush.msrb.mxu3 %v1296_v34  ;;  %v1228_v51 = vld [vmem:[%s4875_s6 + $0x1dd0] sm:$0xff]  ;;  %v1226_v58 = vld [vmem:[%s4875_s6 + $0x1dc0] sm:$0xff]  ;;  %v2304_v34 = vpop.f32.mrf.mxu0 }
 0x127   : > { %2769 = vmatpush.msrb.mxu0 %v1196_v35  ;;  %2788 = vmatpush.msrb.mxu1 %v1230_v36  ;;  %v1292_v55 = vld [vmem:[%s4875_s6 + $0x1fd0] sm:$0xff]  ;;  %v1290_v1 = vld [vmem:[%s4875_s6 + $0x1fc0] sm:$0xff] }
 0x128   : > { %2809 = vmatpush.msrb.mxu2 %v1260_v37  ;;  %2828 = vmatpush.msrb.mxu3 %v1294_v40  ;;  %v1192_v57 = vld [vmem:[%s4875_s6 + $0x1cb0] sm:$0xff]  ;;  %v1190_v3 = vld [vmem:[%s4875_s6 + $0x1ca0] sm:$0xff] }
 0x129   : > { %2770 = vmatpush.msrb.mxu0 %v1194_v49  ;;  %2789 = vmatpush.msrb.mxu1 %v1228_v51  ;;  %v1256_v60 = vld [vmem:[%s4875_s6 + $0x1eb0] sm:$0xff]  ;;  %v1254_v5 = vld [vmem:[%s4875_s6 + $0x1ea0] sm:$0xff]  ;;  %v2305_v51 = vadd.f32 %v2304_v34, %v2285_v30 }
 0x12a   : > { %2810 = vmatpush.msrb.mxu2 %v1258_v54  ;;  %2829 = vmatpush.msrb.mxu3 %v1292_v55  ;;  %v1224_v4 = vld [vmem:[%s4875_s6 + $0x1db0] sm:$0xff]  ;;  %v1222_v8 = vld [vmem:[%s4875_s6 + $0x1da0] sm:$0xff] }
 0x12b   : > { %2771 = vmatpush.msrb.mxu0 %v1192_v57  ;;  %2790 = vmatpush.msrb.mxu1 %v1226_v58  ;;  %v1288_v6 = vld [vmem:[%s4875_s6 + $0x1fb0] sm:$0xff]  ;;  %v1286_v13 = vld [vmem:[%s4875_s6 + $0x1fa0] sm:$0xff] }
 0x12c   : > { %2811 = vmatpush.msrb.mxu2 %v1256_v60  ;;  %2830 = vmatpush.msrb.mxu3 %v1290_v1  ;;  %v1188_v7 = vld [vmem:[%s4875_s6 + $0x1c90] sm:$0xff]  ;;  %v1186_v17 = vld [vmem:[%s4875_s6 + $0x1c80] sm:$0xff] }
 0x12d   : > { %2772 = vmatpush.msrb.mxu0 %v1190_v3  ;;  %2791 = vmatpush.msrb.mxu1 %v1224_v4  ;;  %v1252_v12 = vld [vmem:[%s4875_s6 + $0x1e90] sm:$0xff]  ;;  %v1250_v21 = vld [vmem:[%s4875_s6 + $0x1e80] sm:$0xff]  ;;  %v2325_v3 = vadd.f32 %v2324_v56, %v2305_v51 }
 0x12e   : > { %2812 = vmatpush.msrb.mxu2 %v1254_v5  ;;  %2831 = vmatpush.msrb.mxu3 %v1288_v6  ;;  %v1220_v18 = vld [vmem:[%s4875_s6 + $0x1d90] sm:$0xff]  ;;  %v1218_v24 = vld [vmem:[%s4875_s6 + $0x1d80] sm:$0xff]  ;;  %v2344_v6 = vpop.f32.mrf.mxu2  ;;  %v2384_v34 = vpop.f32.mrf.mxu0 }
 0x12f   : > { %2773 = vmatpush.msrb.mxu0 %v1188_v7  ;;  %2792 = vmatpush.msrb.mxu1 %v1222_v8  ;;  %v1284_v22 = vld [vmem:[%s4875_s6 + $0x1f90] sm:$0xff]  ;;  %v1282_v33 = vld [vmem:[%s4875_s6 + $0x1f80] sm:$0xff] }
 0x130   : > { %2813 = vmatpush.msrb.mxu2 %v1252_v12  ;;  %2832 = vmatpush.msrb.mxu3 %v1286_v13  ;;  %v1184_v23 = vld [vmem:[%s4875_s6 + $0x1c70] sm:$0xff]  ;;  %v1182_v35 = vld [vmem:[%s4875_s6 + $0x1c60] sm:$0xff] }
 0x131   : > { %2774 = vmatpush.msrb.mxu0 %v1186_v17  ;;  %2793 = vmatpush.msrb.mxu1 %v1220_v18  ;;  %v1248_v32 = vld [vmem:[%s4875_s6 + $0x1e70] sm:$0xff]  ;;  %v1246_v37 = vld [vmem:[%s4875_s6 + $0x1e60] sm:$0xff]  ;;  %v2345_v18 = vadd.f32 %v2344_v6, %v2325_v3 }
 0x132   : > { %2814 = vmatpush.msrb.mxu2 %v1250_v21  ;;  %2833 = vmatpush.msrb.mxu3 %v1284_v22  ;;  %v1216_v36 = vld [vmem:[%s4875_s6 + $0x1d70] sm:$0xff]  ;;  %v1214_v49 = vld [vmem:[%s4875_s6 + $0x1d60] sm:$0xff] }
 0x133   : > { %2775 = vmatpush.msrb.mxu0 %v1184_v23  ;;  %2794 = vmatpush.msrb.mxu1 %v1218_v24  ;;  %v1280_v40 = vld [vmem:[%s4875_s6 + $0x1f70] sm:$0xff]  ;;  %v1278_v55 = vld [vmem:[%s4875_s6 + $0x1f60] sm:$0xff]  ;;  %v2364_v23 = vpop.f32.mrf.mxu3 }
 0x134   : > { %2815 = vmatpush.msrb.mxu2 %v1248_v32  ;;  %2834 = vmatpush.msrb.mxu3 %v1282_v33  ;;  %v1180_v44 = vld [vmem:[%s4875_s6 + $0x1c50] sm:$0xff]  ;;  %v1178_v57 = vld [vmem:[%s4875_s6 + $0x1c40] sm:$0xff] }
 0x135   : > { %2776 = vmatpush.msrb.mxu0 %v1182_v35  ;;  %2795 = vmatpush.msrb.mxu1 %v1216_v36  ;;  %v1244_v54 = vld [vmem:[%s4875_s6 + $0x1e50] sm:$0xff]  ;;  %v1242_v59 = vld [vmem:[%s4875_s6 + $0x1e40] sm:$0xff] }
 0x136   : > { %2816 = vmatpush.msrb.mxu2 %v1246_v37  ;;  %2835 = vmatpush.msrb.mxu3 %v1280_v40  ;;  %v1212_v58 = vld [vmem:[%s4875_s6 + $0x1d50] sm:$0xff]  ;;  %v1210_v2 = vld [vmem:[%s4875_s6 + $0x1d40] sm:$0xff]  ;;  %v2365_v37 = vadd.f32 %v2364_v23, %v2345_v18 }
 0x137   : > { %2777 = vmatpush.msrb.mxu0 %v1180_v44  ;;  %2796 = vmatpush.msrb.mxu1 %v1214_v49  ;;  %v1276_v60 = vld [vmem:[%s4875_s6 + $0x1f50] sm:$0xff]  ;;  %v1274_v5 = vld [vmem:[%s4875_s6 + $0x1f40] sm:$0xff] }
 0x138   : > { %2817 = vmatpush.msrb.mxu2 %v1244_v54  ;;  %2836 = vmatpush.msrb.mxu3 %v1278_v55  ;;  %v1176_v1 = vld [vmem:[%s4875_s6 + $0x1c30] sm:$0xff]  ;;  %v1174_v7 = vld [vmem:[%s4875_s6 + $0x1c20] sm:$0xff]  ;;  %v2385_v54 = vadd.f32 %v2384_v34, %v2365_v37 }
 0x139   : > { %2778 = vmatpush.msrb.mxu0 %v1178_v57  ;;  %2797 = vmatpush.msrb.mxu1 %v1212_v58  ;;  %v1240_v4 = vld [vmem:[%s4875_s6 + $0x1e30] sm:$0xff]  ;;  %v1238_v11 = vld [vmem:[%s4875_s6 + $0x1e20] sm:$0xff]  ;;  %v2404_v57 = vpop.f32.mrf.mxu1 }
 0x13a   : > { %2818 = vmatpush.msrb.mxu2 %v1242_v59  ;;  %2837 = vmatpush.msrb.mxu3 %v1276_v60  ;;  %v1208_v8 = vld [vmem:[%s4875_s6 + $0x1d30] sm:$0xff]  ;;  %v1206_v14 = vld [vmem:[%s4875_s6 + $0x1d20] sm:$0xff] }
 0x13b   : > { %2779 = vmatpush.msrb.mxu0 %v1176_v1  ;;  %2798 = vmatpush.msrb.mxu1 %v1210_v2  ;;  %v1272_v12 = vld [vmem:[%s4875_s6 + $0x1f30] sm:$0xff]  ;;  %v1270_v22 = vld [vmem:[%s4875_s6 + $0x1f20] sm:$0xff]  ;;  %v2424_v2 = vpop.f32.mrf.mxu2 }
 0x13c   : > { %2819 = vmatpush.msrb.mxu2 %v1240_v4  ;;  %2838 = vmatpush.msrb.mxu3 %v1274_v5  ;;  %v1172_v13 = vld [vmem:[%s4875_s6 + $0x1c10] sm:$0xff]  ;;  %v1170_v24 = vld [vmem:[%s4875_s6 + $0x1c00] sm:$0xff]  ;;  %v2405_v5 = vadd.f32 %v2404_v57, %v2385_v54 }
 0x13d   : > { %v268_v17 = vld [vmem:[%s4898_s27 + $0x40] sm:$0xff]  ;;  %2780 = vmatpush.msrb.mxu0 %v1174_v7  ;;  %2799 = vmatpush.msrb.mxu1 %v1208_v8  ;;  %v1234_v32 = vld [vmem:[%s4875_s6 + $0x1e00] sm:$0xff]  ;;  %v5516_v56 = vld.sshfl [vmem:[#allocation1 + $0x38] sm:$0xff pattern:$0x73625140] }
 0x13e   : > { %v1236_v21 = vld [vmem:[%s4875_s6 + $0x1e10] sm:$0xff]  ;;  %2121 = vst [vmem:[#allocation1] ss:$4 sm:$0xff] %v268_v17  ;;  %2820 = vmatpush.msrb.mxu2 %v1238_v11  ;;  %2839 = vmatpush.msrb.mxu3 %v1272_v12  ;;  %v5506_v36 = vld.sshfl [vmem:[#allocation1 + $0x30] sm:$0xff pattern:$0x73625140]  ;;  %v2425_v12 = vadd.f32 %v2424_v2, %v2405_v5  ;;  %v2444_v17 = vpop.f32.mrf.mxu3 }
 0x13f   : > { %v1204_v30 = vld [vmem:[%s4875_s6 + $0x1d10] sm:$0xff]  ;;  %2781 = vmatpush.msrb.mxu0 %v1172_v13  ;;  %2800 = vmatpush.msrb.mxu1 %v1206_v14  ;;  %v1202_v49 = vld [vmem:[%s4875_s6 + $0x1d00] sm:$0xff] }
 0x140   : > { %v1268_v33 = vld [vmem:[%s4875_s6 + $0x1f10] sm:$0xff]  ;;  %2821 = vmatpush.msrb.mxu2 %v1236_v21  ;;  %2840 = vmatpush.msrb.mxu3 %v1270_v22  ;;  %v1266_v51 = vld [vmem:[%s4875_s6 + $0x1f00] sm:$0xff] }
 0x141   : > { %v5504_v35 = vld.sshfl [vmem:[#allocation1 + $0x20] sm:$0xff pattern:$0x73625140]  ;;  %2782 = vmatpush.msrb.mxu0 %v1170_v24  ;;  %2801 = vmatpush.msrb.mxu1 %v1204_v30  ;;  %v5514_v55 = vld.sshfl [vmem:[#allocation1 + $0x28] sm:$0xff pattern:$0x73625140]  ;;  %v2464_v24 = vpop.f32.mrf.mxu0  ;;  %v2484_v57 = vpop.f32.mrf.mxu1 }
 0x142   : > { %v1328_v40 = vld [vmem:[%s4875_s6 + $0x20f0] sm:$0xff]  ;;  %2822 = vmatpush.msrb.mxu2 %v1234_v32  ;;  %2841 = vmatpush.msrb.mxu3 %v1268_v33  ;;  %v1326_v58 = vld [vmem:[%s4875_s6 + $0x20e0] sm:$0xff]  ;;  %v2445_v33 = vadd.f32 %v2444_v17, %v2425_v12 }
 0x143   : > { %v1392_v44 = vld [vmem:[%s4875_s6 + $0x22f0] sm:$0xff]  ;;  %2783 = vmatmul.f32.vlgmr.msrb.gmra.mxu0 %v5504_v35  ;;  %2823 = vmatmul.f32.vlgmr.msrb.gmra.mxu2 %v5506_v36  ;;  %v1390_v60 = vld [vmem:[%s4875_s6 + $0x22e0] sm:$0xff]  ;;  %v2504_v2 = vpop.f32.mrf.mxu2 }
 0x144   : > { %2847 = vmatpush.msra.mxu0 %v1328_v40  ;;  %2887 = vmatpush.msra.mxu2 %v1392_v44  ;;  %v1360_v59 = vld [vmem:[%s4875_s6 + $0x21f0] sm:$0xff]  ;;  %v1358_v4 = vld [vmem:[%s4875_s6 + $0x21e0] sm:$0xff] }
 0x145   : > { %2802 = vmatpush.msrb.mxu1 %v1202_v49  ;;  %2842 = vmatpush.msrb.mxu3 %v1266_v51  ;;  %v1424_v1 = vld [vmem:[%s4875_s6 + $0x23f0] sm:$0xff]  ;;  %v1422_v7 = vld [vmem:[%s4875_s6 + $0x23e0] sm:$0xff]  ;;  %v2465_v49 = vadd.f32 %v2464_v24, %v2445_v33 }
 0x146   : > { %2803 = vmatmul.f32.vlgmr.msrb.gmra.mxu1 %v5514_v55  ;;  %2843 = vmatmul.f32.vlgmr.msrb.gmra.mxu3 %v5516_v56  ;;  %v1324_v3 = vld [vmem:[%s4875_s6 + $0x20d0] sm:$0xff]  ;;  %v1322_v8 = vld [vmem:[%s4875_s6 + $0x20c0] sm:$0xff]  ;;  %v2524_v17 = vpop.f32.mrf.mxu3 }
 0x147   : > { %2848 = vmatpush.msra.mxu0 %v1326_v58  ;;  %2867 = vmatpush.msra.mxu1 %v1360_v59  ;;  %v1388_v6 = vld [vmem:[%s4875_s6 + $0x22d0] sm:$0xff]  ;;  %v1386_v13 = vld [vmem:[%s4875_s6 + $0x22c0] sm:$0xff]  ;;  %v2485_v5 = vadd.f32 %v2484_v57, %v2465_v49 }
 0x148   : > { %2888 = vmatpush.msra.mxu2 %v1390_v60  ;;  %2907 = vmatpush.msra.mxu3 %v1424_v1  ;;  %v1356_v11 = vld [vmem:[%s4875_s6 + $0x21d0] sm:$0xff]  ;;  %v1354_v21 = vld [vmem:[%s4875_s6 + $0x21c0] sm:$0xff] }
 0x149   : > { %2849 = vmatpush.msra.mxu0 %v1324_v3  ;;  %2868 = vmatpush.msra.mxu1 %v1358_v4  ;;  %v1420_v14 = vld [vmem:[%s4875_s6 + $0x23d0] sm:$0xff]  ;;  %v1418_v23 = vld [vmem:[%s4875_s6 + $0x23c0] sm:$0xff]  ;;  %v2505_v12 = vadd.f32 %v2504_v2, %v2485_v5 }
 0x14a   : > { %2889 = vmatpush.msra.mxu2 %v1388_v6  ;;  %2908 = vmatpush.msra.mxu3 %v1422_v7  ;;  %v1320_v18 = vld [vmem:[%s4875_s6 + $0x20b0] sm:$0xff]  ;;  %v1318_v30 = vld [vmem:[%s4875_s6 + $0x20a0] sm:$0xff] }
 0x14b   : > { %2850 = vmatpush.msra.mxu0 %v1322_v8  ;;  %2869 = vmatpush.msra.mxu1 %v1356_v11  ;;  %v1384_v22 = vld [vmem:[%s4875_s6 + $0x22b0] sm:$0xff]  ;;  %v1382_v34 = vld [vmem:[%s4875_s6 + $0x22a0] sm:$0xff] }
 0x14c   : > { %2890 = vmatpush.msra.mxu2 %v1386_v13  ;;  %2909 = vmatpush.msra.mxu3 %v1420_v14  ;;  %v1352_v32 = vld [vmem:[%s4875_s6 + $0x21b0] sm:$0xff]  ;;  %v1350_v44 = vld [vmem:[%s4875_s6 + $0x21a0] sm:$0xff] }
 0x14d   : > { %2851 = vmatpush.msra.mxu0 %v1320_v18  ;;  %2870 = vmatpush.msra.mxu1 %v1354_v21  ;;  %v1416_v37 = vld [vmem:[%s4875_s6 + $0x23b0] sm:$0xff]  ;;  %v1414_v54 = vld [vmem:[%s4875_s6 + $0x23a0] sm:$0xff] }
 0x14e   : > { %2891 = vmatpush.msra.mxu2 %v1384_v22  ;;  %2910 = vmatpush.msra.mxu3 %v1418_v23  ;;  %v1316_v40 = vld [vmem:[%s4875_s6 + $0x2090] sm:$0xff]  ;;  %v1314_v58 = vld [vmem:[%s4875_s6 + $0x2080] sm:$0xff] }
 0x14f   : > { %2852 = vmatpush.msra.mxu0 %v1318_v30  ;;  %2871 = vmatpush.msra.mxu1 %v1352_v32  ;;  %v1380_v51 = vld [vmem:[%s4875_s6 + $0x2290] sm:$0xff]  ;;  %v1378_v60 = vld [vmem:[%s4875_s6 + $0x2280] sm:$0xff]  ;;  %v2525_v32 = vadd.f32 %v2524_v17, %v2505_v12 }
 0x150   : > { %2892 = vmatpush.msra.mxu2 %v1382_v34  ;;  %2911 = vmatpush.msra.mxu3 %v1416_v37  ;;  %v1348_v59 = vld [vmem:[%s4875_s6 + $0x2190] sm:$0xff]  ;;  %v1346_v4 = vld [vmem:[%s4875_s6 + $0x2180] sm:$0xff] }
 0x151   : > { %2853 = vmatpush.msra.mxu0 %v1316_v40  ;;  %2872 = vmatpush.msra.mxu1 %v1350_v44  ;;  %v1412_v1 = vld [vmem:[%s4875_s6 + $0x2390] sm:$0xff]  ;;  %v1410_v7 = vld [vmem:[%s4875_s6 + $0x2380] sm:$0xff] }
 0x152   : > { %2893 = vmatpush.msra.mxu2 %v1380_v51  ;;  %2912 = vmatpush.msra.mxu3 %v1414_v54  ;;  %v1312_v3 = vld [vmem:[%s4875_s6 + $0x2070] sm:$0xff]  ;;  %v1310_v8 = vld [vmem:[%s4875_s6 + $0x2060] sm:$0xff] }
 0x153   : > { %2854 = vmatpush.msra.mxu0 %v1314_v58  ;;  %2873 = vmatpush.msra.mxu1 %v1348_v59  ;;  %v1376_v6 = vld [vmem:[%s4875_s6 + $0x2270] sm:$0xff]  ;;  %v1374_v13 = vld [vmem:[%s4875_s6 + $0x2260] sm:$0xff] }
 0x154   : > { %2894 = vmatpush.msra.mxu2 %v1378_v60  ;;  %2913 = vmatpush.msra.mxu3 %v1412_v1  ;;  %v1344_v11 = vld [vmem:[%s4875_s6 + $0x2170] sm:$0xff]  ;;  %v1342_v21 = vld [vmem:[%s4875_s6 + $0x2160] sm:$0xff] }
 0x155   : > { %2855 = vmatpush.msra.mxu0 %v1312_v3  ;;  %2874 = vmatpush.msra.mxu1 %v1346_v4  ;;  %v1408_v14 = vld [vmem:[%s4875_s6 + $0x2370] sm:$0xff]  ;;  %v1406_v23 = vld [vmem:[%s4875_s6 + $0x2360] sm:$0xff] }
 0x156   : > { %2895 = vmatpush.msra.mxu2 %v1376_v6  ;;  %2914 = vmatpush.msra.mxu3 %v1410_v7  ;;  %v1308_v18 = vld [vmem:[%s4875_s6 + $0x2050] sm:$0xff]  ;;  %v1306_v24 = vld [vmem:[%s4875_s6 + $0x2040] sm:$0xff] }
 0x157   : > { %2856 = vmatpush.msra.mxu0 %v1310_v8  ;;  %2875 = vmatpush.msra.mxu1 %v1344_v11  ;;  %v1372_v22 = vld [vmem:[%s4875_s6 + $0x2250] sm:$0xff]  ;;  %v1370_v33 = vld [vmem:[%s4875_s6 + $0x2240] sm:$0xff] }
 0x158   : > { %2896 = vmatpush.msra.mxu2 %v1374_v13  ;;  %2915 = vmatpush.msra.mxu3 %v1408_v14  ;;  %v1340_v30 = vld [vmem:[%s4875_s6 + $0x2150] sm:$0xff]  ;;  %v1338_v40 = vld [vmem:[%s4875_s6 + $0x2140] sm:$0xff] }
 0x159   : > { %2857 = vmatpush.msra.mxu0 %v1308_v18  ;;  %2876 = vmatpush.msra.mxu1 %v1342_v21  ;;  %v1404_v34 = vld [vmem:[%s4875_s6 + $0x2350] sm:$0xff]  ;;  %v1402_v51 = vld [vmem:[%s4875_s6 + $0x2340] sm:$0xff] }
 0x15a   : > { %2897 = vmatpush.msra.mxu2 %v1372_v22  ;;  %2916 = vmatpush.msra.mxu3 %v1406_v23  ;;  %v1304_v37 = vld [vmem:[%s4875_s6 + $0x2030] sm:$0xff]  ;;  %v2544_v44 = vpop.f32.mrf.mxu0  ;;  %v1302_v57 = vld [vmem:[%s4875_s6 + $0x2020] sm:$0xff] }
 0x15b   : > { %2858 = vmatpush.msra.mxu0 %v1306_v24  ;;  %2877 = vmatpush.msra.mxu1 %v1340_v30  ;;  %v1368_v49 = vld [vmem:[%s4875_s6 + $0x2230] sm:$0xff]  ;;  %v2545_v54 = vadd.f32 %v2544_v44, %v2525_v32  ;;  %v1366_v59 = vld [vmem:[%s4875_s6 + $0x2220] sm:$0xff] }
 0x15c   : > { %2898 = vmatpush.msra.mxu2 %v1370_v33  ;;  %2917 = vmatpush.msra.mxu3 %v1404_v34  ;;  %v1336_v58 = vld [vmem:[%s4875_s6 + $0x2130] sm:$0xff]  ;;  %v1334_v3 = vld [vmem:[%s4875_s6 + $0x2120] sm:$0xff] }
 0x15d   : > { %2859 = vmatpush.msra.mxu0 %v1304_v37  ;;  %2878 = vmatpush.msra.mxu1 %v1338_v40  ;;  %v1400_v60 = vld [vmem:[%s4875_s6 + $0x2330] sm:$0xff]  ;;  %v2564_v1 = vpop.f32.mrf.mxu1  ;;  %v269_v5 = vld [vmem:[%s4898_s27 + $0x48] sm:$0xff]  ;;  %v5583_v21 = vld.sshfl [vmem:[#allocation1 + $0x10] sm:$0xff pattern:$0x73625140] }
 0x15e   : > { %2899 = vmatpush.msra.mxu2 %v1368_v49  ;;  %2918 = vmatpush.msra.mxu3 %v1402_v51  ;;  %v1300_v2 = vld [vmem:[%s4875_s6 + $0x2010] sm:$0xff]  ;;  %v2565_v4 = vadd.f32 %v2564_v1, %v2545_v54  ;;  %v1398_v7 = vld [vmem:[%s4875_s6 + $0x2320] sm:$0xff]  ;;  %2122 = vst [vmem:[#allocation1 + $0x20] ss:$4 sm:$0xff] %v269_v5 }
 0x15f   : > { %2860 = vmatpush.msra.mxu0 %v1302_v57  ;;  %2879 = vmatpush.msra.mxu1 %v1336_v58  ;;  %v1364_v6 = vld [vmem:[%s4875_s6 + $0x2210] sm:$0xff]  ;;  %v1298_v8 = vld [vmem:[%s4875_s6 + $0x2000] sm:$0xff] }
 0x160   : > { %2900 = vmatpush.msra.mxu2 %v1366_v59  ;;  %2919 = vmatpush.msra.mxu3 %v1400_v60  ;;  %v1332_v11 = vld [vmem:[%s4875_s6 + $0x2110] sm:$0xff]  ;;  %v2584_v12 = vpop.f32.mrf.mxu2  ;;  %v1362_v13 = vld [vmem:[%s4875_s6 + $0x2200] sm:$0xff] }
 0x161   : > { %2861 = vmatpush.msra.mxu0 %v1300_v2  ;;  %2880 = vmatpush.msra.mxu1 %v1334_v3  ;;  %v1396_v14 = vld [vmem:[%s4875_s6 + $0x2310] sm:$0xff]  ;;  %v2585_v17 = vadd.f32 %v2584_v12, %v2565_v4  ;;  %v1330_v30 = vld [vmem:[%s4875_s6 + $0x2100] sm:$0xff] }
 0x162   : > { %2901 = vmatpush.msra.mxu2 %v1364_v6  ;;  %2920 = vmatpush.msra.mxu3 %v1398_v7  ;;  %v5581_v18 = vld.sshfl [vmem:[#allocation1] sm:$0xff pattern:$0x73625140]  ;;  %v1394_v32 = vld [vmem:[%s4875_s6 + $0x2300] sm:$0xff] }
 0x163   : > { %2862 = vmatpush.msra.mxu0 %v1298_v8  ;;  %2881 = vmatpush.msra.mxu1 %v1332_v11  ;;  %v1456_v22 = vld [vmem:[%s4875_s6 + $0x24f0] sm:$0xff]  ;;  %v2604_v24 = vpop.f32.mrf.mxu3  ;;  %v5593_v34 = vld.sshfl [vmem:[#allocation1 + $0x8] sm:$0xff pattern:$0x73625140] }
 0x164   : > { %v1520_v23 = vld [vmem:[%s4875_s6 + $0x26f0] sm:$0xff]  ;;  %2902 = vmatpush.msra.mxu2 %v1362_v13  ;;  %2921 = vmatpush.msra.mxu3 %v1396_v14  ;;  %v5589_v33 = vadd.f32 %v2604_v24, %v2585_v17  ;;  %v1454_v40 = vld [vmem:[%s4875_s6 + $0x24e0] sm:$0xff] }
 0x165   : > { %2863 = vmatmul.f32.vlgmr.msra.gmra.mxu0 %v5581_v18  ;;  %2903 = vmatmul.f32.vlgmr.msra.gmra.mxu2 %v5583_v21  ;;  %v5595_v37 = vld.sshfl [vmem:[#allocation1 + $0x18] sm:$0xff pattern:$0x73625140]  ;;  %v1518_v49 = vld [vmem:[%s4875_s6 + $0x26e0] sm:$0xff] }
 0x166   : > { %2927 = vmatpush.msrb.mxu0 %v1456_v22  ;;  %2967 = vmatpush.msrb.mxu2 %v1520_v23  ;;  %v1488_v44 = vld [vmem:[%s4875_s6 + $0x25f0] sm:$0xff]  ;;  %v1486_v57 = vld [vmem:[%s4875_s6 + $0x25e0] sm:$0xff] }
 0x167   : > { %2882 = vmatpush.msra.mxu1 %v1330_v30  ;;  %2922 = vmatpush.msra.mxu3 %v1394_v32  ;;  %v1552_v51 = vld [vmem:[%s4875_s6 + $0x27f0] sm:$0xff]  ;;  %v1550_v59 = vld [vmem:[%s4875_s6 + $0x27e0] sm:$0xff] }
 0x168   : > { %2883 = vmatmul.f32.vlgmr.msra.gmra.mxu1 %v5593_v34  ;;  %2923 = vmatmul.f32.vlgmr.msra.gmra.mxu3 %v5595_v37  ;;  %v1452_v54 = vld [vmem:[%s4875_s6 + $0x24d0] sm:$0xff]  ;;  %v1450_v60 = vld [vmem:[%s4875_s6 + $0x24c0] sm:$0xff] }
 0x169   : > { %2928 = vmatpush.msrb.mxu0 %v1454_v40  ;;  %2947 = vmatpush.msrb.mxu1 %v1488_v44  ;;  %v1516_v58 = vld [vmem:[%s4875_s6 + $0x26d0] sm:$0xff]  ;;  %v1514_v2 = vld [vmem:[%s4875_s6 + $0x26c0] sm:$0xff] }
 0x16a   : > { %2968 = vmatpush.msrb.mxu2 %v1518_v49  ;;  %2987 = vmatpush.msrb.mxu3 %v1552_v51  ;;  %v1484_v1 = vld [vmem:[%s4875_s6 + $0x25d0] sm:$0xff]  ;;  %v1482_v5 = vld [vmem:[%s4875_s6 + $0x25c0] sm:$0xff] }
 0x16b   : > { %2929 = vmatpush.msrb.mxu0 %v1452_v54  ;;  %2948 = vmatpush.msrb.mxu1 %v1486_v57  ;;  %v1548_v3 = vld [vmem:[%s4875_s6 + $0x27d0] sm:$0xff]  ;;  %v1546_v7 = vld [vmem:[%s4875_s6 + $0x27c0] sm:$0xff] }
 0x16c   : > { %2969 = vmatpush.msrb.mxu2 %v1516_v58  ;;  %2988 = vmatpush.msrb.mxu3 %v1550_v59  ;;  %v1448_v4 = vld [vmem:[%s4875_s6 + $0x24b0] sm:$0xff]  ;;  %v1446_v8 = vld [vmem:[%s4875_s6 + $0x24a0] sm:$0xff] }
 0x16d   : > { %2930 = vmatpush.msrb.mxu0 %v1450_v60  ;;  %2949 = vmatpush.msrb.mxu1 %v1484_v1  ;;  %v1512_v6 = vld [vmem:[%s4875_s6 + $0x26b0] sm:$0xff]  ;;  %v1510_v12 = vld [vmem:[%s4875_s6 + $0x26a0] sm:$0xff] }
 0x16e   : > { %2970 = vmatpush.msrb.mxu2 %v1514_v2  ;;  %2989 = vmatpush.msrb.mxu3 %v1548_v3  ;;  %v1480_v11 = vld [vmem:[%s4875_s6 + $0x25b0] sm:$0xff]  ;;  %v1478_v17 = vld [vmem:[%s4875_s6 + $0x25a0] sm:$0xff] }
 0x16f   : > { %2931 = vmatpush.msrb.mxu0 %v1448_v4  ;;  %2950 = vmatpush.msrb.mxu1 %v1482_v5  ;;  %v1544_v13 = vld [vmem:[%s4875_s6 + $0x27b0] sm:$0xff]  ;;  %v1542_v23 = vld [vmem:[%s4875_s6 + $0x27a0] sm:$0xff] }
 0x170   : > { %2971 = vmatpush.msrb.mxu2 %v1512_v6  ;;  %2990 = vmatpush.msrb.mxu3 %v1546_v7  ;;  %v1444_v14 = vld [vmem:[%s4875_s6 + $0x2490] sm:$0xff]  ;;  %v1442_v24 = vld [vmem:[%s4875_s6 + $0x2480] sm:$0xff] }
 0x171   : > { %2932 = vmatpush.msrb.mxu0 %v1446_v8  ;;  %2951 = vmatpush.msrb.mxu1 %v1480_v11  ;;  %v1508_v22 = vld [vmem:[%s4875_s6 + $0x2690] sm:$0xff]  ;;  %v1506_v32 = vld [vmem:[%s4875_s6 + $0x2680] sm:$0xff] }
 0x172   : > { %2972 = vmatpush.msrb.mxu2 %v1510_v12  ;;  %2991 = vmatpush.msrb.mxu3 %v1544_v13  ;;  %v1476_v30 = vld [vmem:[%s4875_s6 + $0x2590] sm:$0xff]  ;;  %v1474_v49 = vld [vmem:[%s4875_s6 + $0x2580] sm:$0xff] }
 0x173   : > { %2933 = vmatpush.msrb.mxu0 %v1444_v14  ;;  %2952 = vmatpush.msrb.mxu1 %v1478_v17  ;;  %v1540_v40 = vld [vmem:[%s4875_s6 + $0x2790] sm:$0xff]  ;;  %v1538_v54 = vld [vmem:[%s4875_s6 + $0x2780] sm:$0xff] }
 0x174   : > { %2973 = vmatpush.msrb.mxu2 %v1508_v22  ;;  %2992 = vmatpush.msrb.mxu3 %v1542_v23  ;;  %v1440_v44 = vld [vmem:[%s4875_s6 + $0x2470] sm:$0xff]  ;;  %v1438_v57 = vld [vmem:[%s4875_s6 + $0x2460] sm:$0xff] }
 0x175   : > { %2934 = vmatpush.msrb.mxu0 %v1442_v24  ;;  %2953 = vmatpush.msrb.mxu1 %v1476_v30  ;;  %v1504_v51 = vld [vmem:[%s4875_s6 + $0x2670] sm:$0xff]  ;;  %v1502_v59 = vld [vmem:[%s4875_s6 + $0x2660] sm:$0xff] }
 0x176   : > { %2974 = vmatpush.msrb.mxu2 %v1506_v32  ;;  %2993 = vmatpush.msrb.mxu3 %v1540_v40  ;;  %v1472_v58 = vld [vmem:[%s4875_s6 + $0x2570] sm:$0xff]  ;;  %v1470_v2 = vld [vmem:[%s4875_s6 + $0x2560] sm:$0xff] }
 0x177   : > { %2935 = vmatpush.msrb.mxu0 %v1440_v44  ;;  %2954 = vmatpush.msrb.mxu1 %v1474_v49  ;;  %v1536_v60 = vld [vmem:[%s4875_s6 + $0x2770] sm:$0xff]  ;;  %v1534_v4 = vld [vmem:[%s4875_s6 + $0x2760] sm:$0xff] }
 0x178   : > { %2975 = vmatpush.msrb.mxu2 %v1504_v51  ;;  %2994 = vmatpush.msrb.mxu3 %v1538_v54  ;;  %v1436_v1 = vld [vmem:[%s4875_s6 + $0x2450] sm:$0xff]  ;;  %v1434_v5 = vld [vmem:[%s4875_s6 + $0x2440] sm:$0xff] }
 0x179   : > { %2936 = vmatpush.msrb.mxu0 %v1438_v57  ;;  %2955 = vmatpush.msrb.mxu1 %v1472_v58  ;;  %v1500_v3 = vld [vmem:[%s4875_s6 + $0x2650] sm:$0xff]  ;;  %v1498_v7 = vld [vmem:[%s4875_s6 + $0x2640] sm:$0xff] }
 0x17a   : > { %2976 = vmatpush.msrb.mxu2 %v1502_v59  ;;  %2995 = vmatpush.msrb.mxu3 %v1536_v60  ;;  %v1468_v6 = vld [vmem:[%s4875_s6 + $0x2550] sm:$0xff]  ;;  %v1466_v12 = vld [vmem:[%s4875_s6 + $0x2540] sm:$0xff] }
 0x17b   : > { %2937 = vmatpush.msrb.mxu0 %v1436_v1  ;;  %2956 = vmatpush.msrb.mxu1 %v1470_v2  ;;  %v1532_v8 = vld [vmem:[%s4875_s6 + $0x2750] sm:$0xff]  ;;  %v1530_v17 = vld [vmem:[%s4875_s6 + $0x2740] sm:$0xff] }
 0x17c   : > { %2977 = vmatpush.msrb.mxu2 %v1500_v3  ;;  %2996 = vmatpush.msrb.mxu3 %v1534_v4  ;;  %v1432_v11 = vld [vmem:[%s4875_s6 + $0x2430] sm:$0xff]  ;;  %v2624_v13 = vpop.f32.mrf.mxu0  ;;  %v1430_v23 = vld [vmem:[%s4875_s6 + $0x2420] sm:$0xff] }
 0x17d   : > { %2938 = vmatpush.msrb.mxu0 %v1434_v5  ;;  %2957 = vmatpush.msrb.mxu1 %v1468_v6  ;;  %v1496_v14 = vld [vmem:[%s4875_s6 + $0x2630] sm:$0xff]  ;;  %v2625_v22 = vadd.f32 %v2624_v13, %v5589_v33  ;;  %v1494_v30 = vld [vmem:[%s4875_s6 + $0x2620] sm:$0xff] }
 0x17e   : > { %2978 = vmatpush.msrb.mxu2 %v1498_v7  ;;  %2997 = vmatpush.msrb.mxu3 %v1532_v8  ;;  %v1464_v24 = vld [vmem:[%s4875_s6 + $0x2530] sm:$0xff]  ;;  %v1462_v49 = vld [vmem:[%s4875_s6 + $0x2520] sm:$0xff] }
 0x17f   : > { %2939 = vmatpush.msrb.mxu0 %v1432_v11  ;;  %2958 = vmatpush.msrb.mxu1 %v1466_v12  ;;  %v1528_v32 = vld [vmem:[%s4875_s6 + $0x2730] sm:$0xff]  ;;  %v2644_v40 = vpop.f32.mrf.mxu1  ;;  %v270_v51 = vld [vmem:[%s4898_s27 + $0x50] sm:$0xff] }
 0x180   : > { %2979 = vmatpush.msrb.mxu2 %v1496_v14  ;;  %2998 = vmatpush.msrb.mxu3 %v1530_v17  ;;  %v1428_v44 = vld [vmem:[%s4875_s6 + $0x2410] sm:$0xff]  ;;  %v2645_v33 = vadd.f32 %v2644_v40, %v2625_v22  ;;  %v1526_v57 = vld [vmem:[%s4875_s6 + $0x2720] sm:$0xff]  ;;  %2131 = vst [vmem:[#allocation1] ss:$4 sm:$0xff] %v270_v51 }
 0x181   : > { %2940 = vmatpush.msrb.mxu0 %v1430_v23  ;;  %2959 = vmatpush.msrb.mxu1 %v1464_v24  ;;  %v1492_v54 = vld [vmem:[%s4875_s6 + $0x2610] sm:$0xff]  ;;  %v1426_v58 = vld [vmem:[%s4875_s6 + $0x2400] sm:$0xff] }
 0x182   : > { %2980 = vmatpush.msrb.mxu2 %v1494_v30  ;;  %2999 = vmatpush.msrb.mxu3 %v1528_v32  ;;  %v1460_v59 = vld [vmem:[%s4875_s6 + $0x2510] sm:$0xff]  ;;  %v2664_v60 = vpop.f32.mrf.mxu2  ;;  %v1490_v1 = vld [vmem:[%s4875_s6 + $0x2600] sm:$0xff] }
 0x183   : > { %2941 = vmatpush.msrb.mxu0 %v1428_v44  ;;  %2960 = vmatpush.msrb.mxu1 %v1462_v49  ;;  %v1524_v2 = vld [vmem:[%s4875_s6 + $0x2710] sm:$0xff]  ;;  %v2665_v3 = vadd.f32 %v2664_v60, %v2645_v33  ;;  %v5663_v5 = vld.sshfl [vmem:[#allocation1 + $0x30] sm:$0xff pattern:$0x73625140] }
 0x184   : > { %2981 = vmatpush.msrb.mxu2 %v1492_v54  ;;  %3000 = vmatpush.msrb.mxu3 %v1526_v57  ;;  %v5661_v4 = vld.sshfl [vmem:[#allocation1 + $0x20] sm:$0xff pattern:$0x73625140]  ;;  %v1458_v11 = vld [vmem:[%s4875_s6 + $0x2500] sm:$0xff] }
 0x185   : > { %2942 = vmatpush.msrb.mxu0 %v1426_v58  ;;  %2961 = vmatpush.msrb.mxu1 %v1460_v59  ;;  %v1584_v6 = vld [vmem:[%s4875_s6 + $0x28f0] sm:$0xff]  ;;  %v2684_v8 = vpop.f32.mrf.mxu3  ;;  %v1522_v12 = vld [vmem:[%s4875_s6 + $0x2700] sm:$0xff] }
 0x186   : > { %v1648_v7 = vld [vmem:[%s4875_s6 + $0x2af0] sm:$0xff]  ;;  %2982 = vmatpush.msrb.mxu2 %v1490_v1  ;;  %3001 = vmatpush.msrb.mxu3 %v1524_v2  ;;  %v5669_v13 = vadd.f32 %v2684_v8, %v2665_v3  ;;  %v5673_v14 = vld.sshfl [vmem:[#allocation1 + $0x28] sm:$0xff pattern:$0x73625140] }
 0x187   : > { %2943 = vmatmul.f32.vlgmr.msrb.gmra.mxu0 %v5661_v4  ;;  %2983 = vmatmul.f32.vlgmr.msrb.gmra.mxu2 %v5663_v5  ;;  %v5675_v17 = vld.sshfl [vmem:[#allocation1 + $0x38] sm:$0xff pattern:$0x73625140]  ;;  %v1582_v22 = vld [vmem:[%s4875_s6 + $0x28e0] sm:$0xff] }
 0x188   : > { %3007 = vmatpush.msra.mxu0 %v1584_v6  ;;  %3047 = vmatpush.msra.mxu2 %v1648_v7  ;;  %v1616_v23 = vld [vmem:[%s4875_s6 + $0x29f0] sm:$0xff]  ;;  %v1646_v24 = vld [vmem:[%s4875_s6 + $0x2ae0] sm:$0xff] }
 0x189   : > { %2962 = vmatpush.msrb.mxu1 %v1458_v11  ;;  %3002 = vmatpush.msrb.mxu3 %v1522_v12  ;;  %v1680_v30 = vld [vmem:[%s4875_s6 + $0x2bf0] sm:$0xff]  ;;  %v1614_v40 = vld [vmem:[%s4875_s6 + $0x29e0] sm:$0xff] }
 0x18a   : > { %2963 = vmatmul.f32.vlgmr.msrb.gmra.mxu1 %v5673_v14  ;;  %3003 = vmatmul.f32.vlgmr.msrb.gmra.mxu3 %v5675_v17  ;;  %v1580_v32 = vld [vmem:[%s4875_s6 + $0x28d0] sm:$0xff]  ;;  %v1678_v49 = vld [vmem:[%s4875_s6 + $0x2be0] sm:$0xff] }
 0x18b   : > { %3008 = vmatpush.msra.mxu0 %v1582_v22  ;;  %3027 = vmatpush.msra.mxu1 %v1616_v23  ;;  %v1644_v44 = vld [vmem:[%s4875_s6 + $0x2ad0] sm:$0xff]  ;;  %v1578_v33 = vld [vmem:[%s4875_s6 + $0x28c0] sm:$0xff] }
 0x18c   : > { %3048 = vmatpush.msra.mxu2 %v1646_v24  ;;  %3067 = vmatpush.msra.mxu3 %v1680_v30  ;;  %v1612_v51 = vld [vmem:[%s4875_s6 + $0x29d0] sm:$0xff]  ;;  %v1642_v54 = vld [vmem:[%s4875_s6 + $0x2ac0] sm:$0xff] }
 0x18d   : > { %3009 = vmatpush.msra.mxu0 %v1580_v32  ;;  %3028 = vmatpush.msra.mxu1 %v1614_v40  ;;  %v1676_v57 = vld [vmem:[%s4875_s6 + $0x2bd0] sm:$0xff]  ;;  %v1610_v59 = vld [vmem:[%s4875_s6 + $0x29c0] sm:$0xff] }
 0x18e   : > { %3049 = vmatpush.msra.mxu2 %v1644_v44  ;;  %3068 = vmatpush.msra.mxu3 %v1678_v49  ;;  %v1576_v58 = vld [vmem:[%s4875_s6 + $0x28b0] sm:$0xff]  ;;  %v1674_v1 = vld [vmem:[%s4875_s6 + $0x2bc0] sm:$0xff] }
 0x18f   : > { %3010 = vmatpush.msra.mxu0 %v1578_v33  ;;  %3029 = vmatpush.msra.mxu1 %v1612_v51  ;;  %v1640_v60 = vld [vmem:[%s4875_s6 + $0x2ab0] sm:$0xff]  ;;  %v1574_v2 = vld [vmem:[%s4875_s6 + $0x28a0] sm:$0xff] }
 0x190   : > { %3050 = vmatpush.msra.mxu2 %v1642_v54  ;;  %3069 = vmatpush.msra.mxu3 %v1676_v57  ;;  %v1608_v3 = vld [vmem:[%s4875_s6 + $0x29b0] sm:$0xff]  ;;  %v1638_v6 = vld [vmem:[%s4875_s6 + $0x2aa0] sm:$0xff] }
 0x191   : > { %3011 = vmatpush.msra.mxu0 %v1576_v58  ;;  %3030 = vmatpush.msra.mxu1 %v1610_v59  ;;  %v1672_v7 = vld [vmem:[%s4875_s6 + $0x2bb0] sm:$0xff]  ;;  %v1606_v11 = vld [vmem:[%s4875_s6 + $0x29a0] sm:$0xff] }
 0x192   : > { %3051 = vmatpush.msra.mxu2 %v1640_v60  ;;  %3070 = vmatpush.msra.mxu3 %v1674_v1  ;;  %v1572_v8 = vld [vmem:[%s4875_s6 + $0x2890] sm:$0xff]  ;;  %v1670_v22 = vld [vmem:[%s4875_s6 + $0x2ba0] sm:$0xff] }
 0x193   : > { %3012 = vmatpush.msra.mxu0 %v1574_v2  ;;  %3031 = vmatpush.msra.mxu1 %v1608_v3  ;;  %v1636_v12 = vld [vmem:[%s4875_s6 + $0x2a90] sm:$0xff]  ;;  %v1570_v23 = vld [vmem:[%s4875_s6 + $0x2880] sm:$0xff] }
 0x194   : > { %3052 = vmatpush.msra.mxu2 %v1638_v6  ;;  %3071 = vmatpush.msra.mxu3 %v1672_v7  ;;  %v1604_v24 = vld [vmem:[%s4875_s6 + $0x2990] sm:$0xff]  ;;  %v1634_v30 = vld [vmem:[%s4875_s6 + $0x2a80] sm:$0xff] }
 0x195   : > { %3013 = vmatpush.msra.mxu0 %v1572_v8  ;;  %3032 = vmatpush.msra.mxu1 %v1606_v11  ;;  %v1668_v32 = vld [vmem:[%s4875_s6 + $0x2b90] sm:$0xff]  ;;  %v1602_v44 = vld [vmem:[%s4875_s6 + $0x2980] sm:$0xff] }
 0x196   : > { %3053 = vmatpush.msra.mxu2 %v1636_v12  ;;  %3072 = vmatpush.msra.mxu3 %v1670_v22  ;;  %v1568_v40 = vld [vmem:[%s4875_s6 + $0x2870] sm:$0xff]  ;;  %v1666_v33 = vld [vmem:[%s4875_s6 + $0x2b80] sm:$0xff] }
 0x197   : > { %3014 = vmatpush.msra.mxu0 %v1570_v23  ;;  %3033 = vmatpush.msra.mxu1 %v1604_v24  ;;  %v1632_v49 = vld [vmem:[%s4875_s6 + $0x2a70] sm:$0xff]  ;;  %v1566_v51 = vld [vmem:[%s4875_s6 + $0x2860] sm:$0xff] }
 0x198   : > { %3054 = vmatpush.msra.mxu2 %v1634_v30  ;;  %3073 = vmatpush.msra.mxu3 %v1668_v32  ;;  %v1600_v54 = vld [vmem:[%s4875_s6 + $0x2970] sm:$0xff]  ;;  %v1630_v57 = vld [vmem:[%s4875_s6 + $0x2a60] sm:$0xff] }
 0x199   : > { %3015 = vmatpush.msra.mxu0 %v1568_v40  ;;  %3034 = vmatpush.msra.mxu1 %v1602_v44  ;;  %v1664_v58 = vld [vmem:[%s4875_s6 + $0x2b70] sm:$0xff]  ;;  %v1598_v60 = vld [vmem:[%s4875_s6 + $0x2960] sm:$0xff] }
 0x19a   : > { %3055 = vmatpush.msra.mxu2 %v1632_v49  ;;  %3074 = vmatpush.msra.mxu3 %v1666_v33  ;;  %v1564_v59 = vld [vmem:[%s4875_s6 + $0x2850] sm:$0xff]  ;;  %v1662_v2 = vld [vmem:[%s4875_s6 + $0x2b60] sm:$0xff] }
 0x19b   : > { %3016 = vmatpush.msra.mxu0 %v1566_v51  ;;  %3035 = vmatpush.msra.mxu1 %v1600_v54  ;;  %v1628_v1 = vld [vmem:[%s4875_s6 + $0x2a50] sm:$0xff]  ;;  %v1562_v3 = vld [vmem:[%s4875_s6 + $0x2840] sm:$0xff] }
 0x19c   : > { %3056 = vmatpush.msra.mxu2 %v1630_v57  ;;  %3075 = vmatpush.msra.mxu3 %v1664_v58  ;;  %v1596_v6 = vld [vmem:[%s4875_s6 + $0x2950] sm:$0xff]  ;;  %v1626_v7 = vld [vmem:[%s4875_s6 + $0x2a40] sm:$0xff] }
 0x19d   : > { %3017 = vmatpush.msra.mxu0 %v1564_v59  ;;  %3036 = vmatpush.msra.mxu1 %v1598_v60  ;;  %v1660_v8 = vld [vmem:[%s4875_s6 + $0x2b50] sm:$0xff]  ;;  %v1594_v12 = vld [vmem:[%s4875_s6 + $0x2940] sm:$0xff] }
 0x19e   : > { %3057 = vmatpush.msra.mxu2 %v1628_v1  ;;  %3076 = vmatpush.msra.mxu3 %v1662_v2  ;;  %v1560_v11 = vld [vmem:[%s4875_s6 + $0x2830] sm:$0xff]  ;;  %v2704_v22 = vpop.f32.mrf.mxu0  ;;  %v1658_v24 = vld [vmem:[%s4875_s6 + $0x2b40] sm:$0xff] }
 0x19f   : > { %3018 = vmatpush.msra.mxu0 %v1562_v3  ;;  %3037 = vmatpush.msra.mxu1 %v1596_v6  ;;  %v1624_v23 = vld [vmem:[%s4875_s6 + $0x2a30] sm:$0xff]  ;;  %v2705_v30 = vadd.f32 %v2704_v22, %v5669_v13  ;;  %v1558_v32 = vld [vmem:[%s4875_s6 + $0x2820] sm:$0xff] }
 0x1a0   : > { %3058 = vmatpush.msra.mxu2 %v1626_v7  ;;  %3077 = vmatpush.msra.mxu3 %v1660_v8  ;;  %v1592_v40 = vld [vmem:[%s4875_s6 + $0x2930] sm:$0xff]  ;;  %v1622_v44 = vld [vmem:[%s4875_s6 + $0x2a20] sm:$0xff] }
 0x1a1   : > { %3019 = vmatpush.msra.mxu0 %v1560_v11  ;;  %3038 = vmatpush.msra.mxu1 %v1594_v12  ;;  %v1656_v49 = vld [vmem:[%s4875_s6 + $0x2b30] sm:$0xff]  ;;  %v2724_v33 = vpop.f32.mrf.mxu1  ;;  %v1590_v54 = vld [vmem:[%s4875_s6 + $0x2920] sm:$0xff] }
 0x1a2   : > { %3059 = vmatpush.msra.mxu2 %v1624_v23  ;;  %3078 = vmatpush.msra.mxu3 %v1658_v24  ;;  %v1556_v51 = vld [vmem:[%s4875_s6 + $0x2810] sm:$0xff]  ;;  %v2725_v13 = vadd.f32 %v2724_v33, %v2705_v30  ;;  %v1654_v59 = vld [vmem:[%s4875_s6 + $0x2b20] sm:$0xff] }
 0x1a3   : > { %v271_v57 = vld [vmem:[%s4898_s27 + $0x58] sm:$0xff]  ;;  %3020 = vmatpush.msra.mxu0 %v1558_v32  ;;  %3039 = vmatpush.msra.mxu1 %v1592_v40  ;;  %v1554_v60 = vld [vmem:[%s4875_s6 + $0x2800] sm:$0xff]  ;;  %v5741_v8 = vld.sshfl [vmem:[#allocation1] sm:$0xff pattern:$0x73625140] }
 0x1a4   : > { %v1620_v58 = vld [vmem:[%s4875_s6 + $0x2a10] sm:$0xff]  ;;  %2132 = vst [vmem:[#allocation1 + $0x20] ss:$4 sm:$0xff] %v271_v57  ;;  %3060 = vmatpush.msra.mxu2 %v1622_v44  ;;  %3079 = vmatpush.msra.mxu3 %v1656_v49  ;;  %v2744_v2 = vpop.f32.mrf.mxu2  ;;  %v1618_v3 = vld [vmem:[%s4875_s6 + $0x2a00] sm:$0xff] }
 0x1a5   : > { %v1588_v1 = vld [vmem:[%s4875_s6 + $0x2910] sm:$0xff]  ;;  %3021 = vmatpush.msra.mxu0 %v1556_v51  ;;  %3040 = vmatpush.msra.mxu1 %v1590_v54  ;;  %v2745_v7 = vadd.f32 %v2744_v2, %v2725_v13  ;;  %v5743_v11 = vld.sshfl [vmem:[#allocation1 + $0x10] sm:$0xff pattern:$0x73625140] }
 0x1a6   : > { %v1652_v6 = vld [vmem:[%s4875_s6 + $0x2b10] sm:$0xff]  ;;  %3061 = vmatpush.msra.mxu2 %v1620_v58  ;;  %3080 = vmatpush.msra.mxu3 %v1654_v59  ;;  %v1586_v24 = vld [vmem:[%s4875_s6 + $0x2900] sm:$0xff] }
 0x1a7   : > { %3022 = vmatpush.msra.mxu0 %v1554_v60  ;;  %3041 = vmatpush.msra.mxu1 %v1588_v1  ;;  %v1712_v12 = vld [vmem:[%s4875_s6 + $0x2cf0] sm:$0xff]  ;;  %v2764_v23 = vpop.f32.mrf.mxu3  ;;  %v1650_v30 = vld [vmem:[%s4875_s6 + $0x2b00] sm:$0xff] }
 0x1a8   : > { %v1776_v22 = vld [vmem:[%s4875_s6 + $0x2ef0] sm:$0xff]  ;;  %3062 = vmatpush.msra.mxu2 %v1618_v3  ;;  %3081 = vmatpush.msra.mxu3 %v1652_v6  ;;  %v5749_v32 = vadd.f32 %v2764_v23, %v2745_v7  ;;  %v5753_v40 = vld.sshfl [vmem:[#allocation1 + $0x8] sm:$0xff pattern:$0x73625140] }
 0x1a9   : > { %3023 = vmatmul.f32.vlgmr.msra.gmra.mxu0 %v5741_v8  ;;  %3063 = vmatmul.f32.vlgmr.msra.gmra.mxu2 %v5743_v11  ;;  %v5755_v44 = vld.sshfl [vmem:[#allocation1 + $0x18] sm:$0xff pattern:$0x73625140]  ;;  %v1710_v49 = vld [vmem:[%s4875_s6 + $0x2ce0] sm:$0xff] }
 0x1aa   : > { %3087 = vmatpush.msrb.mxu0 %v1712_v12  ;;  %3127 = vmatpush.msrb.mxu2 %v1776_v22  ;;  %v1744_v33 = vld [vmem:[%s4875_s6 + $0x2df0] sm:$0xff]  ;;  %v1774_v51 = vld [vmem:[%s4875_s6 + $0x2ee0] sm:$0xff] }
 0x1ab   : > { %3042 = vmatpush.msra.mxu1 %v1586_v24  ;;  %3082 = vmatpush.msra.mxu3 %v1650_v30  ;;  %v1808_v54 = vld [vmem:[%s4875_s6 + $0x2ff0] sm:$0xff]  ;;  %v1742_v57 = vld [vmem:[%s4875_s6 + $0x2de0] sm:$0xff] }
 0x1ac   : > { %3043 = vmatmul.f32.vlgmr.msra.gmra.mxu1 %v5753_v40  ;;  %3083 = vmatmul.f32.vlgmr.msra.gmra.mxu3 %v5755_v44  ;;  %v1708_v13 = vld [vmem:[%s4875_s6 + $0x2cd0] sm:$0xff]  ;;  %v1806_v59 = vld [vmem:[%s4875_s6 + $0x2fe0] sm:$0xff] }
 0x1ad   : > { %3088 = vmatpush.msrb.mxu0 %v1710_v49  ;;  %3107 = vmatpush.msrb.mxu1 %v1744_v33  ;;  %v1772_v58 = vld [vmem:[%s4875_s6 + $0x2ed0] sm:$0xff]  ;;  %v1706_v60 = vld [vmem:[%s4875_s6 + $0x2cc0] sm:$0xff] }
 0x1ae   : > { %3128 = vmatpush.msrb.mxu2 %v1774_v51  ;;  %3147 = vmatpush.msrb.mxu3 %v1808_v54  ;;  %v1740_v1 = vld [vmem:[%s4875_s6 + $0x2dd0] sm:$0xff]  ;;  %v1770_v2 = vld [vmem:[%s4875_s6 + $0x2ec0] sm:$0xff] }
 0x1af   : > { %3089 = vmatpush.msrb.mxu0 %v1708_v13  ;;  %3108 = vmatpush.msrb.mxu1 %v1742_v57  ;;  %v1804_v3 = vld [vmem:[%s4875_s6 + $0x2fd0] sm:$0xff]  ;;  %v1738_v7 = vld [vmem:[%s4875_s6 + $0x2dc0] sm:$0xff] }
 0x1b0   : > { %3129 = vmatpush.msrb.mxu2 %v1772_v58  ;;  %3148 = vmatpush.msrb.mxu3 %v1806_v59  ;;  %v1704_v6 = vld [vmem:[%s4875_s6 + $0x2cb0] sm:$0xff]  ;;  %v1802_v22 = vld [vmem:[%s4875_s6 + $0x2fc0] sm:$0xff] }
 0x1b1   : > { %3090 = vmatpush.msrb.mxu0 %v1706_v60  ;;  %3109 = vmatpush.msrb.mxu1 %v1740_v1  ;;  %v1768_v12 = vld [vmem:[%s4875_s6 + $0x2eb0] sm:$0xff]  ;;  %v1702_v23 = vld [vmem:[%s4875_s6 + $0x2ca0] sm:$0xff] }
 0x1b2   : > { %3130 = vmatpush.msrb.mxu2 %v1770_v2  ;;  %3149 = vmatpush.msrb.mxu3 %v1804_v3  ;;  %v1736_v24 = vld [vmem:[%s4875_s6 + $0x2db0] sm:$0xff]  ;;  %v1766_v30 = vld [vmem:[%s4875_s6 + $0x2ea0] sm:$0xff] }
 0x1b3   : > { %3091 = vmatpush.msrb.mxu0 %v1704_v6  ;;  %3110 = vmatpush.msrb.mxu1 %v1738_v7  ;;  %v1800_v49 = vld [vmem:[%s4875_s6 + $0x2fb0] sm:$0xff]  ;;  %v1734_v51 = vld [vmem:[%s4875_s6 + $0x2da0] sm:$0xff] }
 0x1b4   : > { %3131 = vmatpush.msrb.mxu2 %v1768_v12  ;;  %3150 = vmatpush.msrb.mxu3 %v1802_v22  ;;  %v1700_v33 = vld [vmem:[%s4875_s6 + $0x2c90] sm:$0xff]  ;;  %v1798_v13 = vld [vmem:[%s4875_s6 + $0x2fa0] sm:$0xff] }
 0x1b5   : > { %3092 = vmatpush.msrb.mxu0 %v1702_v23  ;;  %3111 = vmatpush.msrb.mxu1 %v1736_v24  ;;  %v1764_v54 = vld [vmem:[%s4875_s6 + $0x2e90] sm:$0xff]  ;;  %v1698_v57 = vld [vmem:[%s4875_s6 + $0x2c80] sm:$0xff] }
 0x1b6   : > { %3132 = vmatpush.msrb.mxu2 %v1766_v30  ;;  %3151 = vmatpush.msrb.mxu3 %v1800_v49  ;;  %v1732_v58 = vld [vmem:[%s4875_s6 + $0x2d90] sm:$0xff]  ;;  %v1762_v59 = vld [vmem:[%s4875_s6 + $0x2e80] sm:$0xff] }
 0x1b7   : > { %3093 = vmatpush.msrb.mxu0 %v1700_v33  ;;  %3112 = vmatpush.msrb.mxu1 %v1734_v51  ;;  %v1796_v60 = vld [vmem:[%s4875_s6 + $0x2f90] sm:$0xff]  ;;  %v1730_v2 = vld [vmem:[%s4875_s6 + $0x2d80] sm:$0xff] }
 0x1b8   : > { %3133 = vmatpush.msrb.mxu2 %v1764_v54  ;;  %3152 = vmatpush.msrb.mxu3 %v1798_v13  ;;  %v1696_v1 = vld [vmem:[%s4875_s6 + $0x2c70] sm:$0xff]  ;;  %v1794_v6 = vld [vmem:[%s4875_s6 + $0x2f80] sm:$0xff] }
 0x1b9   : > { %3094 = vmatpush.msrb.mxu0 %v1698_v57  ;;  %3113 = vmatpush.msrb.mxu1 %v1732_v58  ;;  %v1760_v3 = vld [vmem:[%s4875_s6 + $0x2e70] sm:$0xff]  ;;  %v1694_v7 = vld [vmem:[%s4875_s6 + $0x2c60] sm:$0xff] }
 0x1ba   : > { %3134 = vmatpush.msrb.mxu2 %v1762_v59  ;;  %3153 = vmatpush.msrb.mxu3 %v1796_v60  ;;  %v1728_v12 = vld [vmem:[%s4875_s6 + $0x2d70] sm:$0xff]  ;;  %v1758_v22 = vld [vmem:[%s4875_s6 + $0x2e60] sm:$0xff] }
 0x1bb   : > { %3095 = vmatpush.msrb.mxu0 %v1696_v1  ;;  %3114 = vmatpush.msrb.mxu1 %v1730_v2  ;;  %v1792_v23 = vld [vmem:[%s4875_s6 + $0x2f70] sm:$0xff]  ;;  %v1726_v30 = vld [vmem:[%s4875_s6 + $0x2d60] sm:$0xff] }
 0x1bc   : > { %3135 = vmatpush.msrb.mxu2 %v1760_v3  ;;  %3154 = vmatpush.msrb.mxu3 %v1794_v6  ;;  %v1692_v24 = vld [vmem:[%s4875_s6 + $0x2c50] sm:$0xff]  ;;  %v1790_v33 = vld [vmem:[%s4875_s6 + $0x2f60] sm:$0xff] }
 0x1bd   : > { %3096 = vmatpush.msrb.mxu0 %v1694_v7  ;;  %3115 = vmatpush.msrb.mxu1 %v1728_v12  ;;  %v1756_v49 = vld [vmem:[%s4875_s6 + $0x2e50] sm:$0xff]  ;;  %v1690_v51 = vld [vmem:[%s4875_s6 + $0x2c40] sm:$0xff] }
 0x1be   : > { %3136 = vmatpush.msrb.mxu2 %v1758_v22  ;;  %3155 = vmatpush.msrb.mxu3 %v1792_v23  ;;  %v1724_v54 = vld [vmem:[%s4875_s6 + $0x2d50] sm:$0xff]  ;;  %v1754_v13 = vld [vmem:[%s4875_s6 + $0x2e40] sm:$0xff] }
 0x1bf   : > { %3097 = vmatpush.msrb.mxu0 %v1692_v24  ;;  %3116 = vmatpush.msrb.mxu1 %v1726_v30  ;;  %v1788_v57 = vld [vmem:[%s4875_s6 + $0x2f50] sm:$0xff]  ;;  %v1722_v59 = vld [vmem:[%s4875_s6 + $0x2d40] sm:$0xff] }
 0x1c0   : > { %3137 = vmatpush.msrb.mxu2 %v1756_v49  ;;  %3156 = vmatpush.msrb.mxu3 %v1790_v33  ;;  %v1688_v58 = vld [vmem:[%s4875_s6 + $0x2c30] sm:$0xff]  ;;  %v2784_v60 = vpop.f32.mrf.mxu0  ;;  %v1786_v2 = vld [vmem:[%s4875_s6 + $0x2f40] sm:$0xff] }
 0x1c1   : > { %3098 = vmatpush.msrb.mxu0 %v1690_v51  ;;  %3117 = vmatpush.msrb.mxu1 %v1724_v54  ;;  %v1752_v1 = vld [vmem:[%s4875_s6 + $0x2e30] sm:$0xff]  ;;  %v2785_v3 = vadd.f32 %v2784_v60, %v5749_v32  ;;  %v1686_v6 = vld [vmem:[%s4875_s6 + $0x2c20] sm:$0xff] }
 0x1c2   : > { %3138 = vmatpush.msrb.mxu2 %v1754_v13  ;;  %3157 = vmatpush.msrb.mxu3 %v1788_v57  ;;  %v1720_v7 = vld [vmem:[%s4875_s6 + $0x2d30] sm:$0xff]  ;;  %v1750_v12 = vld [vmem:[%s4875_s6 + $0x2e20] sm:$0xff] }
 0x1c3   : > { %3099 = vmatpush.msrb.mxu0 %v1688_v58  ;;  %3118 = vmatpush.msrb.mxu1 %v1722_v59  ;;  %v1784_v22 = vld [vmem:[%s4875_s6 + $0x2f30] sm:$0xff]  ;;  %v2804_v23 = vpop.f32.mrf.mxu1  ;;  %v1718_v30 = vld [vmem:[%s4875_s6 + $0x2d20] sm:$0xff] }
 0x1c4   : > { %3139 = vmatpush.msrb.mxu2 %v1752_v1  ;;  %3158 = vmatpush.msrb.mxu3 %v1786_v2  ;;  %v1684_v24 = vld [vmem:[%s4875_s6 + $0x2c10] sm:$0xff]  ;;  %v2805_v32 = vadd.f32 %v2804_v23, %v2785_v3  ;;  %v1782_v51 = vld [vmem:[%s4875_s6 + $0x2f20] sm:$0xff] }
 0x1c5   : > { %v272_v49 = vld [vmem:[%s4898_s27 + $0x60] sm:$0xff]  ;;  %3100 = vmatpush.msrb.mxu0 %v1686_v6  ;;  %3119 = vmatpush.msrb.mxu1 %v1720_v7  ;;  %v1682_v54 = vld [vmem:[%s4875_s6 + $0x2c00] sm:$0xff] }
 0x1c6   : > { %v1748_v33 = vld [vmem:[%s4875_s6 + $0x2e10] sm:$0xff]  ;;  %2141 = vst [vmem:[#allocation1] ss:$4 sm:$0xff] %v272_v49  ;;  %3140 = vmatpush.msrb.mxu2 %v1750_v12  ;;  %3159 = vmatpush.msrb.mxu3 %v1784_v22  ;;  %v2824_v57 = vpop.f32.mrf.mxu2  ;;  %v1746_v58 = vld [vmem:[%s4875_s6 + $0x2e00] sm:$0xff] }
 0x1c7   : > { %v1716_v13 = vld [vmem:[%s4875_s6 + $0x2d10] sm:$0xff]  ;;  %3101 = vmatpush.msrb.mxu0 %v1684_v24  ;;  %3120 = vmatpush.msrb.mxu1 %v1718_v30  ;;  %v2825_v60 = vadd.f32 %v2824_v57, %v2805_v32  ;;  %v5823_v2 = vld.sshfl [vmem:[#allocation1 + $0x30] sm:$0xff pattern:$0x73625140] }
 0x1c8   : > { %v1780_v59 = vld [vmem:[%s4875_s6 + $0x2f10] sm:$0xff]  ;;  %3141 = vmatpush.msrb.mxu2 %v1748_v33  ;;  %3160 = vmatpush.msrb.mxu3 %v1782_v51  ;;  %v1714_v12 = vld [vmem:[%s4875_s6 + $0x2d00] sm:$0xff] }
 0x1c9   : > { %v5821_v1 = vld.sshfl [vmem:[#allocation1 + $0x20] sm:$0xff pattern:$0x73625140]  ;;  %3102 = vmatpush.msrb.mxu0 %v1682_v54  ;;  %3121 = vmatpush.msrb.mxu1 %v1716_v13  ;;  %v2844_v7 = vpop.f32.mrf.mxu3  ;;  %v1778_v22 = vld [vmem:[%s4875_s6 + $0x2f00] sm:$0xff] }
 0x1ca   : > { %v1840_v3 = vld [vmem:[%s4875_s6 + $0x30f0] sm:$0xff]  ;;  %3142 = vmatpush.msrb.mxu2 %v1746_v58  ;;  %3161 = vmatpush.msrb.mxu3 %v1780_v59  ;;  %v5829_v23 = vadd.f32 %v2844_v7, %v2825_v60  ;;  %v5833_v24 = vld.sshfl [vmem:[#allocation1 + $0x28] sm:$0xff pattern:$0x73625140] }
 0x1cb   : > { %v1904_v6 = vld [vmem:[%s4875_s6 + $0x32f0] sm:$0xff]  ;;  %3103 = vmatmul.f32.vlgmr.msrb.gmra.mxu0 %v5821_v1  ;;  %3143 = vmatmul.f32.vlgmr.msrb.gmra.mxu2 %v5823_v2  ;;  %v1838_v32 = vld [vmem:[%s4875_s6 + $0x30e0] sm:$0xff] }
 0x1cc   : > { %v5835_v30 = vld.sshfl [vmem:[#allocation1 + $0x38] sm:$0xff pattern:$0x73625140]  ;;  %3167 = vmatpush.msra.mxu0 %v1840_v3  ;;  %3207 = vmatpush.msra.mxu2 %v1904_v6  ;;  %v1902_v33 = vld [vmem:[%s4875_s6 + $0x32e0] sm:$0xff] }
 0x1cd   : > { %6969 = vst [vmem:[#allocation7_spill] sm:$0xff] %v5835_v30  ;;  %v1872_v49 = vld [vmem:[%s4875_s6 + $0x31f0] sm:$0xff]  ;;  %3122 = vmatpush.msrb.mxu1 %v1714_v12  ;;  %3162 = vmatpush.msrb.mxu3 %v1778_v22  ;;  %v1870_v13 = vld [vmem:[%s4875_s6 + $0x31e0] sm:$0xff] }
 0x1ce   : > { %v1936_v51 = vld [vmem:[%s4875_s6 + $0x33f0] sm:$0xff]  ;;  %3123 = vmatmul.f32.vlgmr.msrb.gmra.mxu1 %v5833_v24  ;;  %3163 = vmatmul.f32.vlgmr.msrb.gmra.mxu3 %v5835_v30  ;;  %v1934_v58 = vld [vmem:[%s4875_s6 + $0x33e0] sm:$0xff] }
 0x1cf   : > { %v1836_v54 = vld [vmem:[%s4875_s6 + $0x30d0] sm:$0xff]  ;;  %3168 = vmatpush.msra.mxu0 %v1838_v32  ;;  %3187 = vmatpush.msra.mxu1 %v1872_v49  ;;  %v1834_v59 = vld [vmem:[%s4875_s6 + $0x30c0] sm:$0xff] }
 0x1d0   : > { %v1900_v57 = vld [vmem:[%s4875_s6 + $0x32d0] sm:$0xff]  ;;  %3208 = vmatpush.msra.mxu2 %v1902_v33  ;;  %3227 = vmatpush.msra.mxu3 %v1936_v51  ;;  %v1898_v3 = vld [vmem:[%s4875_s6 + $0x32c0] sm:$0xff] }
 0x1d1   : > { %v1868_v60 = vld [vmem:[%s4875_s6 + $0x31d0] sm:$0xff]  ;;  %3169 = vmatpush.msra.mxu0 %v1836_v54  ;;  %3188 = vmatpush.msra.mxu1 %v1870_v13  ;;  %v1866_v12 = vld [vmem:[%s4875_s6 + $0x31c0] sm:$0xff] }
 0x1d2   : > { %v1932_v6 = vld [vmem:[%s4875_s6 + $0x33d0] sm:$0xff]  ;;  %3209 = vmatpush.msra.mxu2 %v1900_v57  ;;  %3228 = vmatpush.msra.mxu3 %v1934_v58  ;;  %v1930_v32 = vld [vmem:[%s4875_s6 + $0x33c0] sm:$0xff] }
 0x1d3   : > { %v1832_v7 = vld [vmem:[%s4875_s6 + $0x30b0] sm:$0xff]  ;;  %3170 = vmatpush.msra.mxu0 %v1834_v59  ;;  %3189 = vmatpush.msra.mxu1 %v1868_v60  ;;  %v1830_v49 = vld [vmem:[%s4875_s6 + $0x30a0] sm:$0xff] }
 0x1d4   : > { %v1896_v22 = vld [vmem:[%s4875_s6 + $0x32b0] sm:$0xff]  ;;  %3210 = vmatpush.msra.mxu2 %v1898_v3  ;;  %3229 = vmatpush.msra.mxu3 %v1932_v6  ;;  %v1894_v51 = vld [vmem:[%s4875_s6 + $0x32a0] sm:$0xff] }
 0x1d5   : > { %v1864_v33 = vld [vmem:[%s4875_s6 + $0x31b0] sm:$0xff]  ;;  %3171 = vmatpush.msra.mxu0 %v1832_v7  ;;  %3190 = vmatpush.msra.mxu1 %v1866_v12  ;;  %v1862_v57 = vld [vmem:[%s4875_s6 + $0x31a0] sm:$0xff] }
 0x1d6   : > { %v1928_v54 = vld [vmem:[%s4875_s6 + $0x33b0] sm:$0xff]  ;;  %3211 = vmatpush.msra.mxu2 %v1896_v22  ;;  %3230 = vmatpush.msra.mxu3 %v1930_v32  ;;  %v1926_v59 = vld [vmem:[%s4875_s6 + $0x33a0] sm:$0xff] }
 0x1d7   : > { %v1828_v13 = vld [vmem:[%s4875_s6 + $0x3090] sm:$0xff]  ;;  %3172 = vmatpush.msra.mxu0 %v1830_v49  ;;  %3191 = vmatpush.msra.mxu1 %v1864_v33  ;;  %v1826_v60 = vld [vmem:[%s4875_s6 + $0x3080] sm:$0xff] }
 0x1d8   : > { %v1892_v58 = vld [vmem:[%s4875_s6 + $0x3290] sm:$0xff]  ;;  %3212 = vmatpush.msra.mxu2 %v1894_v51  ;;  %3231 = vmatpush.msra.mxu3 %v1928_v54  ;;  %v1890_v6 = vld [vmem:[%s4875_s6 + $0x3280] sm:$0xff] }
 0x1d9   : > { %v1860_v3 = vld [vmem:[%s4875_s6 + $0x3190] sm:$0xff]  ;;  %3173 = vmatpush.msra.mxu0 %v1828_v13  ;;  %3192 = vmatpush.msra.mxu1 %v1862_v57  ;;  %v1858_v22 = vld [vmem:[%s4875_s6 + $0x3180] sm:$0xff] }
 0x1da   : > { %v1924_v7 = vld [vmem:[%s4875_s6 + $0x3390] sm:$0xff]  ;;  %3213 = vmatpush.msra.mxu2 %v1892_v58  ;;  %3232 = vmatpush.msra.mxu3 %v1926_v59  ;;  %v1922_v49 = vld [vmem:[%s4875_s6 + $0x3380] sm:$0xff] }
 0x1db   : > { %v1824_v12 = vld [vmem:[%s4875_s6 + $0x3070] sm:$0xff]  ;;  %3174 = vmatpush.msra.mxu0 %v1826_v60  ;;  %3193 = vmatpush.msra.mxu1 %v1860_v3  ;;  %v1822_v33 = vld [vmem:[%s4875_s6 + $0x3060] sm:$0xff] }
 0x1dc   : > { %v1888_v32 = vld [vmem:[%s4875_s6 + $0x3270] sm:$0xff]  ;;  %3214 = vmatpush.msra.mxu2 %v1890_v6  ;;  %3233 = vmatpush.msra.mxu3 %v1924_v7  ;;  %v1886_v54 = vld [vmem:[%s4875_s6 + $0x3260] sm:$0xff] }
 0x1dd   : > { %v1856_v51 = vld [vmem:[%s4875_s6 + $0x3170] sm:$0xff]  ;;  %3175 = vmatpush.msra.mxu0 %v1824_v12  ;;  %3194 = vmatpush.msra.mxu1 %v1858_v22  ;;  %v1854_v58 = vld [vmem:[%s4875_s6 + $0x3160] sm:$0xff] }
 0x1de   : > { %v1920_v13 = vld [vmem:[%s4875_s6 + $0x3370] sm:$0xff]  ;;  %3215 = vmatpush.msra.mxu2 %v1888_v32  ;;  %3234 = vmatpush.msra.mxu3 %v1922_v49  ;;  %v1918_v60 = vld [vmem:[%s4875_s6 + $0x3360] sm:$0xff] }
 0x1df   : > { %v1820_v57 = vld [vmem:[%s4875_s6 + $0x3050] sm:$0xff]  ;;  %3176 = vmatpush.msra.mxu0 %v1822_v33  ;;  %3195 = vmatpush.msra.mxu1 %v1856_v51  ;;  %v1818_v3 = vld [vmem:[%s4875_s6 + $0x3040] sm:$0xff] }
 0x1e0   : > { %v1884_v59 = vld [vmem:[%s4875_s6 + $0x3250] sm:$0xff]  ;;  %3216 = vmatpush.msra.mxu2 %v1886_v54  ;;  %3235 = vmatpush.msra.mxu3 %v1920_v13  ;;  %v1882_v7 = vld [vmem:[%s4875_s6 + $0x3240] sm:$0xff] }
 0x1e1   : > { %v1852_v6 = vld [vmem:[%s4875_s6 + $0x3150] sm:$0xff]  ;;  %3177 = vmatpush.msra.mxu0 %v1820_v57  ;;  %3196 = vmatpush.msra.mxu1 %v1854_v58  ;;  %v1850_v32 = vld [vmem:[%s4875_s6 + $0x3140] sm:$0xff] }
 0x1e2   : > { %v1916_v12 = vld [vmem:[%s4875_s6 + $0x3350] sm:$0xff]  ;;  %3217 = vmatpush.msra.mxu2 %v1884_v59  ;;  %3236 = vmatpush.msra.mxu3 %v1918_v60  ;;  %v2864_v49 = vpop.f32.mrf.mxu0  ;;  %v1914_v51 = vld [vmem:[%s4875_s6 + $0x3340] sm:$0xff] }
 0x1e3   : > { %v1816_v22 = vld [vmem:[%s4875_s6 + $0x3030] sm:$0xff]  ;;  %3178 = vmatpush.msra.mxu0 %v1818_v3  ;;  %3197 = vmatpush.msra.mxu1 %v1852_v6  ;;  %v2865_v54 = vadd.f32 %v2864_v49, %v5829_v23  ;;  %v1814_v13 = vld [vmem:[%s4875_s6 + $0x3020] sm:$0xff] }
 0x1e4   : > { %v1880_v33 = vld [vmem:[%s4875_s6 + $0x3230] sm:$0xff]  ;;  %3218 = vmatpush.msra.mxu2 %v1882_v7  ;;  %3237 = vmatpush.msra.mxu3 %v1916_v12  ;;  %v1878_v58 = vld [vmem:[%s4875_s6 + $0x3220] sm:$0xff] }
 0x1e5   : > { %v1848_v57 = vld [vmem:[%s4875_s6 + $0x3130] sm:$0xff]  ;;  %3179 = vmatpush.msra.mxu0 %v1816_v22  ;;  %3198 = vmatpush.msra.mxu1 %v1850_v32  ;;  %v2884_v60 = vpop.f32.mrf.mxu1  ;;  %v1846_v6 = vld [vmem:[%s4875_s6 + $0x3120] sm:$0xff] }
 0x1e6   : > { %v1912_v59 = vld [vmem:[%s4875_s6 + $0x3330] sm:$0xff]  ;;  %3219 = vmatpush.msra.mxu2 %v1880_v33  ;;  %3238 = vmatpush.msra.mxu3 %v1914_v51  ;;  %v2885_v23 = vadd.f32 %v2884_v60, %v2865_v54  ;;  %v273_v7 = vld [vmem:[%s4898_s27 + $0x68] sm:$0xff] }
 0x1e7   : > { %v1812_v3 = vld [vmem:[%s4875_s6 + $0x3010] sm:$0xff]  ;;  %3180 = vmatpush.msra.mxu0 %v1814_v13  ;;  %3199 = vmatpush.msra.mxu1 %v1848_v57  ;;  %v1910_v49 = vld [vmem:[%s4875_s6 + $0x3320] sm:$0xff]  ;;  %2142 = vst [vmem:[#allocation1 + $0x20] ss:$4 sm:$0xff] %v273_v7 }
 0x1e8   : > { %v1876_v12 = vld [vmem:[%s4875_s6 + $0x3210] sm:$0xff]  ;;  %3220 = vmatpush.msra.mxu2 %v1878_v58  ;;  %3239 = vmatpush.msra.mxu3 %v1912_v59  ;;  %v1810_v22 = vld [vmem:[%s4875_s6 + $0x3000] sm:$0xff]  ;;  %v2904_v30 = vpop.f32.mrf.mxu2 }
 0x1e9   : > { %v1844_v32 = vld [vmem:[%s4875_s6 + $0x3110] sm:$0xff]  ;;  %3181 = vmatpush.msra.mxu0 %v1812_v3  ;;  %3200 = vmatpush.msra.mxu1 %v1846_v6  ;;  %v1874_v33 = vld [vmem:[%s4875_s6 + $0x3200] sm:$0xff]  ;;  %v2905_v54 = vadd.f32 %v2904_v30, %v2885_v23 }
 0x1ea   : > { %v1908_v51 = vld [vmem:[%s4875_s6 + $0x3310] sm:$0xff]  ;;  %3221 = vmatpush.msra.mxu2 %v1876_v12  ;;  %3240 = vmatpush.msra.mxu3 %v1910_v49  ;;  %v2145_v57 = vld.sshfl [vmem:[#allocation1 + $0x10] sm:$0xff pattern:$0x73625140] }
 0x1eb   : > { %v2143_v13 = vld.sshfl [vmem:[#allocation1] sm:$0xff pattern:$0x73625140]  ;;  %3182 = vmatpush.msra.mxu0 %v1810_v22  ;;  %3201 = vmatpush.msra.mxu1 %v1844_v32  ;;  %v2924_v60 = vpop.f32.mrf.mxu3  ;;  %v1842_v3 = vld [vmem:[%s4875_s6 + $0x3100] sm:$0xff] }
 0x1ec   : > { %v1968_v58 = vld [vmem:[%s4875_s6 + $0x34f0] sm:$0xff]  ;;  %3222 = vmatpush.msra.mxu2 %v1874_v33  ;;  %3241 = vmatpush.msra.mxu3 %v1908_v51  ;;  %v1906_v6 = vld [vmem:[%s4875_s6 + $0x3300] sm:$0xff]  ;;  %v5905_v7 = vadd.f32 %v2924_v60, %v2905_v54 }
 0x1ed   : > { %v2032_v59 = vld [vmem:[%s4875_s6 + $0x36f0] sm:$0xff]  ;;  %3183 = vmatmul.f32.vlgmr.msra.gmra.mxu0 %v2143_v13  ;;  %3223 = vmatmul.f32.vlgmr.msra.gmra.mxu2 %v2145_v57  ;;  %v2144_v30 = vld.sshfl [vmem:[#allocation1 + $0x8] sm:$0xff pattern:$0x73625140] }
 0x1ee   : > { %v2146_v23 = vld.sshfl [vmem:[#allocation1 + $0x18] sm:$0xff pattern:$0x73625140]  ;;  %3247 = vmatpush.msrb.mxu0 %v1968_v58  ;;  %3287 = vmatpush.msrb.mxu2 %v2032_v59  ;;  %v1966_v12 = vld [vmem:[%s4875_s6 + $0x34e0] sm:$0xff] }
 0x1ef   : > { %v2000_v49 = vld [vmem:[%s4875_s6 + $0x35f0] sm:$0xff]  ;;  %3202 = vmatpush.msra.mxu1 %v1842_v3  ;;  %3242 = vmatpush.msra.mxu3 %v1906_v6  ;;  %v2030_v22 = vld [vmem:[%s4875_s6 + $0x36e0] sm:$0xff] }
 0x1f0   : > { %v2064_v32 = vld [vmem:[%s4875_s6 + $0x37f0] sm:$0xff]  ;;  %3203 = vmatmul.f32.vlgmr.msra.gmra.mxu1 %v2144_v30  ;;  %3243 = vmatmul.f32.vlgmr.msra.gmra.mxu3 %v2146_v23  ;;  %v1998_v51 = vld [vmem:[%s4875_s6 + $0x35e0] sm:$0xff] }
 0x1f1   : > { %v1964_v33 = vld [vmem:[%s4875_s6 + $0x34d0] sm:$0xff]  ;;  %3248 = vmatpush.msrb.mxu0 %v1966_v12  ;;  %3267 = vmatpush.msrb.mxu1 %v2000_v49  ;;  %v2062_v13 = vld [vmem:[%s4875_s6 + $0x37e0] sm:$0xff] }
 0x1f2   : > { %v2028_v54 = vld [vmem:[%s4875_s6 + $0x36d0] sm:$0xff]  ;;  %3288 = vmatpush.msrb.mxu2 %v2030_v22  ;;  %3307 = vmatpush.msrb.mxu3 %v2064_v32  ;;  %v1962_v57 = vld [vmem:[%s4875_s6 + $0x34c0] sm:$0xff] }
 0x1f3   : > { %v1996_v58 = vld [vmem:[%s4875_s6 + $0x35d0] sm:$0xff]  ;;  %3249 = vmatpush.msrb.mxu0 %v1964_v33  ;;  %3268 = vmatpush.msrb.mxu1 %v1998_v51  ;;  %v2026_v59 = vld [vmem:[%s4875_s6 + $0x36c0] sm:$0xff] }
 0x1f4   : > { %v2060_v60 = vld [vmem:[%s4875_s6 + $0x37d0] sm:$0xff]  ;;  %3289 = vmatpush.msrb.mxu2 %v2028_v54  ;;  %3308 = vmatpush.msrb.mxu3 %v2062_v13  ;;  %v1994_v6 = vld [vmem:[%s4875_s6 + $0x35c0] sm:$0xff] }
 0x1f5   : > { %v1960_v3 = vld [vmem:[%s4875_s6 + $0x34b0] sm:$0xff]  ;;  %3250 = vmatpush.msrb.mxu0 %v1962_v57  ;;  %3269 = vmatpush.msrb.mxu1 %v1996_v58  ;;  %v2058_v23 = vld [vmem:[%s4875_s6 + $0x37c0] sm:$0xff] }
 0x1f6   : > { %v2024_v30 = vld [vmem:[%s4875_s6 + $0x36b0] sm:$0xff]  ;;  %3290 = vmatpush.msrb.mxu2 %v2026_v59  ;;  %3309 = vmatpush.msrb.mxu3 %v2060_v60  ;;  %v1958_v12 = vld [vmem:[%s4875_s6 + $0x34a0] sm:$0xff] }
 0x1f7   : > { %v1992_v49 = vld [vmem:[%s4875_s6 + $0x35b0] sm:$0xff]  ;;  %3251 = vmatpush.msrb.mxu0 %v1960_v3  ;;  %3270 = vmatpush.msrb.mxu1 %v1994_v6  ;;  %v2022_v22 = vld [vmem:[%s4875_s6 + $0x36a0] sm:$0xff] }
 0x1f8   : > { %v2056_v32 = vld [vmem:[%s4875_s6 + $0x37b0] sm:$0xff]  ;;  %3291 = vmatpush.msrb.mxu2 %v2024_v30  ;;  %3310 = vmatpush.msrb.mxu3 %v2058_v23  ;;  %v1990_v51 = vld [vmem:[%s4875_s6 + $0x35a0] sm:$0xff] }
 0x1f9   : > { %v1956_v33 = vld [vmem:[%s4875_s6 + $0x3490] sm:$0xff]  ;;  %3252 = vmatpush.msrb.mxu0 %v1958_v12  ;;  %3271 = vmatpush.msrb.mxu1 %v1992_v49  ;;  %v2054_v13 = vld [vmem:[%s4875_s6 + $0x37a0] sm:$0xff] }
 0x1fa   : > { %v2020_v54 = vld [vmem:[%s4875_s6 + $0x3690] sm:$0xff]  ;;  %3292 = vmatpush.msrb.mxu2 %v2022_v22  ;;  %3311 = vmatpush.msrb.mxu3 %v2056_v32  ;;  %v1954_v57 = vld [vmem:[%s4875_s6 + $0x3480] sm:$0xff] }
 0x1fb   : > { %v1988_v58 = vld [vmem:[%s4875_s6 + $0x3590] sm:$0xff]  ;;  %3253 = vmatpush.msrb.mxu0 %v1956_v33  ;;  %3272 = vmatpush.msrb.mxu1 %v1990_v51  ;;  %v2018_v59 = vld [vmem:[%s4875_s6 + $0x3680] sm:$0xff] }
 0x1fc   : > { %v2052_v60 = vld [vmem:[%s4875_s6 + $0x3790] sm:$0xff]  ;;  %3293 = vmatpush.msrb.mxu2 %v2020_v54  ;;  %3312 = vmatpush.msrb.mxu3 %v2054_v13  ;;  %v1986_v6 = vld [vmem:[%s4875_s6 + $0x3580] sm:$0xff] }
 0x1fd   : > { %v1952_v3 = vld [vmem:[%s4875_s6 + $0x3470] sm:$0xff]  ;;  %3254 = vmatpush.msrb.mxu0 %v1954_v57  ;;  %3273 = vmatpush.msrb.mxu1 %v1988_v58  ;;  %v2050_v23 = vld [vmem:[%s4875_s6 + $0x3780] sm:$0xff] }
 0x1fe   : > { %v2016_v30 = vld [vmem:[%s4875_s6 + $0x3670] sm:$0xff]  ;;  %3294 = vmatpush.msrb.mxu2 %v2018_v59  ;;  %3313 = vmatpush.msrb.mxu3 %v2052_v60  ;;  %v1950_v12 = vld [vmem:[%s4875_s6 + $0x3460] sm:$0xff] }
 0x1ff   : > { %v1984_v49 = vld [vmem:[%s4875_s6 + $0x3570] sm:$0xff]  ;;  %3255 = vmatpush.msrb.mxu0 %v1952_v3  ;;  %3274 = vmatpush.msrb.mxu1 %v1986_v6  ;;  %v2014_v22 = vld [vmem:[%s4875_s6 + $0x3660] sm:$0xff] }
 0x200   : > { %v2048_v32 = vld [vmem:[%s4875_s6 + $0x3770] sm:$0xff]  ;;  %3295 = vmatpush.msrb.mxu2 %v2016_v30  ;;  %3314 = vmatpush.msrb.mxu3 %v2050_v23  ;;  %v1982_v51 = vld [vmem:[%s4875_s6 + $0x3560] sm:$0xff] }
 0x201   : > { %v1948_v33 = vld [vmem:[%s4875_s6 + $0x3450] sm:$0xff]  ;;  %3256 = vmatpush.msrb.mxu0 %v1950_v12  ;;  %3275 = vmatpush.msrb.mxu1 %v1984_v49  ;;  %v2046_v13 = vld [vmem:[%s4875_s6 + $0x3760] sm:$0xff] }
 0x202   : > { %v2012_v54 = vld [vmem:[%s4875_s6 + $0x3650] sm:$0xff]  ;;  %3296 = vmatpush.msrb.mxu2 %v2014_v22  ;;  %3315 = vmatpush.msrb.mxu3 %v2048_v32  ;;  %v1946_v57 = vld [vmem:[%s4875_s6 + $0x3440] sm:$0xff] }
 0x203   : > { %v1980_v58 = vld [vmem:[%s4875_s6 + $0x3550] sm:$0xff]  ;;  %3257 = vmatpush.msrb.mxu0 %v1948_v33  ;;  %3276 = vmatpush.msrb.mxu1 %v1982_v51  ;;  %v2010_v59 = vld [vmem:[%s4875_s6 + $0x3640] sm:$0xff] }
 0x204   : > { %v2044_v60 = vld [vmem:[%s4875_s6 + $0x3750] sm:$0xff]  ;;  %3297 = vmatpush.msrb.mxu2 %v2012_v54  ;;  %3316 = vmatpush.msrb.mxu3 %v2046_v13  ;;  %v1978_v6 = vld [vmem:[%s4875_s6 + $0x3540] sm:$0xff]  ;;  %v2944_v30 = vpop.f32.mrf.mxu0 }
 0x205   : > { %v1944_v3 = vld [vmem:[%s4875_s6 + $0x3430] sm:$0xff]  ;;  %3258 = vmatpush.msrb.mxu0 %v1946_v57  ;;  %3277 = vmatpush.msrb.mxu1 %v1980_v58  ;;  %v2042_v12 = vld [vmem:[%s4875_s6 + $0x3740] sm:$0xff]  ;;  %v2945_v49 = vadd.f32 %v2944_v30, %v5905_v7 }
 0x206   : > { %v2008_v23 = vld [vmem:[%s4875_s6 + $0x3630] sm:$0xff]  ;;  %3298 = vmatpush.msrb.mxu2 %v2010_v59  ;;  %3317 = vmatpush.msrb.mxu3 %v2044_v60  ;;  %v1942_v22 = vld [vmem:[%s4875_s6 + $0x3420] sm:$0xff] }
 0x207   : > { %v1976_v32 = vld [vmem:[%s4875_s6 + $0x3530] sm:$0xff]  ;;  %3259 = vmatpush.msrb.mxu0 %v1944_v3  ;;  %3278 = vmatpush.msrb.mxu1 %v1978_v6  ;;  %v2006_v33 = vld [vmem:[%s4875_s6 + $0x3620] sm:$0xff]  ;;  %v2964_v54 = vpop.f32.mrf.mxu1 }
 0x208   : > { %v2040_v51 = vld [vmem:[%s4875_s6 + $0x3730] sm:$0xff]  ;;  %3299 = vmatpush.msrb.mxu2 %v2008_v23  ;;  %3318 = vmatpush.msrb.mxu3 %v2042_v12  ;;  %v1974_v57 = vld [vmem:[%s4875_s6 + $0x3520] sm:$0xff]  ;;  %v2965_v7 = vadd.f32 %v2964_v54, %v2945_v49 }
 0x209   : > { %v1940_v13 = vld [vmem:[%s4875_s6 + $0x3410] sm:$0xff]  ;;  %3260 = vmatpush.msrb.mxu0 %v1942_v22  ;;  %3279 = vmatpush.msrb.mxu1 %v1976_v32  ;;  %v2038_v59 = vld [vmem:[%s4875_s6 + $0x3720] sm:$0xff]  ;;  %v305_v32 = vld [vmem:[%s4875_s6 + $0xf8] sm:$0xff] }
 0x20a   : > { %v2004_v58 = vld [vmem:[%s4875_s6 + $0x3610] sm:$0xff]  ;;  %3300 = vmatpush.msrb.mxu2 %v2006_v33  ;;  %3319 = vmatpush.msrb.mxu3 %v2040_v51  ;;  %v1938_v60 = vld [vmem:[%s4875_s6 + $0x3400] sm:$0xff]  ;;  %v2984_v6 = vpop.f32.mrf.mxu2  ;;  %v369_v33 = vld [vmem:[%s4875_s6 + $0x2f8] sm:$0xff] }
 0x20b   : > { %v1972_v3 = vld [vmem:[%s4875_s6 + $0x3510] sm:$0xff]  ;;  %3261 = vmatpush.msrb.mxu0 %v1940_v13  ;;  %3280 = vmatpush.msrb.mxu1 %v1974_v57  ;;  %v2002_v30 = vld [vmem:[%s4875_s6 + $0x3600] sm:$0xff]  ;;  %v2985_v12 = vadd.f32 %v2984_v6, %v2965_v7  ;;  %v401_v6 = vld [vmem:[%s4875_s6 + $0x3f8] sm:$0xff] }
 0x20c   : > { %v2036_v23 = vld [vmem:[%s4875_s6 + $0x3710] sm:$0xff]  ;;  %3301 = vmatpush.msrb.mxu2 %v2004_v58  ;;  %3320 = vmatpush.msrb.mxu3 %v2038_v59  ;;  %v2149_v22 = vld.sshfl [vmem:[#allocation1 + $0x30] sm:$0xff pattern:$0x73625140] }
 0x20d   : > { %v2147_v49 = vld.sshfl [vmem:[#allocation1 + $0x20] sm:$0xff pattern:$0x73625140]  ;;  %3262 = vmatpush.msrb.mxu0 %v1938_v60  ;;  %3281 = vmatpush.msrb.mxu1 %v1972_v3  ;;  %v3004_v51 = vpop.f32.mrf.mxu3  ;;  %v1970_v54 = vld [vmem:[%s4875_s6 + $0x3500] sm:$0xff]  ;;  %v303_v59 = vld [vmem:[%s4875_s6 + $0xe8] sm:$0xff] }
 0x20e   : > { %3302 = vmatpush.msrb.mxu2 %v2002_v30  ;;  %3321 = vmatpush.msrb.mxu3 %v2036_v23  ;;  %v2034_v13 = vld [vmem:[%s4875_s6 + $0x3700] sm:$0xff]  ;;  %v5972_v57 = vadd.f32 %v3004_v51, %v2985_v12  ;;  %v2150_v58 = vld.sshfl [vmem:[#allocation1 + $0x38] sm:$0xff pattern:$0x73625140]  ;;  %v337_v60 = vld [vmem:[%s4875_s6 + $0x1f8] sm:$0xff] }
 0x20f   : > { %3263 = vmatmul.f32.vlgmr.msrb.gmra.mxu0 %v2147_v49  ;;  %3303 = vmatmul.f32.vlgmr.msrb.gmra.mxu2 %v2149_v22  ;;  %v2148_v7 = vld.sshfl [vmem:[#allocation1 + $0x28] sm:$0xff pattern:$0x73625140]  ;;  %v367_v3 = vld [vmem:[%s4875_s6 + $0x2e8] sm:$0xff] }
 0x210   : > { %3327 = vmatpush.msra.mxu0 %v305_v32  ;;  %3367 = vmatpush.msra.mxu2 %v369_v33  ;;  %v301_v30 = vld [vmem:[%s4875_s6 + $0xd8] sm:$0xff]  ;;  %v335_v23 = vld [vmem:[%s4875_s6 + $0x1e8] sm:$0xff] }
 0x211   : > { %3282 = vmatpush.msrb.mxu1 %v1970_v54  ;;  %3322 = vmatpush.msrb.mxu3 %v2034_v13  ;;  %v365_v12 = vld [vmem:[%s4875_s6 + $0x2d8] sm:$0xff]  ;;  %v399_v49 = vld [vmem:[%s4875_s6 + $0x3e8] sm:$0xff] }
 0x212   : > { %3283 = vmatmul.f32.vlgmr.msrb.gmra.mxu1 %v2148_v7  ;;  %3323 = vmatmul.f32.vlgmr.msrb.gmra.mxu3 %v2150_v58  ;;  %v299_v22 = vld [vmem:[%s4875_s6 + $0xc8] sm:$0xff]  ;;  %v333_v32 = vld [vmem:[%s4875_s6 + $0x1d8] sm:$0xff] }
 0x213   : > { %3328 = vmatpush.msra.mxu0 %v303_v59  ;;  %3347 = vmatpush.msra.mxu1 %v337_v60  ;;  %v363_v33 = vld [vmem:[%s4875_s6 + $0x2c8] sm:$0xff]  ;;  %v397_v51 = vld [vmem:[%s4875_s6 + $0x3d8] sm:$0xff] }
 0x214   : > { %3368 = vmatpush.msra.mxu2 %v367_v3  ;;  %3387 = vmatpush.msra.mxu3 %v401_v6  ;;  %v297_v54 = vld [vmem:[%s4875_s6 + $0xb8] sm:$0xff]  ;;  %v331_v13 = vld [vmem:[%s4875_s6 + $0x1c8] sm:$0xff] }
 0x215   : > { %3329 = vmatpush.msra.mxu0 %v301_v30  ;;  %3348 = vmatpush.msra.mxu1 %v335_v23  ;;  %v361_v7 = vld [vmem:[%s4875_s6 + $0x2b8] sm:$0xff]  ;;  %v395_v58 = vld [vmem:[%s4875_s6 + $0x3c8] sm:$0xff] }
 0x216   : > { %3369 = vmatpush.msra.mxu2 %v365_v12  ;;  %3388 = vmatpush.msra.mxu3 %v399_v49  ;;  %v295_v59 = vld [vmem:[%s4875_s6 + $0xa8] sm:$0xff]  ;;  %v329_v60 = vld [vmem:[%s4875_s6 + $0x1b8] sm:$0xff] }
 0x217   : > { %3330 = vmatpush.msra.mxu0 %v299_v22  ;;  %3349 = vmatpush.msra.mxu1 %v333_v32  ;;  %v359_v3 = vld [vmem:[%s4875_s6 + $0x2a8] sm:$0xff]  ;;  %v393_v6 = vld [vmem:[%s4875_s6 + $0x3b8] sm:$0xff] }
 0x218   : > { %3370 = vmatpush.msra.mxu2 %v363_v33  ;;  %3389 = vmatpush.msra.mxu3 %v397_v51  ;;  %v293_v30 = vld [vmem:[%s4875_s6 + $0x98] sm:$0xff]  ;;  %v327_v23 = vld [vmem:[%s4875_s6 + $0x1a8] sm:$0xff] }
 0x219   : > { %3331 = vmatpush.msra.mxu0 %v297_v54  ;;  %3350 = vmatpush.msra.mxu1 %v331_v13  ;;  %v357_v12 = vld [vmem:[%s4875_s6 + $0x298] sm:$0xff]  ;;  %v391_v49 = vld [vmem:[%s4875_s6 + $0x3a8] sm:$0xff] }
 0x21a   : > { %3371 = vmatpush.msra.mxu2 %v361_v7  ;;  %3390 = vmatpush.msra.mxu3 %v395_v58  ;;  %v291_v22 = vld [vmem:[%s4875_s6 + $0x88] sm:$0xff]  ;;  %v325_v32 = vld [vmem:[%s4875_s6 + $0x198] sm:$0xff] }
 0x21b   : > { %3332 = vmatpush.msra.mxu0 %v295_v59  ;;  %3351 = vmatpush.msra.mxu1 %v329_v60  ;;  %v355_v33 = vld [vmem:[%s4875_s6 + $0x288] sm:$0xff]  ;;  %v389_v51 = vld [vmem:[%s4875_s6 + $0x398] sm:$0xff] }
 0x21c   : > { %3372 = vmatpush.msra.mxu2 %v359_v3  ;;  %3391 = vmatpush.msra.mxu3 %v393_v6  ;;  %v289_v54 = vld [vmem:[%s4875_s6 + $0x78] sm:$0xff]  ;;  %v323_v13 = vld [vmem:[%s4875_s6 + $0x188] sm:$0xff] }
 0x21d   : > { %3333 = vmatpush.msra.mxu0 %v293_v30  ;;  %3352 = vmatpush.msra.mxu1 %v327_v23  ;;  %v353_v7 = vld [vmem:[%s4875_s6 + $0x278] sm:$0xff]  ;;  %v387_v58 = vld [vmem:[%s4875_s6 + $0x388] sm:$0xff] }
 0x21e   : > { %3373 = vmatpush.msra.mxu2 %v357_v12  ;;  %3392 = vmatpush.msra.mxu3 %v391_v49  ;;  %v287_v59 = vld [vmem:[%s4875_s6 + $0x68] sm:$0xff]  ;;  %v321_v60 = vld [vmem:[%s4875_s6 + $0x178] sm:$0xff] }
 0x21f   : > { %3334 = vmatpush.msra.mxu0 %v291_v22  ;;  %3353 = vmatpush.msra.mxu1 %v325_v32  ;;  %v351_v3 = vld [vmem:[%s4875_s6 + $0x268] sm:$0xff]  ;;  %v385_v6 = vld [vmem:[%s4875_s6 + $0x378] sm:$0xff] }
 0x220   : > { %3374 = vmatpush.msra.mxu2 %v355_v33  ;;  %3393 = vmatpush.msra.mxu3 %v389_v51  ;;  %v285_v30 = vld [vmem:[%s4875_s6 + $0x58] sm:$0xff]  ;;  %v319_v23 = vld [vmem:[%s4875_s6 + $0x168] sm:$0xff] }
 0x221   : > { %3335 = vmatpush.msra.mxu0 %v289_v54  ;;  %3354 = vmatpush.msra.mxu1 %v323_v13  ;;  %v349_v12 = vld [vmem:[%s4875_s6 + $0x258] sm:$0xff]  ;;  %v383_v49 = vld [vmem:[%s4875_s6 + $0x368] sm:$0xff] }
 0x222   : > { %3375 = vmatpush.msra.mxu2 %v353_v7  ;;  %3394 = vmatpush.msra.mxu3 %v387_v58  ;;  %v283_v22 = vld [vmem:[%s4875_s6 + $0x48] sm:$0xff]  ;;  %v317_v32 = vld [vmem:[%s4875_s6 + $0x158] sm:$0xff] }
 0x223   : > { %3336 = vmatpush.msra.mxu0 %v287_v59  ;;  %3355 = vmatpush.msra.mxu1 %v321_v60  ;;  %v347_v33 = vld [vmem:[%s4875_s6 + $0x248] sm:$0xff]  ;;  %v381_v51 = vld [vmem:[%s4875_s6 + $0x358] sm:$0xff] }
 0x224   : > { %3376 = vmatpush.msra.mxu2 %v351_v3  ;;  %3395 = vmatpush.msra.mxu3 %v385_v6  ;;  %v281_v54 = vld [vmem:[%s4875_s6 + $0x38] sm:$0xff]  ;;  %v315_v13 = vld [vmem:[%s4875_s6 + $0x148] sm:$0xff] }
 0x225   : > { %3337 = vmatpush.msra.mxu0 %v285_v30  ;;  %3356 = vmatpush.msra.mxu1 %v319_v23  ;;  %v345_v58 = vld [vmem:[%s4875_s6 + $0x238] sm:$0xff]  ;;  %v379_v59 = vld [vmem:[%s4875_s6 + $0x348] sm:$0xff] }
 0x226   : > { %3377 = vmatpush.msra.mxu2 %v349_v12  ;;  %3396 = vmatpush.msra.mxu3 %v383_v49  ;;  %v3024_v7 = vpop.f32.mrf.mxu0  ;;  %v279_v3 = vld [vmem:[%s4875_s6 + $0x28] sm:$0xff]  ;;  %v313_v6 = vld [vmem:[%s4875_s6 + $0x138] sm:$0xff] }
 0x227   : > { %3338 = vmatpush.msra.mxu0 %v283_v22  ;;  %3357 = vmatpush.msra.mxu1 %v317_v32  ;;  %v3025_v60 = vadd.f32 %v3024_v7, %v5972_v57  ;;  %v343_v30 = vld [vmem:[%s4875_s6 + $0x228] sm:$0xff]  ;;  %v377_v23 = vld [vmem:[%s4875_s6 + $0x338] sm:$0xff] }
 0x228   : > { %3378 = vmatpush.msra.mxu2 %v347_v33  ;;  %3397 = vmatpush.msra.mxu3 %v381_v51  ;;  %v277_v49 = vld [vmem:[%s4875_s6 + $0x18] sm:$0xff]  ;;  %v311_v22 = vld [vmem:[%s4875_s6 + $0x128] sm:$0xff] }
 0x229   : > { %3339 = vmatpush.msra.mxu0 %v281_v54  ;;  %3358 = vmatpush.msra.mxu1 %v315_v13  ;;  %v3044_v12 = vpop.f32.mrf.mxu1  ;;  %v341_v32 = vld [vmem:[%s4875_s6 + $0x218] sm:$0xff]  ;;  %v375_v33 = vld [vmem:[%s4875_s6 + $0x328] sm:$0xff] }
 0x22a   : > { %3379 = vmatpush.msra.mxu2 %v345_v58  ;;  %3398 = vmatpush.msra.mxu3 %v379_v59  ;;  %v3045_v57 = vadd.f32 %v3044_v12, %v3025_v60  ;;  %v275_v51 = vld [vmem:[%s4875_s6 + $0x8] sm:$0xff]  ;;  %v309_v54 = vld [vmem:[%s4875_s6 + $0x118] sm:$0xff] }
 0x22b   : > { %3340 = vmatpush.msra.mxu0 %v279_v3  ;;  %3359 = vmatpush.msra.mxu1 %v313_v6  ;;  %v339_v7 = vld [vmem:[%s4875_s6 + $0x208] sm:$0xff]  ;;  %v373_v58 = vld [vmem:[%s4875_s6 + $0x318] sm:$0xff] }
 0x22c   : > { %3380 = vmatpush.msra.mxu2 %v343_v30  ;;  %3399 = vmatpush.msra.mxu3 %v377_v23  ;;  %v3064_v13 = vpop.f32.mrf.mxu2  ;;  %v433_v60 = vld [vmem:[%s4875_s6 + $0x4f8] sm:$0xff]  ;;  %v307_v6 = vld [vmem:[%s4875_s6 + $0x108] sm:$0xff] }
 0x22d   : > { %3341 = vmatpush.msra.mxu0 %v277_v49  ;;  %3360 = vmatpush.msra.mxu1 %v311_v22  ;;  %v3065_v59 = vadd.f32 %v3064_v13, %v3045_v57  ;;  %v497_v3 = vld [vmem:[%s4875_s6 + $0x6f8] sm:$0xff]  ;;  %v371_v30 = vld [vmem:[%s4875_s6 + $0x308] sm:$0xff] }
 0x22e   : > { %3381 = vmatpush.msra.mxu2 %v341_v32  ;;  %3400 = vmatpush.msra.mxu3 %v375_v33  ;;  %v431_v12 = vld [vmem:[%s4875_s6 + $0x4e8] sm:$0xff]  ;;  %v465_v49 = vld [vmem:[%s4875_s6 + $0x5f8] sm:$0xff] }
 0x22f   : > { %3342 = vmatpush.msra.mxu0 %v275_v51  ;;  %3361 = vmatpush.msra.mxu1 %v309_v54  ;;  %v3084_v23 = vpop.f32.mrf.mxu3  ;;  %v495_v57 = vld [vmem:[%s4875_s6 + $0x6e8] sm:$0xff]  ;;  %v529_v32 = vld [vmem:[%s4875_s6 + $0x7f8] sm:$0xff] }
 0x230   : > { %3382 = vmatpush.msra.mxu2 %v339_v7  ;;  %3401 = vmatpush.msra.mxu3 %v373_v58  ;;  %v6041_v22 = vadd.f32 %v3084_v23, %v3065_v59  ;;  %v429_v33 = vld [vmem:[%s4875_s6 + $0x4d8] sm:$0xff]  ;;  %v463_v51 = vld [vmem:[%s4875_s6 + $0x5e8] sm:$0xff] }
 0x231   : > { %3407 = vmatpush.msrb.mxu0 %v433_v60  ;;  %3362 = vmatpush.msra.mxu1 %v307_v6  ;;  %v493_v54 = vld [vmem:[%s4875_s6 + $0x6d8] sm:$0xff]  ;;  %v527_v13 = vld [vmem:[%s4875_s6 + $0x7e8] sm:$0xff] }
 0x232   : > { %3447 = vmatpush.msrb.mxu2 %v497_v3  ;;  %3402 = vmatpush.msra.mxu3 %v371_v30  ;;  %v427_v7 = vld [vmem:[%s4875_s6 + $0x4c8] sm:$0xff]  ;;  %v461_v58 = vld [vmem:[%s4875_s6 + $0x5d8] sm:$0xff] }
 0x233   : > { %3408 = vmatpush.msrb.mxu0 %v431_v12  ;;  %3427 = vmatpush.msrb.mxu1 %v465_v49  ;;  %v491_v59 = vld [vmem:[%s4875_s6 + $0x6c8] sm:$0xff]  ;;  %v525_v60 = vld [vmem:[%s4875_s6 + $0x7d8] sm:$0xff] }
 0x234   : > { %3448 = vmatpush.msrb.mxu2 %v495_v57  ;;  %3467 = vmatpush.msrb.mxu3 %v529_v32  ;;  %v425_v3 = vld [vmem:[%s4875_s6 + $0x4b8] sm:$0xff]  ;;  %v459_v6 = vld [vmem:[%s4875_s6 + $0x5c8] sm:$0xff] }
 0x235   : > { %3409 = vmatpush.msrb.mxu0 %v429_v33  ;;  %3428 = vmatpush.msrb.mxu1 %v463_v51  ;;  %v489_v30 = vld [vmem:[%s4875_s6 + $0x6b8] sm:$0xff]  ;;  %v523_v23 = vld [vmem:[%s4875_s6 + $0x7c8] sm:$0xff] }
 0x236   : > { %3449 = vmatpush.msrb.mxu2 %v493_v54  ;;  %3468 = vmatpush.msrb.mxu3 %v527_v13  ;;  %v423_v12 = vld [vmem:[%s4875_s6 + $0x4a8] sm:$0xff]  ;;  %v457_v49 = vld [vmem:[%s4875_s6 + $0x5b8] sm:$0xff] }
 0x237   : > { %3410 = vmatpush.msrb.mxu0 %v427_v7  ;;  %3429 = vmatpush.msrb.mxu1 %v461_v58  ;;  %v487_v57 = vld [vmem:[%s4875_s6 + $0x6a8] sm:$0xff]  ;;  %v521_v32 = vld [vmem:[%s4875_s6 + $0x7b8] sm:$0xff] }
 0x238   : > { %3450 = vmatpush.msrb.mxu2 %v491_v59  ;;  %3469 = vmatpush.msrb.mxu3 %v525_v60  ;;  %v421_v33 = vld [vmem:[%s4875_s6 + $0x498] sm:$0xff]  ;;  %v455_v51 = vld [vmem:[%s4875_s6 + $0x5a8] sm:$0xff] }
 0x239   : > { %3411 = vmatpush.msrb.mxu0 %v425_v3  ;;  %3430 = vmatpush.msrb.mxu1 %v459_v6  ;;  %v485_v54 = vld [vmem:[%s4875_s6 + $0x698] sm:$0xff]  ;;  %v519_v13 = vld [vmem:[%s4875_s6 + $0x7a8] sm:$0xff] }
 0x23a   : > { %3451 = vmatpush.msrb.mxu2 %v489_v30  ;;  %3470 = vmatpush.msrb.mxu3 %v523_v23  ;;  %v419_v7 = vld [vmem:[%s4875_s6 + $0x488] sm:$0xff]  ;;  %v453_v58 = vld [vmem:[%s4875_s6 + $0x598] sm:$0xff] }
 0x23b   : > { %3412 = vmatpush.msrb.mxu0 %v423_v12  ;;  %3431 = vmatpush.msrb.mxu1 %v457_v49  ;;  %v483_v59 = vld [vmem:[%s4875_s6 + $0x688] sm:$0xff]  ;;  %v517_v60 = vld [vmem:[%s4875_s6 + $0x798] sm:$0xff] }
 0x23c   : > { %3452 = vmatpush.msrb.mxu2 %v487_v57  ;;  %3471 = vmatpush.msrb.mxu3 %v521_v32  ;;  %v417_v3 = vld [vmem:[%s4875_s6 + $0x478] sm:$0xff]  ;;  %v451_v6 = vld [vmem:[%s4875_s6 + $0x588] sm:$0xff] }
 0x23d   : > { %3413 = vmatpush.msrb.mxu0 %v421_v33  ;;  %3432 = vmatpush.msrb.mxu1 %v455_v51  ;;  %v481_v30 = vld [vmem:[%s4875_s6 + $0x678] sm:$0xff]  ;;  %v515_v23 = vld [vmem:[%s4875_s6 + $0x788] sm:$0xff] }
 0x23e   : > { %3453 = vmatpush.msrb.mxu2 %v485_v54  ;;  %3472 = vmatpush.msrb.mxu3 %v519_v13  ;;  %v415_v12 = vld [vmem:[%s4875_s6 + $0x468] sm:$0xff]  ;;  %v449_v49 = vld [vmem:[%s4875_s6 + $0x578] sm:$0xff] }
 0x23f   : > { %3414 = vmatpush.msrb.mxu0 %v419_v7  ;;  %3433 = vmatpush.msrb.mxu1 %v453_v58  ;;  %v479_v57 = vld [vmem:[%s4875_s6 + $0x668] sm:$0xff]  ;;  %v513_v32 = vld [vmem:[%s4875_s6 + $0x778] sm:$0xff] }
 0x240   : > { %3454 = vmatpush.msrb.mxu2 %v483_v59  ;;  %3473 = vmatpush.msrb.mxu3 %v517_v60  ;;  %v413_v33 = vld [vmem:[%s4875_s6 + $0x458] sm:$0xff]  ;;  %v447_v51 = vld [vmem:[%s4875_s6 + $0x568] sm:$0xff] }
 0x241   : > { %3415 = vmatpush.msrb.mxu0 %v417_v3  ;;  %3434 = vmatpush.msrb.mxu1 %v451_v6  ;;  %v477_v54 = vld [vmem:[%s4875_s6 + $0x658] sm:$0xff]  ;;  %v511_v13 = vld [vmem:[%s4875_s6 + $0x768] sm:$0xff] }
 0x242   : > { %3455 = vmatpush.msrb.mxu2 %v481_v30  ;;  %3474 = vmatpush.msrb.mxu3 %v515_v23  ;;  %v411_v7 = vld [vmem:[%s4875_s6 + $0x448] sm:$0xff]  ;;  %v445_v58 = vld [vmem:[%s4875_s6 + $0x558] sm:$0xff] }
 0x243   : > { %3416 = vmatpush.msrb.mxu0 %v415_v12  ;;  %3435 = vmatpush.msrb.mxu1 %v449_v49  ;;  %v475_v59 = vld [vmem:[%s4875_s6 + $0x648] sm:$0xff]  ;;  %v509_v60 = vld [vmem:[%s4875_s6 + $0x758] sm:$0xff] }
 0x244   : > { %3456 = vmatpush.msrb.mxu2 %v479_v57  ;;  %3475 = vmatpush.msrb.mxu3 %v513_v32  ;;  %v409_v3 = vld [vmem:[%s4875_s6 + $0x438] sm:$0xff]  ;;  %v443_v6 = vld [vmem:[%s4875_s6 + $0x548] sm:$0xff] }
 0x245   : > { %3417 = vmatpush.msrb.mxu0 %v413_v33  ;;  %3436 = vmatpush.msrb.mxu1 %v447_v51  ;;  %v473_v30 = vld [vmem:[%s4875_s6 + $0x638] sm:$0xff]  ;;  %v507_v23 = vld [vmem:[%s4875_s6 + $0x748] sm:$0xff] }
 0x246   : > { %3457 = vmatpush.msrb.mxu2 %v477_v54  ;;  %3476 = vmatpush.msrb.mxu3 %v511_v13  ;;  %v407_v12 = vld [vmem:[%s4875_s6 + $0x428] sm:$0xff]  ;;  %v441_v49 = vld [vmem:[%s4875_s6 + $0x538] sm:$0xff] }
 0x247   : > { %3418 = vmatpush.msrb.mxu0 %v411_v7  ;;  %3437 = vmatpush.msrb.mxu1 %v445_v58  ;;  %v471_v32 = vld [vmem:[%s4875_s6 + $0x628] sm:$0xff]  ;;  %v505_v33 = vld [vmem:[%s4875_s6 + $0x738] sm:$0xff] }
 0x248   : > { %3458 = vmatpush.msrb.mxu2 %v475_v59  ;;  %3477 = vmatpush.msrb.mxu3 %v509_v60  ;;  %v3104_v57 = vpop.f32.mrf.mxu0  ;;  %v405_v54 = vld [vmem:[%s4875_s6 + $0x418] sm:$0xff]  ;;  %v439_v13 = vld [vmem:[%s4875_s6 + $0x528] sm:$0xff] }
 0x249   : > { %3419 = vmatpush.msrb.mxu0 %v409_v3  ;;  %3438 = vmatpush.msrb.mxu1 %v443_v6  ;;  %v3105_v51 = vadd.f32 %v3104_v57, %v6041_v22  ;;  %v469_v7 = vld [vmem:[%s4875_s6 + $0x618] sm:$0xff]  ;;  %v503_v58 = vld [vmem:[%s4875_s6 + $0x728] sm:$0xff] }
 0x24a   : > { %3459 = vmatpush.msrb.mxu2 %v473_v30  ;;  %3478 = vmatpush.msrb.mxu3 %v507_v23  ;;  %v403_v60 = vld [vmem:[%s4875_s6 + $0x408] sm:$0xff]  ;;  %v437_v22 = vld [vmem:[%s4875_s6 + $0x518] sm:$0xff] }
 0x24b   : > { %3420 = vmatpush.msrb.mxu0 %v407_v12  ;;  %3439 = vmatpush.msrb.mxu1 %v441_v49  ;;  %v3124_v59 = vpop.f32.mrf.mxu1  ;;  %v467_v6 = vld [vmem:[%s4875_s6 + $0x608] sm:$0xff]  ;;  %v501_v30 = vld [vmem:[%s4875_s6 + $0x718] sm:$0xff] }
 0x24c   : > { %3460 = vmatpush.msrb.mxu2 %v471_v32  ;;  %3479 = vmatpush.msrb.mxu3 %v505_v33  ;;  %v3125_v3 = vadd.f32 %v3124_v59, %v3105_v51  ;;  %v561_v12 = vld [vmem:[%s4875_s6 + $0x8f8] sm:$0xff]  ;;  %v435_v32 = vld [vmem:[%s4875_s6 + $0x508] sm:$0xff] }
 0x24d   : > { %3421 = vmatpush.msrb.mxu0 %v405_v54  ;;  %3440 = vmatpush.msrb.mxu1 %v439_v13  ;;  %v625_v57 = vld [vmem:[%s4875_s6 + $0xaf8] sm:$0xff]  ;;  %v499_v33 = vld [vmem:[%s4875_s6 + $0x708] sm:$0xff] }
 0x24e   : > { %3461 = vmatpush.msrb.mxu2 %v469_v7  ;;  %3480 = vmatpush.msrb.mxu3 %v503_v58  ;;  %v3144_v23 = vpop.f32.mrf.mxu2  ;;  %v593_v54 = vld [vmem:[%s4875_s6 + $0x9f8] sm:$0xff]  ;;  %v623_v7 = vld [vmem:[%s4875_s6 + $0xae8] sm:$0xff] }
 0x24f   : > { %3383 = vmatmul.f32.vlgmr.msra.gmra.mxu2 %v5009_v45  ;;  %3422 = vmatpush.msrb.mxu0 %v403_v60  ;;  %v3145_v49 = vadd.f32 %v3144_v23, %v3125_v3  ;;  %v559_v45 = vld [vmem:[%s4875_s6 + $0x8e8] sm:$0xff]  ;;  %v657_v58 = vld [vmem:[%s4875_s6 + $0xbf8] sm:$0xff] }
 0x250   : > { %3441 = vmatpush.msrb.mxu1 %v437_v22  ;;  %3462 = vmatpush.msrb.mxu2 %v467_v6  ;;  %v591_v59 = vld [vmem:[%s4875_s6 + $0x9e8] sm:$0xff]  ;;  %v589_v22 = vld [vmem:[%s4875_s6 + $0x9d8] sm:$0xff] }
 0x251   : > { %3481 = vmatpush.msrb.mxu3 %v501_v30  ;;  %3343 = vmatmul.f32.vlgmr.msra.gmra.mxu0 %v5011_v46  ;;  %v3164_v51 = vpop.f32.mrf.mxu3  ;;  %v557_v46 = vld [vmem:[%s4875_s6 + $0x8d8] sm:$0xff]  ;;  %v655_v60 = vld [vmem:[%s4875_s6 + $0xbe8] sm:$0xff] }
 0x252   : > { %3403 = vmatmul.f32.vlgmr.msra.gmra.mxu3 %v5013_v47  ;;  %3487 = vmatpush.msra.mxu0 %v561_v12  ;;  %v6111_v13 = vadd.f32 %v3164_v51, %v3145_v49  ;;  %v621_v47 = vld [vmem:[%s4875_s6 + $0xad8] sm:$0xff]  ;;  %v555_v3 = vld [vmem:[%s4875_s6 + $0x8c8] sm:$0xff] }
 0x253   : > { %3527 = vmatpush.msra.mxu2 %v625_v57  ;;  %3442 = vmatpush.msrb.mxu1 %v435_v32  ;;  %v619_v6 = vld [vmem:[%s4875_s6 + $0xac8] sm:$0xff]  ;;  %v553_v30 = vld [vmem:[%s4875_s6 + $0x8b8] sm:$0xff] }
 0x254   : > { %3482 = vmatpush.msrb.mxu3 %v499_v33  ;;  %3363 = vmatmul.f32.vlgmr.msra.gmra.mxu1 %v5015_v48  ;;  %v653_v48 = vld [vmem:[%s4875_s6 + $0xbd8] sm:$0xff]  ;;  %v587_v23 = vld [vmem:[%s4875_s6 + $0x9c8] sm:$0xff] }
 0x255   : > { %3488 = vmatpush.msra.mxu0 %v559_v45  ;;  %3507 = vmatpush.msra.mxu1 %v593_v54  ;;  %v617_v12 = vld [vmem:[%s4875_s6 + $0xab8] sm:$0xff]  ;;  %v651_v49 = vld [vmem:[%s4875_s6 + $0xbc8] sm:$0xff] }
 0x256   : > { %3528 = vmatpush.msra.mxu2 %v623_v7  ;;  %3547 = vmatpush.msra.mxu3 %v657_v58  ;;  %v585_v57 = vld [vmem:[%s4875_s6 + $0x9b8] sm:$0xff]  ;;  %v615_v32 = vld [vmem:[%s4875_s6 + $0xaa8] sm:$0xff] }
 0x257   : > { %3489 = vmatpush.msra.mxu0 %v557_v46  ;;  %3508 = vmatpush.msra.mxu1 %v591_v59  ;;  %v649_v33 = vld [vmem:[%s4875_s6 + $0xbb8] sm:$0xff]  ;;  %v583_v51 = vld [vmem:[%s4875_s6 + $0x9a8] sm:$0xff] }
 0x258   : > { %3529 = vmatpush.msra.mxu2 %v621_v47  ;;  %3548 = vmatpush.msra.mxu3 %v655_v60  ;;  %v647_v45 = vld [vmem:[%s4875_s6 + $0xba8] sm:$0xff]  ;;  %v581_v7 = vld [vmem:[%s4875_s6 + $0x998] sm:$0xff] }
 0x259   : > { %3463 = vmatmul.f32.vlgmr.msrb.gmra.mxu2 %v5029_v61  ;;  %3490 = vmatpush.msra.mxu0 %v555_v3  ;;  %v551_v61 = vld [vmem:[%s4875_s6 + $0x8a8] sm:$0xff]  ;;  %v545_v46 = vld [vmem:[%s4875_s6 + $0x878] sm:$0xff] }
 0x25a   : > { %3509 = vmatpush.msra.mxu1 %v589_v22  ;;  %3530 = vmatpush.msra.mxu2 %v619_v6  ;;  %v547_v54 = vld [vmem:[%s4875_s6 + $0x888] sm:$0xff]  ;;  %v609_v47 = vld [vmem:[%s4875_s6 + $0xa78] sm:$0xff] }
 0x25b   : > { %3549 = vmatpush.msra.mxu3 %v653_v48  ;;  %3423 = vmatmul.f32.vlgmr.msrb.gmra.mxu0 %v5031_v62  ;;  %v549_v62 = vld [vmem:[%s4875_s6 + $0x898] sm:$0xff]  ;;  %v611_v58 = vld [vmem:[%s4875_s6 + $0xa88] sm:$0xff] }
 0x25c   : > { %3483 = vmatmul.f32.vlgmr.msrb.gmra.mxu3 %v5033_v63  ;;  %3491 = vmatpush.msra.mxu0 %v553_v30  ;;  %v613_v63 = vld [vmem:[%s4875_s6 + $0xa98] sm:$0xff]  ;;  %v579_v59 = vld [vmem:[%s4875_s6 + $0x988] sm:$0xff] }
 0x25d   : > { %3510 = vmatpush.msra.mxu1 %v587_v23  ;;  %3531 = vmatpush.msra.mxu2 %v617_v12  ;;  %v643_v60 = vld [vmem:[%s4875_s6 + $0xb88] sm:$0xff]  ;;  %v577_v22 = vld [vmem:[%s4875_s6 + $0x978] sm:$0xff] }
 0x25e   : > { %3550 = vmatpush.msra.mxu3 %v651_v49  ;;  %3443 = vmatmul.f32.vlgmr.msrb.gmra.mxu1 %v5035_v0  ;;  %v645_v0 = vld [vmem:[%s4875_s6 + $0xb98] sm:$0xff]  ;;  %v543_v3 = vld [vmem:[%s4875_s6 + $0x868] sm:$0xff] }
 0x25f   : > { %3492 = vmatpush.msra.mxu0 %v551_v61  ;;  %3511 = vmatpush.msra.mxu1 %v585_v57  ;;  %v607_v6 = vld [vmem:[%s4875_s6 + $0xa68] sm:$0xff]  ;;  %v641_v48 = vld [vmem:[%s4875_s6 + $0xb78] sm:$0xff] }
 0x260   : > { %3532 = vmatpush.msra.mxu2 %v615_v32  ;;  %3551 = vmatpush.msra.mxu3 %v649_v33  ;;  %v541_v30 = vld [vmem:[%s4875_s6 + $0x858] sm:$0xff]  ;;  %v575_v23 = vld [vmem:[%s4875_s6 + $0x968] sm:$0xff] }
 0x261   : > { %3493 = vmatpush.msra.mxu0 %v549_v62  ;;  %3512 = vmatpush.msra.mxu1 %v583_v51  ;;  %v605_v12 = vld [vmem:[%s4875_s6 + $0xa58] sm:$0xff]  ;;  %v639_v49 = vld [vmem:[%s4875_s6 + $0xb68] sm:$0xff] }
 0x262   : > { %3533 = vmatpush.msra.mxu2 %v613_v63  ;;  %3552 = vmatpush.msra.mxu3 %v647_v45  ;;  %v539_v61 = vld [vmem:[%s4875_s6 + $0x848] sm:$0xff]  ;;  %v573_v57 = vld [vmem:[%s4875_s6 + $0x958] sm:$0xff] }
 0x263   : > { %3494 = vmatpush.msra.mxu0 %v547_v54  ;;  %3513 = vmatpush.msra.mxu1 %v581_v7  ;;  %v603_v32 = vld [vmem:[%s4875_s6 + $0xa48] sm:$0xff]  ;;  %v637_v33 = vld [vmem:[%s4875_s6 + $0xb58] sm:$0xff] }
 0x264   : > { %3534 = vmatpush.msra.mxu2 %v611_v58  ;;  %3553 = vmatpush.msra.mxu3 %v645_v0  ;;  %v537_v62 = vld [vmem:[%s4875_s6 + $0x838] sm:$0xff]  ;;  %v571_v51 = vld [vmem:[%s4875_s6 + $0x948] sm:$0xff] }
 0x265   : > { %3495 = vmatpush.msra.mxu0 %v545_v46  ;;  %3514 = vmatpush.msra.mxu1 %v579_v59  ;;  %v601_v45 = vld [vmem:[%s4875_s6 + $0xa38] sm:$0xff]  ;;  %v635_v54 = vld [vmem:[%s4875_s6 + $0xb48] sm:$0xff] }
 0x266   : > { %3535 = vmatpush.msra.mxu2 %v609_v47  ;;  %3554 = vmatpush.msra.mxu3 %v643_v60  ;;  %v535_v58 = vld [vmem:[%s4875_s6 + $0x828] sm:$0xff]  ;;  %v569_v0 = vld [vmem:[%s4875_s6 + $0x938] sm:$0xff] }
 0x267   : > { %3496 = vmatpush.msra.mxu0 %v543_v3  ;;  %3515 = vmatpush.msra.mxu1 %v577_v22  ;;  %v599_v46 = vld [vmem:[%s4875_s6 + $0xa28] sm:$0xff]  ;;  %v633_v59 = vld [vmem:[%s4875_s6 + $0xb38] sm:$0xff] }
 0x268   : > { %3536 = vmatpush.msra.mxu2 %v607_v6  ;;  %3555 = vmatpush.msra.mxu3 %v641_v48  ;;  %v533_v60 = vld [vmem:[%s4875_s6 + $0x818] sm:$0xff]  ;;  %v567_v3 = vld [vmem:[%s4875_s6 + $0x928] sm:$0xff] }
 0x269   : > { %3497 = vmatpush.msra.mxu0 %v541_v30  ;;  %3516 = vmatpush.msra.mxu1 %v575_v23  ;;  %v597_v22 = vld [vmem:[%s4875_s6 + $0xa18] sm:$0xff]  ;;  %v631_v6 = vld [vmem:[%s4875_s6 + $0xb28] sm:$0xff] }
 0x26a   : > { %3537 = vmatpush.msra.mxu2 %v605_v12  ;;  %3556 = vmatpush.msra.mxu3 %v639_v49  ;;  %v3184_v63 = vpop.f32.mrf.mxu0  ;;  %v531_v48 = vld [vmem:[%s4875_s6 + $0x808] sm:$0xff]  ;;  %v565_v30 = vld [vmem:[%s4875_s6 + $0x918] sm:$0xff] }
 0x26b   : > { %3498 = vmatpush.msra.mxu0 %v539_v61  ;;  %3517 = vmatpush.msra.mxu1 %v573_v57  ;;  %v3185_v7 = vadd.f32 %v3184_v63, %v6111_v13  ;;  %v595_v12 = vld [vmem:[%s4875_s6 + $0xa08] sm:$0xff]  ;;  %v629_v49 = vld [vmem:[%s4875_s6 + $0xb18] sm:$0xff] }
 0x26c   : > { %3538 = vmatpush.msra.mxu2 %v603_v32  ;;  %3557 = vmatpush.msra.mxu3 %v637_v33  ;;  %v689_v57 = vld [vmem:[%s4875_s6 + $0xcf8] sm:$0xff] }
 0x26d   : > { %3499 = vmatpush.msra.mxu0 %v537_v62  ;;  %3518 = vmatpush.msra.mxu1 %v571_v51  ;;  %v3204_v47 = vpop.f32.mrf.mxu1  ;;  %v753_v32 = vld [vmem:[%s4875_s6 + $0xef8] sm:$0xff]  ;;  %v563_v62 = vld [vmem:[%s4875_s6 + $0x908] sm:$0xff] }
 0x26e   : > { %3539 = vmatpush.msra.mxu2 %v601_v45  ;;  %3558 = vmatpush.msra.mxu3 %v635_v54  ;;  %v3205_v13 = vadd.f32 %v3204_v47, %v3185_v7  ;;  %v627_v51 = vld [vmem:[%s4875_s6 + $0xb08] sm:$0xff]  ;;  %v721_v54 = vld [vmem:[%s4875_s6 + $0xdf8] sm:$0xff] }
 0x26f   : > { %3500 = vmatpush.msra.mxu0 %v535_v58  ;;  %3519 = vmatpush.msra.mxu1 %v569_v0  ;;  %v687_v45 = vld [vmem:[%s4875_s6 + $0xce8] sm:$0xff]  ;;  %v785_v58 = vld [vmem:[%s4875_s6 + $0xff8] sm:$0xff] }
 0x270   : > { %3540 = vmatpush.msra.mxu2 %v599_v46  ;;  %3559 = vmatpush.msra.mxu3 %v633_v59  ;;  %v3224_v23 = vpop.f32.mrf.mxu2  ;;  %v751_v7 = vld [vmem:[%s4875_s6 + $0xee8] sm:$0xff]  ;;  %v749_v0 = vld [vmem:[%s4875_s6 + $0xed8] sm:$0xff] }
 0x271   : > { %3501 = vmatpush.msra.mxu0 %v533_v60  ;;  %3520 = vmatpush.msra.mxu1 %v567_v3  ;;  %v3225_v61 = vadd.f32 %v3224_v23, %v3205_v13  ;;  %v783_v46 = vld [vmem:[%s4875_s6 + $0xfe8] sm:$0xff]  ;;  %v717_v47 = vld [vmem:[%s4875_s6 + $0xdd8] sm:$0xff] }
 0x272   : > { %3541 = vmatpush.msra.mxu2 %v597_v22  ;;  %3560 = vmatpush.msra.mxu3 %v631_v6  ;;  %v683_v59 = vld [vmem:[%s4875_s6 + $0xcc8] sm:$0xff]  ;;  %v681_v60 = vld [vmem:[%s4875_s6 + $0xcb8] sm:$0xff] }
 0x273   : > { %3502 = vmatpush.msra.mxu0 %v531_v48  ;;  %3521 = vmatpush.msra.mxu1 %v565_v30  ;;  %v3244_v33 = vpop.f32.mrf.mxu3  ;;  %v715_v3 = vld [vmem:[%s4875_s6 + $0xdc8] sm:$0xff]  ;;  %v745_v13 = vld [vmem:[%s4875_s6 + $0xeb8] sm:$0xff] }
 0x274   : > { %3542 = vmatpush.msra.mxu2 %v595_v12  ;;  %3561 = vmatpush.msra.mxu3 %v629_v49  ;;  %v6181_v63 = vadd.f32 %v3244_v33, %v3225_v61  ;;  %v779_v22 = vld [vmem:[%s4875_s6 + $0xfc8] sm:$0xff]  ;;  %v713_v48 = vld [vmem:[%s4875_s6 + $0xdb8] sm:$0xff] }
 0x275   : > { %3503 = vmatmul.f32.vlgmr.msra.gmra.mxu0 %v5066_v26  ;;  %3543 = vmatmul.f32.vlgmr.msra.gmra.mxu2 %v5068_v27  ;;  %v685_v26 = vld [vmem:[%s4875_s6 + $0xcd8] sm:$0xff]  ;;  %v719_v27 = vld [vmem:[%s4875_s6 + $0xde8] sm:$0xff] }
 0x276   : > { %3567 = vmatpush.msrb.mxu0 %v689_v57  ;;  %3607 = vmatpush.msrb.mxu2 %v753_v32  ;;  %v679_v6 = vld [vmem:[%s4875_s6 + $0xca8] sm:$0xff]  ;;  %v777_v23 = vld [vmem:[%s4875_s6 + $0xfb8] sm:$0xff] }
 0x277   : > { %3522 = vmatpush.msra.mxu1 %v563_v62  ;;  %3562 = vmatpush.msra.mxu3 %v627_v51  ;;  %v743_v30 = vld [vmem:[%s4875_s6 + $0xea8] sm:$0xff]  ;;  %v677_v12 = vld [vmem:[%s4875_s6 + $0xc98] sm:$0xff] }
 0x278   : > { %3523 = vmatmul.f32.vlgmr.msra.gmra.mxu1 %v5070_v28  ;;  %3563 = vmatmul.f32.vlgmr.msra.gmra.mxu3 %v5074_v31  ;;  %v747_v28 = vld [vmem:[%s4875_s6 + $0xec8] sm:$0xff]  ;;  %v781_v31 = vld [vmem:[%s4875_s6 + $0xfd8] sm:$0xff] }
 0x279   : > { %3568 = vmatpush.msrb.mxu0 %v687_v45  ;;  %3587 = vmatpush.msrb.mxu1 %v721_v54  ;;  %v711_v49 = vld [vmem:[%s4875_s6 + $0xda8] sm:$0xff]  ;;  %v741_v61 = vld [vmem:[%s4875_s6 + $0xe98] sm:$0xff] }
 0x27a   : > { %3608 = vmatpush.msrb.mxu2 %v751_v7  ;;  %3627 = vmatpush.msrb.mxu3 %v785_v58  ;;  %v775_v57 = vld [vmem:[%s4875_s6 + $0xfa8] sm:$0xff]  ;;  %v709_v33 = vld [vmem:[%s4875_s6 + $0xd98] sm:$0xff] }
 0x27b   : > { %3569 = vmatpush.msrb.mxu0 %v685_v26  ;;  %3588 = vmatpush.msrb.mxu1 %v719_v27  ;;  %v675_v32 = vld [vmem:[%s4875_s6 + $0xc88] sm:$0xff]  ;;  %v773_v51 = vld [vmem:[%s4875_s6 + $0xf98] sm:$0xff] }
 0x27c   : > { %3609 = vmatpush.msrb.mxu2 %v749_v0  ;;  %3628 = vmatpush.msrb.mxu3 %v783_v46  ;;  %v739_v62 = vld [vmem:[%s4875_s6 + $0xe88] sm:$0xff]  ;;  %v673_v45 = vld [vmem:[%s4875_s6 + $0xc78] sm:$0xff] }
 0x27d   : > { %3570 = vmatpush.msrb.mxu0 %v683_v59  ;;  %3589 = vmatpush.msrb.mxu1 %v717_v47  ;;  %v707_v54 = vld [vmem:[%s4875_s6 + $0xd88] sm:$0xff]  ;;  %v737_v7 = vld [vmem:[%s4875_s6 + $0xe78] sm:$0xff] }
 0x27e   : > { %3610 = vmatpush.msrb.mxu2 %v747_v28  ;;  %3629 = vmatpush.msrb.mxu3 %v781_v31  ;;  %v771_v58 = vld [vmem:[%s4875_s6 + $0xf88] sm:$0xff]  ;;  %v705_v27 = vld [vmem:[%s4875_s6 + $0xd78] sm:$0xff] }
 0x27f   : > { %3571 = vmatpush.msrb.mxu0 %v681_v60  ;;  %3590 = vmatpush.msrb.mxu1 %v715_v3  ;;  %v671_v26 = vld [vmem:[%s4875_s6 + $0xc68] sm:$0xff]  ;;  %v769_v46 = vld [vmem:[%s4875_s6 + $0xf78] sm:$0xff] }
 0x280   : > { %3611 = vmatpush.msrb.mxu2 %v745_v13  ;;  %3630 = vmatpush.msrb.mxu3 %v779_v22  ;;  %v735_v0 = vld [vmem:[%s4875_s6 + $0xe68] sm:$0xff]  ;;  %v669_v59 = vld [vmem:[%s4875_s6 + $0xc58] sm:$0xff] }
 0x281   : > { %3572 = vmatpush.msrb.mxu0 %v679_v6  ;;  %3591 = vmatpush.msrb.mxu1 %v713_v48  ;;  %v703_v47 = vld [vmem:[%s4875_s6 + $0xd68] sm:$0xff]  ;;  %v733_v28 = vld [vmem:[%s4875_s6 + $0xe58] sm:$0xff] }
 0x282   : > { %3612 = vmatpush.msrb.mxu2 %v743_v30  ;;  %3631 = vmatpush.msrb.mxu3 %v777_v23  ;;  %v767_v31 = vld [vmem:[%s4875_s6 + $0xf68] sm:$0xff]  ;;  %v701_v3 = vld [vmem:[%s4875_s6 + $0xd58] sm:$0xff] }
 0x283   : > { %3573 = vmatpush.msrb.mxu0 %v677_v12  ;;  %3592 = vmatpush.msrb.mxu1 %v711_v49  ;;  %v667_v60 = vld [vmem:[%s4875_s6 + $0xc48] sm:$0xff]  ;;  %v765_v22 = vld [vmem:[%s4875_s6 + $0xf58] sm:$0xff] }
 0x284   : > { %3613 = vmatpush.msrb.mxu2 %v741_v61  ;;  %3632 = vmatpush.msrb.mxu3 %v775_v57  ;;  %v731_v13 = vld [vmem:[%s4875_s6 + $0xe48] sm:$0xff]  ;;  %v665_v6 = vld [vmem:[%s4875_s6 + $0xc38] sm:$0xff] }
 0x285   : > { %3574 = vmatpush.msrb.mxu0 %v675_v32  ;;  %3593 = vmatpush.msrb.mxu1 %v709_v33  ;;  %v699_v48 = vld [vmem:[%s4875_s6 + $0xd48] sm:$0xff]  ;;  %v729_v23 = vld [vmem:[%s4875_s6 + $0xe38] sm:$0xff] }
 0x286   : > { %3614 = vmatpush.msrb.mxu2 %v739_v62  ;;  %3633 = vmatpush.msrb.mxu3 %v773_v51  ;;  %v763_v12 = vld [vmem:[%s4875_s6 + $0xf48] sm:$0xff]  ;;  %v697_v57 = vld [vmem:[%s4875_s6 + $0xd38] sm:$0xff] }
 0x287   : > { %3575 = vmatpush.msrb.mxu0 %v673_v45  ;;  %3594 = vmatpush.msrb.mxu1 %v707_v54  ;;  %v663_v61 = vld [vmem:[%s4875_s6 + $0xc28] sm:$0xff]  ;;  %v761_v33 = vld [vmem:[%s4875_s6 + $0xf38] sm:$0xff] }
 0x288   : > { %3615 = vmatpush.msrb.mxu2 %v737_v7  ;;  %3634 = vmatpush.msrb.mxu3 %v771_v58  ;;  %v727_v32 = vld [vmem:[%s4875_s6 + $0xe28] sm:$0xff]  ;;  %v661_v51 = vld [vmem:[%s4875_s6 + $0xc18] sm:$0xff] }
 0x289   : > { %3576 = vmatpush.msrb.mxu0 %v671_v26  ;;  %3595 = vmatpush.msrb.mxu1 %v705_v27  ;;  %v695_v45 = vld [vmem:[%s4875_s6 + $0xd28] sm:$0xff]  ;;  %v693_v26 = vld [vmem:[%s4875_s6 + $0xd18] sm:$0xff] }
 0x28a   : > { %3616 = vmatpush.msrb.mxu2 %v735_v0  ;;  %3635 = vmatpush.msrb.mxu3 %v769_v46  ;;  %v759_v54 = vld [vmem:[%s4875_s6 + $0xf28] sm:$0xff]  ;;  %v757_v46 = vld [vmem:[%s4875_s6 + $0xf18] sm:$0xff] }
 0x28b   : > { %3577 = vmatpush.msrb.mxu0 %v669_v59  ;;  %3596 = vmatpush.msrb.mxu1 %v703_v47  ;;  %v659_v58 = vld [vmem:[%s4875_s6 + $0xc08] sm:$0xff]  ;;  %v817_v47 = vld [vmem:[%s4875_s6 + $0x10f8] sm:$0xff] }
 0x28c   : > { %3617 = vmatpush.msrb.mxu2 %v733_v28  ;;  %3636 = vmatpush.msrb.mxu3 %v767_v31  ;;  %v3264_v30 = vpop.f32.mrf.mxu0  ;;  %v723_v0 = vld [vmem:[%s4875_s6 + $0xe08] sm:$0xff]  ;;  %v881_v28 = vld [vmem:[%s4875_s6 + $0x12f8] sm:$0xff] }
 0x28d   : > { %3578 = vmatpush.msrb.mxu0 %v667_v60  ;;  %3597 = vmatpush.msrb.mxu1 %v701_v3  ;;  %v3265_v49 = vadd.f32 %v3264_v30, %v6181_v63  ;;  %v725_v63 = vld [vmem:[%s4875_s6 + $0xe18] sm:$0xff]  ;;  %v691_v60 = vld [vmem:[%s4875_s6 + $0xd08] sm:$0xff] }
 0x28e   : > { %3618 = vmatpush.msrb.mxu2 %v731_v13  ;;  %3637 = vmatpush.msrb.mxu3 %v765_v22  ;;  %v755_v3 = vld [vmem:[%s4875_s6 + $0xf08] sm:$0xff]  ;;  %v913_v30 = vld [vmem:[%s4875_s6 + $0x13f8] sm:$0xff] }
 0x28f   : > { %3579 = vmatpush.msrb.mxu0 %v665_v6  ;;  %3598 = vmatpush.msrb.mxu1 %v699_v48  ;;  %v3284_v62 = vpop.f32.mrf.mxu1  ;;  %v815_v22 = vld [vmem:[%s4875_s6 + $0x10e8] sm:$0xff]  ;;  %v849_v6 = vld [vmem:[%s4875_s6 + $0x11f8] sm:$0xff] }
 0x290   : > { %3619 = vmatpush.msrb.mxu2 %v729_v23  ;;  %3638 = vmatpush.msrb.mxu3 %v763_v12  ;;  %v3285_v7 = vadd.f32 %v3284_v62, %v3265_v49  ;;  %v879_v48 = vld [vmem:[%s4875_s6 + $0x12e8] sm:$0xff]  ;;  %v877_v23 = vld [vmem:[%s4875_s6 + $0x12d8] sm:$0xff] }
 0x291   : > { %3580 = vmatpush.msrb.mxu0 %v663_v61  ;;  %3599 = vmatpush.msrb.mxu1 %v697_v57  ;;  %v911_v12 = vld [vmem:[%s4875_s6 + $0x13e8] sm:$0xff]  ;;  %v845_v61 = vld [vmem:[%s4875_s6 + $0x11d8] sm:$0xff] }
 0x292   : > { %3620 = vmatpush.msrb.mxu2 %v727_v32  ;;  %3639 = vmatpush.msrb.mxu3 %v761_v33  ;;  %v3304_v27 = vpop.f32.mrf.mxu2  ;;  %v811_v49 = vld [vmem:[%s4875_s6 + $0x10c8] sm:$0xff]  ;;  %v809_v57 = vld [vmem:[%s4875_s6 + $0x10b8] sm:$0xff] }
 0x293   : > { %3581 = vmatpush.msrb.mxu0 %v661_v51  ;;  %3600 = vmatpush.msrb.mxu1 %v695_v45  ;;  %v3305_v59 = vadd.f32 %v3304_v27, %v3285_v7  ;;  %v843_v32 = vld [vmem:[%s4875_s6 + $0x11c8] sm:$0xff]  ;;  %v873_v33 = vld [vmem:[%s4875_s6 + $0x12b8] sm:$0xff] }
 0x294   : > { %3621 = vmatpush.msrb.mxu2 %v725_v63  ;;  %3640 = vmatpush.msrb.mxu3 %v759_v54  ;;  %v907_v62 = vld [vmem:[%s4875_s6 + $0x13c8] sm:$0xff]  ;;  %v841_v45 = vld [vmem:[%s4875_s6 + $0x11b8] sm:$0xff] }
 0x295   : > { %3582 = vmatpush.msrb.mxu0 %v659_v58  ;;  %3601 = vmatpush.msrb.mxu1 %v693_v26  ;;  %v3324_v31 = vpop.f32.mrf.mxu3  ;;  %v807_v51 = vld [vmem:[%s4875_s6 + $0x10a8] sm:$0xff]  ;;  %v905_v54 = vld [vmem:[%s4875_s6 + $0x13b8] sm:$0xff] }
 0x296   : > { %3622 = vmatpush.msrb.mxu2 %v723_v0  ;;  %3641 = vmatpush.msrb.mxu3 %v757_v46  ;;  %v6252_v13 = vadd.f32 %v3324_v31, %v3305_v59  ;;  %v871_v63 = vld [vmem:[%s4875_s6 + $0x12a8] sm:$0xff]  ;;  %v805_v7 = vld [vmem:[%s4875_s6 + $0x1098] sm:$0xff] }
 0x297   : > { %3583 = vmatmul.f32.vlgmr.msrb.gmra.mxu0 %v5145_v41  ;;  %3623 = vmatmul.f32.vlgmr.msrb.gmra.mxu2 %v5147_v42  ;;  %v813_v41 = vld [vmem:[%s4875_s6 + $0x10d8] sm:$0xff]  ;;  %v847_v42 = vld [vmem:[%s4875_s6 + $0x11e8] sm:$0xff] }
 0x298   : > { %3647 = vmatpush.msra.mxu0 %v817_v47  ;;  %3687 = vmatpush.msra.mxu2 %v881_v28  ;;  %v839_v58 = vld [vmem:[%s4875_s6 + $0x11a8] sm:$0xff]  ;;  %v869_v26 = vld [vmem:[%s4875_s6 + $0x1298] sm:$0xff] }
 0x299   : > { %3602 = vmatpush.msrb.mxu1 %v691_v60  ;;  %3642 = vmatpush.msrb.mxu3 %v755_v3  ;;  %v903_v27 = vld [vmem:[%s4875_s6 + $0x13a8] sm:$0xff]  ;;  %v837_v46 = vld [vmem:[%s4875_s6 + $0x1198] sm:$0xff] }
 0x29a   : > { %3603 = vmatmul.f32.vlgmr.msrb.gmra.mxu1 %v5149_v43  ;;  %3643 = vmatmul.f32.vlgmr.msrb.gmra.mxu3 %v5153_v50  ;;  %v875_v43 = vld [vmem:[%s4875_s6 + $0x12c8] sm:$0xff]  ;;  %v909_v50 = vld [vmem:[%s4875_s6 + $0x13d8] sm:$0xff] }
 0x29b   : > { %3648 = vmatpush.msra.mxu0 %v815_v22  ;;  %3667 = vmatpush.msra.mxu1 %v849_v6  ;;  %v803_v0 = vld [vmem:[%s4875_s6 + $0x1088] sm:$0xff]  ;;  %v901_v47 = vld [vmem:[%s4875_s6 + $0x1398] sm:$0xff] }
 0x29c   : > { %3688 = vmatpush.msra.mxu2 %v879_v48  ;;  %3707 = vmatpush.msra.mxu3 %v913_v30  ;;  %v867_v59 = vld [vmem:[%s4875_s6 + $0x1288] sm:$0xff]  ;;  %v801_v28 = vld [vmem:[%s4875_s6 + $0x1078] sm:$0xff] }
 0x29d   : > { %3649 = vmatpush.msra.mxu0 %v813_v41  ;;  %3668 = vmatpush.msra.mxu1 %v847_v42  ;;  %v835_v31 = vld [vmem:[%s4875_s6 + $0x1188] sm:$0xff]  ;;  %v865_v60 = vld [vmem:[%s4875_s6 + $0x1278] sm:$0xff] }
 0x29e   : > { %3689 = vmatpush.msra.mxu2 %v877_v23  ;;  %3708 = vmatpush.msra.mxu3 %v911_v12  ;;  %v899_v3 = vld [vmem:[%s4875_s6 + $0x1388] sm:$0xff]  ;;  %v833_v6 = vld [vmem:[%s4875_s6 + $0x1178] sm:$0xff] }
 0x29f   : > { %3650 = vmatpush.msra.mxu0 %v811_v49  ;;  %3669 = vmatpush.msra.mxu1 %v845_v61  ;;  %v799_v22 = vld [vmem:[%s4875_s6 + $0x1068] sm:$0xff]  ;;  %v897_v30 = vld [vmem:[%s4875_s6 + $0x1378] sm:$0xff] }
 0x2a0   : > { %3690 = vmatpush.msra.mxu2 %v875_v43  ;;  %3709 = vmatpush.msra.mxu3 %v909_v50  ;;  %v863_v48 = vld [vmem:[%s4875_s6 + $0x1268] sm:$0xff]  ;;  %v797_v41 = vld [vmem:[%s4875_s6 + $0x1058] sm:$0xff] }
 0x2a1   : > { %3651 = vmatpush.msra.mxu0 %v809_v57  ;;  %3670 = vmatpush.msra.mxu1 %v843_v32  ;;  %v831_v42 = vld [vmem:[%s4875_s6 + $0x1168] sm:$0xff]  ;;  %v861_v23 = vld [vmem:[%s4875_s6 + $0x1258] sm:$0xff] }
 0x2a2   : > { %3691 = vmatpush.msra.mxu2 %v873_v33  ;;  %3710 = vmatpush.msra.mxu3 %v907_v62  ;;  %v895_v12 = vld [vmem:[%s4875_s6 + $0x1368] sm:$0xff]  ;;  %v829_v61 = vld [vmem:[%s4875_s6 + $0x1158] sm:$0xff] }
 0x2a3   : > { %3652 = vmatpush.msra.mxu0 %v807_v51  ;;  %3671 = vmatpush.msra.mxu1 %v841_v45  ;;  %v795_v49 = vld [vmem:[%s4875_s6 + $0x1048] sm:$0xff]  ;;  %v893_v50 = vld [vmem:[%s4875_s6 + $0x1358] sm:$0xff] }
 0x2a4   : > { %3692 = vmatpush.msra.mxu2 %v871_v63  ;;  %3711 = vmatpush.msra.mxu3 %v905_v54  ;;  %v859_v43 = vld [vmem:[%s4875_s6 + $0x1248] sm:$0xff]  ;;  %v793_v57 = vld [vmem:[%s4875_s6 + $0x1038] sm:$0xff] }
 0x2a5   : > { %3653 = vmatpush.msra.mxu0 %v805_v7  ;;  %3672 = vmatpush.msra.mxu1 %v839_v58  ;;  %v827_v32 = vld [vmem:[%s4875_s6 + $0x1148] sm:$0xff]  ;;  %v857_v33 = vld [vmem:[%s4875_s6 + $0x1238] sm:$0xff] }
 0x2a6   : > { %3693 = vmatpush.msra.mxu2 %v869_v26  ;;  %3712 = vmatpush.msra.mxu3 %v903_v27  ;;  %v891_v62 = vld [vmem:[%s4875_s6 + $0x1348] sm:$0xff]  ;;  %v825_v45 = vld [vmem:[%s4875_s6 + $0x1138] sm:$0xff] }
 0x2a7   : > { %3654 = vmatpush.msra.mxu0 %v803_v0  ;;  %3673 = vmatpush.msra.mxu1 %v837_v46  ;;  %v791_v51 = vld [vmem:[%s4875_s6 + $0x1028] sm:$0xff]  ;;  %v889_v54 = vld [vmem:[%s4875_s6 + $0x1338] sm:$0xff] }
 0x2a8   : > { %3694 = vmatpush.msra.mxu2 %v867_v59  ;;  %3713 = vmatpush.msra.mxu3 %v901_v47  ;;  %v855_v63 = vld [vmem:[%s4875_s6 + $0x1228] sm:$0xff]  ;;  %v789_v7 = vld [vmem:[%s4875_s6 + $0x1018] sm:$0xff] }
 0x2a9   : > { %3655 = vmatpush.msra.mxu0 %v801_v28  ;;  %3674 = vmatpush.msra.mxu1 %v835_v31  ;;  %v823_v58 = vld [vmem:[%s4875_s6 + $0x1128] sm:$0xff]  ;;  %v853_v26 = vld [vmem:[%s4875_s6 + $0x1218] sm:$0xff] }
 0x2aa   : > { %3695 = vmatpush.msra.mxu2 %v865_v60  ;;  %3714 = vmatpush.msra.mxu3 %v899_v3  ;;  %v887_v27 = vld [vmem:[%s4875_s6 + $0x1328] sm:$0xff]  ;;  %v821_v46 = vld [vmem:[%s4875_s6 + $0x1118] sm:$0xff] }
 0x2ab   : > { %3656 = vmatpush.msra.mxu0 %v799_v22  ;;  %3675 = vmatpush.msra.mxu1 %v833_v6  ;;  %v787_v0 = vld [vmem:[%s4875_s6 + $0x1008] sm:$0xff]  ;;  %v885_v47 = vld [vmem:[%s4875_s6 + $0x1318] sm:$0xff] }
 0x2ac   : > { %3696 = vmatpush.msra.mxu2 %v863_v48  ;;  %3715 = vmatpush.msra.mxu3 %v897_v30  ;;  %v851_v59 = vld [vmem:[%s4875_s6 + $0x1208] sm:$0xff]  ;;  %v945_v28 = vld [vmem:[%s4875_s6 + $0x14f8] sm:$0xff] }
 0x2ad   : > { %3657 = vmatpush.msra.mxu0 %v797_v41  ;;  %3676 = vmatpush.msra.mxu1 %v831_v42  ;;  %v1009_v31 = vld [vmem:[%s4875_s6 + $0x16f8] sm:$0xff]  ;;  %v819_v60 = vld [vmem:[%s4875_s6 + $0x1108] sm:$0xff] }
 0x2ae   : > { %3697 = vmatpush.msra.mxu2 %v861_v23  ;;  %3716 = vmatpush.msra.mxu3 %v895_v12  ;;  %v883_v3 = vld [vmem:[%s4875_s6 + $0x1308] sm:$0xff]  ;;  %v977_v6 = vld [vmem:[%s4875_s6 + $0x15f8] sm:$0xff] }
 0x2af   : > { %3658 = vmatpush.msra.mxu0 %v795_v49  ;;  %3677 = vmatpush.msra.mxu1 %v829_v61  ;;  %v943_v22 = vld [vmem:[%s4875_s6 + $0x14e8] sm:$0xff]  ;;  %v1041_v30 = vld [vmem:[%s4875_s6 + $0x17f8] sm:$0xff] }
 0x2b0   : > { %3698 = vmatpush.msra.mxu2 %v859_v43  ;;  %3717 = vmatpush.msra.mxu3 %v893_v50  ;;  %v1007_v48 = vld [vmem:[%s4875_s6 + $0x16e8] sm:$0xff]  ;;  %v1005_v41 = vld [vmem:[%s4875_s6 + $0x16d8] sm:$0xff] }
 0x2b1   : > { %3659 = vmatpush.msra.mxu0 %v793_v57  ;;  %3678 = vmatpush.msra.mxu1 %v827_v32  ;;  %v1039_v42 = vld [vmem:[%s4875_s6 + $0x17e8] sm:$0xff]  ;;  %v973_v12 = vld [vmem:[%s4875_s6 + $0x15d8] sm:$0xff] }
 0x2b2   : > { %3699 = vmatpush.msra.mxu2 %v857_v33  ;;  %3718 = vmatpush.msra.mxu3 %v891_v62  ;;  %v939_v23 = vld [vmem:[%s4875_s6 + $0x14c8] sm:$0xff]  ;;  %v937_v49 = vld [vmem:[%s4875_s6 + $0x14b8] sm:$0xff] }
 0x2b3   : > { %3660 = vmatpush.msra.mxu0 %v791_v51  ;;  %3679 = vmatpush.msra.mxu1 %v825_v45  ;;  %v971_v61 = vld [vmem:[%s4875_s6 + $0x15c8] sm:$0xff]  ;;  %v1001_v43 = vld [vmem:[%s4875_s6 + $0x16b8] sm:$0xff] }
 0x2b4   : > { %3700 = vmatpush.msra.mxu2 %v855_v63  ;;  %3719 = vmatpush.msra.mxu3 %v889_v54  ;;  %v1035_v50 = vld [vmem:[%s4875_s6 + $0x17c8] sm:$0xff]  ;;  %v969_v32 = vld [vmem:[%s4875_s6 + $0x15b8] sm:$0xff] }
 0x2b5   : > { %3661 = vmatpush.msra.mxu0 %v789_v7  ;;  %3680 = vmatpush.msra.mxu1 %v823_v58  ;;  %v935_v57 = vld [vmem:[%s4875_s6 + $0x14a8] sm:$0xff]  ;;  %v1033_v62 = vld [vmem:[%s4875_s6 + $0x17b8] sm:$0xff] }
 0x2b6   : > { %3701 = vmatpush.msra.mxu2 %v853_v26  ;;  %3720 = vmatpush.msra.mxu3 %v887_v27  ;;  %v999_v33 = vld [vmem:[%s4875_s6 + $0x16a8] sm:$0xff]  ;;  %v933_v51 = vld [vmem:[%s4875_s6 + $0x1498] sm:$0xff] }
 0x2b7   : > { %3662 = vmatpush.msra.mxu0 %v787_v0  ;;  %3681 = vmatpush.msra.mxu1 %v821_v46  ;;  %v967_v45 = vld [vmem:[%s4875_s6 + $0x15a8] sm:$0xff]  ;;  %v997_v63 = vld [vmem:[%s4875_s6 + $0x1698] sm:$0xff] }
 0x2b8   : > { %3702 = vmatpush.msra.mxu2 %v851_v59  ;;  %3721 = vmatpush.msra.mxu3 %v885_v47  ;;  %v1031_v54 = vld [vmem:[%s4875_s6 + $0x17a8] sm:$0xff]  ;;  %v965_v58 = vld [vmem:[%s4875_s6 + $0x1598] sm:$0xff] }
 0x2b9   : > { %3663 = vmatmul.f32.vlgmr.msra.gmra.mxu0 %v5273_v9  ;;  %3703 = vmatmul.f32.vlgmr.msra.gmra.mxu2 %v5275_v10  ;;  %v941_v9 = vld [vmem:[%s4875_s6 + $0x14d8] sm:$0xff]  ;;  %v975_v10 = vld [vmem:[%s4875_s6 + $0x15e8] sm:$0xff] }
 0x2ba   : > { %3727 = vmatpush.msrb.mxu0 %v945_v28  ;;  %3767 = vmatpush.msrb.mxu2 %v1009_v31  ;;  %v931_v7 = vld [vmem:[%s4875_s6 + $0x1488] sm:$0xff]  ;;  %v1029_v27 = vld [vmem:[%s4875_s6 + $0x1798] sm:$0xff] }
 0x2bb   : > { %3682 = vmatpush.msra.mxu1 %v819_v60  ;;  %3722 = vmatpush.msra.mxu3 %v883_v3  ;;  %v995_v26 = vld [vmem:[%s4875_s6 + $0x1688] sm:$0xff]  ;;  %v929_v0 = vld [vmem:[%s4875_s6 + $0x1478] sm:$0xff] }
 0x2bc   : > { %3683 = vmatmul.f32.vlgmr.msra.gmra.mxu1 %v5283_v15  ;;  %3723 = vmatmul.f32.vlgmr.msra.gmra.mxu3 %v5285_v16  ;;  %v1003_v15 = vld [vmem:[%s4875_s6 + $0x16c8] sm:$0xff]  ;;  %v1037_v16 = vld [vmem:[%s4875_s6 + $0x17d8] sm:$0xff] }
 0x2bd   : > { %3728 = vmatpush.msrb.mxu0 %v943_v22  ;;  %3747 = vmatpush.msrb.mxu1 %v977_v6  ;;  %v963_v46 = vld [vmem:[%s4875_s6 + $0x1588] sm:$0xff]  ;;  %v993_v59 = vld [vmem:[%s4875_s6 + $0x1678] sm:$0xff] }
 0x2be   : > { %3768 = vmatpush.msrb.mxu2 %v1007_v48  ;;  %3787 = vmatpush.msrb.mxu3 %v1041_v30  ;;  %v1027_v47 = vld [vmem:[%s4875_s6 + $0x1788] sm:$0xff]  ;;  %v961_v31 = vld [vmem:[%s4875_s6 + $0x1578] sm:$0xff] }
 0x2bf   : > { %3729 = vmatpush.msrb.mxu0 %v941_v9  ;;  %3748 = vmatpush.msrb.mxu1 %v975_v10  ;;  %v927_v28 = vld [vmem:[%s4875_s6 + $0x1468] sm:$0xff]  ;;  %v1025_v3 = vld [vmem:[%s4875_s6 + $0x1778] sm:$0xff] }
 0x2c0   : > { %3769 = vmatpush.msrb.mxu2 %v1005_v41  ;;  %3788 = vmatpush.msrb.mxu3 %v1039_v42  ;;  %v991_v60 = vld [vmem:[%s4875_s6 + $0x1668] sm:$0xff]  ;;  %v925_v22 = vld [vmem:[%s4875_s6 + $0x1458] sm:$0xff] }
 0x2c1   : > { %3730 = vmatpush.msrb.mxu0 %v939_v23  ;;  %3749 = vmatpush.msrb.mxu1 %v973_v12  ;;  %v959_v6 = vld [vmem:[%s4875_s6 + $0x1568] sm:$0xff]  ;;  %v989_v48 = vld [vmem:[%s4875_s6 + $0x1658] sm:$0xff] }
 0x2c2   : > { %3770 = vmatpush.msrb.mxu2 %v1003_v15  ;;  %3789 = vmatpush.msrb.mxu3 %v1037_v16  ;;  %v1023_v30 = vld [vmem:[%s4875_s6 + $0x1768] sm:$0xff]  ;;  %v957_v10 = vld [vmem:[%s4875_s6 + $0x1558] sm:$0xff] }
 0x2c3   : > { %3731 = vmatpush.msrb.mxu0 %v937_v49  ;;  %3750 = vmatpush.msrb.mxu1 %v971_v61  ;;  %v923_v9 = vld [vmem:[%s4875_s6 + $0x1448] sm:$0xff]  ;;  %v1021_v42 = vld [vmem:[%s4875_s6 + $0x1758] sm:$0xff] }
 0x2c4   : > { %3771 = vmatpush.msrb.mxu2 %v1001_v43  ;;  %3790 = vmatpush.msrb.mxu3 %v1035_v50  ;;  %v987_v41 = vld [vmem:[%s4875_s6 + $0x1648] sm:$0xff]  ;;  %v921_v23 = vld [vmem:[%s4875_s6 + $0x1438] sm:$0xff] }
 0x2c5   : > { %3732 = vmatpush.msrb.mxu0 %v935_v57  ;;  %3751 = vmatpush.msrb.mxu1 %v969_v32  ;;  %v955_v12 = vld [vmem:[%s4875_s6 + $0x1548] sm:$0xff]  ;;  %v985_v15 = vld [vmem:[%s4875_s6 + $0x1638] sm:$0xff] }
 0x2c6   : > { %3772 = vmatpush.msrb.mxu2 %v999_v33  ;;  %3791 = vmatpush.msrb.mxu3 %v1033_v62  ;;  %v1019_v16 = vld [vmem:[%s4875_s6 + $0x1748] sm:$0xff]  ;;  %v953_v61 = vld [vmem:[%s4875_s6 + $0x1538] sm:$0xff] }
 0x2c7   : > { %3733 = vmatpush.msrb.mxu0 %v933_v51  ;;  %3752 = vmatpush.msrb.mxu1 %v967_v45  ;;  %v919_v49 = vld [vmem:[%s4875_s6 + $0x1428] sm:$0xff]  ;;  %v1017_v50 = vld [vmem:[%s4875_s6 + $0x1738] sm:$0xff] }
 0x2c8   : > { %3773 = vmatpush.msrb.mxu2 %v997_v63  ;;  %3792 = vmatpush.msrb.mxu3 %v1031_v54  ;;  %v983_v43 = vld [vmem:[%s4875_s6 + $0x1628] sm:$0xff]  ;;  %v917_v57 = vld [vmem:[%s4875_s6 + $0x1418] sm:$0xff] }
 0x2c9   : > { %3734 = vmatpush.msrb.mxu0 %v931_v7  ;;  %3753 = vmatpush.msrb.mxu1 %v965_v58  ;;  %v951_v32 = vld [vmem:[%s4875_s6 + $0x1528] sm:$0xff]  ;;  %v981_v33 = vld [vmem:[%s4875_s6 + $0x1618] sm:$0xff] }
 0x2ca   : > { %3774 = vmatpush.msrb.mxu2 %v995_v26  ;;  %3793 = vmatpush.msrb.mxu3 %v1029_v27  ;;  %v1015_v62 = vld [vmem:[%s4875_s6 + $0x1728] sm:$0xff]  ;;  %v949_v45 = vld [vmem:[%s4875_s6 + $0x1518] sm:$0xff] }
 0x2cb   : > { %3735 = vmatpush.msrb.mxu0 %v929_v0  ;;  %3754 = vmatpush.msrb.mxu1 %v963_v46  ;;  %v915_v51 = vld [vmem:[%s4875_s6 + $0x1408] sm:$0xff]  ;;  %v1013_v54 = vld [vmem:[%s4875_s6 + $0x1718] sm:$0xff] }
 0x2cc   : > { %3775 = vmatpush.msrb.mxu2 %v993_v59  ;;  %3794 = vmatpush.msrb.mxu3 %v1027_v47  ;;  %v979_v63 = vld [vmem:[%s4875_s6 + $0x1608] sm:$0xff]  ;;  %v1073_v7 = vld [vmem:[%s4875_s6 + $0x18f8] sm:$0xff] }
 0x2cd   : > { %3736 = vmatpush.msrb.mxu0 %v927_v28  ;;  %3755 = vmatpush.msrb.mxu1 %v961_v31  ;;  %v1137_v58 = vld [vmem:[%s4875_s6 + $0x1af8] sm:$0xff]  ;;  %v947_v26 = vld [vmem:[%s4875_s6 + $0x1508] sm:$0xff] }
 0x2ce   : > { %3776 = vmatpush.msrb.mxu2 %v991_v60  ;;  %3795 = vmatpush.msrb.mxu3 %v1025_v3  ;;  %v1011_v27 = vld [vmem:[%s4875_s6 + $0x1708] sm:$0xff]  ;;  %v1105_v46 = vld [vmem:[%s4875_s6 + $0x19f8] sm:$0xff] }
 0x2cf   : > { %3737 = vmatpush.msrb.mxu0 %v925_v22  ;;  %3756 = vmatpush.msrb.mxu1 %v959_v6  ;;  %v1071_v0 = vld [vmem:[%s4875_s6 + $0x18e8] sm:$0xff]  ;;  %v1169_v47 = vld [vmem:[%s4875_s6 + $0x1bf8] sm:$0xff] }
 0x2d0   : > { %3777 = vmatpush.msrb.mxu2 %v989_v48  ;;  %3796 = vmatpush.msrb.mxu3 %v1023_v30  ;;  %v1135_v59 = vld [vmem:[%s4875_s6 + $0x1ae8] sm:$0xff]  ;;  %v1133_v28 = vld [vmem:[%s4875_s6 + $0x1ad8] sm:$0xff] }
 0x2d1   : > { %3738 = vmatpush.msrb.mxu0 %v923_v9  ;;  %3757 = vmatpush.msrb.mxu1 %v957_v10  ;;  %v1167_v31 = vld [vmem:[%s4875_s6 + $0x1be8] sm:$0xff]  ;;  %v1101_v3 = vld [vmem:[%s4875_s6 + $0x19d8] sm:$0xff] }
 0x2d2   : > { %3778 = vmatpush.msrb.mxu2 %v987_v41  ;;  %3797 = vmatpush.msrb.mxu3 %v1021_v42  ;;  %v1067_v60 = vld [vmem:[%s4875_s6 + $0x18c8] sm:$0xff]  ;;  %v1065_v22 = vld [vmem:[%s4875_s6 + $0x18b8] sm:$0xff] }
 0x2d3   : > { %3739 = vmatpush.msrb.mxu0 %v921_v23  ;;  %3758 = vmatpush.msrb.mxu1 %v955_v12  ;;  %v1099_v6 = vld [vmem:[%s4875_s6 + $0x19c8] sm:$0xff]  ;;  %v1129_v48 = vld [vmem:[%s4875_s6 + $0x1ab8] sm:$0xff] }
 0x2d4   : > { %3779 = vmatpush.msrb.mxu2 %v985_v15  ;;  %3798 = vmatpush.msrb.mxu3 %v1019_v16  ;;  %v1163_v30 = vld [vmem:[%s4875_s6 + $0x1bc8] sm:$0xff]  ;;  %v1097_v10 = vld [vmem:[%s4875_s6 + $0x19b8] sm:$0xff] }
 0x2d5   : > { %3740 = vmatpush.msrb.mxu0 %v919_v49  ;;  %3759 = vmatpush.msrb.mxu1 %v953_v61  ;;  %v1063_v9 = vld [vmem:[%s4875_s6 + $0x18a8] sm:$0xff]  ;;  %v1161_v42 = vld [vmem:[%s4875_s6 + $0x1bb8] sm:$0xff] }
 0x2d6   : > { %3780 = vmatpush.msrb.mxu2 %v983_v43  ;;  %3799 = vmatpush.msrb.mxu3 %v1017_v50  ;;  %v1127_v41 = vld [vmem:[%s4875_s6 + $0x1aa8] sm:$0xff]  ;;  %v1061_v23 = vld [vmem:[%s4875_s6 + $0x1898] sm:$0xff] }
 0x2d7   : > { %3741 = vmatpush.msrb.mxu0 %v917_v57  ;;  %3760 = vmatpush.msrb.mxu1 %v951_v32  ;;  %v1095_v12 = vld [vmem:[%s4875_s6 + $0x19a8] sm:$0xff]  ;;  %v1125_v15 = vld [vmem:[%s4875_s6 + $0x1a98] sm:$0xff] }
 0x2d8   : > { %3781 = vmatpush.msrb.mxu2 %v981_v33  ;;  %3800 = vmatpush.msrb.mxu3 %v1015_v62  ;;  %v1159_v16 = vld [vmem:[%s4875_s6 + $0x1ba8] sm:$0xff]  ;;  %v1093_v61 = vld [vmem:[%s4875_s6 + $0x1998] sm:$0xff] }
 0x2d9   : > { %3742 = vmatpush.msrb.mxu0 %v915_v51  ;;  %3761 = vmatpush.msrb.mxu1 %v949_v45  ;;  %v1059_v49 = vld [vmem:[%s4875_s6 + $0x1888] sm:$0xff]  ;;  %v1157_v50 = vld [vmem:[%s4875_s6 + $0x1b98] sm:$0xff] }
 0x2da   : > { %3782 = vmatpush.msrb.mxu2 %v979_v63  ;;  %3801 = vmatpush.msrb.mxu3 %v1013_v54  ;;  %v1123_v43 = vld [vmem:[%s4875_s6 + $0x1a88] sm:$0xff]  ;;  %v1057_v57 = vld [vmem:[%s4875_s6 + $0x1878] sm:$0xff] }
 0x2db   : > { %3743 = vmatmul.f32.vlgmr.msrb.gmra.mxu0 %v5350_v38  ;;  %3783 = vmatmul.f32.vlgmr.msrb.gmra.mxu2 %v5352_v39  ;;  %v1069_v38 = vld [vmem:[%s4875_s6 + $0x18d8] sm:$0xff]  ;;  %v1103_v39 = vld [vmem:[%s4875_s6 + $0x19e8] sm:$0xff] }
 0x2dc   : > { %3807 = vmatpush.msra.mxu0 %v1073_v7  ;;  %3847 = vmatpush.msra.mxu2 %v1137_v58  ;;  %v1091_v32 = vld [vmem:[%s4875_s6 + $0x1988] sm:$0xff]  ;;  %v1121_v33 = vld [vmem:[%s4875_s6 + $0x1a78] sm:$0xff] }
 0x2dd   : > { %3762 = vmatpush.msrb.mxu1 %v947_v26  ;;  %3802 = vmatpush.msrb.mxu3 %v1011_v27  ;;  %v1155_v62 = vld [vmem:[%s4875_s6 + $0x1b88] sm:$0xff]  ;;  %v1089_v45 = vld [vmem:[%s4875_s6 + $0x1978] sm:$0xff] }
 0x2de   : > { %3763 = vmatmul.f32.vlgmr.msrb.gmra.mxu1 %v5360_v52  ;;  %3803 = vmatmul.f32.vlgmr.msrb.gmra.mxu3 %v5362_v53  ;;  %v1131_v52 = vld [vmem:[%s4875_s6 + $0x1ac8] sm:$0xff]  ;;  %v1165_v53 = vld [vmem:[%s4875_s6 + $0x1bd8] sm:$0xff] }
 0x2df   : > { %3808 = vmatpush.msra.mxu0 %v1071_v0  ;;  %3827 = vmatpush.msra.mxu1 %v1105_v46  ;;  %v1055_v51 = vld [vmem:[%s4875_s6 + $0x1868] sm:$0xff]  ;;  %v1153_v54 = vld [vmem:[%s4875_s6 + $0x1b78] sm:$0xff] }
 0x2e0   : > { %3848 = vmatpush.msra.mxu2 %v1135_v59  ;;  %3867 = vmatpush.msra.mxu3 %v1169_v47  ;;  %v1119_v63 = vld [vmem:[%s4875_s6 + $0x1a68] sm:$0xff]  ;;  %v1053_v7 = vld [vmem:[%s4875_s6 + $0x1858] sm:$0xff] }
 0x2e1   : > { %3809 = vmatpush.msra.mxu0 %v1069_v38  ;;  %3828 = vmatpush.msra.mxu1 %v1103_v39  ;;  %v1087_v58 = vld [vmem:[%s4875_s6 + $0x1968] sm:$0xff]  ;;  %v1117_v26 = vld [vmem:[%s4875_s6 + $0x1a58] sm:$0xff] }
 0x2e2   : > { %3849 = vmatpush.msra.mxu2 %v1133_v28  ;;  %3868 = vmatpush.msra.mxu3 %v1167_v31  ;;  %v1151_v27 = vld [vmem:[%s4875_s6 + $0x1b68] sm:$0xff]  ;;  %v1085_v46 = vld [vmem:[%s4875_s6 + $0x1958] sm:$0xff] }
 0x2e3   : > { %3810 = vmatpush.msra.mxu0 %v1067_v60  ;;  %3829 = vmatpush.msra.mxu1 %v1101_v3  ;;  %v1051_v0 = vld [vmem:[%s4875_s6 + $0x1848] sm:$0xff]  ;;  %v1149_v47 = vld [vmem:[%s4875_s6 + $0x1b58] sm:$0xff] }
 0x2e4   : > { %3850 = vmatpush.msra.mxu2 %v1131_v52  ;;  %3869 = vmatpush.msra.mxu3 %v1165_v53  ;;  %v1115_v59 = vld [vmem:[%s4875_s6 + $0x1a48] sm:$0xff]  ;;  %v1049_v38 = vld [vmem:[%s4875_s6 + $0x1838] sm:$0xff] }
 0x2e5   : > { %3811 = vmatpush.msra.mxu0 %v1065_v22  ;;  %3830 = vmatpush.msra.mxu1 %v1099_v6  ;;  %v1083_v39 = vld [vmem:[%s4875_s6 + $0x1948] sm:$0xff]  ;;  %v1113_v28 = vld [vmem:[%s4875_s6 + $0x1a38] sm:$0xff] }
 0x2e6   : > { %3851 = vmatpush.msra.mxu2 %v1129_v48  ;;  %3870 = vmatpush.msra.mxu3 %v1163_v30  ;;  %v1147_v31 = vld [vmem:[%s4875_s6 + $0x1b48] sm:$0xff]  ;;  %v1081_v3 = vld [vmem:[%s4875_s6 + $0x1938] sm:$0xff] }
 0x2e7   : > { %3812 = vmatpush.msra.mxu0 %v1063_v9  ;;  %3831 = vmatpush.msra.mxu1 %v1097_v10  ;;  %v1047_v60 = vld [vmem:[%s4875_s6 + $0x1828] sm:$0xff]  ;;  %v1145_v53 = vld [vmem:[%s4875_s6 + $0x1b38] sm:$0xff] }
 0x2e8   : > { %3852 = vmatpush.msra.mxu2 %v1127_v41  ;;  %3871 = vmatpush.msra.mxu3 %v1161_v42  ;;  %v1111_v52 = vld [vmem:[%s4875_s6 + $0x1a28] sm:$0xff]  ;;  %v1045_v22 = vld [vmem:[%s4875_s6 + $0x1818] sm:$0xff] }
 0x2e9   : > { %3813 = vmatpush.msra.mxu0 %v1061_v23  ;;  %3832 = vmatpush.msra.mxu1 %v1095_v12  ;;  %v1079_v6 = vld [vmem:[%s4875_s6 + $0x1928] sm:$0xff]  ;;  %v1109_v48 = vld [vmem:[%s4875_s6 + $0x1a18] sm:$0xff] }
 0x2ea   : > { %3853 = vmatpush.msra.mxu2 %v1125_v15  ;;  %3872 = vmatpush.msra.mxu3 %v1159_v16  ;;  %v1143_v30 = vld [vmem:[%s4875_s6 + $0x1b28] sm:$0xff]  ;;  %v1077_v10 = vld [vmem:[%s4875_s6 + $0x1918] sm:$0xff] }
 0x2eb   : > { %3814 = vmatpush.msra.mxu0 %v1059_v49  ;;  %3833 = vmatpush.msra.mxu1 %v1093_v61  ;;  %v1043_v9 = vld [vmem:[%s4875_s6 + $0x1808] sm:$0xff]  ;;  %v1141_v42 = vld [vmem:[%s4875_s6 + $0x1b18] sm:$0xff] }
 0x2ec   : > { %3854 = vmatpush.msra.mxu2 %v1123_v43  ;;  %3873 = vmatpush.msra.mxu3 %v1157_v50  ;;  %v1107_v41 = vld [vmem:[%s4875_s6 + $0x1a08] sm:$0xff]  ;;  %v1201_v23 = vld [vmem:[%s4875_s6 + $0x1cf8] sm:$0xff] }
 0x2ed   : > { %3815 = vmatpush.msra.mxu0 %v1057_v57  ;;  %3834 = vmatpush.msra.mxu1 %v1091_v32  ;;  %v1265_v12 = vld [vmem:[%s4875_s6 + $0x1ef8] sm:$0xff]  ;;  %v1075_v15 = vld [vmem:[%s4875_s6 + $0x1908] sm:$0xff] }
 0x2ee   : > { %3855 = vmatpush.msra.mxu2 %v1121_v33  ;;  %3874 = vmatpush.msra.mxu3 %v1155_v62  ;;  %v1139_v16 = vld [vmem:[%s4875_s6 + $0x1b08] sm:$0xff]  ;;  %v1233_v61 = vld [vmem:[%s4875_s6 + $0x1df8] sm:$0xff] }
 0x2ef   : > { %3816 = vmatpush.msra.mxu0 %v1055_v51  ;;  %3835 = vmatpush.msra.mxu1 %v1089_v45  ;;  %v1199_v49 = vld [vmem:[%s4875_s6 + $0x1ce8] sm:$0xff]  ;;  %v1297_v50 = vld [vmem:[%s4875_s6 + $0x1ff8] sm:$0xff] }
 0x2f0   : > { %3856 = vmatpush.msra.mxu2 %v1119_v63  ;;  %3875 = vmatpush.msra.mxu3 %v1153_v54  ;;  %v1263_v43 = vld [vmem:[%s4875_s6 + $0x1ee8] sm:$0xff]  ;;  %v1261_v57 = vld [vmem:[%s4875_s6 + $0x1ed8] sm:$0xff] }
 0x2f1   : > { %3817 = vmatpush.msra.mxu0 %v1053_v7  ;;  %3836 = vmatpush.msra.mxu1 %v1087_v58  ;;  %v1295_v32 = vld [vmem:[%s4875_s6 + $0x1fe8] sm:$0xff]  ;;  %v1229_v62 = vld [vmem:[%s4875_s6 + $0x1dd8] sm:$0xff] }
 0x2f2   : > { %3857 = vmatpush.msra.mxu2 %v1117_v26  ;;  %3876 = vmatpush.msra.mxu3 %v1151_v27  ;;  %v1195_v33 = vld [vmem:[%s4875_s6 + $0x1cc8] sm:$0xff]  ;;  %v1193_v51 = vld [vmem:[%s4875_s6 + $0x1cb8] sm:$0xff] }
 0x2f3   : > { %3818 = vmatpush.msra.mxu0 %v1051_v0  ;;  %3837 = vmatpush.msra.mxu1 %v1085_v46  ;;  %v1227_v45 = vld [vmem:[%s4875_s6 + $0x1dc8] sm:$0xff]  ;;  %v1257_v63 = vld [vmem:[%s4875_s6 + $0x1eb8] sm:$0xff] }
 0x2f4   : > { %3858 = vmatpush.msra.mxu2 %v1115_v59  ;;  %3877 = vmatpush.msra.mxu3 %v1149_v47  ;;  %v1291_v54 = vld [vmem:[%s4875_s6 + $0x1fc8] sm:$0xff]  ;;  %v1225_v58 = vld [vmem:[%s4875_s6 + $0x1db8] sm:$0xff] }
 0x2f5   : > { %3819 = vmatpush.msra.mxu0 %v1049_v38  ;;  %3838 = vmatpush.msra.mxu1 %v1083_v39  ;;  %v1191_v7 = vld [vmem:[%s4875_s6 + $0x1ca8] sm:$0xff]  ;;  %v1289_v27 = vld [vmem:[%s4875_s6 + $0x1fb8] sm:$0xff] }
 0x2f6   : > { %3859 = vmatpush.msra.mxu2 %v1113_v28  ;;  %3878 = vmatpush.msra.mxu3 %v1147_v31  ;;  %v1255_v26 = vld [vmem:[%s4875_s6 + $0x1ea8] sm:$0xff]  ;;  %v1189_v0 = vld [vmem:[%s4875_s6 + $0x1c98] sm:$0xff] }
 0x2f7   : > { %3820 = vmatpush.msra.mxu0 %v1047_v60  ;;  %3839 = vmatpush.msra.mxu1 %v1081_v3  ;;  %v1223_v46 = vld [vmem:[%s4875_s6 + $0x1da8] sm:$0xff]  ;;  %v1253_v59 = vld [vmem:[%s4875_s6 + $0x1e98] sm:$0xff] }
 0x2f8   : > { %3860 = vmatpush.msra.mxu2 %v1111_v52  ;;  %3879 = vmatpush.msra.mxu3 %v1145_v53  ;;  %v1287_v47 = vld [vmem:[%s4875_s6 + $0x1fa8] sm:$0xff]  ;;  %v1221_v39 = vld [vmem:[%s4875_s6 + $0x1d98] sm:$0xff] }
 0x2f9   : > { %3821 = vmatpush.msra.mxu0 %v1045_v22  ;;  %3840 = vmatpush.msra.mxu1 %v1079_v6  ;;  %v1187_v38 = vld [vmem:[%s4875_s6 + $0x1c88] sm:$0xff]  ;;  %v1285_v31 = vld [vmem:[%s4875_s6 + $0x1f98] sm:$0xff] }
 0x2fa   : > { %3861 = vmatpush.msra.mxu2 %v1109_v48  ;;  %3880 = vmatpush.msra.mxu3 %v1143_v30  ;;  %v1251_v28 = vld [vmem:[%s4875_s6 + $0x1e88] sm:$0xff]  ;;  %v1185_v60 = vld [vmem:[%s4875_s6 + $0x1c78] sm:$0xff] }
 0x2fb   : > { %3822 = vmatpush.msra.mxu0 %v1043_v9  ;;  %3841 = vmatpush.msra.mxu1 %v1077_v10  ;;  %v1219_v3 = vld [vmem:[%s4875_s6 + $0x1d88] sm:$0xff]  ;;  %v1249_v52 = vld [vmem:[%s4875_s6 + $0x1e78] sm:$0xff] }
 0x2fc   : > { %3862 = vmatpush.msra.mxu2 %v1107_v41  ;;  %3881 = vmatpush.msra.mxu3 %v1141_v42  ;;  %v1283_v53 = vld [vmem:[%s4875_s6 + $0x1f88] sm:$0xff]  ;;  %v1217_v6 = vld [vmem:[%s4875_s6 + $0x1d78] sm:$0xff] }
 0x2fd   : > { %3823 = vmatmul.f32.vlgmr.msra.gmra.mxu0 %v5427_v19  ;;  %3863 = vmatmul.f32.vlgmr.msra.gmra.mxu2 %v5429_v20  ;;  %v1197_v19 = vld [vmem:[%s4875_s6 + $0x1cd8] sm:$0xff]  ;;  %v1231_v20 = vld [vmem:[%s4875_s6 + $0x1de8] sm:$0xff] }
 0x2fe   : > { %3887 = vmatpush.msrb.mxu0 %v1201_v23  ;;  %3927 = vmatpush.msrb.mxu2 %v1265_v12  ;;  %v1183_v22 = vld [vmem:[%s4875_s6 + $0x1c68] sm:$0xff]  ;;  %v1281_v30 = vld [vmem:[%s4875_s6 + $0x1f78] sm:$0xff] }
 0x2ff   : > { %3842 = vmatpush.msra.mxu1 %v1075_v15  ;;  %3882 = vmatpush.msra.mxu3 %v1139_v16  ;;  %v1247_v48 = vld [vmem:[%s4875_s6 + $0x1e68] sm:$0xff]  ;;  %v1181_v9 = vld [vmem:[%s4875_s6 + $0x1c58] sm:$0xff] }
 0x300   : > { %3843 = vmatmul.f32.vlgmr.msra.gmra.mxu1 %v5437_v25  ;;  %3883 = vmatmul.f32.vlgmr.msra.gmra.mxu3 %v5439_v29  ;;  %v1259_v25 = vld [vmem:[%s4875_s6 + $0x1ec8] sm:$0xff]  ;;  %v1293_v29 = vld [vmem:[%s4875_s6 + $0x1fd8] sm:$0xff] }
 0x301   : > { %3888 = vmatpush.msrb.mxu0 %v1199_v49  ;;  %3907 = vmatpush.msrb.mxu1 %v1233_v61  ;;  %v1215_v10 = vld [vmem:[%s4875_s6 + $0x1d68] sm:$0xff]  ;;  %v1245_v41 = vld [vmem:[%s4875_s6 + $0x1e58] sm:$0xff] }
 0x302   : > { %3928 = vmatpush.msrb.mxu2 %v1263_v43  ;;  %3947 = vmatpush.msrb.mxu3 %v1297_v50  ;;  %v1279_v42 = vld [vmem:[%s4875_s6 + $0x1f68] sm:$0xff]  ;;  %v1213_v12 = vld [vmem:[%s4875_s6 + $0x1d58] sm:$0xff] }
 0x303   : > { %3889 = vmatpush.msrb.mxu0 %v1197_v19  ;;  %3908 = vmatpush.msrb.mxu1 %v1231_v20  ;;  %v1179_v23 = vld [vmem:[%s4875_s6 + $0x1c48] sm:$0xff]  ;;  %v1277_v16 = vld [vmem:[%s4875_s6 + $0x1f58] sm:$0xff] }
 0x304   : > { %3929 = vmatpush.msrb.mxu2 %v1261_v57  ;;  %3948 = vmatpush.msrb.mxu3 %v1295_v32  ;;  %v1243_v15 = vld [vmem:[%s4875_s6 + $0x1e48] sm:$0xff]  ;;  %v1177_v49 = vld [vmem:[%s4875_s6 + $0x1c38] sm:$0xff] }
 0x305   : > { %3890 = vmatpush.msrb.mxu0 %v1195_v33  ;;  %3909 = vmatpush.msrb.mxu1 %v1229_v62  ;;  %v1211_v61 = vld [vmem:[%s4875_s6 + $0x1d48] sm:$0xff]  ;;  %v1241_v43 = vld [vmem:[%s4875_s6 + $0x1e38] sm:$0xff] }
 0x306   : > { %3930 = vmatpush.msrb.mxu2 %v1259_v25  ;;  %3949 = vmatpush.msrb.mxu3 %v1293_v29  ;;  %v1275_v50 = vld [vmem:[%s4875_s6 + $0x1f48] sm:$0xff]  ;;  %v1209_v20 = vld [vmem:[%s4875_s6 + $0x1d38] sm:$0xff] }
 0x307   : > { %3891 = vmatpush.msrb.mxu0 %v1193_v51  ;;  %3910 = vmatpush.msrb.mxu1 %v1227_v45  ;;  %v1175_v19 = vld [vmem:[%s4875_s6 + $0x1c28] sm:$0xff]  ;;  %v1273_v32 = vld [vmem:[%s4875_s6 + $0x1f38] sm:$0xff] }
 0x308   : > { %3931 = vmatpush.msrb.mxu2 %v1257_v63  ;;  %3950 = vmatpush.msrb.mxu3 %v1291_v54  ;;  %v1239_v57 = vld [vmem:[%s4875_s6 + $0x1e28] sm:$0xff]  ;;  %v1173_v33 = vld [vmem:[%s4875_s6 + $0x1c18] sm:$0xff] }
 0x309   : > { %3892 = vmatpush.msrb.mxu0 %v1191_v7  ;;  %3911 = vmatpush.msrb.mxu1 %v1225_v58  ;;  %v1207_v62 = vld [vmem:[%s4875_s6 + $0x1d28] sm:$0xff]  ;;  %v1237_v25 = vld [vmem:[%s4875_s6 + $0x1e18] sm:$0xff] }
 0x30a   : > { %3932 = vmatpush.msrb.mxu2 %v1255_v26  ;;  %3951 = vmatpush.msrb.mxu3 %v1289_v27  ;;  %v1271_v29 = vld [vmem:[%s4875_s6 + $0x1f28] sm:$0xff]  ;;  %v1205_v45 = vld [vmem:[%s4875_s6 + $0x1d18] sm:$0xff] }
 0x30b   : > { %3893 = vmatpush.msrb.mxu0 %v1189_v0  ;;  %3912 = vmatpush.msrb.mxu1 %v1223_v46  ;;  %v1171_v51 = vld [vmem:[%s4875_s6 + $0x1c08] sm:$0xff]  ;;  %v1269_v54 = vld [vmem:[%s4875_s6 + $0x1f18] sm:$0xff] }
 0x30c   : > { %3933 = vmatpush.msrb.mxu2 %v1253_v59  ;;  %3952 = vmatpush.msrb.mxu3 %v1287_v47  ;;  %v1235_v63 = vld [vmem:[%s4875_s6 + $0x1e08] sm:$0xff]  ;;  %v1329_v7 = vld [vmem:[%s4875_s6 + $0x20f8] sm:$0xff] }
 0x30d   : > { %3894 = vmatpush.msrb.mxu0 %v1187_v38  ;;  %3913 = vmatpush.msrb.mxu1 %v1221_v39  ;;  %v1393_v58 = vld [vmem:[%s4875_s6 + $0x22f8] sm:$0xff]  ;;  %v1203_v26 = vld [vmem:[%s4875_s6 + $0x1d08] sm:$0xff] }
 0x30e   : > { %3934 = vmatpush.msrb.mxu2 %v1251_v28  ;;  %3953 = vmatpush.msrb.mxu3 %v1285_v31  ;;  %v1267_v27 = vld [vmem:[%s4875_s6 + $0x1f08] sm:$0xff]  ;;  %v1361_v46 = vld [vmem:[%s4875_s6 + $0x21f8] sm:$0xff] }
 0x30f   : > { %3895 = vmatpush.msrb.mxu0 %v1185_v60  ;;  %3914 = vmatpush.msrb.mxu1 %v1219_v3  ;;  %v1327_v0 = vld [vmem:[%s4875_s6 + $0x20e8] sm:$0xff]  ;;  %v1425_v47 = vld [vmem:[%s4875_s6 + $0x23f8] sm:$0xff] }
 0x310   : > { %3935 = vmatpush.msrb.mxu2 %v1249_v52  ;;  %3954 = vmatpush.msrb.mxu3 %v1283_v53  ;;  %v1391_v59 = vld [vmem:[%s4875_s6 + $0x22e8] sm:$0xff]  ;;  %v1389_v38 = vld [vmem:[%s4875_s6 + $0x22d8] sm:$0xff] }
 0x311   : > { %3896 = vmatpush.msrb.mxu0 %v1183_v22  ;;  %3915 = vmatpush.msrb.mxu1 %v1217_v6  ;;  %v1423_v39 = vld [vmem:[%s4875_s6 + $0x23e8] sm:$0xff]  ;;  %v1357_v31 = vld [vmem:[%s4875_s6 + $0x21d8] sm:$0xff] }
 0x312   : > { %3936 = vmatpush.msrb.mxu2 %v1247_v48  ;;  %3955 = vmatpush.msrb.mxu3 %v1281_v30  ;;  %v1323_v28 = vld [vmem:[%s4875_s6 + $0x20c8] sm:$0xff]  ;;  %v1321_v60 = vld [vmem:[%s4875_s6 + $0x20b8] sm:$0xff] }
 0x313   : > { %3897 = vmatpush.msrb.mxu0 %v1181_v9  ;;  %3916 = vmatpush.msrb.mxu1 %v1215_v10  ;;  %v1355_v3 = vld [vmem:[%s4875_s6 + $0x21c8] sm:$0xff]  ;;  %v1385_v52 = vld [vmem:[%s4875_s6 + $0x22b8] sm:$0xff] }
 0x314   : > { %3937 = vmatpush.msrb.mxu2 %v1245_v41  ;;  %3956 = vmatpush.msrb.mxu3 %v1279_v42  ;;  %v1419_v53 = vld [vmem:[%s4875_s6 + $0x23c8] sm:$0xff]  ;;  %v1353_v6 = vld [vmem:[%s4875_s6 + $0x21b8] sm:$0xff] }
 0x315   : > { %3898 = vmatpush.msrb.mxu0 %v1179_v23  ;;  %3917 = vmatpush.msrb.mxu1 %v1213_v12  ;;  %v1319_v22 = vld [vmem:[%s4875_s6 + $0x20a8] sm:$0xff]  ;;  %v1417_v30 = vld [vmem:[%s4875_s6 + $0x23b8] sm:$0xff] }
 0x316   : > { %3938 = vmatpush.msrb.mxu2 %v1243_v15  ;;  %3957 = vmatpush.msrb.mxu3 %v1277_v16  ;;  %v1383_v48 = vld [vmem:[%s4875_s6 + $0x22a8] sm:$0xff]  ;;  %v1317_v9 = vld [vmem:[%s4875_s6 + $0x2098] sm:$0xff] }
 0x317   : > { %3899 = vmatpush.msrb.mxu0 %v1177_v49  ;;  %3918 = vmatpush.msrb.mxu1 %v1211_v61  ;;  %v1351_v10 = vld [vmem:[%s4875_s6 + $0x21a8] sm:$0xff]  ;;  %v1381_v41 = vld [vmem:[%s4875_s6 + $0x2298] sm:$0xff] }
 0x318   : > { %3939 = vmatpush.msrb.mxu2 %v1241_v43  ;;  %3958 = vmatpush.msrb.mxu3 %v1275_v50  ;;  %v1415_v42 = vld [vmem:[%s4875_s6 + $0x23a8] sm:$0xff]  ;;  %v1349_v12 = vld [vmem:[%s4875_s6 + $0x2198] sm:$0xff] }
 0x319   : > { %3900 = vmatpush.msrb.mxu0 %v1175_v19  ;;  %3919 = vmatpush.msrb.mxu1 %v1209_v20  ;;  %v1315_v23 = vld [vmem:[%s4875_s6 + $0x2088] sm:$0xff]  ;;  %v1413_v16 = vld [vmem:[%s4875_s6 + $0x2398] sm:$0xff] }
 0x31a   : > { %3940 = vmatpush.msrb.mxu2 %v1239_v57  ;;  %3959 = vmatpush.msrb.mxu3 %v1273_v32  ;;  %v1379_v15 = vld [vmem:[%s4875_s6 + $0x2288] sm:$0xff]  ;;  %v1313_v49 = vld [vmem:[%s4875_s6 + $0x2078] sm:$0xff] }
 0x31b   : > { %3901 = vmatpush.msrb.mxu0 %v1173_v33  ;;  %3920 = vmatpush.msrb.mxu1 %v1207_v62  ;;  %v1347_v61 = vld [vmem:[%s4875_s6 + $0x2188] sm:$0xff]  ;;  %v1377_v43 = vld [vmem:[%s4875_s6 + $0x2278] sm:$0xff] }
 0x31c   : > { %3941 = vmatpush.msrb.mxu2 %v1237_v25  ;;  %3960 = vmatpush.msrb.mxu3 %v1271_v29  ;;  %v1411_v50 = vld [vmem:[%s4875_s6 + $0x2388] sm:$0xff]  ;;  %v1345_v20 = vld [vmem:[%s4875_s6 + $0x2178] sm:$0xff] }
 0x31d   : > { %3902 = vmatpush.msrb.mxu0 %v1171_v51  ;;  %3921 = vmatpush.msrb.mxu1 %v1205_v45  ;;  %v1311_v19 = vld [vmem:[%s4875_s6 + $0x2068] sm:$0xff]  ;;  %v1409_v32 = vld [vmem:[%s4875_s6 + $0x2378] sm:$0xff] }
 0x31e   : > { %3942 = vmatpush.msrb.mxu2 %v1235_v63  ;;  %3961 = vmatpush.msrb.mxu3 %v1269_v54  ;;  %v1375_v57 = vld [vmem:[%s4875_s6 + $0x2268] sm:$0xff]  ;;  %v1309_v33 = vld [vmem:[%s4875_s6 + $0x2058] sm:$0xff] }
 0x31f   : > { %3903 = vmatmul.f32.vlgmr.msrb.gmra.mxu0 %v5504_v35  ;;  %3943 = vmatmul.f32.vlgmr.msrb.gmra.mxu2 %v5506_v36  ;;  %v1325_v35 = vld [vmem:[%s4875_s6 + $0x20d8] sm:$0xff]  ;;  %v1359_v36 = vld [vmem:[%s4875_s6 + $0x21e8] sm:$0xff] }
 0x320   : > { %3967 = vmatpush.msra.mxu0 %v1329_v7  ;;  %4007 = vmatpush.msra.mxu2 %v1393_v58  ;;  %v1343_v62 = vld [vmem:[%s4875_s6 + $0x2168] sm:$0xff]  ;;  %v1373_v25 = vld [vmem:[%s4875_s6 + $0x2258] sm:$0xff] }
 0x321   : > { %3922 = vmatpush.msrb.mxu1 %v1203_v26  ;;  %3962 = vmatpush.msrb.mxu3 %v1267_v27  ;;  %v1407_v29 = vld [vmem:[%s4875_s6 + $0x2368] sm:$0xff]  ;;  %v1341_v45 = vld [vmem:[%s4875_s6 + $0x2158] sm:$0xff] }
 0x322   : > { %3923 = vmatmul.f32.vlgmr.msrb.gmra.mxu1 %v5514_v55  ;;  %3963 = vmatmul.f32.vlgmr.msrb.gmra.mxu3 %v5516_v56  ;;  %v1387_v55 = vld [vmem:[%s4875_s6 + $0x22c8] sm:$0xff]  ;;  %v1421_v56 = vld [vmem:[%s4875_s6 + $0x23d8] sm:$0xff] }
 0x323   : > { %3968 = vmatpush.msra.mxu0 %v1327_v0  ;;  %3987 = vmatpush.msra.mxu1 %v1361_v46  ;;  %v1307_v51 = vld [vmem:[%s4875_s6 + $0x2048] sm:$0xff]  ;;  %v1405_v54 = vld [vmem:[%s4875_s6 + $0x2358] sm:$0xff] }
 0x324   : > { %4008 = vmatpush.msra.mxu2 %v1391_v59  ;;  %4027 = vmatpush.msra.mxu3 %v1425_v47  ;;  %v1371_v63 = vld [vmem:[%s4875_s6 + $0x2248] sm:$0xff]  ;;  %v1305_v7 = vld [vmem:[%s4875_s6 + $0x2038] sm:$0xff] }
 0x325   : > { %3969 = vmatpush.msra.mxu0 %v1325_v35  ;;  %3988 = vmatpush.msra.mxu1 %v1359_v36  ;;  %v1339_v58 = vld [vmem:[%s4875_s6 + $0x2148] sm:$0xff]  ;;  %v1369_v26 = vld [vmem:[%s4875_s6 + $0x2238] sm:$0xff] }
 0x326   : > { %4009 = vmatpush.msra.mxu2 %v1389_v38  ;;  %4028 = vmatpush.msra.mxu3 %v1423_v39  ;;  %v1403_v27 = vld [vmem:[%s4875_s6 + $0x2348] sm:$0xff]  ;;  %v1337_v46 = vld [vmem:[%s4875_s6 + $0x2138] sm:$0xff] }
 0x327   : > { %3970 = vmatpush.msra.mxu0 %v1323_v28  ;;  %3989 = vmatpush.msra.mxu1 %v1357_v31  ;;  %v1303_v0 = vld [vmem:[%s4875_s6 + $0x2028] sm:$0xff]  ;;  %v1401_v47 = vld [vmem:[%s4875_s6 + $0x2338] sm:$0xff] }
 0x328   : > { %4010 = vmatpush.msra.mxu2 %v1387_v55  ;;  %4029 = vmatpush.msra.mxu3 %v1421_v56  ;;  %v1367_v59 = vld [vmem:[%s4875_s6 + $0x2228] sm:$0xff]  ;;  %v1301_v35 = vld [vmem:[%s4875_s6 + $0x2018] sm:$0xff] }
 0x329   : > { %3971 = vmatpush.msra.mxu0 %v1321_v60  ;;  %3990 = vmatpush.msra.mxu1 %v1355_v3  ;;  %v1335_v36 = vld [vmem:[%s4875_s6 + $0x2128] sm:$0xff]  ;;  %v1365_v38 = vld [vmem:[%s4875_s6 + $0x2218] sm:$0xff] }
 0x32a   : > { %4011 = vmatpush.msra.mxu2 %v1385_v52  ;;  %4030 = vmatpush.msra.mxu3 %v1419_v53  ;;  %v1399_v39 = vld [vmem:[%s4875_s6 + $0x2328] sm:$0xff]  ;;  %v1333_v31 = vld [vmem:[%s4875_s6 + $0x2118] sm:$0xff] }
 0x32b   : > { %3972 = vmatpush.msra.mxu0 %v1319_v22  ;;  %3991 = vmatpush.msra.mxu1 %v1353_v6  ;;  %v1299_v28 = vld [vmem:[%s4875_s6 + $0x2008] sm:$0xff]  ;;  %v1397_v56 = vld [vmem:[%s4875_s6 + $0x2318] sm:$0xff] }
 0x32c   : > { %4012 = vmatpush.msra.mxu2 %v1383_v48  ;;  %4031 = vmatpush.msra.mxu3 %v1417_v30  ;;  %v1363_v55 = vld [vmem:[%s4875_s6 + $0x2208] sm:$0xff]  ;;  %v1457_v60 = vld [vmem:[%s4875_s6 + $0x24f8] sm:$0xff] }
 0x32d   : > { %3973 = vmatpush.msra.mxu0 %v1317_v9  ;;  %3992 = vmatpush.msra.mxu1 %v1351_v10  ;;  %v1521_v3 = vld [vmem:[%s4875_s6 + $0x26f8] sm:$0xff]  ;;  %v1331_v52 = vld [vmem:[%s4875_s6 + $0x2108] sm:$0xff] }
 0x32e   : > { %4013 = vmatpush.msra.mxu2 %v1381_v41  ;;  %4032 = vmatpush.msra.mxu3 %v1415_v42  ;;  %v1395_v53 = vld [vmem:[%s4875_s6 + $0x2308] sm:$0xff]  ;;  %v1489_v6 = vld [vmem:[%s4875_s6 + $0x25f8] sm:$0xff] }
 0x32f   : > { %3974 = vmatpush.msra.mxu0 %v1315_v23  ;;  %3993 = vmatpush.msra.mxu1 %v1349_v12  ;;  %v1455_v22 = vld [vmem:[%s4875_s6 + $0x24e8] sm:$0xff]  ;;  %v1553_v30 = vld [vmem:[%s4875_s6 + $0x27f8] sm:$0xff] }
 0x330   : > { %4014 = vmatpush.msra.mxu2 %v1379_v15  ;;  %4033 = vmatpush.msra.mxu3 %v1413_v16  ;;  %v1519_v48 = vld [vmem:[%s4875_s6 + $0x26e8] sm:$0xff]  ;;  %v1517_v9 = vld [vmem:[%s4875_s6 + $0x26d8] sm:$0xff] }
 0x331   : > { %3975 = vmatpush.msra.mxu0 %v1313_v49  ;;  %3994 = vmatpush.msra.mxu1 %v1347_v61  ;;  %v1551_v10 = vld [vmem:[%s4875_s6 + $0x27e8] sm:$0xff]  ;;  %v1485_v42 = vld [vmem:[%s4875_s6 + $0x25d8] sm:$0xff] }
 0x332   : > { %4015 = vmatpush.msra.mxu2 %v1377_v43  ;;  %4034 = vmatpush.msra.mxu3 %v1411_v50  ;;  %v1451_v41 = vld [vmem:[%s4875_s6 + $0x24c8] sm:$0xff]  ;;  %v1449_v23 = vld [vmem:[%s4875_s6 + $0x24b8] sm:$0xff] }
 0x333   : > { %3976 = vmatpush.msra.mxu0 %v1311_v19  ;;  %3995 = vmatpush.msra.mxu1 %v1345_v20  ;;  %v1483_v12 = vld [vmem:[%s4875_s6 + $0x25c8] sm:$0xff]  ;;  %v1513_v15 = vld [vmem:[%s4875_s6 + $0x26b8] sm:$0xff] }
 0x334   : > { %4016 = vmatpush.msra.mxu2 %v1375_v57  ;;  %4035 = vmatpush.msra.mxu3 %v1409_v32  ;;  %v1547_v16 = vld [vmem:[%s4875_s6 + $0x27c8] sm:$0xff]  ;;  %v1481_v61 = vld [vmem:[%s4875_s6 + $0x25b8] sm:$0xff] }
 0x335   : > { %3977 = vmatpush.msra.mxu0 %v1309_v33  ;;  %3996 = vmatpush.msra.mxu1 %v1343_v62  ;;  %v1447_v49 = vld [vmem:[%s4875_s6 + $0x24a8] sm:$0xff]  ;;  %v1545_v50 = vld [vmem:[%s4875_s6 + $0x27b8] sm:$0xff] }
 0x336   : > { %4017 = vmatpush.msra.mxu2 %v1373_v25  ;;  %4036 = vmatpush.msra.mxu3 %v1407_v29  ;;  %v1511_v43 = vld [vmem:[%s4875_s6 + $0x26a8] sm:$0xff]  ;;  %v1445_v19 = vld [vmem:[%s4875_s6 + $0x2498] sm:$0xff] }
 0x337   : > { %3978 = vmatpush.msra.mxu0 %v1307_v51  ;;  %3997 = vmatpush.msra.mxu1 %v1341_v45  ;;  %v1479_v20 = vld [vmem:[%s4875_s6 + $0x25a8] sm:$0xff]  ;;  %v1509_v57 = vld [vmem:[%s4875_s6 + $0x2698] sm:$0xff] }
 0x338   : > { %4018 = vmatpush.msra.mxu2 %v1371_v63  ;;  %4037 = vmatpush.msra.mxu3 %v1405_v54  ;;  %v1543_v32 = vld [vmem:[%s4875_s6 + $0x27a8] sm:$0xff]  ;;  %v1477_v62 = vld [vmem:[%s4875_s6 + $0x2598] sm:$0xff] }
 0x339   : > { %3979 = vmatpush.msra.mxu0 %v1305_v7  ;;  %3998 = vmatpush.msra.mxu1 %v1339_v58  ;;  %v1443_v33 = vld [vmem:[%s4875_s6 + $0x2488] sm:$0xff]  ;;  %v1541_v29 = vld [vmem:[%s4875_s6 + $0x2798] sm:$0xff] }
 0x33a   : > { %4019 = vmatpush.msra.mxu2 %v1369_v26  ;;  %4038 = vmatpush.msra.mxu3 %v1403_v27  ;;  %v1507_v25 = vld [vmem:[%s4875_s6 + $0x2688] sm:$0xff]  ;;  %v1441_v51 = vld [vmem:[%s4875_s6 + $0x2478] sm:$0xff] }
 0x33b   : > { %3980 = vmatpush.msra.mxu0 %v1303_v0  ;;  %3999 = vmatpush.msra.mxu1 %v1337_v46  ;;  %v1475_v45 = vld [vmem:[%s4875_s6 + $0x2588] sm:$0xff]  ;;  %v1505_v63 = vld [vmem:[%s4875_s6 + $0x2678] sm:$0xff] }
 0x33c   : > { %4020 = vmatpush.msra.mxu2 %v1367_v59  ;;  %4039 = vmatpush.msra.mxu3 %v1401_v47  ;;  %v1539_v54 = vld [vmem:[%s4875_s6 + $0x2788] sm:$0xff]  ;;  %v1473_v58 = vld [vmem:[%s4875_s6 + $0x2578] sm:$0xff] }
 0x33d   : > { %3981 = vmatpush.msra.mxu0 %v1301_v35  ;;  %4000 = vmatpush.msra.mxu1 %v1335_v36  ;;  %v1439_v7 = vld [vmem:[%s4875_s6 + $0x2468] sm:$0xff]  ;;  %v1537_v27 = vld [vmem:[%s4875_s6 + $0x2778] sm:$0xff] }
 0x33e   : > { %4021 = vmatpush.msra.mxu2 %v1365_v38  ;;  %4040 = vmatpush.msra.mxu3 %v1399_v39  ;;  %v1503_v26 = vld [vmem:[%s4875_s6 + $0x2668] sm:$0xff]  ;;  %v1437_v0 = vld [vmem:[%s4875_s6 + $0x2458] sm:$0xff] }
 0x33f   : > { %3982 = vmatpush.msra.mxu0 %v1299_v28  ;;  %4001 = vmatpush.msra.mxu1 %v1333_v31  ;;  %v1471_v46 = vld [vmem:[%s4875_s6 + $0x2568] sm:$0xff]  ;;  %v1501_v59 = vld [vmem:[%s4875_s6 + $0x2658] sm:$0xff] }
 0x340   : > { %4022 = vmatpush.msra.mxu2 %v1363_v55  ;;  %4041 = vmatpush.msra.mxu3 %v1397_v56  ;;  %v1535_v47 = vld [vmem:[%s4875_s6 + $0x2768] sm:$0xff]  ;;  %v1469_v36 = vld [vmem:[%s4875_s6 + $0x2558] sm:$0xff] }
 0x341   : > { %3983 = vmatmul.f32.vlgmr.msra.gmra.mxu0 %v5581_v18  ;;  %4023 = vmatmul.f32.vlgmr.msra.gmra.mxu2 %v5583_v21  ;;  %v1453_v18 = vld [vmem:[%s4875_s6 + $0x24d8] sm:$0xff]  ;;  %v1487_v21 = vld [vmem:[%s4875_s6 + $0x25e8] sm:$0xff] }
 0x342   : > { %4047 = vmatpush.msrb.mxu0 %v1457_v60  ;;  %4087 = vmatpush.msrb.mxu2 %v1521_v3  ;;  %v1435_v35 = vld [vmem:[%s4875_s6 + $0x2448] sm:$0xff]  ;;  %v1533_v39 = vld [vmem:[%s4875_s6 + $0x2758] sm:$0xff] }
 0x343   : > { %4002 = vmatpush.msra.mxu1 %v1331_v52  ;;  %4042 = vmatpush.msra.mxu3 %v1395_v53  ;;  %v1499_v38 = vld [vmem:[%s4875_s6 + $0x2648] sm:$0xff]  ;;  %v1433_v28 = vld [vmem:[%s4875_s6 + $0x2438] sm:$0xff] }
 0x344   : > { %4003 = vmatmul.f32.vlgmr.msra.gmra.mxu1 %v5593_v34  ;;  %4043 = vmatmul.f32.vlgmr.msra.gmra.mxu3 %v5595_v37  ;;  %v1515_v34 = vld [vmem:[%s4875_s6 + $0x26c8] sm:$0xff]  ;;  %v1549_v37 = vld [vmem:[%s4875_s6 + $0x27d8] sm:$0xff] }
 0x345   : > { %4048 = vmatpush.msrb.mxu0 %v1455_v22  ;;  %4067 = vmatpush.msrb.mxu1 %v1489_v6  ;;  %v1467_v31 = vld [vmem:[%s4875_s6 + $0x2548] sm:$0xff]  ;;  %v1497_v55 = vld [vmem:[%s4875_s6 + $0x2638] sm:$0xff] }
 0x346   : > { %4088 = vmatpush.msrb.mxu2 %v1519_v48  ;;  %4107 = vmatpush.msrb.mxu3 %v1553_v30  ;;  %v1531_v56 = vld [vmem:[%s4875_s6 + $0x2748] sm:$0xff]  ;;  %v1465_v3 = vld [vmem:[%s4875_s6 + $0x2538] sm:$0xff] }
 0x347   : > { %4049 = vmatpush.msrb.mxu0 %v1453_v18  ;;  %4068 = vmatpush.msrb.mxu1 %v1487_v21  ;;  %v1431_v60 = vld [vmem:[%s4875_s6 + $0x2428] sm:$0xff]  ;;  %v1529_v53 = vld [vmem:[%s4875_s6 + $0x2738] sm:$0xff] }
 0x348   : > { %4089 = vmatpush.msrb.mxu2 %v1517_v9  ;;  %4108 = vmatpush.msrb.mxu3 %v1551_v10  ;;  %v1495_v52 = vld [vmem:[%s4875_s6 + $0x2628] sm:$0xff]  ;;  %v1429_v22 = vld [vmem:[%s4875_s6 + $0x2418] sm:$0xff] }
 0x349   : > { %4050 = vmatpush.msrb.mxu0 %v1451_v41  ;;  %4069 = vmatpush.msrb.mxu1 %v1485_v42  ;;  %v1463_v6 = vld [vmem:[%s4875_s6 + $0x2528] sm:$0xff]  ;;  %v1493_v48 = vld [vmem:[%s4875_s6 + $0x2618] sm:$0xff] }
 0x34a   : > { %4090 = vmatpush.msrb.mxu2 %v1515_v34  ;;  %4109 = vmatpush.msrb.mxu3 %v1549_v37  ;;  %v1527_v30 = vld [vmem:[%s4875_s6 + $0x2728] sm:$0xff]  ;;  %v1461_v21 = vld [vmem:[%s4875_s6 + $0x2518] sm:$0xff] }
 0x34b   : > { %4051 = vmatpush.msrb.mxu0 %v1449_v23  ;;  %4070 = vmatpush.msrb.mxu1 %v1483_v12  ;;  %v1427_v18 = vld [vmem:[%s4875_s6 + $0x2408] sm:$0xff]  ;;  %v1525_v10 = vld [vmem:[%s4875_s6 + $0x2718] sm:$0xff] }
 0x34c   : > { %4091 = vmatpush.msrb.mxu2 %v1513_v15  ;;  %4110 = vmatpush.msrb.mxu3 %v1547_v16  ;;  %v1491_v9 = vld [vmem:[%s4875_s6 + $0x2608] sm:$0xff]  ;;  %v1585_v41 = vld [vmem:[%s4875_s6 + $0x28f8] sm:$0xff] }
 0x34d   : > { %4052 = vmatpush.msrb.mxu0 %v1447_v49  ;;  %4071 = vmatpush.msrb.mxu1 %v1481_v61  ;;  %v1649_v42 = vld [vmem:[%s4875_s6 + $0x2af8] sm:$0xff]  ;;  %v1459_v34 = vld [vmem:[%s4875_s6 + $0x2508] sm:$0xff] }
 0x34e   : > { %4092 = vmatpush.msrb.mxu2 %v1511_v43  ;;  %4111 = vmatpush.msrb.mxu3 %v1545_v50  ;;  %v1523_v37 = vld [vmem:[%s4875_s6 + $0x2708] sm:$0xff]  ;;  %v1617_v12 = vld [vmem:[%s4875_s6 + $0x29f8] sm:$0xff] }
 0x34f   : > { %4053 = vmatpush.msrb.mxu0 %v1445_v19  ;;  %4072 = vmatpush.msrb.mxu1 %v1479_v20  ;;  %v1583_v23 = vld [vmem:[%s4875_s6 + $0x28e8] sm:$0xff]  ;;  %v1681_v16 = vld [vmem:[%s4875_s6 + $0x2bf8] sm:$0xff] }
 0x350   : > { %4093 = vmatpush.msrb.mxu2 %v1509_v57  ;;  %4112 = vmatpush.msrb.mxu3 %v1543_v32  ;;  %v1647_v15 = vld [vmem:[%s4875_s6 + $0x2ae8] sm:$0xff]  ;;  %v1645_v49 = vld [vmem:[%s4875_s6 + $0x2ad8] sm:$0xff] }
 0x351   : > { %4054 = vmatpush.msrb.mxu0 %v1443_v33  ;;  %4073 = vmatpush.msrb.mxu1 %v1477_v62  ;;  %v1679_v61 = vld [vmem:[%s4875_s6 + $0x2be8] sm:$0xff]  ;;  %v1613_v50 = vld [vmem:[%s4875_s6 + $0x29d8] sm:$0xff] }
 0x352   : > { %4094 = vmatpush.msrb.mxu2 %v1507_v25  ;;  %4113 = vmatpush.msrb.mxu3 %v1541_v29  ;;  %v1579_v43 = vld [vmem:[%s4875_s6 + $0x28c8] sm:$0xff]  ;;  %v1577_v19 = vld [vmem:[%s4875_s6 + $0x28b8] sm:$0xff] }
 0x353   : > { %4055 = vmatpush.msrb.mxu0 %v1441_v51  ;;  %4074 = vmatpush.msrb.mxu1 %v1475_v45  ;;  %v1611_v20 = vld [vmem:[%s4875_s6 + $0x29c8] sm:$0xff]  ;;  %v1641_v57 = vld [vmem:[%s4875_s6 + $0x2ab8] sm:$0xff] }
 0x354   : > { %4095 = vmatpush.msrb.mxu2 %v1505_v63  ;;  %4114 = vmatpush.msrb.mxu3 %v1539_v54  ;;  %v1675_v32 = vld [vmem:[%s4875_s6 + $0x2bc8] sm:$0xff]  ;;  %v1609_v62 = vld [vmem:[%s4875_s6 + $0x29b8] sm:$0xff] }
 0x355   : > { %4056 = vmatpush.msrb.mxu0 %v1439_v7  ;;  %4075 = vmatpush.msrb.mxu1 %v1473_v58  ;;  %v1575_v33 = vld [vmem:[%s4875_s6 + $0x28a8] sm:$0xff]  ;;  %v1673_v29 = vld [vmem:[%s4875_s6 + $0x2bb8] sm:$0xff] }
 0x356   : > { %4096 = vmatpush.msrb.mxu2 %v1503_v26  ;;  %4115 = vmatpush.msrb.mxu3 %v1537_v27  ;;  %v1639_v25 = vld [vmem:[%s4875_s6 + $0x2aa8] sm:$0xff]  ;;  %v1573_v51 = vld [vmem:[%s4875_s6 + $0x2898] sm:$0xff] }
 0x357   : > { %4057 = vmatpush.msrb.mxu0 %v1437_v0  ;;  %4076 = vmatpush.msrb.mxu1 %v1471_v46  ;;  %v1607_v45 = vld [vmem:[%s4875_s6 + $0x29a8] sm:$0xff]  ;;  %v1637_v63 = vld [vmem:[%s4875_s6 + $0x2a98] sm:$0xff] }
 0x358   : > { %4097 = vmatpush.msrb.mxu2 %v1501_v59  ;;  %4116 = vmatpush.msrb.mxu3 %v1535_v47  ;;  %v1671_v54 = vld [vmem:[%s4875_s6 + $0x2ba8] sm:$0xff]  ;;  %v1605_v58 = vld [vmem:[%s4875_s6 + $0x2998] sm:$0xff] }
 0x359   : > { %4058 = vmatpush.msrb.mxu0 %v1435_v35  ;;  %4077 = vmatpush.msrb.mxu1 %v1469_v36  ;;  %v1571_v7 = vld [vmem:[%s4875_s6 + $0x2888] sm:$0xff]  ;;  %v1669_v27 = vld [vmem:[%s4875_s6 + $0x2b98] sm:$0xff] }
 0x35a   : > { %4098 = vmatpush.msrb.mxu2 %v1499_v38  ;;  %4117 = vmatpush.msrb.mxu3 %v1533_v39  ;;  %v1635_v26 = vld [vmem:[%s4875_s6 + $0x2a88] sm:$0xff]  ;;  %v1569_v0 = vld [vmem:[%s4875_s6 + $0x2878] sm:$0xff] }
 0x35b   : > { %4059 = vmatpush.msrb.mxu0 %v1433_v28  ;;  %4078 = vmatpush.msrb.mxu1 %v1467_v31  ;;  %v1603_v46 = vld [vmem:[%s4875_s6 + $0x2988] sm:$0xff]  ;;  %v1633_v59 = vld [vmem:[%s4875_s6 + $0x2a78] sm:$0xff] }
 0x35c   : > { %4099 = vmatpush.msrb.mxu2 %v1497_v55  ;;  %4118 = vmatpush.msrb.mxu3 %v1531_v56  ;;  %v1667_v47 = vld [vmem:[%s4875_s6 + $0x2b88] sm:$0xff]  ;;  %v1601_v36 = vld [vmem:[%s4875_s6 + $0x2978] sm:$0xff] }
 0x35d   : > { %4060 = vmatpush.msrb.mxu0 %v1431_v60  ;;  %4079 = vmatpush.msrb.mxu1 %v1465_v3  ;;  %v1567_v35 = vld [vmem:[%s4875_s6 + $0x2868] sm:$0xff]  ;;  %v1665_v39 = vld [vmem:[%s4875_s6 + $0x2b78] sm:$0xff] }
 0x35e   : > { %4100 = vmatpush.msrb.mxu2 %v1495_v52  ;;  %4119 = vmatpush.msrb.mxu3 %v1529_v53  ;;  %v1631_v38 = vld [vmem:[%s4875_s6 + $0x2a68] sm:$0xff]  ;;  %v1565_v28 = vld [vmem:[%s4875_s6 + $0x2858] sm:$0xff] }
 0x35f   : > { %4061 = vmatpush.msrb.mxu0 %v1429_v22  ;;  %4080 = vmatpush.msrb.mxu1 %v1463_v6  ;;  %v1599_v31 = vld [vmem:[%s4875_s6 + $0x2968] sm:$0xff]  ;;  %v1629_v55 = vld [vmem:[%s4875_s6 + $0x2a58] sm:$0xff] }
 0x360   : > { %4101 = vmatpush.msrb.mxu2 %v1493_v48  ;;  %4120 = vmatpush.msrb.mxu3 %v1527_v30  ;;  %v1663_v56 = vld [vmem:[%s4875_s6 + $0x2b68] sm:$0xff]  ;;  %v1597_v3 = vld [vmem:[%s4875_s6 + $0x2958] sm:$0xff] }
 0x361   : > { %4062 = vmatpush.msrb.mxu0 %v1427_v18  ;;  %4081 = vmatpush.msrb.mxu1 %v1461_v21  ;;  %v1563_v60 = vld [vmem:[%s4875_s6 + $0x2848] sm:$0xff]  ;;  %v1661_v53 = vld [vmem:[%s4875_s6 + $0x2b58] sm:$0xff] }
 0x362   : > { %4102 = vmatpush.msrb.mxu2 %v1491_v9  ;;  %4121 = vmatpush.msrb.mxu3 %v1525_v10  ;;  %v1627_v52 = vld [vmem:[%s4875_s6 + $0x2a48] sm:$0xff]  ;;  %v1561_v22 = vld [vmem:[%s4875_s6 + $0x2838] sm:$0xff] }
 0x363   : > { %4063 = vmatmul.f32.vlgmr.msrb.gmra.mxu0 %v5661_v4  ;;  %4103 = vmatmul.f32.vlgmr.msrb.gmra.mxu2 %v5663_v5  ;;  %v1581_v4 = vld [vmem:[%s4875_s6 + $0x28d8] sm:$0xff]  ;;  %v1615_v5 = vld [vmem:[%s4875_s6 + $0x29e8] sm:$0xff] }
 0x364   : > { %4127 = vmatpush.msra.mxu0 %v1585_v41  ;;  %4167 = vmatpush.msra.mxu2 %v1649_v42  ;;  %v1595_v6 = vld [vmem:[%s4875_s6 + $0x2948] sm:$0xff]  ;;  %v1625_v48 = vld [vmem:[%s4875_s6 + $0x2a38] sm:$0xff] }
 0x365   : > { %4082 = vmatpush.msrb.mxu1 %v1459_v34  ;;  %4122 = vmatpush.msrb.mxu3 %v1523_v37  ;;  %v1659_v30 = vld [vmem:[%s4875_s6 + $0x2b48] sm:$0xff]  ;;  %v1593_v21 = vld [vmem:[%s4875_s6 + $0x2938] sm:$0xff] }
 0x366   : > { %4083 = vmatmul.f32.vlgmr.msrb.gmra.mxu1 %v5673_v14  ;;  %4123 = vmatmul.f32.vlgmr.msrb.gmra.mxu3 %v5675_v17  ;;  %v1643_v14 = vld [vmem:[%s4875_s6 + $0x2ac8] sm:$0xff]  ;;  %v1677_v17 = vld [vmem:[%s4875_s6 + $0x2bd8] sm:$0xff] }
 0x367   : > { %4128 = vmatpush.msra.mxu0 %v1583_v23  ;;  %4147 = vmatpush.msra.mxu1 %v1617_v12  ;;  %v1559_v18 = vld [vmem:[%s4875_s6 + $0x2828] sm:$0xff]  ;;  %v1657_v10 = vld [vmem:[%s4875_s6 + $0x2b38] sm:$0xff] }
 0x368   : > { %4168 = vmatpush.msra.mxu2 %v1647_v15  ;;  %4187 = vmatpush.msra.mxu3 %v1681_v16  ;;  %v1623_v9 = vld [vmem:[%s4875_s6 + $0x2a28] sm:$0xff]  ;;  %v1557_v41 = vld [vmem:[%s4875_s6 + $0x2818] sm:$0xff] }
 0x369   : > { %4129 = vmatpush.msra.mxu0 %v1581_v4  ;;  %4148 = vmatpush.msra.mxu1 %v1615_v5  ;;  %v1591_v42 = vld [vmem:[%s4875_s6 + $0x2928] sm:$0xff]  ;;  %v1621_v34 = vld [vmem:[%s4875_s6 + $0x2a18] sm:$0xff] }
 0x36a   : > { %4169 = vmatpush.msra.mxu2 %v1645_v49  ;;  %4188 = vmatpush.msra.mxu3 %v1679_v61  ;;  %v1655_v37 = vld [vmem:[%s4875_s6 + $0x2b28] sm:$0xff]  ;;  %v1589_v12 = vld [vmem:[%s4875_s6 + $0x2918] sm:$0xff] }
 0x36b   : > { %4130 = vmatpush.msra.mxu0 %v1579_v43  ;;  %4149 = vmatpush.msra.mxu1 %v1613_v50  ;;  %v1555_v23 = vld [vmem:[%s4875_s6 + $0x2808] sm:$0xff]  ;;  %v1653_v16 = vld [vmem:[%s4875_s6 + $0x2b18] sm:$0xff] }
 0x36c   : > { %4170 = vmatpush.msra.mxu2 %v1643_v14  ;;  %4189 = vmatpush.msra.mxu3 %v1677_v17  ;;  %v1619_v15 = vld [vmem:[%s4875_s6 + $0x2a08] sm:$0xff]  ;;  %v1713_v4 = vld [vmem:[%s4875_s6 + $0x2cf8] sm:$0xff] }
 0x36d   : > { %4131 = vmatpush.msra.mxu0 %v1577_v19  ;;  %4150 = vmatpush.msra.mxu1 %v1611_v20  ;;  %v1777_v5 = vld [vmem:[%s4875_s6 + $0x2ef8] sm:$0xff]  ;;  %v1587_v49 = vld [vmem:[%s4875_s6 + $0x2908] sm:$0xff] }
 0x36e   : > { %4171 = vmatpush.msra.mxu2 %v1641_v57  ;;  %4190 = vmatpush.msra.mxu3 %v1675_v32  ;;  %v1651_v61 = vld [vmem:[%s4875_s6 + $0x2b08] sm:$0xff]  ;;  %v1745_v50 = vld [vmem:[%s4875_s6 + $0x2df8] sm:$0xff] }
 0x36f   : > { %4132 = vmatpush.msra.mxu0 %v1575_v33  ;;  %4151 = vmatpush.msra.mxu1 %v1609_v62  ;;  %v1711_v43 = vld [vmem:[%s4875_s6 + $0x2ce8] sm:$0xff]  ;;  %v1809_v17 = vld [vmem:[%s4875_s6 + $0x2ff8] sm:$0xff] }
 0x370   : > { %4172 = vmatpush.msra.mxu2 %v1639_v25  ;;  %4191 = vmatpush.msra.mxu3 %v1673_v29  ;;  %v1775_v14 = vld [vmem:[%s4875_s6 + $0x2ee8] sm:$0xff]  ;;  %v1773_v19 = vld [vmem:[%s4875_s6 + $0x2ed8] sm:$0xff] }
 0x371   : > { %4133 = vmatpush.msra.mxu0 %v1573_v51  ;;  %4152 = vmatpush.msra.mxu1 %v1607_v45  ;;  %v1807_v20 = vld [vmem:[%s4875_s6 + $0x2fe8] sm:$0xff]  ;;  %v1741_v32 = vld [vmem:[%s4875_s6 + $0x2dd8] sm:$0xff] }
 0x372   : > { %4173 = vmatpush.msra.mxu2 %v1637_v63  ;;  %4192 = vmatpush.msra.mxu3 %v1671_v54  ;;  %v1707_v57 = vld [vmem:[%s4875_s6 + $0x2cc8] sm:$0xff]  ;;  %v1705_v33 = vld [vmem:[%s4875_s6 + $0x2cb8] sm:$0xff] }
 0x373   : > { %4134 = vmatpush.msra.mxu0 %v1571_v7  ;;  %4153 = vmatpush.msra.mxu1 %v1605_v58  ;;  %v1739_v62 = vld [vmem:[%s4875_s6 + $0x2dc8] sm:$0xff]  ;;  %v1769_v25 = vld [vmem:[%s4875_s6 + $0x2eb8] sm:$0xff] }
 0x374   : > { %4174 = vmatpush.msra.mxu2 %v1635_v26  ;;  %4193 = vmatpush.msra.mxu3 %v1669_v27  ;;  %v1803_v29 = vld [vmem:[%s4875_s6 + $0x2fc8] sm:$0xff]  ;;  %v1737_v45 = vld [vmem:[%s4875_s6 + $0x2db8] sm:$0xff] }
 0x375   : > { %4135 = vmatpush.msra.mxu0 %v1569_v0  ;;  %4154 = vmatpush.msra.mxu1 %v1603_v46  ;;  %v1703_v51 = vld [vmem:[%s4875_s6 + $0x2ca8] sm:$0xff]  ;;  %v1801_v54 = vld [vmem:[%s4875_s6 + $0x2fb8] sm:$0xff] }
 0x376   : > { %4175 = vmatpush.msra.mxu2 %v1633_v59  ;;  %4194 = vmatpush.msra.mxu3 %v1667_v47  ;;  %v1767_v63 = vld [vmem:[%s4875_s6 + $0x2ea8] sm:$0xff]  ;;  %v1701_v7 = vld [vmem:[%s4875_s6 + $0x2c98] sm:$0xff] }
 0x377   : > { %4136 = vmatpush.msra.mxu0 %v1567_v35  ;;  %4155 = vmatpush.msra.mxu1 %v1601_v36  ;;  %v1735_v58 = vld [vmem:[%s4875_s6 + $0x2da8] sm:$0xff]  ;;  %v1765_v26 = vld [vmem:[%s4875_s6 + $0x2e98] sm:$0xff] }
 0x378   : > { %4176 = vmatpush.msra.mxu2 %v1631_v38  ;;  %4195 = vmatpush.msra.mxu3 %v1665_v39  ;;  %v1799_v27 = vld [vmem:[%s4875_s6 + $0x2fa8] sm:$0xff]  ;;  %v1733_v46 = vld [vmem:[%s4875_s6 + $0x2d98] sm:$0xff] }
 0x379   : > { %4137 = vmatpush.msra.mxu0 %v1565_v28  ;;  %4156 = vmatpush.msra.mxu1 %v1599_v31  ;;  %v1699_v0 = vld [vmem:[%s4875_s6 + $0x2c88] sm:$0xff]  ;;  %v1797_v47 = vld [vmem:[%s4875_s6 + $0x2f98] sm:$0xff] }
 0x37a   : > { %4177 = vmatpush.msra.mxu2 %v1629_v55  ;;  %4196 = vmatpush.msra.mxu3 %v1663_v56  ;;  %v1763_v59 = vld [vmem:[%s4875_s6 + $0x2e88] sm:$0xff]  ;;  %v1697_v35 = vld [vmem:[%s4875_s6 + $0x2c78] sm:$0xff] }
 0x37b   : > { %4138 = vmatpush.msra.mxu0 %v1563_v60  ;;  %4157 = vmatpush.msra.mxu1 %v1597_v3  ;;  %v1731_v36 = vld [vmem:[%s4875_s6 + $0x2d88] sm:$0xff]  ;;  %v1761_v38 = vld [vmem:[%s4875_s6 + $0x2e78] sm:$0xff] }
 0x37c   : > { %4178 = vmatpush.msra.mxu2 %v1627_v52  ;;  %4197 = vmatpush.msra.mxu3 %v1661_v53  ;;  %v1795_v39 = vld [vmem:[%s4875_s6 + $0x2f88] sm:$0xff]  ;;  %v1729_v31 = vld [vmem:[%s4875_s6 + $0x2d78] sm:$0xff] }
 0x37d   : > { %4139 = vmatpush.msra.mxu0 %v1561_v22  ;;  %4158 = vmatpush.msra.mxu1 %v1595_v6  ;;  %v1695_v28 = vld [vmem:[%s4875_s6 + $0x2c68] sm:$0xff]  ;;  %v1793_v56 = vld [vmem:[%s4875_s6 + $0x2f78] sm:$0xff] }
 0x37e   : > { %4179 = vmatpush.msra.mxu2 %v1625_v48  ;;  %4198 = vmatpush.msra.mxu3 %v1659_v30  ;;  %v1759_v55 = vld [vmem:[%s4875_s6 + $0x2e68] sm:$0xff]  ;;  %v1693_v60 = vld [vmem:[%s4875_s6 + $0x2c58] sm:$0xff] }
 0x37f   : > { %4140 = vmatpush.msra.mxu0 %v1559_v18  ;;  %4159 = vmatpush.msra.mxu1 %v1593_v21  ;;  %v1727_v3 = vld [vmem:[%s4875_s6 + $0x2d68] sm:$0xff]  ;;  %v1757_v52 = vld [vmem:[%s4875_s6 + $0x2e58] sm:$0xff] }
 0x380   : > { %4180 = vmatpush.msra.mxu2 %v1623_v9  ;;  %4199 = vmatpush.msra.mxu3 %v1657_v10  ;;  %v1791_v53 = vld [vmem:[%s4875_s6 + $0x2f68] sm:$0xff]  ;;  %v1725_v6 = vld [vmem:[%s4875_s6 + $0x2d58] sm:$0xff] }
 0x381   : > { %4141 = vmatpush.msra.mxu0 %v1557_v41  ;;  %4160 = vmatpush.msra.mxu1 %v1591_v42  ;;  %v1691_v22 = vld [vmem:[%s4875_s6 + $0x2c48] sm:$0xff]  ;;  %v1789_v30 = vld [vmem:[%s4875_s6 + $0x2f58] sm:$0xff] }
 0x382   : > { %4181 = vmatpush.msra.mxu2 %v1621_v34  ;;  %4200 = vmatpush.msra.mxu3 %v1655_v37  ;;  %v1755_v48 = vld [vmem:[%s4875_s6 + $0x2e48] sm:$0xff]  ;;  %v1689_v18 = vld [vmem:[%s4875_s6 + $0x2c38] sm:$0xff] }
 0x383   : > { %4142 = vmatpush.msra.mxu0 %v1555_v23  ;;  %4161 = vmatpush.msra.mxu1 %v1589_v12  ;;  %v1723_v21 = vld [vmem:[%s4875_s6 + $0x2d48] sm:$0xff]  ;;  %v1753_v9 = vld [vmem:[%s4875_s6 + $0x2e38] sm:$0xff] }
 0x384   : > { %4182 = vmatpush.msra.mxu2 %v1619_v15  ;;  %4201 = vmatpush.msra.mxu3 %v1653_v16  ;;  %v1787_v10 = vld [vmem:[%s4875_s6 + $0x2f48] sm:$0xff]  ;;  %v1721_v42 = vld [vmem:[%s4875_s6 + $0x2d38] sm:$0xff] }
 0x385   : > { %4143 = vmatmul.f32.vlgmr.msra.gmra.mxu0 %v5741_v8  ;;  %4183 = vmatmul.f32.vlgmr.msra.gmra.mxu2 %v5743_v11  ;;  %v1709_v8 = vld [vmem:[%s4875_s6 + $0x2cd8] sm:$0xff]  ;;  %v1743_v11 = vld [vmem:[%s4875_s6 + $0x2de8] sm:$0xff] }
 0x386   : > { %4207 = vmatpush.msrb.mxu0 %v1713_v4  ;;  %4247 = vmatpush.msrb.mxu2 %v1777_v5  ;;  %v1687_v41 = vld [vmem:[%s4875_s6 + $0x2c28] sm:$0xff]  ;;  %v1785_v37 = vld [vmem:[%s4875_s6 + $0x2f38] sm:$0xff] }
 0x387   : > { %4162 = vmatpush.msra.mxu1 %v1587_v49  ;;  %4202 = vmatpush.msra.mxu3 %v1651_v61  ;;  %v1751_v34 = vld [vmem:[%s4875_s6 + $0x2e28] sm:$0xff]  ;;  %v1685_v23 = vld [vmem:[%s4875_s6 + $0x2c18] sm:$0xff] }
 0x388   : > { %4163 = vmatmul.f32.vlgmr.msra.gmra.mxu1 %v5753_v40  ;;  %4203 = vmatmul.f32.vlgmr.msra.gmra.mxu3 %v5755_v44  ;;  %v1771_v40 = vld [vmem:[%s4875_s6 + $0x2ec8] sm:$0xff]  ;;  %v1805_v44 = vld [vmem:[%s4875_s6 + $0x2fd8] sm:$0xff] }
 0x389   : > { %4208 = vmatpush.msrb.mxu0 %v1711_v43  ;;  %4227 = vmatpush.msrb.mxu1 %v1745_v50  ;;  %v1719_v12 = vld [vmem:[%s4875_s6 + $0x2d28] sm:$0xff]  ;;  %v1749_v15 = vld [vmem:[%s4875_s6 + $0x2e18] sm:$0xff] }
 0x38a   : > { %4248 = vmatpush.msrb.mxu2 %v1775_v14  ;;  %4267 = vmatpush.msrb.mxu3 %v1809_v17  ;;  %v1783_v16 = vld [vmem:[%s4875_s6 + $0x2f28] sm:$0xff]  ;;  %v1717_v5 = vld [vmem:[%s4875_s6 + $0x2d18] sm:$0xff] }
 0x38b   : > { %4209 = vmatpush.msrb.mxu0 %v1709_v8  ;;  %4228 = vmatpush.msrb.mxu1 %v1743_v11  ;;  %v1683_v4 = vld [vmem:[%s4875_s6 + $0x2c08] sm:$0xff]  ;;  %v1781_v61 = vld [vmem:[%s4875_s6 + $0x2f18] sm:$0xff] }
 0x38c   : > { %4249 = vmatpush.msrb.mxu2 %v1773_v19  ;;  %4268 = vmatpush.msrb.mxu3 %v1807_v20  ;;  %v1747_v49 = vld [vmem:[%s4875_s6 + $0x2e08] sm:$0xff]  ;;  %v1841_v43 = vld [vmem:[%s4875_s6 + $0x30f8] sm:$0xff] }
 0x38d   : > { %4210 = vmatpush.msrb.mxu0 %v1707_v57  ;;  %4229 = vmatpush.msrb.mxu1 %v1741_v32  ;;  %v1905_v50 = vld [vmem:[%s4875_s6 + $0x32f8] sm:$0xff]  ;;  %v1715_v14 = vld [vmem:[%s4875_s6 + $0x2d08] sm:$0xff]  ;;  %v6970_v57 = vld [vmem:[#allocation7_spill] sm:$0xff] }
 0x38e   : > { %4250 = vmatpush.msrb.mxu2 %v1771_v40  ;;  %4269 = vmatpush.msrb.mxu3 %v1805_v44  ;;  %v1779_v17 = vld [vmem:[%s4875_s6 + $0x2f08] sm:$0xff]  ;;  %v1873_v11 = vld [vmem:[%s4875_s6 + $0x31f8] sm:$0xff] }
 0x38f   : > { %4211 = vmatpush.msrb.mxu0 %v1705_v33  ;;  %4230 = vmatpush.msrb.mxu1 %v1739_v62  ;;  %v1839_v8 = vld [vmem:[%s4875_s6 + $0x30e8] sm:$0xff]  ;;  %v1937_v20 = vld [vmem:[%s4875_s6 + $0x33f8] sm:$0xff] }
 0x390   : > { %4251 = vmatpush.msrb.mxu2 %v1769_v25  ;;  %4270 = vmatpush.msrb.mxu3 %v1803_v29  ;;  %v1903_v19 = vld [vmem:[%s4875_s6 + $0x32e8] sm:$0xff]  ;;  %v1901_v32 = vld [vmem:[%s4875_s6 + $0x32d8] sm:$0xff] }
 0x391   : > { %4212 = vmatpush.msrb.mxu0 %v1703_v51  ;;  %4231 = vmatpush.msrb.mxu1 %v1737_v45  ;;  %v1935_v40 = vld [vmem:[%s4875_s6 + $0x33e8] sm:$0xff]  ;;  %v1869_v33 = vld [vmem:[%s4875_s6 + $0x31d8] sm:$0xff] }
 0x392   : > { %4252 = vmatpush.msrb.mxu2 %v1767_v63  ;;  %4271 = vmatpush.msrb.mxu3 %v1801_v54  ;;  %v1835_v44 = vld [vmem:[%s4875_s6 + $0x30c8] sm:$0xff]  ;;  %v1933_v62 = vld [vmem:[%s4875_s6 + $0x33d8] sm:$0xff] }
 0x393   : > { %4213 = vmatpush.msrb.mxu0 %v1701_v7  ;;  %4232 = vmatpush.msrb.mxu1 %v1735_v58  ;;  %v1833_v25 = vld [vmem:[%s4875_s6 + $0x30b8] sm:$0xff]  ;;  %v1867_v29 = vld [vmem:[%s4875_s6 + $0x31c8] sm:$0xff] }
 0x394   : > { %4253 = vmatpush.msrb.mxu2 %v1765_v26  ;;  %4272 = vmatpush.msrb.mxu3 %v1799_v27  ;;  %v1897_v51 = vld [vmem:[%s4875_s6 + $0x32b8] sm:$0xff]  ;;  %v1931_v45 = vld [vmem:[%s4875_s6 + $0x33c8] sm:$0xff] }
 0x395   : > { %4214 = vmatpush.msrb.mxu0 %v1699_v0  ;;  %4233 = vmatpush.msrb.mxu1 %v1733_v46  ;;  %v1831_v63 = vld [vmem:[%s4875_s6 + $0x30a8] sm:$0xff]  ;;  %v1865_v54 = vld [vmem:[%s4875_s6 + $0x31b8] sm:$0xff] }
 0x396   : > { %4254 = vmatpush.msrb.mxu2 %v1763_v59  ;;  %4273 = vmatpush.msrb.mxu3 %v1797_v47  ;;  %v1895_v7 = vld [vmem:[%s4875_s6 + $0x32a8] sm:$0xff]  ;;  %v1929_v58 = vld [vmem:[%s4875_s6 + $0x33b8] sm:$0xff] }
 0x397   : > { %4215 = vmatpush.msrb.mxu0 %v1697_v35  ;;  %4234 = vmatpush.msrb.mxu1 %v1731_v36  ;;  %v1829_v26 = vld [vmem:[%s4875_s6 + $0x3098] sm:$0xff]  ;;  %v1863_v27 = vld [vmem:[%s4875_s6 + $0x31a8] sm:$0xff] }
 0x398   : > { %4255 = vmatpush.msrb.mxu2 %v1761_v38  ;;  %4274 = vmatpush.msrb.mxu3 %v1795_v39  ;;  %v1893_v0 = vld [vmem:[%s4875_s6 + $0x3298] sm:$0xff]  ;;  %v1927_v46 = vld [vmem:[%s4875_s6 + $0x33a8] sm:$0xff] }
 0x399   : > { %4216 = vmatpush.msrb.mxu0 %v1695_v28  ;;  %4235 = vmatpush.msrb.mxu1 %v1729_v31  ;;  %v1827_v59 = vld [vmem:[%s4875_s6 + $0x3088] sm:$0xff]  ;;  %v1861_v47 = vld [vmem:[%s4875_s6 + $0x3198] sm:$0xff] }
 0x39a   : > { %4256 = vmatpush.msrb.mxu2 %v1759_v55  ;;  %4275 = vmatpush.msrb.mxu3 %v1793_v56  ;;  %v1891_v35 = vld [vmem:[%s4875_s6 + $0x3288] sm:$0xff]  ;;  %v1925_v36 = vld [vmem:[%s4875_s6 + $0x3398] sm:$0xff] }
 0x39b   : > { %4217 = vmatpush.msrb.mxu0 %v1693_v60  ;;  %4236 = vmatpush.msrb.mxu1 %v1727_v3  ;;  %v1825_v38 = vld [vmem:[%s4875_s6 + $0x3078] sm:$0xff]  ;;  %v1859_v39 = vld [vmem:[%s4875_s6 + $0x3188] sm:$0xff] }
 0x39c   : > { %4257 = vmatpush.msrb.mxu2 %v1757_v52  ;;  %4276 = vmatpush.msrb.mxu3 %v1791_v53  ;;  %v1889_v28 = vld [vmem:[%s4875_s6 + $0x3278] sm:$0xff]  ;;  %v1923_v31 = vld [vmem:[%s4875_s6 + $0x3388] sm:$0xff] }
 0x39d   : > { %4218 = vmatpush.msrb.mxu0 %v1691_v22  ;;  %4237 = vmatpush.msrb.mxu1 %v1725_v6  ;;  %v1823_v55 = vld [vmem:[%s4875_s6 + $0x3068] sm:$0xff]  ;;  %v1857_v56 = vld [vmem:[%s4875_s6 + $0x3178] sm:$0xff] }
 0x39e   : > { %4258 = vmatpush.msrb.mxu2 %v1755_v48  ;;  %4277 = vmatpush.msrb.mxu3 %v1789_v30  ;;  %v1887_v60 = vld [vmem:[%s4875_s6 + $0x3268] sm:$0xff]  ;;  %v1921_v3 = vld [vmem:[%s4875_s6 + $0x3378] sm:$0xff] }
 0x39f   : > { %4219 = vmatpush.msrb.mxu0 %v1689_v18  ;;  %4238 = vmatpush.msrb.mxu1 %v1723_v21  ;;  %v1821_v52 = vld [vmem:[%s4875_s6 + $0x3058] sm:$0xff]  ;;  %v1855_v53 = vld [vmem:[%s4875_s6 + $0x3168] sm:$0xff] }
 0x3a0   : > { %4259 = vmatpush.msrb.mxu2 %v1753_v9  ;;  %4278 = vmatpush.msrb.mxu3 %v1787_v10  ;;  %v1885_v22 = vld [vmem:[%s4875_s6 + $0x3258] sm:$0xff]  ;;  %v1919_v6 = vld [vmem:[%s4875_s6 + $0x3368] sm:$0xff] }
 0x3a1   : > { %4220 = vmatpush.msrb.mxu0 %v1687_v41  ;;  %4239 = vmatpush.msrb.mxu1 %v1721_v42  ;;  %v1819_v48 = vld [vmem:[%s4875_s6 + $0x3048] sm:$0xff]  ;;  %v1853_v30 = vld [vmem:[%s4875_s6 + $0x3158] sm:$0xff] }
 0x3a2   : > { %4260 = vmatpush.msrb.mxu2 %v1751_v34  ;;  %4279 = vmatpush.msrb.mxu3 %v1785_v37  ;;  %v1883_v18 = vld [vmem:[%s4875_s6 + $0x3248] sm:$0xff]  ;;  %v1917_v21 = vld [vmem:[%s4875_s6 + $0x3358] sm:$0xff] }
 0x3a3   : > { %4221 = vmatpush.msrb.mxu0 %v1685_v23  ;;  %4240 = vmatpush.msrb.mxu1 %v1719_v12  ;;  %v1817_v9 = vld [vmem:[%s4875_s6 + $0x3038] sm:$0xff]  ;;  %v1851_v10 = vld [vmem:[%s4875_s6 + $0x3148] sm:$0xff] }
 0x3a4   : > { %4261 = vmatpush.msrb.mxu2 %v1749_v15  ;;  %4280 = vmatpush.msrb.mxu3 %v1783_v16  ;;  %v1881_v41 = vld [vmem:[%s4875_s6 + $0x3238] sm:$0xff]  ;;  %v1915_v42 = vld [vmem:[%s4875_s6 + $0x3348] sm:$0xff] }
 0x3a5   : > { %4222 = vmatpush.msrb.mxu0 %v1683_v4  ;;  %4241 = vmatpush.msrb.mxu1 %v1717_v5  ;;  %v1815_v34 = vld [vmem:[%s4875_s6 + $0x3028] sm:$0xff]  ;;  %v1849_v37 = vld [vmem:[%s4875_s6 + $0x3138] sm:$0xff] }
 0x3a6   : > { %4262 = vmatpush.msrb.mxu2 %v1747_v49  ;;  %4281 = vmatpush.msrb.mxu3 %v1781_v61  ;;  %v1879_v23 = vld [vmem:[%s4875_s6 + $0x3228] sm:$0xff]  ;;  %v1913_v12 = vld [vmem:[%s4875_s6 + $0x3338] sm:$0xff] }
 0x3a7   : > { %4223 = vmatmul.f32.vlgmr.msrb.gmra.mxu0 %v5821_v1  ;;  %4263 = vmatmul.f32.vlgmr.msrb.gmra.mxu2 %v5823_v2  ;;  %v1837_v1 = vld [vmem:[%s4875_s6 + $0x30d8] sm:$0xff]  ;;  %v1871_v2 = vld [vmem:[%s4875_s6 + $0x31e8] sm:$0xff] }
 0x3a8   : > { %4287 = vmatpush.msra.mxu0 %v1841_v43  ;;  %4327 = vmatpush.msra.mxu2 %v1905_v50  ;;  %v1813_v15 = vld [vmem:[%s4875_s6 + $0x3018] sm:$0xff]  ;;  %v1847_v16 = vld [vmem:[%s4875_s6 + $0x3128] sm:$0xff] }
 0x3a9   : > { %4242 = vmatpush.msrb.mxu1 %v1715_v14  ;;  %4282 = vmatpush.msrb.mxu3 %v1779_v17  ;;  %v1877_v4 = vld [vmem:[%s4875_s6 + $0x3218] sm:$0xff]  ;;  %v1911_v5 = vld [vmem:[%s4875_s6 + $0x3328] sm:$0xff] }
 0x3aa   : > { %4243 = vmatmul.f32.vlgmr.msrb.gmra.mxu1 %v5833_v24  ;;  %4283 = vmatmul.f32.vlgmr.msrb.gmra.mxu3 %v6970_v57  ;;  %v1899_v24 = vld [vmem:[%s4875_s6 + $0x32c8] sm:$0xff]  ;;  %v1845_v61 = vld [vmem:[%s4875_s6 + $0x3118] sm:$0xff] }
 0x3ab   : > { %4288 = vmatpush.msra.mxu0 %v1839_v8  ;;  %4307 = vmatpush.msra.mxu1 %v1873_v11  ;;  %v1811_v49 = vld [vmem:[%s4875_s6 + $0x3008] sm:$0xff]  ;;  %v1909_v50 = vld [vmem:[%s4875_s6 + $0x3318] sm:$0xff]  ;;  %v3364_v8 = vpop.f32.mrf.mxu1 }
 0x3ac   : > { %4328 = vmatpush.msra.mxu2 %v1903_v19  ;;  %4347 = vmatpush.msra.mxu3 %v1937_v20  ;;  %v1875_v43 = vld [vmem:[%s4875_s6 + $0x3208] sm:$0xff]  ;;  %v1969_v14 = vld [vmem:[%s4875_s6 + $0x34f8] sm:$0xff] }
 0x3ad   : > { %4289 = vmatpush.msra.mxu0 %v1837_v1  ;;  %4308 = vmatpush.msra.mxu1 %v1871_v2  ;;  %v2033_v17 = vld [vmem:[%s4875_s6 + $0x36f8] sm:$0xff]  ;;  %v1843_v11 = vld [vmem:[%s4875_s6 + $0x3108] sm:$0xff]  ;;  %v3344_v1 = vpop.f32.mrf.mxu0 }
 0x3ae   : > { %4329 = vmatpush.msra.mxu2 %v1901_v32  ;;  %4348 = vmatpush.msra.mxu3 %v1935_v40  ;;  %v1907_v19 = vld [vmem:[%s4875_s6 + $0x3308] sm:$0xff]  ;;  %v4667_v20 = vld.sshfl [vmem:[#allocation1] sm:$0xff pattern:$0x73625140]  ;;  %v3365_v40 = vadd.f32 %v3364_v8, %v3344_v1 }
 0x3af   : > { %4290 = vmatpush.msra.mxu0 %v1835_v44  ;;  %4309 = vmatpush.msra.mxu1 %v1869_v33  ;;  %v4668_v57 = vld.sshfl [vmem:[#allocation1 + $0x10] sm:$0xff pattern:$0x73625140]  ;;  %v2001_v32 = vld [vmem:[%s4875_s6 + $0x35f8] sm:$0xff] }
 0x3b0   : > { %4330 = vmatpush.msra.mxu2 %v1899_v24  ;;  %4349 = vmatpush.msra.mxu3 %v1933_v62  ;;  %v1967_v2 = vld [vmem:[%s4875_s6 + $0x34e8] sm:$0xff]  ;;  %v2065_v33 = vld [vmem:[%s4875_s6 + $0x37f8] sm:$0xff]  ;;  %v3384_v24 = vpop.f32.mrf.mxu2 }
 0x3b1   : > { %4291 = vmatpush.msra.mxu0 %v1833_v25  ;;  %4310 = vmatpush.msra.mxu1 %v1867_v29  ;;  %v2031_v44 = vld [vmem:[%s4875_s6 + $0x36e8] sm:$0xff]  ;;  %v4669_v62 = vld.sshfl [vmem:[#allocation1 + $0x8] sm:$0xff pattern:$0x73625140] }
 0x3b2   : > { %4331 = vmatpush.msra.mxu2 %v1897_v51  ;;  %4350 = vmatpush.msra.mxu3 %v1931_v45  ;;  %v4670_v25 = vld.sshfl [vmem:[#allocation1 + $0x18] sm:$0xff pattern:$0x73625140]  ;;  %v1965_v29 = vld [vmem:[%s4875_s6 + $0x34d8] sm:$0xff] }
 0x3b3   : > { %4292 = vmatpush.msra.mxu0 %v1831_v63  ;;  %4311 = vmatpush.msra.mxu1 %v1865_v54  ;;  %v1999_v51 = vld [vmem:[%s4875_s6 + $0x35e8] sm:$0xff]  ;;  %v2029_v45 = vld [vmem:[%s4875_s6 + $0x36d8] sm:$0xff] }
 0x3b4   : > { %4332 = vmatpush.msra.mxu2 %v1895_v7  ;;  %4351 = vmatpush.msra.mxu3 %v1929_v58  ;;  %v2063_v63 = vld [vmem:[%s4875_s6 + $0x37e8] sm:$0xff]  ;;  %v1997_v7 = vld [vmem:[%s4875_s6 + $0x35d8] sm:$0xff]  ;;  %v3385_v58 = vadd.f32 %v3384_v24, %v3365_v40 }
 0x3b5   : > { %4293 = vmatpush.msra.mxu0 %v1829_v26  ;;  %4312 = vmatpush.msra.mxu1 %v1863_v27  ;;  %v1963_v54 = vld [vmem:[%s4875_s6 + $0x34c8] sm:$0xff]  ;;  %v2061_v27 = vld [vmem:[%s4875_s6 + $0x37d8] sm:$0xff] }
 0x3b6   : > { %4333 = vmatpush.msra.mxu2 %v1893_v0  ;;  %4352 = vmatpush.msra.mxu3 %v1927_v46  ;;  %v2027_v26 = vld [vmem:[%s4875_s6 + $0x36c8] sm:$0xff]  ;;  %v3404_v0 = vpop.f32.mrf.mxu3  ;;  %v1961_v46 = vld [vmem:[%s4875_s6 + $0x34b8] sm:$0xff] }
 0x3b7   : > { %4294 = vmatpush.msra.mxu0 %v1827_v59  ;;  %4313 = vmatpush.msra.mxu1 %v1861_v47  ;;  %v1995_v59 = vld [vmem:[%s4875_s6 + $0x35c8] sm:$0xff]  ;;  %v2025_v47 = vld [vmem:[%s4875_s6 + $0x36b8] sm:$0xff] }
 0x3b8   : > { %4334 = vmatpush.msra.mxu2 %v1891_v35  ;;  %4353 = vmatpush.msra.mxu3 %v1925_v36  ;;  %v2059_v35 = vld [vmem:[%s4875_s6 + $0x37c8] sm:$0xff]  ;;  %v1941_v24 = vld [vmem:[%s4875_s6 + $0x3418] sm:$0xff] }
 0x3b9   : > { %4295 = vmatpush.msra.mxu0 %v1825_v38  ;;  %4314 = vmatpush.msra.mxu1 %v1859_v39  ;;  %v1959_v36 = vld [vmem:[%s4875_s6 + $0x34a8] sm:$0xff]  ;;  %v1993_v38 = vld [vmem:[%s4875_s6 + $0x35b8] sm:$0xff]  ;;  %v3405_v39 = vadd.f32 %v3404_v0, %v3385_v58 }
 0x3ba   : > { %4335 = vmatpush.msra.mxu2 %v1889_v28  ;;  %4354 = vmatpush.msra.mxu3 %v1923_v31  ;;  %v2023_v28 = vld [vmem:[%s4875_s6 + $0x36a8] sm:$0xff]  ;;  %v2057_v31 = vld [vmem:[%s4875_s6 + $0x37b8] sm:$0xff] }
 0x3bb   : > { %4296 = vmatpush.msra.mxu0 %v1823_v55  ;;  %4315 = vmatpush.msra.mxu1 %v1857_v56  ;;  %v3424_v55 = vpop.f32.mrf.mxu0  ;;  %v1957_v56 = vld [vmem:[%s4875_s6 + $0x3498] sm:$0xff]  ;;  %v1971_v0 = vld [vmem:[%s4875_s6 + $0x3508] sm:$0xff] }
 0x3bc   : > { %4336 = vmatpush.msra.mxu2 %v1887_v60  ;;  %4355 = vmatpush.msra.mxu3 %v1921_v3  ;;  %v1991_v60 = vld [vmem:[%s4875_s6 + $0x35a8] sm:$0xff]  ;;  %v2021_v3 = vld [vmem:[%s4875_s6 + $0x3698] sm:$0xff] }
 0x3bd   : > { %4297 = vmatpush.msra.mxu0 %v1821_v52  ;;  %4316 = vmatpush.msra.mxu1 %v1855_v53  ;;  %v2055_v52 = vld [vmem:[%s4875_s6 + $0x37a8] sm:$0xff]  ;;  %v2037_v58 = vld [vmem:[%s4875_s6 + $0x3718] sm:$0xff] }
 0x3be   : > { %4337 = vmatpush.msra.mxu2 %v1885_v22  ;;  %4356 = vmatpush.msra.mxu3 %v1919_v6  ;;  %v1955_v53 = vld [vmem:[%s4875_s6 + $0x3488] sm:$0xff]  ;;  %v1989_v22 = vld [vmem:[%s4875_s6 + $0x3598] sm:$0xff]  ;;  %v3425_v6 = vadd.f32 %v3424_v55, %v3405_v39  ;;  %v3484_v8 = vpop.f32.mrf.mxu3 }
 0x3bf   : > { %4298 = vmatpush.msra.mxu0 %v1819_v48  ;;  %4317 = vmatpush.msra.mxu1 %v1853_v30  ;;  %v2019_v48 = vld [vmem:[%s4875_s6 + $0x3688] sm:$0xff]  ;;  %v2053_v30 = vld [vmem:[%s4875_s6 + $0x3798] sm:$0xff] }
 0x3c0   : > { %4338 = vmatpush.msra.mxu2 %v1883_v18  ;;  %4357 = vmatpush.msra.mxu3 %v1917_v21  ;;  %v3444_v18 = vpop.f32.mrf.mxu1  ;;  %v1953_v21 = vld [vmem:[%s4875_s6 + $0x3478] sm:$0xff]  ;;  %v4674_v39 = vld.sshfl [vmem:[#allocation1 + $0x38] sm:$0xff pattern:$0x73625140] }
 0x3c1   : > { %4299 = vmatpush.msra.mxu0 %v1817_v9  ;;  %4318 = vmatpush.msra.mxu1 %v1851_v10  ;;  %v1987_v9 = vld [vmem:[%s4875_s6 + $0x3588] sm:$0xff]  ;;  %v2017_v10 = vld [vmem:[%s4875_s6 + $0x3678] sm:$0xff] }
 0x3c2   : > { %4339 = vmatpush.msra.mxu2 %v1881_v41  ;;  %4358 = vmatpush.msra.mxu3 %v1915_v42  ;;  %v2051_v41 = vld [vmem:[%s4875_s6 + $0x3788] sm:$0xff] }
 0x3c3   : > { %4300 = vmatpush.msra.mxu0 %v1815_v34  ;;  %4319 = vmatpush.msra.mxu1 %v1849_v37  ;;  %v1951_v42 = vld [vmem:[%s4875_s6 + $0x3468] sm:$0xff]  ;;  %v1985_v34 = vld [vmem:[%s4875_s6 + $0x3578] sm:$0xff]  ;;  %v3445_v37 = vadd.f32 %v3444_v18, %v3425_v6  ;;  %v3504_v1 = vpop.f32.mrf.mxu0 }
 0x3c4   : > { %4340 = vmatpush.msra.mxu2 %v1879_v23  ;;  %4359 = vmatpush.msra.mxu3 %v1913_v12  ;;  %v2015_v23 = vld [vmem:[%s4875_s6 + $0x3668] sm:$0xff]  ;;  %v2049_v12 = vld [vmem:[%s4875_s6 + $0x3778] sm:$0xff] }
 0x3c5   : > { %4301 = vmatpush.msra.mxu0 %v1813_v15  ;;  %4320 = vmatpush.msra.mxu1 %v1847_v16  ;;  %v3464_v15 = vpop.f32.mrf.mxu2  ;;  %v1949_v16 = vld [vmem:[%s4875_s6 + $0x3458] sm:$0xff] }
 0x3c6   : > { %4341 = vmatpush.msra.mxu2 %v1877_v4  ;;  %4360 = vmatpush.msra.mxu3 %v1911_v5  ;;  %v1983_v4 = vld [vmem:[%s4875_s6 + $0x3568] sm:$0xff]  ;;  %v2013_v5 = vld [vmem:[%s4875_s6 + $0x3658] sm:$0xff] }
 0x3c7   : > { %4302 = vmatpush.msra.mxu0 %v1811_v49  ;;  %4321 = vmatpush.msra.mxu1 %v1845_v61  ;;  %v2047_v49 = vld [vmem:[%s4875_s6 + $0x3768] sm:$0xff] }
 0x3c8   : > { %4342 = vmatpush.msra.mxu2 %v1875_v43  ;;  %4361 = vmatpush.msra.mxu3 %v1909_v50  ;;  %v1947_v61 = vld [vmem:[%s4875_s6 + $0x3448] sm:$0xff]  ;;  %v1981_v43 = vld [vmem:[%s4875_s6 + $0x3558] sm:$0xff]  ;;  %v3465_v50 = vadd.f32 %v3464_v15, %v3445_v37 }
 0x3c9   : > { %4303 = vmatmul.f32.vlgmr.msra.gmra.mxu0 %v4667_v20  ;;  %4343 = vmatmul.f32.vlgmr.msra.gmra.mxu2 %v4668_v57  ;;  %v2009_v20 = vld [vmem:[%s4875_s6 + $0x3638] sm:$0xff]  ;;  %v2043_v57 = vld [vmem:[%s4875_s6 + $0x3748] sm:$0xff] }
 0x3ca   : > { %4367 = vmatpush.msrb.mxu0 %v1969_v14  ;;  %4407 = vmatpush.msrb.mxu2 %v2033_v17  ;;  %v2011_v14 = vld [vmem:[%s4875_s6 + $0x3648] sm:$0xff]  ;;  %v2045_v17 = vld [vmem:[%s4875_s6 + $0x3758] sm:$0xff]  ;;  %v3485_v40 = vadd.f32 %v3484_v8, %v3465_v50 }
 0x3cb   : > { %4322 = vmatpush.msra.mxu1 %v1843_v11  ;;  %4362 = vmatpush.msra.mxu3 %v1907_v19  ;;  %v1945_v11 = vld [vmem:[%s4875_s6 + $0x3438] sm:$0xff]  ;;  %v1979_v19 = vld [vmem:[%s4875_s6 + $0x3548] sm:$0xff] }
 0x3cc   : > { %4323 = vmatmul.f32.vlgmr.msra.gmra.mxu1 %v4669_v62  ;;  %4363 = vmatmul.f32.vlgmr.msra.gmra.mxu3 %v4670_v25  ;;  %v1975_v62 = vld [vmem:[%s4875_s6 + $0x3528] sm:$0xff]  ;;  %v3505_v25 = vadd.f32 %v3504_v1, %v3485_v40 }
 0x3cd   : > { %4368 = vmatpush.msrb.mxu0 %v1967_v2  ;;  %4387 = vmatpush.msrb.mxu1 %v2001_v32  ;;  %v1943_v2 = vld [vmem:[%s4875_s6 + $0x3428] sm:$0xff]  ;;  %v1977_v32 = vld [vmem:[%s4875_s6 + $0x3538] sm:$0xff] }
 0x3ce   : > { %4408 = vmatpush.msrb.mxu2 %v2031_v44  ;;  %4427 = vmatpush.msrb.mxu3 %v2065_v33  ;;  %v2007_v44 = vld [vmem:[%s4875_s6 + $0x3628] sm:$0xff]  ;;  %v2041_v33 = vld [vmem:[%s4875_s6 + $0x3738] sm:$0xff] }
 0x3cf   : > { %4369 = vmatpush.msrb.mxu0 %v1965_v29  ;;  %4388 = vmatpush.msrb.mxu1 %v1999_v51  ;;  %v2005_v29 = vld [vmem:[%s4875_s6 + $0x3618] sm:$0xff]  ;;  %v2039_v51 = vld [vmem:[%s4875_s6 + $0x3728] sm:$0xff] }
 0x3d0   : > { %4409 = vmatpush.msrb.mxu2 %v2029_v45  ;;  %4428 = vmatpush.msrb.mxu3 %v2063_v63  ;;  %v3524_v45 = vpop.f32.mrf.mxu1  ;;  %v1939_v63 = vld [vmem:[%s4875_s6 + $0x3408] sm:$0xff] }
 0x3d1   : > { %4370 = vmatpush.msrb.mxu0 %v1963_v54  ;;  %4389 = vmatpush.msrb.mxu1 %v1997_v7  ;;  %v1973_v54 = vld [vmem:[%s4875_s6 + $0x3518] sm:$0xff]  ;;  %v2003_v7 = vld [vmem:[%s4875_s6 + $0x3608] sm:$0xff] }
 0x3d2   : > { %4410 = vmatpush.msrb.mxu2 %v2027_v26  ;;  %4429 = vmatpush.msrb.mxu3 %v2061_v27  ;;  %v3544_v26 = vpop.f32.mrf.mxu2  ;;  %v3525_v27 = vadd.f32 %v3524_v45, %v3505_v25 }
 0x3d3   : > { %4371 = vmatpush.msrb.mxu0 %v1961_v46  ;;  %4390 = vmatpush.msrb.mxu1 %v1995_v59  ;;  %v2035_v46 = vld [vmem:[%s4875_s6 + $0x3708] sm:$0xff] }
 0x3d4   : > { %4411 = vmatpush.msrb.mxu2 %v2025_v47  ;;  %4430 = vmatpush.msrb.mxu3 %v2059_v35  ;;  %v3545_v59 = vadd.f32 %v3544_v26, %v3525_v27  ;;  %v4671_v47 = vld.sshfl [vmem:[#allocation1 + $0x20] sm:$0xff pattern:$0x73625140]  ;;  %v4672_v35 = vld.sshfl [vmem:[#allocation1 + $0x30] sm:$0xff pattern:$0x73625140] }
 0x3d5   : > { %4372 = vmatpush.msrb.mxu0 %v1959_v36  ;;  %4391 = vmatpush.msrb.mxu1 %v1993_v38  ;;  %v3564_v36 = vpop.f32.mrf.mxu3  ;;  %v4673_v38 = vld.sshfl [vmem:[#allocation1 + $0x28] sm:$0xff pattern:$0x73625140] }
 0x3d6   : > { %4412 = vmatpush.msrb.mxu2 %v2023_v28  ;;  %4431 = vmatpush.msrb.mxu3 %v2057_v31  ;;  %v3584_v28 = vpop.f32.mrf.mxu0  ;;  %v3565_v31 = vadd.f32 %v3564_v36, %v3545_v59 }
 0x3d7   : > { %4373 = vmatpush.msrb.mxu0 %v1957_v56  ;;  %4392 = vmatpush.msrb.mxu1 %v1991_v60 }
 0x3d8   : > { %4413 = vmatpush.msrb.mxu2 %v2021_v3  ;;  %4432 = vmatpush.msrb.mxu3 %v2055_v52  ;;  %v3585_v55 = vadd.f32 %v3584_v28, %v3565_v31  ;;  %v3604_v56 = vpop.f32.mrf.mxu1 }
 0x3d9   : > { %4374 = vmatpush.msrb.mxu0 %v1955_v53  ;;  %4393 = vmatpush.msrb.mxu1 %v1989_v22 }
 0x3da   : > { %4414 = vmatpush.msrb.mxu2 %v2019_v48  ;;  %4433 = vmatpush.msrb.mxu3 %v2053_v30  ;;  %v3624_v60 = vpop.f32.mrf.mxu2  ;;  %v3605_v3 = vadd.f32 %v3604_v56, %v3585_v55 }
 0x3db   : > { %4375 = vmatpush.msrb.mxu0 %v1953_v21  ;;  %4394 = vmatpush.msrb.mxu1 %v1987_v9 }
 0x3dc   : > { %4415 = vmatpush.msrb.mxu2 %v2017_v10  ;;  %4434 = vmatpush.msrb.mxu3 %v2051_v41  ;;  %v3625_v52 = vadd.f32 %v3624_v60, %v3605_v3 }
 0x3dd   : > { %4376 = vmatpush.msrb.mxu0 %v1951_v42  ;;  %4395 = vmatpush.msrb.mxu1 %v1985_v34  ;;  %v3644_v53 = vpop.f32.mrf.mxu3 }
 0x3de   : > { %4416 = vmatpush.msrb.mxu2 %v2015_v23  ;;  %4435 = vmatpush.msrb.mxu3 %v2049_v12  ;;  %v3664_v22 = vpop.f32.mrf.mxu0  ;;  %v3645_v6 = vadd.f32 %v3644_v53, %v3625_v52 }
 0x3df   : > { %4377 = vmatpush.msrb.mxu0 %v1949_v16  ;;  %4396 = vmatpush.msrb.mxu1 %v1983_v4 }
 0x3e0   : > { %4417 = vmatpush.msrb.mxu2 %v2013_v5  ;;  %4436 = vmatpush.msrb.mxu3 %v2047_v49  ;;  %v3665_v48 = vadd.f32 %v3664_v22, %v3645_v6  ;;  %v3684_v30 = vpop.f32.mrf.mxu1 }
 0x3e1   : > { %4378 = vmatpush.msrb.mxu0 %v1947_v61  ;;  %4397 = vmatpush.msrb.mxu1 %v1981_v43 }
 0x3e2   : > { %4418 = vmatpush.msrb.mxu2 %v2011_v14  ;;  %4437 = vmatpush.msrb.mxu3 %v2045_v17  ;;  %v3704_v18 = vpop.f32.mrf.mxu2  ;;  %v3685_v21 = vadd.f32 %v3684_v30, %v3665_v48 }
 0x3e3   : > { %4379 = vmatpush.msrb.mxu0 %v1945_v11  ;;  %4398 = vmatpush.msrb.mxu1 %v1979_v19 }
 0x3e4   : > { %4419 = vmatpush.msrb.mxu2 %v2009_v20  ;;  %4438 = vmatpush.msrb.mxu3 %v2043_v57  ;;  %v3705_v9 = vadd.f32 %v3704_v18, %v3685_v21 }
 0x3e5   : > { %4380 = vmatpush.msrb.mxu0 %v1943_v2  ;;  %4399 = vmatpush.msrb.mxu1 %v1977_v32  ;;  %v3724_v10 = vpop.f32.mrf.mxu3 }
 0x3e6   : > { %4420 = vmatpush.msrb.mxu2 %v2007_v44  ;;  %4439 = vmatpush.msrb.mxu3 %v2041_v33  ;;  %v3744_v41 = vpop.f32.mrf.mxu0  ;;  %v3725_v42 = vadd.f32 %v3724_v10, %v3705_v9 }
 0x3e7   : > { %4381 = vmatpush.msrb.mxu0 %v1941_v24  ;;  %4400 = vmatpush.msrb.mxu1 %v1975_v62 }
 0x3e8   : > { %4421 = vmatpush.msrb.mxu2 %v2005_v29  ;;  %4440 = vmatpush.msrb.mxu3 %v2039_v51  ;;  %v3745_v34 = vadd.f32 %v3744_v41, %v3725_v42  ;;  %v3764_v37 = vpop.f32.mrf.mxu1 }
 0x3e9   : > { %4382 = vmatpush.msrb.mxu0 %v1939_v63  ;;  %4401 = vmatpush.msrb.mxu1 %v1973_v54 }
 0x3ea   : > { %4422 = vmatpush.msrb.mxu2 %v2003_v7  ;;  %4441 = vmatpush.msrb.mxu3 %v2037_v58  ;;  %v3784_v23 = vpop.f32.mrf.mxu2  ;;  %v3765_v12 = vadd.f32 %v3764_v37, %v3745_v34 }
 0x3eb   : > { %4383 = vmatmul.f32.vlgmr.msrb.gmra.mxu0 %v4671_v47  ;;  %4423 = vmatmul.f32.vlgmr.msrb.gmra.mxu2 %v4672_v35 }
 0x3ec   : > { %4402 = vmatpush.msrb.mxu1 %v1971_v0  ;;  %4442 = vmatpush.msrb.mxu3 %v2035_v46  ;;  %v3785_v15 = vadd.f32 %v3784_v23, %v3765_v12 }
 0x3ed   : > { %4403 = vmatmul.f32.vlgmr.msrb.gmra.mxu1 %v4673_v38  ;;  %4443 = vmatmul.f32.vlgmr.msrb.gmra.mxu3 %v4674_v39  ;;  %v3804_v16 = vpop.f32.mrf.mxu3 }
 0x3ee   : > { %v3824_v4 = vpop.f32.mrf.mxu0  ;;  %v3805_v5 = vadd.f32 %v3804_v16, %v3785_v15 }
 0x3f0   : > { %v3825_v49 = vadd.f32 %v3824_v4, %v3805_v5  ;;  %v3844_v61 = vpop.f32.mrf.mxu1 }
 0x3f2   : > { %v3864_v43 = vpop.f32.mrf.mxu2  ;;  %v3845_v50 = vadd.f32 %v3844_v61, %v3825_v49  ;;  %v259_v49 = vld [vmem:[#allocation2] sm:$0xf] }
 0x3f4   : > { %v3865_v14 = vadd.f32 %v3864_v43, %v3845_v50 }
 0x3f5   : > { %v3884_v17 = vpop.f32.mrf.mxu3 }
 0x3f6   : > { %v3904_v8 = vpop.f32.mrf.mxu0  ;;  %v3885_v11 = vadd.f32 %v3884_v17, %v3865_v14 }
 0x3f8   : > { %v3905_v19 = vadd.f32 %v3904_v8, %v3885_v11  ;;  %v3924_v20 = vpop.f32.mrf.mxu1 }
 0x3fa   : > { %v3944_v57 = vpop.f32.mrf.mxu2  ;;  %v3925_v1 = vadd.f32 %v3924_v20, %v3905_v19 }
 0x3fc   : > { %v3945_v2 = vadd.f32 %v3944_v57, %v3925_v1 }
 0x3fd   : > { %v3964_v32 = vpop.f32.mrf.mxu3 }
 0x3fe   : > { %v3984_v40 = vpop.f32.mrf.mxu0  ;;  %v3965_v44 = vadd.f32 %v3964_v32, %v3945_v2 }
 0x400   : > { %v3985_v33 = vadd.f32 %v3984_v40, %v3965_v44  ;;  %v4004_v24 = vpop.f32.mrf.mxu1 }
 0x402   : > { %v4024_v62 = vpop.f32.mrf.mxu2  ;;  %v4005_v25 = vadd.f32 %v4004_v24, %v3985_v33 }
 0x404   : > { %v4025_v29 = vadd.f32 %v4024_v62, %v4005_v25 }
 0x405   : > { %v4044_v51 = vpop.f32.mrf.mxu3 }
 0x406   : > { %v4064_v45 = vpop.f32.mrf.mxu0  ;;  %v4045_v63 = vadd.f32 %v4044_v51, %v4025_v29 }
 0x408   : > { %v4065_v54 = vadd.f32 %v4064_v45, %v4045_v63  ;;  %v4084_v7 = vpop.f32.mrf.mxu1 }
 0x40a   : > { %v4104_v58 = vpop.f32.mrf.mxu2  ;;  %v4085_v26 = vadd.f32 %v4084_v7, %v4065_v54 }
 0x40c   : > { %v4105_v27 = vadd.f32 %v4104_v58, %v4085_v26 }
 0x40d   : > { %v4124_v0 = vpop.f32.mrf.mxu3 }
 0x40e   : > { %v4144_v46 = vpop.f32.mrf.mxu0  ;;  %v4125_v59 = vadd.f32 %v4124_v0, %v4105_v27 }
 0x410   : > { %v4145_v47 = vadd.f32 %v4144_v46, %v4125_v59  ;;  %v4164_v35 = vpop.f32.mrf.mxu1 }
 0x412   : > { %v4184_v36 = vpop.f32.mrf.mxu2  ;;  %v4165_v38 = vadd.f32 %v4164_v35, %v4145_v47 }
 0x414   : > { %v4185_v39 = vadd.f32 %v4184_v36, %v4165_v38 }
 0x415   : > { %v4204_v28 = vpop.f32.mrf.mxu3 }
 0x416   : > { %v4205_v55 = vadd.f32 %v4204_v28, %v4185_v39 }
 0x424   : > { %v4224_v31 = vpop.f32.mrf.mxu0 }
 0x425   : > { %v4225_v56 = vadd.f32 %v4224_v31, %v4205_v55 }
 0x427   : > { %v4244_v60 = vpop.f32.mrf.mxu1 }
 0x428   : > { %v4245_v52 = vadd.f32 %v4244_v60, %v4225_v56 }
 0x42a   : > { %v4264_v3 = vpop.f32.mrf.mxu2 }
 0x42b   : > { %v4265_v53 = vadd.f32 %v4264_v3, %v4245_v52 }
 0x42d   : > { %v4284_v22 = vpop.f32.mrf.mxu3 }
 0x42e   : > { %v4285_v48 = vadd.f32 %v4284_v22, %v4265_v53 }
 0x446   : > { %v4304_v6 = vpop.f32.mrf.mxu0 }
 0x447   : > { %v4305_v30 = vadd.f32 %v4304_v6, %v4285_v48 }
 0x449   : > { %v4324_v18 = vpop.f32.mrf.mxu1 }
 0x44a   : > { %v4325_v9 = vadd.f32 %v4324_v18, %v4305_v30 }
 0x44c   : > { %v4344_v21 = vpop.f32.mrf.mxu2 }
 0x44d   : > { %v4345_v10 = vadd.f32 %v4344_v21, %v4325_v9 }
 0x44f   : > { %v4364_v41 = vpop.f32.mrf.mxu3 }
 0x450   : > { %v4365_v42 = vadd.f32 %v4364_v41, %v4345_v10 }
 0x468   : > { %v4384_v34 = vpop.f32.mrf.mxu0 }
 0x469   : > { %v4385_v37 = vadd.f32 %v4384_v34, %v4365_v42 }
 0x46a   : > { %v4404_v23 = vpop.f32.mrf.mxu1 }
 0x46b   : > { %v4405_v12 = vadd.f32 %v4404_v23, %v4385_v37 }
 0x46e   : > { %v4424_v15 = vpop.f32.mrf.mxu2 }
 0x46f   : > { %v4425_v16 = vadd.f32 %v4424_v15, %v4405_v12 }
 0x470   : > { %v4444_v4 = vpop.f32.mrf.mxu3 }
 0x471   : > { %v4445_v5 = vadd.f32 %v4444_v4, %v4425_v16 }
 0x473   : > { %v4449_v61 = vrot.slane %v4445_v5, 6 }
 0x474   : > { %4458 = sbr.rel (%p4586_p3) target bundleno = 1157 (0x485), region = 44 }
 0x475   : > { %v4451_v43 = vsel %vm4450_vm0, %v6252_v13, %v4449_v61 }
 0x476   : > { %v4453_v50 = vadd.f32 %v4451_v43, %v259_v49 }
 0x478   : > { %4454 = vst [vmem:[#allocation2] sm:$0xf] %v4453_v50 }
 0x479   : > { %v4460_v14 = vld [vmem:[%s246_s9] sm:$0x3] }
 0x47a   : > { %v4462_v17 = vperm.slane %v4460_v14, 0  ;;  %v4463_v8 = vperm.slane %v4460_v14, 1 }
 0x47c   : > { %v4464_v19 = vrot.slane %v4463_v8, 6 }
 0x47e   : > { %v4465_v20 = vsel %vm4450_vm0, %v4462_v17, %v4464_v19 }
 0x47f   : > { %v4459_v11 = vld [vmem:[#allocation2] sm:$0xf] }
 0x480   : > { %v4467_v57 = vadd.f32 %v4465_v20, %v4459_v11 }
 0x482   : > { %v4468_v1 = vmax.f32 %v4467_v57, 0.0 }
 0x484   : > { %4469 = vst [vmem:[%s4893_s20] sm:$0xf] %v4468_v1 }
 0x485 PF: > { %s16_s19 = sadd.s32 1, %s4771_s19   ;;  %s6971_s25 = sld [smem:[#allocation6_spill]] }
 0x486   : > { %p13_p4 = scmp.ge.s32.totalorder %s16_s19, 44   ;;  %s6972_s12 = smov %s4747_s13 }
 0x487   : > { %s6973_s13 = smov %s4751_s14  ;;  %s6974_s14 = smov %s4864_s5 }
 0x488   : > { %s6975_s15 = smov %s4763_s17  ;;  %s6976_s16 = smov %s4767_s18 }
 0x489   : > { %s6977_s17 = smov %s6980_s21  ;;  %15 = sbr.rel (!%p13_p4) target bundleno = 5 (0x5), region = 87 }
 0x48b   : > { %s6978_s18 = smov %s6971_s25 }
 0x48e   :  { %4492 = vsyncpa [#allocation4], 1 }
 0x48f   :  { %4494 = vsyncpa [#allocation4 + $0x1], 1 }

</bundles_post_ra>
